<compile_context>
chip_gen: v7x
topology: tpu7x:2x2x1
jax: 0.10.0
libtpu: 0.0.40
codegen_flags: <defaults>
</compile_context>

<pallas_src>
import numpy as np
import jax
import jax.numpy as jnp
from jax.experimental import pallas as pl
from jax.experimental.pallas import tpu as pltpu

# ----- hyper-parameters (small demo sizes consistent with GSANN.__init__) -----
TOKEN_SIZE = 50
FEATURE_SIZE = 16
HIDDEN_SIZE = 32
HEADS = 4
DH = HIDDEN_SIZE // HEADS
LABEL_SIZE = 1
N_BLOCKS = 8                       # nodes (basic blocks) per graph
TOKENS_PER_BLOCK = 6

BATCH = 64                         # graphs per call
GRAPHS_PER_STEP = 16               # graphs fused into one super-graph per grid step
M_NODES = GRAPHS_PER_STEP * N_BLOCKS   # 128 nodes per step -> full lane width
PARAM_ROWS = 128
PARAM_LANES = 64
NODE_LANES = 32                    # [token-emb mean (16) | label (1) | pad]
LANES_OUT = 128                    # lane-dense output row per graph


def gsann_kernel(params_ref, node_ref, adj_ref, out_ref):
    # ---- unpack the parameter slab once per grid step (hoisted) ----
    w_proj = params_ref[0:16, 0:HIDDEN_SIZE]             # (F, H)
    b_proj = params_ref[16:17, 0:HIDDEN_SIZE]            # (1, H)
    w_mlp = params_ref[17:18, 0:HIDDEN_SIZE]             # (1, H) row form of (H, 1)
    b_mlp = params_ref[18:19, 0:1]                       # (1, 1)
    w_cat = params_ref[24:56, 0:2 * HIDDEN_SIZE]         # (H, 2H) = [W_in | W_out]
    hmask = params_ref[56:64, 0:2 * HIDDEN_SIZE]         # (2*HEADS, 2H) head lane masks
    a_attn = params_ref[64:128, 0:4 * HEADS]             # (2H, 16) block-diag a_src/a_dst

    # ---- per-step graph data: one 128-node block-diagonal super graph ----
    nodes = node_ref[...]                                 # (128, 32)
    tok = nodes[:, 0:FEATURE_SIZE]                        # (128, F)
    lab_col = nodes[:, FEATURE_SIZE:FEATURE_SIZE + 1]     # (128, 1) label repl. per node
    adj_f = adj_ref[0:M_NODES, :]                         # (128, 128) forward CFG (blockdiag)
    adj_r = adj_ref[M_NODES:2 * M_NODES, :]               # (128, 128) reversed CFG (blockdiag)

    # block embedding (TreeEmbed -> TBCNN -> BlockEmb stand-in), all nodes at once
    feats = jnp.tanh(
        jnp.dot(tok, w_proj, preferred_element_type=jnp.float32) + b_proj)      # (128, H)

    # fused projections for both GAT layers + all per-head attention logits
    h_cat = jnp.dot(feats, w_cat, preferred_element_type=jnp.float32)           # (128, 2H)
    e_all = jnp.dot(h_cat, a_attn, preferred_element_type=jnp.float32)          # (128, 16)
    e_src = e_all[:, 0:2 * HEADS]                         # (128, 8), col = d*HEADS + k
    e_dst = e_all[:, 2 * HEADS:4 * HEADS]                 # (128, 8)
    e_srcT = e_src.T                                      # (8, 128), one small XLU transpose

    acc = jnp.zeros((M_NODES, 2 * HIDDEN_SIZE), jnp.float32)
    for d in range(2):                                    # 0: forward CFG, 1: reversed CFG
        adj_d = adj_f if d == 0 else adj_r
        amask = adj_d > 0.0                               # hoisted out of head loop
        zero_one = amask.astype(jnp.float32)
        for k in range(HEADS):
            c = d * HEADS + k
            e = e_dst[:, c:c + 1] + e_srcT[c:c + 1, :]    # (128,128): e[i,j] for edge j->i
            e = jnp.where(e > 0, e, 0.2 * e)              # LeakyReLU(0.2)
            e = jnp.where(amask, e, -1e9)                 # block-diag mask kills cross-graph
            e = e - jnp.max(e, axis=-1, keepdims=True)
            pnum = jnp.exp(e) * zero_one
            denom = jnp.sum(pnum, axis=-1, keepdims=True)
            alpha = pnum * pl.reciprocal(jnp.maximum(denom, 1e-9), approx=True)
            # head output lands in its own lane range of acc (no lane concat)
            acc = acc + jnp.dot(alpha, h_cat * hmask[c:c + 1, :],
                                preferred_element_type=jnp.float32)

    gat_both = jnp.where(acc > 0, acc, jnp.exp(acc) - 1.0)        # ELU, both layers at once
    fea = (gat_both[:, 0:HIDDEN_SIZE]
           + gat_both[:, HIDDEN_SIZE:2 * HIDDEN_SIZE]
           + feats)                                               # (128, H)

    # per-graph max-pool (append label column so one reduction yields both)
    ext = jnp.concatenate([fea, lab_col], axis=-1)                # (128, H+1)
    rows = []
    for g in range(GRAPHS_PER_STEP):                              # contiguous sublane groups
        rows.append(jnp.max(ext[g * N_BLOCKS:(g + 1) * N_BLOCKS, :],
                            axis=0, keepdims=True))
    pooled_ext = jnp.concatenate(rows, axis=0)                    # (16, H+1)
    pooled = pooled_ext[:, 0:HIDDEN_SIZE]                         # (16, H)
    label = pooled_ext[:, HIDDEN_SIZE:HIDDEN_SIZE + 1]            # (16, 1)

    logits = jnp.sum(pooled * w_mlp, axis=-1, keepdims=True) + b_mlp   # (16, 1)
    prob = 1.0 / (1.0 + jnp.exp(-logits))                              # F.sigmoid(logits)
    loss = (jnp.maximum(logits, 0.0) - logits * label
            + jnp.log(1.0 + jnp.exp(-jnp.abs(logits))))                # BCEWithLogits

    pad = jnp.zeros((GRAPHS_PER_STEP, LANES_OUT - HIDDEN_SIZE - 2), jnp.float32)
    out_ref[...] = jnp.concatenate([pooled, prob, loss, pad], axis=-1)  # (16, 128)


def gsann_forward(param_slab, node_slab, adj_slab):
    batch = node_slab.shape[0] // N_BLOCKS
    assert batch % GRAPHS_PER_STEP == 0
    steps = batch // GRAPHS_PER_STEP
    out = pl.pallas_call(
        gsann_kernel,
        out_shape=jax.ShapeDtypeStruct((batch, LANES_OUT), jnp.float32),
        grid=(steps,),
        in_specs=[
            pl.BlockSpec((PARAM_ROWS, PARAM_LANES), lambda b: (0, 0)),     # broadcast params
            pl.BlockSpec((M_NODES, NODE_LANES), lambda b: (b, 0)),          # node features
            pl.BlockSpec((2 * M_NODES, M_NODES), lambda b: (b, 0)),         # blockdiag adj/adjT
        ],
        out_specs=pl.BlockSpec((GRAPHS_PER_STEP, LANES_OUT), lambda b: (b, 0)),
        compiler_params=pltpu.CompilerParams(dimension_semantics=("parallel",)),
    )(param_slab, node_slab, adj_slab)
    pooled = out[:, 0:HIDDEN_SIZE]
    prob = out[:, HIDDEN_SIZE:HIDDEN_SIZE + 1]
    loss = out[:, HIDDEN_SIZE + 1:HIDDEN_SIZE + 2]
    return prob, loss, pooled


# ---------------------------- host-side packing ------------------------------
def pack_params(params):
    (w_proj, b_proj, w_in, asrc_in, adst_in,
     w_out, asrc_out, adst_out, w_mlp, b_mlp) = [np.asarray(p) for p in params]
    slab = np.zeros((PARAM_ROWS, PARAM_LANES), np.float32)
    slab[0:16, 0:HIDDEN_SIZE] = w_proj
    slab[16, 0:HIDDEN_SIZE] = b_proj[0]
    slab[17, 0:HIDDEN_SIZE] = w_mlp[:, 0]
    slab[18, 0] = b_mlp[0, 0]
    slab[24:24 + HIDDEN_SIZE, 0:HIDDEN_SIZE] = w_in
    slab[24:24 + HIDDEN_SIZE, HIDDEN_SIZE:2 * HIDDEN_SIZE] = w_out
    # head lane masks over the (N, 2H) concatenated hidden state
    hmask = np.zeros((2 * HEADS, 2 * HIDDEN_SIZE), np.float32)
    for d in range(2):
        for k in range(HEADS):
            c = d * HEADS + k
            hmask[c, d * HIDDEN_SIZE + k * DH: d * HIDDEN_SIZE + (k + 1) * DH] = 1.0
    slab[56:64, 0:2 * HIDDEN_SIZE] = hmask
    # block-diagonal attention matrices: cols 0:4 src_in, 4:8 src_out, 8:12 dst_in, 12:16 dst_out
    a_attn = np.zeros((2 * HIDDEN_SIZE, 4 * HEADS), np.float32)
    for k in range(HEADS):
        r_in = slice(k * DH, (k + 1) * DH)
        r_out = slice(HIDDEN_SIZE + k * DH, HIDDEN_SIZE + (k + 1) * DH)
        a_attn[r_in, k] = asrc_in[k]
        a_attn[r_out, HEADS + k] = asrc_out[k]
        a_attn[r_in, 2 * HEADS + k] = adst_in[k]
        a_attn[r_out, 3 * HEADS + k] = adst_out[k]
    slab[64:64 + 2 * HIDDEN_SIZE, 0:4 * HEADS] = a_attn
    return jnp.asarray(slab)


def pack_graphs(tok_emb, adj, label):
    """Pack per-graph data into per-step slabs.

    node slab: (B*N, 32)   [token-emb mean | label (replicated per node) | pad]
    adj slab : (steps*2*128, 128)  block-diagonal super-graph adjacency, forward
               CFG in rows 0:128 of each step, reversed CFG in rows 128:256.
    """
    tok_emb = np.asarray(tok_emb)
    adj = np.asarray(adj)
    label = np.asarray(label)
    batch = tok_emb.shape[0]
    steps = batch // GRAPHS_PER_STEP

    node = np.zeros((batch * N_BLOCKS, NODE_LANES), np.float32)
    node[:, 0:FEATURE_SIZE] = tok_emb.reshape(batch * N_BLOCKS, FEATURE_SIZE)
    node[:, FEATURE_SIZE] = np.repeat(label, N_BLOCKS)

    adj_slab = np.zeros((steps * 2 * M_NODES, M_NODES), np.float32)
    for s in range(steps):
        base = s * 2 * M_NODES
        for g in range(GRAPHS_PER_STEP):
            gi = s * GRAPHS_PER_STEP + g
            r0 = g * N_BLOCKS
            blk = adj[gi]
            adj_slab[base + r0: base + r0 + N_BLOCKS, r0:r0 + N_BLOCKS] = blk
            adj_slab[base + M_NODES + r0: base + M_NODES + r0 + N_BLOCKS,
                     r0:r0 + N_BLOCKS] = blk.T            # reversed CFG precomputed on host
    return jnp.asarray(node), jnp.asarray(adj_slab)


# --------------------------- pure-JAX reference -------------------------------
def gsann_reference_single(tok_emb, adj, params, label):
    (w_proj, b_proj, w_in, asrc_in, adst_in,
     w_out, asrc_out, adst_out, w_mlp, b_mlp) = params
    feats = jnp.tanh(tok_emb @ w_proj + b_proj)

    def gat(adj_m, w, a_src, a_dst):
        h = feats @ w
        outs = []
        for k in range(HEADS):
            hk = h[:, k * DH:(k + 1) * DH]
            es = (hk * a_src[k]).sum(-1, keepdims=True)
            ed = (hk * a_dst[k]).sum(-1, keepdims=True)
            e = ed + es.T
            e = jnp.where(e > 0, e, 0.2 * e)
            e = jnp.where(adj_m > 0, e, -1e9)
            e = e - e.max(-1, keepdims=True)
            p = jnp.exp(e) * (adj_m > 0)
            alpha = p / jnp.maximum(p.sum(-1, keepdims=True), 1e-9)
            outs.append(alpha @ hk)
        o = jnp.concatenate(outs, -1)
        return jnp.where(o > 0, o, jnp.exp(o) - 1.0)

    gi = gat(adj, w_in, asrc_in, adst_in)
    go = gat(adj.T, w_out, asrc_out, adst_out)
    fea = gi + go + feats
    pooled = fea.max(0, keepdims=True)
    logits = pooled @ w_mlp + b_mlp
    loss = (jnp.maximum(logits, 0.0) - logits * label
            + jnp.log(1.0 + jnp.exp(-jnp.abs(logits))))
    return jax.nn.sigmoid(logits), loss, pooled


if __name__ == "__main__":
    key = jax.random.PRNGKey(0)
    keys = jax.random.split(key, 16)

    # AST token ids per block + TreeEmbed table (embedding lookup is glue in JAX)
    tok_ids = jax.random.randint(keys[0], (BATCH, N_BLOCKS, TOKENS_PER_BLOCK), 0, TOKEN_SIZE)
    emb_table = 0.1 * jax.random.normal(keys[1], (TOKEN_SIZE, FEATURE_SIZE), jnp.float32)
    tok_emb = jnp.mean(emb_table[tok_ids], axis=2)                        # (B, N, F)

    # random small directed CFGs (adj[dst, src]); isolated rows are handled (alpha = 0)
    adj = (jax.random.uniform(keys[2], (BATCH, N_BLOCKS, N_BLOCKS)) < 0.35).astype(jnp.float32)
    label = (jax.random.uniform(keys[3], (BATCH,)) < 0.5).astype(jnp.float32)

    def init(k, shape, scale=0.1):
        return scale * jax.random.normal(k, shape, jnp.float32)

    params = (
        init(keys[4], (FEATURE_SIZE, HIDDEN_SIZE)),   # w_proj (block embedding)
        init(keys[5], (1, HIDDEN_SIZE)),              # b_proj
        init(keys[6], (HIDDEN_SIZE, HIDDEN_SIZE)),    # gat_in:  W
        init(keys[7], (HEADS, DH)),                   # gat_in:  a_src
        init(keys[8], (HEADS, DH)),                   # gat_in:  a_dst
        init(keys[9], (HIDDEN_SIZE, HIDDEN_SIZE)),    # gat_out: W
        init(keys[10], (HEADS, DH)),                  # gat_out: a_src
        init(keys[11], (HEADS, DH)),                  # gat_out: a_dst
        init(keys[12], (HIDDEN_SIZE, LABEL_SIZE)),    # mlp weight
        init(keys[13], (1, LABEL_SIZE)),              # mlp bias
    )

    param_slab = pack_params(params)
    node_slab, adj_slab = pack_graphs(tok_emb, adj, label)

    prob, loss, pooled = gsann_forward(param_slab, node_slab, adj_slab)
    jax.block_until_ready((prob, loss, pooled))

    # sanity check against a pure-JAX reference of the same math
    rprob, rloss, rpooled = jax.vmap(
        lambda te, a, lb: gsann_reference_single(te, a, params, lb)
    )(tok_emb, adj, label.reshape(BATCH, 1, 1))

    # tolerance loosened slightly because the softmax denominator uses the
    # EUP approximate reciprocal (pl.reciprocal(approx=True)).
    assert jnp.allclose(prob, rprob.reshape(BATCH, 1), atol=5e-3), "prob mismatch"
    assert jnp.allclose(loss, rloss.reshape(BATCH, 1), atol=5e-3), "loss mismatch"
    assert jnp.allclose(pooled, rpooled.reshape(BATCH, HIDDEN_SIZE), atol=5e-3), "pooled mismatch"

    print("KERNEL_OK")
</pallas_src>

<mosaic_0001>
module attributes {stable_mosaic.version = 11 : i64} {
  func.func @gsann_kernel(%arg0: i32, %arg1: memref<128x64xf32, #tpu.memory_space<vmem>>, %arg2: memref<128x32xf32, #tpu.memory_space<vmem>>, %arg3: memref<256x128xf32, #tpu.memory_space<vmem>>, %arg4: memref<16x128xf32, #tpu.memory_space<vmem>>) attributes {dimension_semantics = [#tpu.dimension_semantics<parallel>], iteration_bounds = array<i64: 4>, scalar_prefetch = 0 : i64, scratch_operands = 0 : i64, tpu.core_type = #tpu.core_type<tc>, window_params = [{pipeline_mode = #tpu.pipeline_mode<synchronous>, transform_indices = @transform_0, window_bounds = array<i64: 128, 64>}, {transform_indices = @transform_1, window_bounds = array<i64: 128, 32>}, {transform_indices = @transform_2, window_bounds = array<i64: 256, 128>}, {transform_indices = @transform_3, window_bounds = array<i64: 16, 128>}]} {
    %c0 = arith.constant 0 : index
    %c0_0 = arith.constant 0 : index
    %0 = vector.load %arg1[%c0, %c0_0] : memref<128x64xf32, #tpu.memory_space<vmem>>, vector<16x32xf32>
    %c16 = arith.constant 16 : index
    %c0_1 = arith.constant 0 : index
    %1 = vector.load %arg1[%c16, %c0_1] : memref<128x64xf32, #tpu.memory_space<vmem>>, vector<1x32xf32>
    %c17 = arith.constant 17 : index
    %c0_2 = arith.constant 0 : index
    %2 = vector.load %arg1[%c17, %c0_2] : memref<128x64xf32, #tpu.memory_space<vmem>>, vector<1x32xf32>
    %c18 = arith.constant 18 : index
    %c0_3 = arith.constant 0 : index
    %3 = vector.load %arg1[%c18, %c0_3] : memref<128x64xf32, #tpu.memory_space<vmem>>, vector<1x1xf32>
    %c24 = arith.constant 24 : index
    %c0_4 = arith.constant 0 : index
    %4 = vector.load %arg1[%c24, %c0_4] : memref<128x64xf32, #tpu.memory_space<vmem>>, vector<32x64xf32>
    %c56 = arith.constant 56 : index
    %c0_5 = arith.constant 0 : index
    %5 = vector.load %arg1[%c56, %c0_5] : memref<128x64xf32, #tpu.memory_space<vmem>>, vector<8x64xf32>
    %c64 = arith.constant 64 : index
    %c0_6 = arith.constant 0 : index
    %6 = vector.load %arg1[%c64, %c0_6] : memref<128x64xf32, #tpu.memory_space<vmem>>, vector<64x16xf32>
    %c0_7 = arith.constant 0 : index
    %c0_8 = arith.constant 0 : index
    %7 = vector.load %arg2[%c0_7, %c0_8] : memref<128x32xf32, #tpu.memory_space<vmem>>, vector<128x32xf32>
    %8 = vector.extract_strided_slice %7 {offsets = [0, 0], sizes = [128, 16], strides = [1, 1]} : vector<128x32xf32> to vector<128x16xf32>
    %9 = vector.extract_strided_slice %7 {offsets = [0, 16], sizes = [128, 1], strides = [1, 1]} : vector<128x32xf32> to vector<128x1xf32>
    %c0_9 = arith.constant 0 : index
    %c0_10 = arith.constant 0 : index
    %10 = vector.load %arg3[%c0_9, %c0_10] : memref<256x128xf32, #tpu.memory_space<vmem>>, vector<128x128xf32>
    %c128 = arith.constant 128 : index
    %c0_11 = arith.constant 0 : index
    %11 = vector.load %arg3[%c128, %c0_11] : memref<256x128xf32, #tpu.memory_space<vmem>>, vector<128x128xf32>
    %cst = arith.constant dense<0.000000e+00> : vector<128x32xf32>
    %12 = tpu.matmul %8, %0, %cst {dimension_numbers = #tpu.dot_dimension_numbers<[1], [0], [0], [1], [0, 0, 1, 1], [], []>} : vector<128x16xf32>, vector<16x32xf32>, vector<128x32xf32> -> vector<128x32xf32>
    %13 = vector.broadcast %1 : vector<1x32xf32> to vector<128x32xf32>
    %14 = arith.addf %12, %13 : vector<128x32xf32>
    %15 = math.tanh %14 : vector<128x32xf32>
    %cst_12 = arith.constant dense<0.000000e+00> : vector<128x64xf32>
    %16 = tpu.matmul %15, %4, %cst_12 {dimension_numbers = #tpu.dot_dimension_numbers<[1], [0], [0], [1], [0, 0, 1, 1], [], []>} : vector<128x32xf32>, vector<32x64xf32>, vector<128x64xf32> -> vector<128x64xf32>
    %cst_13 = arith.constant dense<0.000000e+00> : vector<128x16xf32>
    %17 = tpu.matmul %16, %6, %cst_13 {dimension_numbers = #tpu.dot_dimension_numbers<[1], [0], [0], [1], [0, 0, 1, 1], [], []>} : vector<128x64xf32>, vector<64x16xf32>, vector<128x16xf32> -> vector<128x16xf32>
    %18 = vector.extract_strided_slice %17 {offsets = [0, 0], sizes = [128, 8], strides = [1, 1]} : vector<128x16xf32> to vector<128x8xf32>
    %19 = vector.extract_strided_slice %17 {offsets = [0, 8], sizes = [128, 8], strides = [1, 1]} : vector<128x16xf32> to vector<128x8xf32>
    %20 = tpu.transpose %18, [1, 0] : vector<128x8xf32> -> vector<8x128xf32>
    %cst_14 = arith.constant 0.000000e+00 : f32
    %21 = vector.broadcast %cst_14 : f32 to vector<128x64xf32>
    %cst_15 = arith.constant 0.000000e+00 : f32
    %22 = vector.broadcast %cst_15 : f32 to vector<128x128xf32>
    %23 = arith.cmpf ogt, %10, %22 : vector<128x128xf32>
    %24 = arith.extui %23 : vector<128x128xi1> to vector<128x128xi32>
    %25 = arith.sitofp %24 : vector<128x128xi32> to vector<128x128xf32>
    %26 = vector.extract_strided_slice %19 {offsets = [0, 0], sizes = [128, 1], strides = [1, 1]} : vector<128x8xf32> to vector<128x1xf32>
    %27 = vector.extract_strided_slice %20 {offsets = [0, 0], sizes = [1, 128], strides = [1, 1]} : vector<8x128xf32> to vector<1x128xf32>
    %28 = vector.broadcast %26 : vector<128x1xf32> to vector<128x128xf32>
    %29 = vector.broadcast %27 : vector<1x128xf32> to vector<128x128xf32>
    %30 = arith.addf %28, %29 : vector<128x128xf32>
    %cst_16 = arith.constant 0.000000e+00 : f32
    %31 = vector.broadcast %cst_16 : f32 to vector<128x128xf32>
    %32 = arith.cmpf ogt, %30, %31 : vector<128x128xf32>
    %cst_17 = arith.constant 2.000000e-01 : f32
    %33 = vector.broadcast %cst_17 : f32 to vector<128x128xf32>
    %34 = arith.mulf %33, %30 : vector<128x128xf32>
    %35 = arith.select %32, %30, %34 : vector<128x128xi1>, vector<128x128xf32>
    %cst_18 = arith.constant -1.000000e+09 : f32
    %36 = vector.broadcast %cst_18 : f32 to vector<128x128xf32>
    %37 = arith.select %23, %35, %36 : vector<128x128xi1>, vector<128x128xf32>
    %cst_19 = arith.constant dense<0xFF800000> : vector<128xf32>
    %38 = vector.multi_reduction <maximumf>, %37, %cst_19 [1] : vector<128x128xf32> to vector<128xf32>
    %39 = vector.shape_cast %38 : vector<128xf32> to vector<128x1xf32>
    %40 = vector.broadcast %39 : vector<128x1xf32> to vector<128x128xf32>
    %41 = arith.subf %37, %40 : vector<128x128xf32>
    %42 = math.exp %41 : vector<128x128xf32>
    %43 = arith.mulf %42, %25 : vector<128x128xf32>
    %cst_20 = arith.constant dense<0.000000e+00> : vector<128xf32>
    %44 = vector.multi_reduction <add>, %43, %cst_20 [1] : vector<128x128xf32> to vector<128xf32>
    %45 = vector.shape_cast %44 : vector<128xf32> to vector<128x1xf32>
    %cst_21 = arith.constant 9.99999971E-10 : f32
    %46 = vector.broadcast %cst_21 : f32 to vector<128x1xf32>
    %47 = arith.maximumf %45, %46 : vector<128x1xf32>
    %48 = tpu.reciprocal %47 {approx = true} : vector<128x1xf32> -> vector<128x1xf32>
    %49 = vector.broadcast %48 : vector<128x1xf32> to vector<128x128xf32>
    %50 = arith.mulf %43, %49 : vector<128x128xf32>
    %51 = vector.extract_strided_slice %5 {offsets = [0, 0], sizes = [1, 64], strides = [1, 1]} : vector<8x64xf32> to vector<1x64xf32>
    %52 = vector.broadcast %51 : vector<1x64xf32> to vector<128x64xf32>
    %53 = arith.mulf %16, %52 : vector<128x64xf32>
    %cst_22 = arith.constant dense<0.000000e+00> : vector<128x64xf32>
    %54 = tpu.matmul %50, %53, %cst_22 {dimension_numbers = #tpu.dot_dimension_numbers<[1], [0], [0], [1], [0, 0, 1, 1], [], []>} : vector<128x128xf32>, vector<128x64xf32>, vector<128x64xf32> -> vector<128x64xf32>
    %55 = arith.addf %21, %54 : vector<128x64xf32>
    %56 = vector.extract_strided_slice %19 {offsets = [0, 1], sizes = [128, 1], strides = [1, 1]} : vector<128x8xf32> to vector<128x1xf32>
    %57 = vector.extract_strided_slice %20 {offsets = [1, 0], sizes = [1, 128], strides = [1, 1]} : vector<8x128xf32> to vector<1x128xf32>
    %58 = vector.broadcast %56 : vector<128x1xf32> to vector<128x128xf32>
    %59 = vector.broadcast %57 : vector<1x128xf32> to vector<128x128xf32>
    %60 = arith.addf %58, %59 : vector<128x128xf32>
    %cst_23 = arith.constant 0.000000e+00 : f32
    %61 = vector.broadcast %cst_23 : f32 to vector<128x128xf32>
    %62 = arith.cmpf ogt, %60, %61 : vector<128x128xf32>
    %cst_24 = arith.constant 2.000000e-01 : f32
    %63 = vector.broadcast %cst_24 : f32 to vector<128x128xf32>
    %64 = arith.mulf %63, %60 : vector<128x128xf32>
    %65 = arith.select %62, %60, %64 : vector<128x128xi1>, vector<128x128xf32>
    %cst_25 = arith.constant -1.000000e+09 : f32
    %66 = vector.broadcast %cst_25 : f32 to vector<128x128xf32>
    %67 = arith.select %23, %65, %66 : vector<128x128xi1>, vector<128x128xf32>
    %cst_26 = arith.constant dense<0xFF800000> : vector<128xf32>
    %68 = vector.multi_reduction <maximumf>, %67, %cst_26 [1] : vector<128x128xf32> to vector<128xf32>
    %69 = vector.shape_cast %68 : vector<128xf32> to vector<128x1xf32>
    %70 = vector.broadcast %69 : vector<128x1xf32> to vector<128x128xf32>
    %71 = arith.subf %67, %70 : vector<128x128xf32>
    %72 = math.exp %71 : vector<128x128xf32>
    %73 = arith.mulf %72, %25 : vector<128x128xf32>
    %cst_27 = arith.constant dense<0.000000e+00> : vector<128xf32>
    %74 = vector.multi_reduction <add>, %73, %cst_27 [1] : vector<128x128xf32> to vector<128xf32>
    %75 = vector.shape_cast %74 : vector<128xf32> to vector<128x1xf32>
    %cst_28 = arith.constant 9.99999971E-10 : f32
    %76 = vector.broadcast %cst_28 : f32 to vector<128x1xf32>
    %77 = arith.maximumf %75, %76 : vector<128x1xf32>
    %78 = tpu.reciprocal %77 {approx = true} : vector<128x1xf32> -> vector<128x1xf32>
    %79 = vector.broadcast %78 : vector<128x1xf32> to vector<128x128xf32>
    %80 = arith.mulf %73, %79 : vector<128x128xf32>
    %81 = vector.extract_strided_slice %5 {offsets = [1, 0], sizes = [1, 64], strides = [1, 1]} : vector<8x64xf32> to vector<1x64xf32>
    %82 = vector.broadcast %81 : vector<1x64xf32> to vector<128x64xf32>
    %83 = arith.mulf %16, %82 : vector<128x64xf32>
    %cst_29 = arith.constant dense<0.000000e+00> : vector<128x64xf32>
    %84 = tpu.matmul %80, %83, %cst_29 {dimension_numbers = #tpu.dot_dimension_numbers<[1], [0], [0], [1], [0, 0, 1, 1], [], []>} : vector<128x128xf32>, vector<128x64xf32>, vector<128x64xf32> -> vector<128x64xf32>
    %85 = arith.addf %55, %84 : vector<128x64xf32>
    %86 = vector.extract_strided_slice %19 {offsets = [0, 2], sizes = [128, 1], strides = [1, 1]} : vector<128x8xf32> to vector<128x1xf32>
    %87 = vector.extract_strided_slice %20 {offsets = [2, 0], sizes = [1, 128], strides = [1, 1]} : vector<8x128xf32> to vector<1x128xf32>
    %88 = vector.broadcast %86 : vector<128x1xf32> to vector<128x128xf32>
    %89 = vector.broadcast %87 : vector<1x128xf32> to vector<128x128xf32>
    %90 = arith.addf %88, %89 : vector<128x128xf32>
    %cst_30 = arith.constant 0.000000e+00 : f32
    %91 = vector.broadcast %cst_30 : f32 to vector<128x128xf32>
    %92 = arith.cmpf ogt, %90, %91 : vector<128x128xf32>
    %cst_31 = arith.constant 2.000000e-01 : f32
    %93 = vector.broadcast %cst_31 : f32 to vector<128x128xf32>
    %94 = arith.mulf %93, %90 : vector<128x128xf32>
    %95 = arith.select %92, %90, %94 : vector<128x128xi1>, vector<128x128xf32>
    %cst_32 = arith.constant -1.000000e+09 : f32
    %96 = vector.broadcast %cst_32 : f32 to vector<128x128xf32>
    %97 = arith.select %23, %95, %96 : vector<128x128xi1>, vector<128x128xf32>
    %cst_33 = arith.constant dense<0xFF800000> : vector<128xf32>
    %98 = vector.multi_reduction <maximumf>, %97, %cst_33 [1] : vector<128x128xf32> to vector<128xf32>
    %99 = vector.shape_cast %98 : vector<128xf32> to vector<128x1xf32>
    %100 = vector.broadcast %99 : vector<128x1xf32> to vector<128x128xf32>
    %101 = arith.subf %97, %100 : vector<128x128xf32>
    %102 = math.exp %101 : vector<128x128xf32>
    %103 = arith.mulf %102, %25 : vector<128x128xf32>
    %cst_34 = arith.constant dense<0.000000e+00> : vector<128xf32>
    %104 = vector.multi_reduction <add>, %103, %cst_34 [1] : vector<128x128xf32> to vector<128xf32>
    %105 = vector.shape_cast %104 : vector<128xf32> to vector<128x1xf32>
    %cst_35 = arith.constant 9.99999971E-10 : f32
    %106 = vector.broadcast %cst_35 : f32 to vector<128x1xf32>
    %107 = arith.maximumf %105, %106 : vector<128x1xf32>
    %108 = tpu.reciprocal %107 {approx = true} : vector<128x1xf32> -> vector<128x1xf32>
    %109 = vector.broadcast %108 : vector<128x1xf32> to vector<128x128xf32>
    %110 = arith.mulf %103, %109 : vector<128x128xf32>
    %111 = vector.extract_strided_slice %5 {offsets = [2, 0], sizes = [1, 64], strides = [1, 1]} : vector<8x64xf32> to vector<1x64xf32>
    %112 = vector.broadcast %111 : vector<1x64xf32> to vector<128x64xf32>
    %113 = arith.mulf %16, %112 : vector<128x64xf32>
    %cst_36 = arith.constant dense<0.000000e+00> : vector<128x64xf32>
    %114 = tpu.matmul %110, %113, %cst_36 {dimension_numbers = #tpu.dot_dimension_numbers<[1], [0], [0], [1], [0, 0, 1, 1], [], []>} : vector<128x128xf32>, vector<128x64xf32>, vector<128x64xf32> -> vector<128x64xf32>
    %115 = arith.addf %85, %114 : vector<128x64xf32>
    %116 = vector.extract_strided_slice %19 {offsets = [0, 3], sizes = [128, 1], strides = [1, 1]} : vector<128x8xf32> to vector<128x1xf32>
    %117 = vector.extract_strided_slice %20 {offsets = [3, 0], sizes = [1, 128], strides = [1, 1]} : vector<8x128xf32> to vector<1x128xf32>
    %118 = vector.broadcast %116 : vector<128x1xf32> to vector<128x128xf32>
    %119 = vector.broadcast %117 : vector<1x128xf32> to vector<128x128xf32>
    %120 = arith.addf %118, %119 : vector<128x128xf32>
    %cst_37 = arith.constant 0.000000e+00 : f32
    %121 = vector.broadcast %cst_37 : f32 to vector<128x128xf32>
    %122 = arith.cmpf ogt, %120, %121 : vector<128x128xf32>
    %cst_38 = arith.constant 2.000000e-01 : f32
    %123 = vector.broadcast %cst_38 : f32 to vector<128x128xf32>
    %124 = arith.mulf %123, %120 : vector<128x128xf32>
    %125 = arith.select %122, %120, %124 : vector<128x128xi1>, vector<128x128xf32>
    %cst_39 = arith.constant -1.000000e+09 : f32
    %126 = vector.broadcast %cst_39 : f32 to vector<128x128xf32>
    %127 = arith.select %23, %125, %126 : vector<128x128xi1>, vector<128x128xf32>
    %cst_40 = arith.constant dense<0xFF800000> : vector<128xf32>
    %128 = vector.multi_reduction <maximumf>, %127, %cst_40 [1] : vector<128x128xf32> to vector<128xf32>
    %129 = vector.shape_cast %128 : vector<128xf32> to vector<128x1xf32>
    %130 = vector.broadcast %129 : vector<128x1xf32> to vector<128x128xf32>
    %131 = arith.subf %127, %130 : vector<128x128xf32>
    %132 = math.exp %131 : vector<128x128xf32>
    %133 = arith.mulf %132, %25 : vector<128x128xf32>
    %cst_41 = arith.constant dense<0.000000e+00> : vector<128xf32>
    %134 = vector.multi_reduction <add>, %133, %cst_41 [1] : vector<128x128xf32> to vector<128xf32>
    %135 = vector.shape_cast %134 : vector<128xf32> to vector<128x1xf32>
    %cst_42 = arith.constant 9.99999971E-10 : f32
    %136 = vector.broadcast %cst_42 : f32 to vector<128x1xf32>
    %137 = arith.maximumf %135, %136 : vector<128x1xf32>
    %138 = tpu.reciprocal %137 {approx = true} : vector<128x1xf32> -> vector<128x1xf32>
    %139 = vector.broadcast %138 : vector<128x1xf32> to vector<128x128xf32>
    %140 = arith.mulf %133, %139 : vector<128x128xf32>
    %141 = vector.extract_strided_slice %5 {offsets = [3, 0], sizes = [1, 64], strides = [1, 1]} : vector<8x64xf32> to vector<1x64xf32>
    %142 = vector.broadcast %141 : vector<1x64xf32> to vector<128x64xf32>
    %143 = arith.mulf %16, %142 : vector<128x64xf32>
    %cst_43 = arith.constant dense<0.000000e+00> : vector<128x64xf32>
    %144 = tpu.matmul %140, %143, %cst_43 {dimension_numbers = #tpu.dot_dimension_numbers<[1], [0], [0], [1], [0, 0, 1, 1], [], []>} : vector<128x128xf32>, vector<128x64xf32>, vector<128x64xf32> -> vector<128x64xf32>
    %145 = arith.addf %115, %144 : vector<128x64xf32>
    %cst_44 = arith.constant 0.000000e+00 : f32
    %146 = vector.broadcast %cst_44 : f32 to vector<128x128xf32>
    %147 = arith.cmpf ogt, %11, %146 : vector<128x128xf32>
    %148 = arith.extui %147 : vector<128x128xi1> to vector<128x128xi32>
    %149 = arith.sitofp %148 : vector<128x128xi32> to vector<128x128xf32>
    %150 = vector.extract_strided_slice %19 {offsets = [0, 4], sizes = [128, 1], strides = [1, 1]} : vector<128x8xf32> to vector<128x1xf32>
    %151 = vector.extract_strided_slice %20 {offsets = [4, 0], sizes = [1, 128], strides = [1, 1]} : vector<8x128xf32> to vector<1x128xf32>
    %152 = vector.broadcast %150 : vector<128x1xf32> to vector<128x128xf32>
    %153 = vector.broadcast %151 : vector<1x128xf32> to vector<128x128xf32>
    %154 = arith.addf %152, %153 : vector<128x128xf32>
    %cst_45 = arith.constant 0.000000e+00 : f32
    %155 = vector.broadcast %cst_45 : f32 to vector<128x128xf32>
    %156 = arith.cmpf ogt, %154, %155 : vector<128x128xf32>
    %cst_46 = arith.constant 2.000000e-01 : f32
    %157 = vector.broadcast %cst_46 : f32 to vector<128x128xf32>
    %158 = arith.mulf %157, %154 : vector<128x128xf32>
    %159 = arith.select %156, %154, %158 : vector<128x128xi1>, vector<128x128xf32>
    %cst_47 = arith.constant -1.000000e+09 : f32
    %160 = vector.broadcast %cst_47 : f32 to vector<128x128xf32>
    %161 = arith.select %147, %159, %160 : vector<128x128xi1>, vector<128x128xf32>
    %cst_48 = arith.constant dense<0xFF800000> : vector<128xf32>
    %162 = vector.multi_reduction <maximumf>, %161, %cst_48 [1] : vector<128x128xf32> to vector<128xf32>
    %163 = vector.shape_cast %162 : vector<128xf32> to vector<128x1xf32>
    %164 = vector.broadcast %163 : vector<128x1xf32> to vector<128x128xf32>
    %165 = arith.subf %161, %164 : vector<128x128xf32>
    %166 = math.exp %165 : vector<128x128xf32>
    %167 = arith.mulf %166, %149 : vector<128x128xf32>
    %cst_49 = arith.constant dense<0.000000e+00> : vector<128xf32>
    %168 = vector.multi_reduction <add>, %167, %cst_49 [1] : vector<128x128xf32> to vector<128xf32>
    %169 = vector.shape_cast %168 : vector<128xf32> to vector<128x1xf32>
    %cst_50 = arith.constant 9.99999971E-10 : f32
    %170 = vector.broadcast %cst_50 : f32 to vector<128x1xf32>
    %171 = arith.maximumf %169, %170 : vector<128x1xf32>
    %172 = tpu.reciprocal %171 {approx = true} : vector<128x1xf32> -> vector<128x1xf32>
    %173 = vector.broadcast %172 : vector<128x1xf32> to vector<128x128xf32>
    %174 = arith.mulf %167, %173 : vector<128x128xf32>
    %175 = vector.extract_strided_slice %5 {offsets = [4, 0], sizes = [1, 64], strides = [1, 1]} : vector<8x64xf32> to vector<1x64xf32>
    %176 = vector.broadcast %175 : vector<1x64xf32> to vector<128x64xf32>
    %177 = arith.mulf %16, %176 : vector<128x64xf32>
    %cst_51 = arith.constant dense<0.000000e+00> : vector<128x64xf32>
    %178 = tpu.matmul %174, %177, %cst_51 {dimension_numbers = #tpu.dot_dimension_numbers<[1], [0], [0], [1], [0, 0, 1, 1], [], []>} : vector<128x128xf32>, vector<128x64xf32>, vector<128x64xf32> -> vector<128x64xf32>
    %179 = arith.addf %145, %178 : vector<128x64xf32>
    %180 = vector.extract_strided_slice %19 {offsets = [0, 5], sizes = [128, 1], strides = [1, 1]} : vector<128x8xf32> to vector<128x1xf32>
    %181 = vector.extract_strided_slice %20 {offsets = [5, 0], sizes = [1, 128], strides = [1, 1]} : vector<8x128xf32> to vector<1x128xf32>
    %182 = vector.broadcast %180 : vector<128x1xf32> to vector<128x128xf32>
    %183 = vector.broadcast %181 : vector<1x128xf32> to vector<128x128xf32>
    %184 = arith.addf %182, %183 : vector<128x128xf32>
    %cst_52 = arith.constant 0.000000e+00 : f32
    %185 = vector.broadcast %cst_52 : f32 to vector<128x128xf32>
    %186 = arith.cmpf ogt, %184, %185 : vector<128x128xf32>
    %cst_53 = arith.constant 2.000000e-01 : f32
    %187 = vector.broadcast %cst_53 : f32 to vector<128x128xf32>
    %188 = arith.mulf %187, %184 : vector<128x128xf32>
    %189 = arith.select %186, %184, %188 : vector<128x128xi1>, vector<128x128xf32>
    %cst_54 = arith.constant -1.000000e+09 : f32
    %190 = vector.broadcast %cst_54 : f32 to vector<128x128xf32>
    %191 = arith.select %147, %189, %190 : vector<128x128xi1>, vector<128x128xf32>
    %cst_55 = arith.constant dense<0xFF800000> : vector<128xf32>
    %192 = vector.multi_reduction <maximumf>, %191, %cst_55 [1] : vector<128x128xf32> to vector<128xf32>
    %193 = vector.shape_cast %192 : vector<128xf32> to vector<128x1xf32>
    %194 = vector.broadcast %193 : vector<128x1xf32> to vector<128x128xf32>
    %195 = arith.subf %191, %194 : vector<128x128xf32>
    %196 = math.exp %195 : vector<128x128xf32>
    %197 = arith.mulf %196, %149 : vector<128x128xf32>
    %cst_56 = arith.constant dense<0.000000e+00> : vector<128xf32>
    %198 = vector.multi_reduction <add>, %197, %cst_56 [1] : vector<128x128xf32> to vector<128xf32>
    %199 = vector.shape_cast %198 : vector<128xf32> to vector<128x1xf32>
    %cst_57 = arith.constant 9.99999971E-10 : f32
    %200 = vector.broadcast %cst_57 : f32 to vector<128x1xf32>
    %201 = arith.maximumf %199, %200 : vector<128x1xf32>
    %202 = tpu.reciprocal %201 {approx = true} : vector<128x1xf32> -> vector<128x1xf32>
    %203 = vector.broadcast %202 : vector<128x1xf32> to vector<128x128xf32>
    %204 = arith.mulf %197, %203 : vector<128x128xf32>
    %205 = vector.extract_strided_slice %5 {offsets = [5, 0], sizes = [1, 64], strides = [1, 1]} : vector<8x64xf32> to vector<1x64xf32>
    %206 = vector.broadcast %205 : vector<1x64xf32> to vector<128x64xf32>
    %207 = arith.mulf %16, %206 : vector<128x64xf32>
    %cst_58 = arith.constant dense<0.000000e+00> : vector<128x64xf32>
    %208 = tpu.matmul %204, %207, %cst_58 {dimension_numbers = #tpu.dot_dimension_numbers<[1], [0], [0], [1], [0, 0, 1, 1], [], []>} : vector<128x128xf32>, vector<128x64xf32>, vector<128x64xf32> -> vector<128x64xf32>
    %209 = arith.addf %179, %208 : vector<128x64xf32>
    %210 = vector.extract_strided_slice %19 {offsets = [0, 6], sizes = [128, 1], strides = [1, 1]} : vector<128x8xf32> to vector<128x1xf32>
    %211 = vector.extract_strided_slice %20 {offsets = [6, 0], sizes = [1, 128], strides = [1, 1]} : vector<8x128xf32> to vector<1x128xf32>
    %212 = vector.broadcast %210 : vector<128x1xf32> to vector<128x128xf32>
    %213 = vector.broadcast %211 : vector<1x128xf32> to vector<128x128xf32>
    %214 = arith.addf %212, %213 : vector<128x128xf32>
    %cst_59 = arith.constant 0.000000e+00 : f32
    %215 = vector.broadcast %cst_59 : f32 to vector<128x128xf32>
    %216 = arith.cmpf ogt, %214, %215 : vector<128x128xf32>
    %cst_60 = arith.constant 2.000000e-01 : f32
    %217 = vector.broadcast %cst_60 : f32 to vector<128x128xf32>
    %218 = arith.mulf %217, %214 : vector<128x128xf32>
    %219 = arith.select %216, %214, %218 : vector<128x128xi1>, vector<128x128xf32>
    %cst_61 = arith.constant -1.000000e+09 : f32
    %220 = vector.broadcast %cst_61 : f32 to vector<128x128xf32>
    %221 = arith.select %147, %219, %220 : vector<128x128xi1>, vector<128x128xf32>
    %cst_62 = arith.constant dense<0xFF800000> : vector<128xf32>
    %222 = vector.multi_reduction <maximumf>, %221, %cst_62 [1] : vector<128x128xf32> to vector<128xf32>
    %223 = vector.shape_cast %222 : vector<128xf32> to vector<128x1xf32>
    %224 = vector.broadcast %223 : vector<128x1xf32> to vector<128x128xf32>
    %225 = arith.subf %221, %224 : vector<128x128xf32>
    %226 = math.exp %225 : vector<128x128xf32>
    %227 = arith.mulf %226, %149 : vector<128x128xf32>
    %cst_63 = arith.constant dense<0.000000e+00> : vector<128xf32>
    %228 = vector.multi_reduction <add>, %227, %cst_63 [1] : vector<128x128xf32> to vector<128xf32>
    %229 = vector.shape_cast %228 : vector<128xf32> to vector<128x1xf32>
    %cst_64 = arith.constant 9.99999971E-10 : f32
    %230 = vector.broadcast %cst_64 : f32 to vector<128x1xf32>
    %231 = arith.maximumf %229, %230 : vector<128x1xf32>
    %232 = tpu.reciprocal %231 {approx = true} : vector<128x1xf32> -> vector<128x1xf32>
    %233 = vector.broadcast %232 : vector<128x1xf32> to vector<128x128xf32>
    %234 = arith.mulf %227, %233 : vector<128x128xf32>
    %235 = vector.extract_strided_slice %5 {offsets = [6, 0], sizes = [1, 64], strides = [1, 1]} : vector<8x64xf32> to vector<1x64xf32>
    %236 = vector.broadcast %235 : vector<1x64xf32> to vector<128x64xf32>
    %237 = arith.mulf %16, %236 : vector<128x64xf32>
    %cst_65 = arith.constant dense<0.000000e+00> : vector<128x64xf32>
    %238 = tpu.matmul %234, %237, %cst_65 {dimension_numbers = #tpu.dot_dimension_numbers<[1], [0], [0], [1], [0, 0, 1, 1], [], []>} : vector<128x128xf32>, vector<128x64xf32>, vector<128x64xf32> -> vector<128x64xf32>
    %239 = arith.addf %209, %238 : vector<128x64xf32>
    %240 = vector.extract_strided_slice %19 {offsets = [0, 7], sizes = [128, 1], strides = [1, 1]} : vector<128x8xf32> to vector<128x1xf32>
    %241 = vector.extract_strided_slice %20 {offsets = [7, 0], sizes = [1, 128], strides = [1, 1]} : vector<8x128xf32> to vector<1x128xf32>
    %242 = vector.broadcast %240 : vector<128x1xf32> to vector<128x128xf32>
    %243 = vector.broadcast %241 : vector<1x128xf32> to vector<128x128xf32>
    %244 = arith.addf %242, %243 : vector<128x128xf32>
    %cst_66 = arith.constant 0.000000e+00 : f32
    %245 = vector.broadcast %cst_66 : f32 to vector<128x128xf32>
    %246 = arith.cmpf ogt, %244, %245 : vector<128x128xf32>
    %cst_67 = arith.constant 2.000000e-01 : f32
    %247 = vector.broadcast %cst_67 : f32 to vector<128x128xf32>
    %248 = arith.mulf %247, %244 : vector<128x128xf32>
    %249 = arith.select %246, %244, %248 : vector<128x128xi1>, vector<128x128xf32>
    %cst_68 = arith.constant -1.000000e+09 : f32
    %250 = vector.broadcast %cst_68 : f32 to vector<128x128xf32>
    %251 = arith.select %147, %249, %250 : vector<128x128xi1>, vector<128x128xf32>
    %cst_69 = arith.constant dense<0xFF800000> : vector<128xf32>
    %252 = vector.multi_reduction <maximumf>, %251, %cst_69 [1] : vector<128x128xf32> to vector<128xf32>
    %253 = vector.shape_cast %252 : vector<128xf32> to vector<128x1xf32>
    %254 = vector.broadcast %253 : vector<128x1xf32> to vector<128x128xf32>
    %255 = arith.subf %251, %254 : vector<128x128xf32>
    %256 = math.exp %255 : vector<128x128xf32>
    %257 = arith.mulf %256, %149 : vector<128x128xf32>
    %cst_70 = arith.constant dense<0.000000e+00> : vector<128xf32>
    %258 = vector.multi_reduction <add>, %257, %cst_70 [1] : vector<128x128xf32> to vector<128xf32>
    %259 = vector.shape_cast %258 : vector<128xf32> to vector<128x1xf32>
    %cst_71 = arith.constant 9.99999971E-10 : f32
    %260 = vector.broadcast %cst_71 : f32 to vector<128x1xf32>
    %261 = arith.maximumf %259, %260 : vector<128x1xf32>
    %262 = tpu.reciprocal %261 {approx = true} : vector<128x1xf32> -> vector<128x1xf32>
    %263 = vector.broadcast %262 : vector<128x1xf32> to vector<128x128xf32>
    %264 = arith.mulf %257, %263 : vector<128x128xf32>
    %265 = vector.extract_strided_slice %5 {offsets = [7, 0], sizes = [1, 64], strides = [1, 1]} : vector<8x64xf32> to vector<1x64xf32>
    %266 = vector.broadcast %265 : vector<1x64xf32> to vector<128x64xf32>
    %267 = arith.mulf %16, %266 : vector<128x64xf32>
    %cst_72 = arith.constant dense<0.000000e+00> : vector<128x64xf32>
    %268 = tpu.matmul %264, %267, %cst_72 {dimension_numbers = #tpu.dot_dimension_numbers<[1], [0], [0], [1], [0, 0, 1, 1], [], []>} : vector<128x128xf32>, vector<128x64xf32>, vector<128x64xf32> -> vector<128x64xf32>
    %269 = arith.addf %239, %268 : vector<128x64xf32>
    %cst_73 = arith.constant 0.000000e+00 : f32
    %270 = vector.broadcast %cst_73 : f32 to vector<128x64xf32>
    %271 = arith.cmpf ogt, %269, %270 : vector<128x64xf32>
    %272 = math.exp %269 : vector<128x64xf32>
    %cst_74 = arith.constant 1.000000e+00 : f32
    %273 = vector.broadcast %cst_74 : f32 to vector<128x64xf32>
    %274 = arith.subf %272, %273 : vector<128x64xf32>
    %275 = arith.select %271, %269, %274 : vector<128x64xi1>, vector<128x64xf32>
    %276 = vector.extract_strided_slice %275 {offsets = [0, 0], sizes = [128, 32], strides = [1, 1]} : vector<128x64xf32> to vector<128x32xf32>
    %277 = vector.extract_strided_slice %275 {offsets = [0, 32], sizes = [128, 32], strides = [1, 1]} : vector<128x64xf32> to vector<128x32xf32>
    %278 = arith.addf %276, %277 : vector<128x32xf32>
    %279 = arith.addf %278, %15 : vector<128x32xf32>
    %280 = tpu.concatenate %279, %9 in 1 : vector<128x32xf32>, vector<128x1xf32> -> vector<128x33xf32>
    %281 = vector.extract_strided_slice %280 {offsets = [0, 0], sizes = [8, 33], strides = [1, 1]} : vector<128x33xf32> to vector<8x33xf32>
    %cst_75 = arith.constant dense<0xFF800000> : vector<33xf32>
    %282 = vector.multi_reduction <maximumf>, %281, %cst_75 [0] : vector<8x33xf32> to vector<33xf32>
    %283 = vector.shape_cast %282 : vector<33xf32> to vector<1x33xf32>
    %284 = vector.extract_strided_slice %280 {offsets = [8, 0], sizes = [8, 33], strides = [1, 1]} : vector<128x33xf32> to vector<8x33xf32>
    %cst_76 = arith.constant dense<0xFF800000> : vector<33xf32>
    %285 = vector.multi_reduction <maximumf>, %284, %cst_76 [0] : vector<8x33xf32> to vector<33xf32>
    %286 = vector.shape_cast %285 : vector<33xf32> to vector<1x33xf32>
    %287 = vector.extract_strided_slice %280 {offsets = [16, 0], sizes = [8, 33], strides = [1, 1]} : vector<128x33xf32> to vector<8x33xf32>
    %cst_77 = arith.constant dense<0xFF800000> : vector<33xf32>
    %288 = vector.multi_reduction <maximumf>, %287, %cst_77 [0] : vector<8x33xf32> to vector<33xf32>
    %289 = vector.shape_cast %288 : vector<33xf32> to vector<1x33xf32>
    %290 = vector.extract_strided_slice %280 {offsets = [24, 0], sizes = [8, 33], strides = [1, 1]} : vector<128x33xf32> to vector<8x33xf32>
    %cst_78 = arith.constant dense<0xFF800000> : vector<33xf32>
    %291 = vector.multi_reduction <maximumf>, %290, %cst_78 [0] : vector<8x33xf32> to vector<33xf32>
    %292 = vector.shape_cast %291 : vector<33xf32> to vector<1x33xf32>
    %293 = vector.extract_strided_slice %280 {offsets = [32, 0], sizes = [8, 33], strides = [1, 1]} : vector<128x33xf32> to vector<8x33xf32>
    %cst_79 = arith.constant dense<0xFF800000> : vector<33xf32>
    %294 = vector.multi_reduction <maximumf>, %293, %cst_79 [0] : vector<8x33xf32> to vector<33xf32>
    %295 = vector.shape_cast %294 : vector<33xf32> to vector<1x33xf32>
    %296 = vector.extract_strided_slice %280 {offsets = [40, 0], sizes = [8, 33], strides = [1, 1]} : vector<128x33xf32> to vector<8x33xf32>
    %cst_80 = arith.constant dense<0xFF800000> : vector<33xf32>
    %297 = vector.multi_reduction <maximumf>, %296, %cst_80 [0] : vector<8x33xf32> to vector<33xf32>
    %298 = vector.shape_cast %297 : vector<33xf32> to vector<1x33xf32>
    %299 = vector.extract_strided_slice %280 {offsets = [48, 0], sizes = [8, 33], strides = [1, 1]} : vector<128x33xf32> to vector<8x33xf32>
    %cst_81 = arith.constant dense<0xFF800000> : vector<33xf32>
    %300 = vector.multi_reduction <maximumf>, %299, %cst_81 [0] : vector<8x33xf32> to vector<33xf32>
    %301 = vector.shape_cast %300 : vector<33xf32> to vector<1x33xf32>
    %302 = vector.extract_strided_slice %280 {offsets = [56, 0], sizes = [8, 33], strides = [1, 1]} : vector<128x33xf32> to vector<8x33xf32>
    %cst_82 = arith.constant dense<0xFF800000> : vector<33xf32>
    %303 = vector.multi_reduction <maximumf>, %302, %cst_82 [0] : vector<8x33xf32> to vector<33xf32>
    %304 = vector.shape_cast %303 : vector<33xf32> to vector<1x33xf32>
    %305 = vector.extract_strided_slice %280 {offsets = [64, 0], sizes = [8, 33], strides = [1, 1]} : vector<128x33xf32> to vector<8x33xf32>
    %cst_83 = arith.constant dense<0xFF800000> : vector<33xf32>
    %306 = vector.multi_reduction <maximumf>, %305, %cst_83 [0] : vector<8x33xf32> to vector<33xf32>
    %307 = vector.shape_cast %306 : vector<33xf32> to vector<1x33xf32>
    %308 = vector.extract_strided_slice %280 {offsets = [72, 0], sizes = [8, 33], strides = [1, 1]} : vector<128x33xf32> to vector<8x33xf32>
    %cst_84 = arith.constant dense<0xFF800000> : vector<33xf32>
    %309 = vector.multi_reduction <maximumf>, %308, %cst_84 [0] : vector<8x33xf32> to vector<33xf32>
    %310 = vector.shape_cast %309 : vector<33xf32> to vector<1x33xf32>
    %311 = vector.extract_strided_slice %280 {offsets = [80, 0], sizes = [8, 33], strides = [1, 1]} : vector<128x33xf32> to vector<8x33xf32>
    %cst_85 = arith.constant dense<0xFF800000> : vector<33xf32>
    %312 = vector.multi_reduction <maximumf>, %311, %cst_85 [0] : vector<8x33xf32> to vector<33xf32>
    %313 = vector.shape_cast %312 : vector<33xf32> to vector<1x33xf32>
    %314 = vector.extract_strided_slice %280 {offsets = [88, 0], sizes = [8, 33], strides = [1, 1]} : vector<128x33xf32> to vector<8x33xf32>
    %cst_86 = arith.constant dense<0xFF800000> : vector<33xf32>
    %315 = vector.multi_reduction <maximumf>, %314, %cst_86 [0] : vector<8x33xf32> to vector<33xf32>
    %316 = vector.shape_cast %315 : vector<33xf32> to vector<1x33xf32>
    %317 = vector.extract_strided_slice %280 {offsets = [96, 0], sizes = [8, 33], strides = [1, 1]} : vector<128x33xf32> to vector<8x33xf32>
    %cst_87 = arith.constant dense<0xFF800000> : vector<33xf32>
    %318 = vector.multi_reduction <maximumf>, %317, %cst_87 [0] : vector<8x33xf32> to vector<33xf32>
    %319 = vector.shape_cast %318 : vector<33xf32> to vector<1x33xf32>
    %320 = vector.extract_strided_slice %280 {offsets = [104, 0], sizes = [8, 33], strides = [1, 1]} : vector<128x33xf32> to vector<8x33xf32>
    %cst_88 = arith.constant dense<0xFF800000> : vector<33xf32>
    %321 = vector.multi_reduction <maximumf>, %320, %cst_88 [0] : vector<8x33xf32> to vector<33xf32>
    %322 = vector.shape_cast %321 : vector<33xf32> to vector<1x33xf32>
    %323 = vector.extract_strided_slice %280 {offsets = [112, 0], sizes = [8, 33], strides = [1, 1]} : vector<128x33xf32> to vector<8x33xf32>
    %cst_89 = arith.constant dense<0xFF800000> : vector<33xf32>
    %324 = vector.multi_reduction <maximumf>, %323, %cst_89 [0] : vector<8x33xf32> to vector<33xf32>
    %325 = vector.shape_cast %324 : vector<33xf32> to vector<1x33xf32>
    %326 = vector.extract_strided_slice %280 {offsets = [120, 0], sizes = [8, 33], strides = [1, 1]} : vector<128x33xf32> to vector<8x33xf32>
    %cst_90 = arith.constant dense<0xFF800000> : vector<33xf32>
    %327 = vector.multi_reduction <maximumf>, %326, %cst_90 [0] : vector<8x33xf32> to vector<33xf32>
    %328 = vector.shape_cast %327 : vector<33xf32> to vector<1x33xf32>
    %329 = tpu.concatenate %283, %286, %289, %292, %295, %298, %301, %304, %307, %310, %313, %316, %319, %322, %325, %328 in 0 : vector<1x33xf32>, vector<1x33xf32>, vector<1x33xf32>, vector<1x33xf32>, vector<1x33xf32>, vector<1x33xf32>, vector<1x33xf32>, vector<1x33xf32>, vector<1x33xf32>, vector<1x33xf32>, vector<1x33xf32>, vector<1x33xf32>, vector<1x33xf32>, vector<1x33xf32>, vector<1x33xf32>, vector<1x33xf32> -> vector<16x33xf32>
    %330 = vector.extract_strided_slice %329 {offsets = [0, 0], sizes = [16, 32], strides = [1, 1]} : vector<16x33xf32> to vector<16x32xf32>
    %331 = vector.extract_strided_slice %329 {offsets = [0, 32], sizes = [16, 1], strides = [1, 1]} : vector<16x33xf32> to vector<16x1xf32>
    %332 = vector.broadcast %2 : vector<1x32xf32> to vector<16x32xf32>
    %333 = arith.mulf %330, %332 : vector<16x32xf32>
    %cst_91 = arith.constant dense<0.000000e+00> : vector<16xf32>
    %334 = vector.multi_reduction <add>, %333, %cst_91 [1] : vector<16x32xf32> to vector<16xf32>
    %335 = vector.shape_cast %334 : vector<16xf32> to vector<16x1xf32>
    %336 = vector.broadcast %3 : vector<1x1xf32> to vector<16x1xf32>
    %337 = arith.addf %335, %336 : vector<16x1xf32>
    %cst_92 = arith.constant 0.000000e+00 : f32
    %338 = vector.broadcast %cst_92 : f32 to vector<16x1xf32>
    %339 = arith.subf %338, %337 : vector<16x1xf32>
    %340 = math.exp %339 : vector<16x1xf32>
    %cst_93 = arith.constant 1.000000e+00 : f32
    %341 = vector.broadcast %cst_93 : f32 to vector<16x1xf32>
    %342 = arith.addf %341, %340 : vector<16x1xf32>
    %cst_94 = arith.constant 1.000000e+00 : f32
    %343 = vector.broadcast %cst_94 : f32 to vector<16x1xf32>
    %344 = arith.divf %343, %342 : vector<16x1xf32>
    %cst_95 = arith.constant 0.000000e+00 : f32
    %345 = vector.broadcast %cst_95 : f32 to vector<16x1xf32>
    %346 = arith.maximumf %337, %345 : vector<16x1xf32>
    %347 = arith.mulf %337, %331 : vector<16x1xf32>
    %348 = arith.subf %346, %347 : vector<16x1xf32>
    %349 = math.absf %337 : vector<16x1xf32>
    %cst_96 = arith.constant 0.000000e+00 : f32
    %350 = vector.broadcast %cst_96 : f32 to vector<16x1xf32>
    %351 = arith.subf %350, %349 : vector<16x1xf32>
    %352 = math.exp %351 : vector<16x1xf32>
    %cst_97 = arith.constant 1.000000e+00 : f32
    %353 = vector.broadcast %cst_97 : f32 to vector<16x1xf32>
    %354 = arith.addf %353, %352 : vector<16x1xf32>
    %355 = math.log %354 : vector<16x1xf32>
    %356 = arith.addf %348, %355 : vector<16x1xf32>
    %cst_98 = arith.constant 0.000000e+00 : f32
    %357 = vector.broadcast %cst_98 : f32 to vector<16x94xf32>
    %358 = tpu.concatenate %330, %344, %356, %357 in 1 : vector<16x32xf32>, vector<16x1xf32>, vector<16x1xf32>, vector<16x94xf32> -> vector<16x128xf32>
    %c0_99 = arith.constant 0 : index
    %c0_100 = arith.constant 0 : index
    %359 = vector.load %arg4[%c0_99, %c0_100] : memref<16x128xf32, #tpu.memory_space<vmem>>, vector<16x128xf32>
    tpu.vector_store %arg4[%c0_99, %c0_100], %358 {strides = array<i32>} : memref<16x128xf32, #tpu.memory_space<vmem>>, vector<16x128xf32>,
    return
  }
  func.func @transform_0(%arg0: i32) -> (i32, i32) {
    %c0_i32 = arith.constant 0 : i32
    %c0_i32_0 = arith.constant 0 : i32
    %c0_i32_1 = arith.constant 0 : i32
    return %c0_i32, %c0_i32_0 : i32, i32
  }
  func.func @transform_1(%arg0: i32) -> (i32, i32) {
    %c0_i32 = arith.constant 0 : i32
    %c0_i32_0 = arith.constant 0 : i32
    return %arg0, %c0_i32 : i32, i32
  }
  func.func @transform_2(%arg0: i32) -> (i32, i32) {
    %c0_i32 = arith.constant 0 : i32
    %c0_i32_0 = arith.constant 0 : i32
    return %arg0, %c0_i32 : i32, i32
  }
  func.func @transform_3(%arg0: i32) -> (i32, i32) {
    %c0_i32 = arith.constant 0 : i32
    %c0_i32_0 = arith.constant 0 : i32
    return %arg0, %c0_i32 : i32, i32
  }
}

</mosaic_0001>

<bundles_post_ra>
// kernel: tpu_custom_call.1
= control target key start
LH: loop header
LB: loop body
LE: loop exit
PB: predicated region body
PF: predicated region fallthrough
CT: control target
= control target key end

     0   :  { %8 = vsyncpa [#allocation3], 0  ;;  %s11785_s0 = inlined_call_operand.vmem [shape: f32[128,64], index: 0, kind: input, shape index: {}]   ;;  %s11786_s1 = inlined_call_operand.vmem [shape: f32[512,32], index: 1, kind: input, shape index: {}]   ;;  %s11787_s2 = inlined_call_operand.hbm [shape: f32[1024,128], index: 2, kind: input, shape index: {}]   ;;  %s11788_s3 = inlined_call_operand.hbm [shape: f32[64,128], index: 3, kind: output, shape index: {}]  }
   0x1   :  { %10 = vsyncpa [#allocation3 + $0x1], 0 }
   0x2   :  { %11 = vsyncpa [#allocation4], 0 }
   0x3   :  { %13 = vsyncpa [#allocation4 + $0x1], 0  ;;  %s7892_s12 = smov 0   ;;  %s7894_s13 = smov 0  }
   0x4   :  { %s7896_s14 = smov 0   ;;  %s7898_s15 = smov 0  }
   0x5 LB: > { %s7913_s16 = sadd.s32 4294967295, %s7851_s15   ;;  %s5591_s17 = sadd.s32 4294967294, %s7851_s15   ;;  %s7851_s15 = sphi %s7898_s15, %s12861_s15   ;;  %s7847_s14 = sphi %s7896_s14, %s12860_s14   ;;  %s7843_s13 = sphi %s7894_s13, %s12859_s13   ;;  %s7839_s12 = sphi %s7892_s12, %s12858_s12  }
   0x6   : > { %s7917_s18 = sadd.s32 1, %s7851_s15   ;;  %s73_s19 = sadd.s32 1, %s7847_s14 }
   0x7   : > { %s70_s20 = ssub.s32 %s7851_s15, %s7917_s18  ;;  %p80_p0 = scmp.ne.s32.totalorder %s7847_s14, %s7843_s13 }
   0x8   : > { %p71_p1 = scmp.eq.s32.totalorder %s70_s20, 0  ;;  %p81_p2 = scmp.eq.s32.totalorder %s7851_s15, 0 }
   0x9   : > { %p86_p3 = scmp.ne.s32.totalorder %s7843_s13, %s7839_s12  ;;  %p87_p4 = scmp.eq.s32.totalorder %s7913_s16, 0 }
   0xa   : > { %s7929_s21 = scalar_select %p71_p1, %s7847_s14, %s73_s19  }
   0xb   : > { %p7931_p5 = por %p81_p2, %p80_p0  ;;  %p7935_p6 = por %p87_p4, %p86_p3 }
   0xc   : > { %p110_p7 = scmp.eq.s32.totalorder %s7913_s16, 3  ;;  %p116_p8 = scmp.eq.s32.totalorder %s5591_s17, 3 }
   0xd   : > { %p6998_p9 = scmp.lt.s32.totalorder %s7851_s15, 4  ;;  %s148_s26 = sand.u32 1, %s7847_s14  }
   0xe   : > { %p7941_p10 = por %p110_p7, %p80_p0  ;;  %p7945_p11 = por %p116_p8, %p86_p3 }
   0xf   : > { %s5706_s27 = sshll.u32 %s7851_s15, 12  ;;  %s5594_s28 = sshll.u32 %s148_s26, 8 }
  0x10   : > { %s12122_s24 = scalar_select %p7941_p10, 1, 0 }
  0x11   : > { %s12123_s25 = scalar_select %p7945_p11, 1, 0 }
  0x12   : > { %s7954_s4 = scalar_lea.hbm %s11787_s2, %s5706_s27  ;;  %s152_s5 = scalar_lea.vmem [#allocation2], %s5594_s28 }
  0x13   : > { %s159_s6 = sshll.u32 %s152_s5, 4  ;;  %p7958_p12 = pnand %p6998_p9, %p7931_p5  ;;  %s7962_s6 = int_to_ptr.vmem [resolvable:$true] %s159_s6 }
  0x14   : > { %s7964_s8 = scalar_lea.sflag [#allocation3], %s148_s26  ;;  %s7755_s9 = scalar_lea.hbm %s7954_s4, 4096 }
  0x15   : > { %p7756_p13 = scmp.ne.s32.totalorder %s7954_s4, %s7755_s9  ;;  %p7757_p0 = pneg %p7958_p12 }
  0x16   : > { %s7760_s17 = scalar_lea.hbm %s11787_s2, 16384  ;;  %p7761_p3 = scmp.lt.u32.totalorder %s7954_s4, %s11787_s2 }
  0x17   : > { %p7758_p1 = pnand %p7757_p0, %p7756_p13  ;;  %p7762_p4 = scmp.lt.u32.totalorder %s7760_s17, %s7755_s9 }
  0x18   : > { %p7764_p7 = scmp.lt.u32.totalorder %s7755_s9, %s7954_s4 }
  0x19   : > { %p7759_p2 = pneg %p7758_p1  ;;  %p7763_p5 = por %p7762_p4, %p7761_p3 }
  0x1b   : > { %p7765_p8 = por %p7764_p7, %p7763_p5 }
  0x1d   : > { %p7766_p9 = pnand %p7765_p8, %p7759_p2 }
  0x1f   : > { %7769 = shalt.err (!%p7766_p9)
}
  0x20   : > { %s7770_s22 = scalar_lea.vmem %s7962_s6, 4096  ;;  %s7853_s26 = smov [#allocation2]  }
  0x21   : > { %p7771_p13 = scmp.ne.s32.totalorder %s7962_s6, %s7770_s22  ;;  %s7775_s27 = sshll.u32 %s7853_s26, 4  ;;  %s7776_s27 = int_to_ptr.vmem [resolvable:$false] %s7775_s27 }
  0x22   : > { %s7777_s28 = scalar_lea.vmem %s7776_s27, 8192  ;;  %p7778_p10 = scmp.lt.s32.totalorder %s7962_s6, %s7776_s27 }
  0x23   : > { %p7773_p1 = pnand %p7771_p13, %p7757_p0  ;;  %p7779_p3 = scmp.lt.s32.totalorder %s7777_s28, %s7770_s22 }
  0x25   : > { %p7774_p11 = pneg %p7773_p1  ;;  %p7780_p4 = por %p7779_p3, %p7778_p10 }
  0x27   : > { %p7781_p5 = pnand %p7780_p4, %p7774_p11 }
  0x29   : > { %7784 = shalt.err (!%p7781_p5)
}
  0x2a   : > { %s7854_s29 = smov 128   ;;  %s7855_s30 = smov 8  }
  0x2b   : > { %6993 = dma.hbm_to_vmem [thread:$0]  (!%p7958_p12), %s7954_s4, 4096, %s7962_s6, %s7964_s8, %s7854_s29, %s7854_s29, %s7855_s30  }
  0x2c   : > { %p5597_p0 = scmp.ge.s32.totalorder %s7851_s15, 1  ;;  %p167_p2 = scmp.lt.s32.totalorder %s7851_s15, 5 }
  0x2e   : > { %p168_p7 = pnand %p5597_p0, %p167_p2 }
  0x30   : > { %171 = sbr.rel (%p168_p7) target bundleno = 2721 (0xaa1), region = 32 }
  0x37   : > { %s7995_s5 = sand.u32 1, %s7843_s13  }
  0x38   : > { %s5598_s9 = sshll.u32 %s7995_s5, 8  ;;  %s174_s10 = scalar_lea.sflag [#allocation3], %s7995_s5 }
  0x39   : > { %s7999_s11 = scalar_lea.vmem [#allocation2], %s5598_s9 }
  0x3a   : > { %7830 = dma.done.wait (%p7935_p6), %s174_s10, 4096  }
  0x3b   : > { %7832 = vsyncadd (%p7935_p6), %s174_s10, 4294963200  ;;  %s5600_s4 = sshll.u32 %s7913_s16, 4  ;;  %vm283_vm0 = vcmask 130048   ;;  %v213_v0 = vld [vmem:[%s11785_s0] sm:$0xff]  ;;  %v214_v1 = vld [vmem:[%s11785_s0 + $0x8] sm:$0xff]  ;;  %vm11927_vm1 = vcmask 261120  }
  0x3c   : > { %p206_p10 = scmp.lt.s32.totalorder %s5600_s4, 63  ;;  %v6574_v3 = vpack.c.bf16 %v214_v1, %v213_v0  ;;  %v218_v19 = vld [vmem:[%s11785_s0 + $0x18] sm:$0xff]  ;;  %v219_v20 = vld [vmem:[%s11785_s0 + $0x20] sm:$0xff]  ;;  %v220_v22 = vld [vmem:[%s11785_s0 + $0x28] sm:$0xff]  ;;  %vm687_vm2 = vcmask 523264   ;;  %s7866_s23 = smov 16  }
  0x3d   : > { %v6578_v21 = vpack.c.bf16 %v219_v20, %v218_v19  ;;  %v221_v23 = vld [vmem:[%s11785_s0 + $0x30] sm:$0xff]  ;;  %v223_v25 = vld [vmem:[%s11785_s0 + $0x40] sm:$0xff]  ;;  %v224_v26 = vld [vmem:[%s11785_s0 + $0x48] sm:$0xff]  ;;  %s7867_s28 = smov 32   ;;  %s7868_s29 = smov 33  }
  0x3e   : > { %s12863_s4 = smov (!%p206_p10, %s5600_s4), 63  ;;  %6575 = vmatprep.subr.bf16.mxu0 %v6574_v3  ;;  %v6582_v24 = vpack.c.bf16 %v221_v23, %v220_v22  ;;  %v225_v27 = vld [vmem:[%s11785_s0 + $0x50] sm:$0xff]  ;;  %v6586_v28 = vpack.c.bf16 %v224_v26, %v223_v25  ;;  %v226_v29 = vld [vmem:[%s11785_s0 + $0x58] sm:$0xff]  ;;  %v227_v31 = vld [vmem:[%s11785_s0 + $0x60] sm:$0xff]  ;;  %v11798_v22 = vmov 9   ;;  %v11800_v23 = vmov 8  }
  0x3f   : > { %s5601_s6 = sshll.u32 %s12863_s4, 3  ;;  %6577 = vmatpush3.bf16.msra.mxu0 %v6574_v3  ;;  %6579 = vmatprep.subr.bf16.mxu1 %v6578_v21  ;;  %v6590_v30 = vpack.c.bf16 %v226_v29, %v225_v27  ;;  %v228_v32 = vld [vmem:[%s11785_s0 + $0x68] sm:$0xff]  ;;  %v229_v34 = vld [vmem:[%s11785_s0 + $0x70] sm:$0xff]  ;;  %v230_v35 = vld [vmem:[%s11785_s0 + $0x78] sm:$0xff]  ;;  %s5599_s30 = sshll.u32 %s7995_s5, 4 }
  0x40   : > { %s8009_s17 = scalar_lea.vmem %s11786_s1, %s5601_s6  ;;  %6581 = vmatpush3.bf16.msra.mxu1 %v6578_v21  ;;  %6587 = vmatprep.subr.bf16.mxu0 %v6586_v28  ;;  %v6594_v33 = vpack.c.bf16 %v228_v32, %v227_v31  ;;  %v6598_v36 = vpack.c.bf16 %v230_v35, %v229_v34  ;;  %v8088_v37 = vld [vmem:[%s11785_s0 + $0x10] ss:$0 sm:$0xff]  ;;  %s204_s9 = scalar_lea.vmem [#allocation5], %s5599_s30 }
  0x41   : > { %v231_v2 = vld [vmem:[%s8009_s17] sm:$0xff]  ;;  %v232_v4 = vld [vmem:[%s8009_s17 + $0x8] sm:$0xff]  ;;  %v233_v5 = vld [vmem:[%s8009_s17 + $0x10] sm:$0xff]  ;;  %6583 = vmatprep.subr.bf16.mxu1 %v6582_v24  ;;  %7050 = vset.pattern.permute.xlu0 %v11798_v22  ;;  %s5506_s10 = sshll.u32 %s204_s9, 4  ;;  %s5707_s4 = sshll.u32 %s7913_s16, 8  ;;  %s11734_s10 = int_to_ptr.vmem [resolvable:$true] %s5506_s10 }
  0x42   : > { %6030 = vmatprep.mubr.msk.f32.mxu0 %vm283_vm0, %v231_v2  ;;  %v234_v6 = vld [vmem:[%s8009_s17 + $0x18] sm:$0xff]  ;;  %v235_v7 = vld [vmem:[%s8009_s17 + $0x20] sm:$0xff]  ;;  %v236_v8 = vld [vmem:[%s8009_s17 + $0x28] sm:$0xff]  ;;  %7049 = vset.pattern.permute.xlu1 %v11800_v23  ;;  %s11741_s8 = scalar_lea.hbm %s11788_s3, %s5707_s4  ;;  %s5493_s16 = scalar_lea.sflag [#allocation4], %s7995_s5 }
  0x43   : > { %6031 = vmatmul.mubr.msk.f32.vlgmr.msra.gmra.mrb[0].mxu0 %vm283_vm0, %v232_v4  ;;  %v237_v9 = vld [vmem:[%s8009_s17 + $0x30] sm:$0xff]  ;;  %v238_v10 = vld [vmem:[%s8009_s17 + $0x38] sm:$0xff]  ;;  %v239_v11 = vld [vmem:[%s8009_s17 + $0x40] sm:$0xff]  ;;  %s7785_s19 = scalar_lea.vmem %s11734_s10, 256  ;;  %p12856_p11 = scmp.ne.s32.totalorder %s12122_s24, 0 }
  0x44   : > { %6033 = vmatprep.mubr.msk.f32.mxu0 %vm283_vm0, %v233_v5  ;;  %v240_v12 = vld [vmem:[%s8009_s17 + $0x48] sm:$0xff]  ;;  %v241_v13 = vld [vmem:[%s8009_s17 + $0x50] sm:$0xff]  ;;  %v242_v14 = vld [vmem:[%s8009_s17 + $0x58] sm:$0xff]  ;;  %6585 = vmatpush3.bf16.msra.mxu1 %v6582_v24  ;;  %v1041_v24 = vlaneseq  ;;  %p7786_p6 = scmp.ne.s32.totalorder %s11734_s10, %s7785_s19  ;;  %s7869_s20 = smov [#allocation5]  }
  0x45   : > { %v243_v15 = vld [vmem:[%s8009_s17 + $0x60] sm:$0xff]  ;;  %v244_v16 = vld [vmem:[%s8009_s17 + $0x68] sm:$0xff]  ;;  %v245_v17 = vld [vmem:[%s8009_s17 + $0x70] sm:$0xff]  ;;  %6589 = vmatpush3.bf16.msra.mxu0 %v6586_v28 }
  0x46   : > { %v246_v18 = vld [vmem:[%s8009_s17 + $0x78] sm:$0xff]  ;;  %6591 = vmatprep.subr.bf16.mxu0 %v6590_v30  ;;  %v8172_v25 = vshrl.u32 %v1041_v24, 7  ;;  %p7787_p12 = pnand %p7786_p6, %p12856_p11 }
  0x47   : > { %6034 = vmatmul.mubr.msk.f32.gmra.mrb[2].mxu0 %vm283_vm0, %v234_v6 }
  0x48   : > { %6036 = vmatprep.mubr.msk.f32.mxu0 %vm283_vm0, %v235_v7  ;;  %12141 = vst [vmem:[#allocation24_spill] sm:$0xff] %v8172_v25  ;;  %v11796_v26 = vsub.s32 1, %v8172_v25  ;;  %v11794_v27 = vsub.s32 3, %v8172_v25  ;;  %v11797_v28 = vsub.s32 0, %v8172_v25  ;;  %v11793_v29 = vsub.s32 4, %v8172_v25  ;;  %p7788_p8 = pneg %p7787_p12 }
  0x49   : > { %6593 = vmatpush3.bf16.msra.mxu0 %v6590_v30  ;;  %v222_v30 = vld [vmem:[%s11785_s0 + $0x38] sm:$0xff]  ;;  %v11795_v31 = vsub.s32 2, %v8172_v25  ;;  %v11790_v32 = vsub.s32 7, %v8172_v25  ;;  %v11791_v34 = vsub.s32 6, %v8172_v25 }
  0x4a   : > { %6595 = vmatprep.subr.bf16.mxu0 %v6594_v33  ;;  %v8187_v35 = vrot.slane %v222_v30, %v11796_v26 }
  0x4b   : > { %6037 = vmatmul.mubr.msk.f32.gmra.mrb[4].mxu0 %vm283_vm0, %v236_v8 }
  0x4c   : > { %6039 = vmatprep.mubr.msk.f32.mxu0 %vm283_vm0, %v237_v9 }
  0x4d   : > { %6597 = vmatpush3.bf16.msra.mxu0 %v6594_v33  ;;  %v11792_v33 = vsub.s32 5, %v8172_v25 }
  0x4e   : > { %6599 = vmatprep.subr.bf16.mxu0 %v6598_v36 }
  0x4f   : > { %6040 = vmatmul.mubr.msk.f32.gmra.mrb[6].mxu0 %vm283_vm0, %v238_v10 }
  0x50   : > { %6042 = vmatprep.mubr.msk.f32.mxu0 %vm283_vm0, %v239_v11 }
  0x51   : > { %6601 = vmatpush3.bf16.msra.mxu0 %v6598_v36  ;;  %v8191_v36 = vrot.slane %v222_v30, %v11794_v27 }
  0x53   : > { %6043 = vmatmul.mubr.msk.f32.gmra.mrb[8].mxu0 %vm283_vm0, %v240_v12 }
  0x54   : > { %6045 = vmatprep.mubr.msk.f32.mxu0 %vm283_vm0, %v241_v13 }
  0x57   : > { %6046 = vmatmul.mubr.msk.f32.gmra.mrb[10].mxu0 %vm283_vm0, %v242_v14 }
  0x58   : > { %6048 = vmatprep.mubr.msk.f32.mxu0 %vm283_vm0, %v243_v15 }
  0x5b   : > { %6049 = vmatmul.mubr.msk.f32.gmra.mrb[12].mxu0 %vm283_vm0, %v244_v16 }
  0x5c   : > { %6051 = vmatprep.mubr.msk.f32.mxu0 %vm283_vm0, %v245_v17 }
  0x5f   : > { %6052 = vmatmul.mubr.msk.f32.gmra.mrb[14].mxu0 %vm283_vm0, %v246_v18 }
 0x116   : > { %v6032_v38 = vpop.f32.mrb[0].mxu0 }
 0x117   : > { %v404_v39 = vadd.f32 %v6032_v38, %v8088_v37  ;;  %v398_v40 = vpop.f32.mrb[1].mxu0  ;;  %v8199_v38 = vrot.slane %v222_v30, %v11793_v29 }
 0x118   : > { %v399_v41 = vadd.f32 %v8088_v37, %v398_v40  ;;  %v8207_v40 = vrot.slane %v222_v30, %v11790_v32 }
 0x11a   : > { %7147 = vtanh.f32 %v399_v41  ;;  %v6035_v42 = vpop.f32.mrb[2].mxu0 }
 0x11b   : > { %7149 = vtanh.f32 %v404_v39  ;;  %v414_v43 = vadd.f32 %v6035_v42, %v8088_v37  ;;  %v408_v44 = vpop.f32.mrb[3].mxu0  ;;  %v8203_v39 = vrot.slane %v222_v30, %v11795_v31  ;;  %v8213_v42 = vrot.slane %v222_v30, %v11792_v33 }
 0x11c   : > { %v409_v45 = vadd.f32 %v8088_v37, %v408_v44 }
 0x11d   : > { %7151 = vtanh.f32 %v414_v43  ;;  %v8217_v43 = vrot.slane %v222_v30, %v11791_v34 }
 0x11e   : > { %7153 = vtanh.f32 %v409_v45  ;;  %v6038_v46 = vpop.f32.mrb[4].mxu0 }
 0x11f   : > { %v424_v47 = vadd.f32 %v6038_v46, %v8088_v37  ;;  %v418_v48 = vpop.f32.mrb[5].mxu0 }
 0x120   : > { %v419_v49 = vadd.f32 %v8088_v37, %v418_v48 }
 0x121   : > { %7155 = vtanh.f32 %v424_v47 }
 0x122   : > { %7157 = vtanh.f32 %v419_v49  ;;  %v6041_v50 = vpop.f32.mrb[6].mxu0 }
 0x123   : > { %v434_v51 = vadd.f32 %v6041_v50, %v8088_v37  ;;  %v428_v52 = vpop.f32.mrb[7].mxu0 }
 0x124   : > { %v8097_v53 = vpop.eup %7147  ;;  %v429_v54 = vadd.f32 %v8088_v37, %v428_v52 }
 0x125   : > { %12125 = vst [vmem:[#allocation8_spill] sm:$0xff] %v8097_v53  ;;  %v8100_v55 = vpop.eup %7149  ;;  %7159 = vtanh.f32 %v434_v51  ;;  %6062 = vmatprep.mubr.msk.f32.mxu1 %vm11927_vm1, %v8097_v53  ;;  %v12203_v53 = vmov 9  }
 0x126   : > { %12126 = vst [vmem:[#allocation9_spill] sm:$0xff] %v8100_v55  ;;  %7161 = vtanh.f32 %v429_v54  ;;  %v6044_v56 = vpop.f32.mrb[8].mxu0  ;;  %6063 = vmatmul.mubr.msk.f32.vlgmr.msra.gmra.mrb[0].mxu1 %vm11927_vm1, %v8100_v55 }
 0x127   : > { %v8106_v57 = vpop.eup %7151  ;;  %v444_v58 = vadd.f32 %v6044_v56, %v8088_v37  ;;  %v438_v59 = vpop.f32.mrb[9].mxu0 }
 0x128   : > { %12127 = vst [vmem:[#allocation10_spill] sm:$0xff] %v8106_v57  ;;  %v8109_v60 = vpop.eup %7153  ;;  %v439_v61 = vadd.f32 %v8088_v37, %v438_v59 }
 0x129   : > { %12128 = vst [vmem:[#allocation11_spill] sm:$0xff] %v8109_v60  ;;  %7163 = vtanh.f32 %v444_v58  ;;  %6065 = vmatprep.mubr.msk.f32.mxu1 %vm11927_vm1, %v8109_v60 }
 0x12a   : > { %7165 = vtanh.f32 %v439_v61  ;;  %v6047_v62 = vpop.f32.mrb[10].mxu0  ;;  %6066 = vmatmul.mubr.msk.f32.gmra.mrb[2].mxu1 %vm11927_vm1, %v8106_v57 }
 0x12b   : > { %v8116_v63 = vpop.eup %7155  ;;  %v454_v0 = vadd.f32 %v6047_v62, %v8088_v37  ;;  %v448_v1 = vpop.f32.mrb[11].mxu0 }
 0x12c   : > { %12129 = vst [vmem:[#allocation12_spill] sm:$0xff] %v8116_v63  ;;  %v8119_v2 = vpop.eup %7157  ;;  %v449_v3 = vadd.f32 %v8088_v37, %v448_v1 }
 0x12d   : > { %12130 = vst [vmem:[#allocation13_spill] sm:$0xff] %v8119_v2  ;;  %7167 = vtanh.f32 %v454_v0  ;;  %6068 = vmatprep.mubr.msk.f32.mxu1 %vm11927_vm1, %v8119_v2 }
 0x12e   : > { %7169 = vtanh.f32 %v449_v3  ;;  %v6050_v4 = vpop.f32.mrb[12].mxu0  ;;  %6069 = vmatmul.mubr.msk.f32.gmra.mrb[4].mxu1 %vm11927_vm1, %v8116_v63 }
 0x12f   : > { %v8126_v5 = vpop.eup %7159  ;;  %v464_v6 = vadd.f32 %v6050_v4, %v8088_v37  ;;  %v458_v7 = vpop.f32.mrb[13].mxu0 }
 0x130   : > { %12131 = vst [vmem:[#allocation14_spill] sm:$0xff] %v8126_v5  ;;  %v8129_v8 = vpop.eup %7161  ;;  %v459_v9 = vadd.f32 %v8088_v37, %v458_v7 }
 0x131   : > { %12132 = vst [vmem:[#allocation15_spill] sm:$0xff] %v8129_v8  ;;  %7171 = vtanh.f32 %v464_v6  ;;  %6071 = vmatprep.mubr.msk.f32.mxu1 %vm11927_vm1, %v8129_v8 }
 0x132   : > { %7173 = vtanh.f32 %v459_v9  ;;  %v6053_v10 = vpop.f32.mrb[14].mxu0  ;;  %6072 = vmatmul.mubr.msk.f32.gmra.mrb[6].mxu1 %vm11927_vm1, %v8126_v5 }
 0x133   : > { %v8136_v11 = vpop.eup %7163  ;;  %v474_v12 = vadd.f32 %v6053_v10, %v8088_v37  ;;  %v468_v13 = vpop.f32.mrb[15].mxu0 }
 0x134   : > { %12133 = vst [vmem:[#allocation16_spill] sm:$0xff] %v8136_v11  ;;  %v8139_v14 = vpop.eup %7165  ;;  %v469_v15 = vadd.f32 %v8088_v37, %v468_v13  ;;  %v8195_v37 = vrot.slane %v222_v30, %v11797_v28 }
 0x135   : > { %12134 = vst [vmem:[#allocation17_spill] sm:$0xff] %v8139_v14  ;;  %7175 = vtanh.f32 %v474_v12  ;;  %6074 = vmatprep.mubr.msk.f32.mxu1 %vm11927_vm1, %v8139_v14 }
 0x136   : > { %7177 = vtanh.f32 %v469_v15  ;;  %6075 = vmatmul.mubr.msk.f32.gmra.mrb[8].mxu1 %vm11927_vm1, %v8136_v11 }
 0x137   : > { %v8146_v16 = vpop.eup %7167 }
 0x138   : > { %12135 = vst [vmem:[#allocation18_spill] sm:$0xff] %v8146_v16  ;;  %v8148_v17 = vpop.eup %7169 }
 0x139   : > { %12136 = vst [vmem:[#allocation19_spill] sm:$0xff] %v8148_v17  ;;  %6077 = vmatprep.mubr.msk.f32.mxu1 %vm11927_vm1, %v8148_v17 }
 0x13a   : > { %6078 = vmatmul.mubr.msk.f32.gmra.mrb[10].mxu1 %vm11927_vm1, %v8146_v16 }
 0x13b   : > { %v8154_v18 = vpop.eup %7171 }
 0x13c   : > { %12137 = vst [vmem:[#allocation20_spill] sm:$0xff] %v8154_v18  ;;  %v8156_v19 = vpop.eup %7173 }
 0x13d   : > { %12138 = vst [vmem:[#allocation21_spill] sm:$0xff] %v8156_v19  ;;  %6080 = vmatprep.mubr.msk.f32.mxu1 %vm11927_vm1, %v8156_v19 }
 0x13e   : > { %6081 = vmatmul.mubr.msk.f32.gmra.mrb[12].mxu1 %vm11927_vm1, %v8154_v18 }
 0x13f   : > { %v8162_v20 = vpop.eup %7175 }
 0x140   : > { %12139 = vst [vmem:[#allocation22_spill] sm:$0xff] %v8162_v20  ;;  %v8164_v21 = vpop.eup %7177 }
 0x141   : > { %12140 = vst [vmem:[#allocation23_spill] sm:$0xff] %v8164_v21  ;;  %6083 = vmatprep.mubr.msk.f32.mxu1 %vm11927_vm1, %v8164_v21 }
 0x142   : > { %6084 = vmatmul.mubr.msk.f32.gmra.mrb[14].mxu1 %vm11927_vm1, %v8162_v20 }
 0x1f9   : > { %v8209_v41 = vpop.f32.mrb[0].mxu1 }
 0x1fa   : > { %v608_v44 = vpop.f32.mrb[1].mxu1  ;;  %v1650_v45 = vmul.f32 %v8209_v41, %v8187_v35  ;;  %v2789_v46 = vmul.f32 %v8209_v41, %v8191_v36  ;;  %v1306_v47 = vmul.f32 %v8209_v41, %v8195_v37  ;;  %v3342_v48 = vmul.f32 %v8209_v41, %v8199_v38 }
 0x1fb   : > { %6102 = vmatprep.mubr.msk.f32.mxu0 %vm687_vm2, %v608_v44  ;;  %v1649_v49 = vmul.f32 %v8187_v35, %v608_v44  ;;  %v2788_v50 = vmul.f32 %v8191_v36, %v608_v44  ;;  %v1305_v51 = vmul.f32 %v8195_v37, %v608_v44  ;;  %v3341_v52 = vmul.f32 %v8199_v38, %v608_v44 }
 0x1fc   : > { %6103 = vmatmul.mubr.msk.f32.vlgmr.msra.gmra.mrb[16].mxu0 %vm687_vm2, %v8209_v41  ;;  %v2283_v54 = vmul.f32 %v8203_v39, %v608_v44  ;;  %v2284_v56 = vmul.f32 %v8209_v41, %v8203_v39  ;;  %v4856_v58 = vmul.f32 %v8207_v40, %v608_v44  ;;  %v4857_v59 = vmul.f32 %v8209_v41, %v8207_v40 }
 0x1fd   : > { %v8240_v61 = vpop.f32.mrb[2].mxu1  ;;  %v6602_v62 = vpack.c.bf16 %v1650_v45, %v1649_v49  ;;  %v6698_v0 = vpack.c.bf16 %v2789_v46, %v2788_v50  ;;  %v8242_v1 = vpack.c.bf16 %v1306_v47, %v1305_v51  ;;  %v8244_v3 = vpack.c.bf16 %v3342_v48, %v3341_v52 }
 0x1fe   : > { %v8246_v4 = vpop.f32.mrb[3].mxu1  ;;  %v1652_v6 = vmul.f32 %v8240_v61, %v8187_v35  ;;  %v2791_v7 = vmul.f32 %v8240_v61, %v8191_v36  ;;  %v1308_v9 = vmul.f32 %v8240_v61, %v8195_v37  ;;  %v8254_v10 = vpack.c.bf16 %v2284_v56, %v2283_v54 }
 0x1ff   : > { %12142 = vst [vmem:[#allocation25_spill] sm:$0xff] %v8242_v1  ;;  %12143 = vst [vmem:[#allocation26_spill] sm:$0xff] %v8244_v3  ;;  %6603 = vmatprep.subr.bf16.mxu0 %v6602_v62  ;;  %6699 = vmatprep.subr.bf16.mxu1 %v6698_v0  ;;  %v1651_v12 = vmul.f32 %v8187_v35, %v8246_v4  ;;  %v2790_v13 = vmul.f32 %v8191_v36, %v8246_v4 }
 0x200   : > { %12144 = vst [vmem:[#allocation27_spill] sm:$0xff] %v8254_v10  ;;  %v1307_v15 = vmul.f32 %v8195_v37, %v8246_v4  ;;  %6605 = vmatpush3.bf16.msra.mxu0 %v6602_v62  ;;  %6701 = vmatpush3.bf16.msra.mxu1 %v6698_v0  ;;  %v2285_v24 = vmul.f32 %v8203_v39, %v8246_v4 }
 0x201   : > { %v2286_v30 = vmul.f32 %v8240_v61, %v8203_v39  ;;  %v8266_v45 = vpack.c.bf16 %v4857_v59, %v4856_v58  ;;  %v8268_v46 = vpop.f32.mrb[4].mxu1  ;;  %v6606_v47 = vpack.c.bf16 %v1652_v6, %v1651_v12  ;;  %v6702_v48 = vpack.c.bf16 %v2791_v7, %v2790_v13  ;;  %6105 = vmatprep.mubr.msk.f32.mxu0 %vm687_vm2, %v8246_v4 }
 0x202   : > { %v8272_v49 = vpack.c.bf16 %v1308_v9, %v1307_v15  ;;  %v3846_v50 = vmul.f32 %v8213_v42, %v608_v44  ;;  %v8275_v51 = vpop.f32.mrb[5].mxu1  ;;  %v1654_v52 = vmul.f32 %v8268_v46, %v8187_v35  ;;  %v2793_v54 = vmul.f32 %v8268_v46, %v8191_v36  ;;  %6106 = vmatmul.mubr.msk.f32.gmra.mrb[18].mxu0 %vm687_vm2, %v8240_v61 }
 0x203   : > { %12145 = vst [vmem:[#allocation28_spill] sm:$0xff] %v8266_v45  ;;  %v8283_v56 = vpack.c.bf16 %v2286_v30, %v2285_v24  ;;  %v4858_v58 = vmul.f32 %v8207_v40, %v8246_v4  ;;  %6607 = vmatprep.subr.bf16.mxu0 %v6606_v47  ;;  %6703 = vmatprep.subr.bf16.mxu1 %v6702_v48 }
 0x204   : > { %12146 = vst [vmem:[#allocation29_spill] sm:$0xff] %v8272_v49  ;;  %v1653_v59 = vmul.f32 %v8187_v35, %v8275_v51  ;;  %v2792_v62 = vmul.f32 %v8191_v36, %v8275_v51  ;;  %v4859_v0 = vmul.f32 %v8240_v61, %v8207_v40  ;;  %6609 = vmatpush3.bf16.msra.mxu0 %v6606_v47 }
 0x205   : > { %12147 = vst [vmem:[#allocation30_spill] sm:$0xff] %v8283_v56  ;;  %6705 = vmatpush3.bf16.msra.mxu1 %v6702_v48  ;;  %v3847_v6 = vmul.f32 %v8209_v41, %v8213_v42  ;;  %v4351_v7 = vmul.f32 %v8217_v43, %v608_v44  ;;  %v8296_v9 = vpop.f32.mrb[6].mxu1  ;;  %6108 = vmatprep.mubr.msk.f32.mxu0 %vm687_vm2, %v8275_v51 }
 0x206   : > { %v6610_v12 = vpack.c.bf16 %v1654_v52, %v1653_v59  ;;  %v6706_v13 = vpack.c.bf16 %v2793_v54, %v2792_v62  ;;  %v8300_v15 = vpack.c.bf16 %v4859_v0, %v4858_v58  ;;  %v4352_v24 = vmul.f32 %v8209_v41, %v8217_v43  ;;  %v8304_v30 = vpop.f32.mrb[7].mxu1  ;;  %6109 = vmatmul.mubr.msk.f32.gmra.mrb[20].mxu0 %vm687_vm2, %v8268_v46 }
 0x207   : > { %v1656_v47 = vmul.f32 %v8296_v9, %v8187_v35  ;;  %v2795_v44 = vmul.f32 %v8296_v9, %v8191_v36  ;;  %v3343_v48 = vmul.f32 %v8199_v38, %v8246_v4  ;;  %v3344_v52 = vmul.f32 %v8240_v61, %v8199_v38  ;;  %6111 = vmatprep.mubr.msk.f32.mxu0 %vm687_vm2, %v8304_v30 }
 0x208   : > { %12148 = vst [vmem:[#allocation31_spill] sm:$0xff] %v8300_v15  ;;  %6611 = vmatprep.subr.bf16.mxu0 %v6610_v12  ;;  %6707 = vmatprep.subr.bf16.mxu1 %v6706_v13  ;;  %v1655_v41 = vmul.f32 %v8187_v35, %v8304_v30  ;;  %v2794_v54 = vmul.f32 %v8191_v36, %v8304_v30 }
 0x209   : > { %v8320_v58 = vpack.c.bf16 %v3847_v6, %v3846_v50  ;;  %6613 = vmatpush3.bf16.msra.mxu0 %v6610_v12  ;;  %6709 = vmatpush3.bf16.msra.mxu1 %v6706_v13  ;;  %v8322_v59 = vpack.c.bf16 %v3344_v52, %v3343_v48  ;;  %v3848_v62 = vmul.f32 %v8213_v42, %v8246_v4  ;;  %v8328_v32 = vpop.f32.mrb[8].mxu1 }
 0x20a   : > { %v3849_v0 = vmul.f32 %v8240_v61, %v8213_v42  ;;  %v6614_v34 = vpack.c.bf16 %v1656_v47, %v1655_v41  ;;  %v6710_v33 = vpack.c.bf16 %v2795_v44, %v2794_v54  ;;  %v8332_v29 = vpack.c.bf16 %v4352_v24, %v4351_v7  ;;  %v8336_v6 = vpop.f32.mrb[9].mxu1  ;;  %6112 = vmatmul.mubr.msk.f32.gmra.mrb[22].mxu0 %vm687_vm2, %v8296_v9 }
 0x20b   : > { %12149 = vst [vmem:[#allocation32_spill] sm:$0xff] %v8320_v58  ;;  %12150 = vst [vmem:[#allocation33_spill] sm:$0xff] %v8322_v59  ;;  %v4353_v50 = vmul.f32 %v8217_v43, %v8246_v4  ;;  %v1658_v12 = vmul.f32 %v8328_v32, %v8187_v35  ;;  %v2797_v13 = vmul.f32 %v8328_v32, %v8191_v36  ;;  %6114 = vmatprep.mubr.msk.f32.mxu0 %vm687_vm2, %v8336_v6 }
 0x20c   : > { %12151 = vst [vmem:[#allocation34_spill] sm:$0xff] %v8332_v29  ;;  %v8344_v47 = vpack.c.bf16 %v3849_v0, %v3848_v62  ;;  %v4354_v7 = vmul.f32 %v8240_v61, %v8217_v43  ;;  %6615 = vmatprep.subr.bf16.mxu0 %v6614_v34  ;;  %6711 = vmatprep.subr.bf16.mxu1 %v6710_v33 }
 0x20d   : > { %v1657_v4 = vmul.f32 %v8187_v35, %v8336_v6  ;;  %v2796_v24 = vmul.f32 %v8191_v36, %v8336_v6  ;;  %6617 = vmatpush3.bf16.msra.mxu0 %v6614_v34  ;;  %6713 = vmatpush3.bf16.msra.mxu1 %v6710_v33  ;;  %v8354_v48 = vpop.f32.mrb[10].mxu1  ;;  %v3851_v26 = vmul.f32 %v8268_v46, %v8213_v42 }
 0x20e   : > { %12152 = vst [vmem:[#allocation35_spill] sm:$0xff] %v8344_v47  ;;  %v8352_v44 = vpack.c.bf16 %v4354_v7, %v4353_v50  ;;  %v8358_v61 = vpop.f32.mrb[11].mxu1  ;;  %v1660_v54 = vmul.f32 %v8354_v48, %v8187_v35  ;;  %v2799_v62 = vmul.f32 %v8354_v48, %v8191_v36  ;;  %6115 = vmatmul.mubr.msk.f32.gmra.mrb[24].mxu0 %vm687_vm2, %v8328_v32 }
 0x20f   : > { %v6618_v52 = vpack.c.bf16 %v1658_v12, %v1657_v4  ;;  %v6714_v41 = vpack.c.bf16 %v2797_v13, %v2796_v24  ;;  %v1659_v33 = vmul.f32 %v8187_v35, %v8358_v61  ;;  %v2798_v34 = vmul.f32 %v8191_v36, %v8358_v61  ;;  %6117 = vmatprep.mubr.msk.f32.mxu0 %vm687_vm2, %v8358_v61 }
 0x210   : > { %12153 = vst [vmem:[#allocation36_spill] sm:$0xff] %v8352_v44  ;;  %v4355_v28 = vmul.f32 %v8217_v43, %v8275_v51  ;;  %v4862_v22 = vmul.f32 %v8207_v40, %v8304_v30  ;;  %v4863_v23 = vmul.f32 %v8296_v9, %v8207_v40  ;;  %v4864_v8 = vmul.f32 %v8207_v40, %v8336_v6 }
 0x211   : > { %6619 = vmatprep.subr.bf16.mxu0 %v6618_v52  ;;  %6715 = vmatprep.subr.bf16.mxu1 %v6714_v41  ;;  %v8370_v0 = vpop.f32.mrb[12].mxu1  ;;  %v6622_v50 = vpack.c.bf16 %v1660_v54, %v1659_v33  ;;  %v6718_v12 = vpack.c.bf16 %v2799_v62, %v2798_v34  ;;  %v4865_v18 = vmul.f32 %v8328_v32, %v8207_v40  ;;  %v12211_v44 = vmov 11  }
 0x212   : > { %6621 = vmatpush3.bf16.msra.mxu0 %v6618_v52  ;;  %6717 = vmatpush3.bf16.msra.mxu1 %v6714_v41  ;;  %v8374_v13 = vpop.f32.mrb[13].mxu1  ;;  %v1662_v7 = vmul.f32 %v8370_v0, %v8187_v35  ;;  %v2801_v4 = vmul.f32 %v8370_v0, %v8191_v36  ;;  %v8466_v20 = vpack.c.bf16 %v4863_v23, %v4862_v22 }
 0x213   : > { %6118 = vmatmul.mubr.msk.f32.gmra.mrb[26].mxu0 %vm687_vm2, %v8354_v48  ;;  %6623 = vmatprep.subr.bf16.mxu0 %v6622_v50  ;;  %v1661_v24 = vmul.f32 %v8187_v35, %v8374_v13  ;;  %v2800_v52 = vmul.f32 %v8191_v36, %v8374_v13  ;;  %v4357_v23 = vmul.f32 %v8217_v43, %v8304_v30 }
 0x214   : > { %6719 = vmatprep.subr.bf16.mxu1 %v6718_v12  ;;  %6120 = vmatprep.mubr.msk.f32.mxu0 %vm687_vm2, %v8374_v13  ;;  %12163 = vst [vmem:[#allocation46_spill] sm:$0xff] %v8466_v20  ;;  %v2294_v19 = vmul.f32 %v8354_v48, %v8203_v39  ;;  %v4361_v2 = vmul.f32 %v8217_v43, %v8358_v61 }
 0x215   : > { %v8386_v41 = vpop.f32.mrb[14].mxu1  ;;  %v6626_v54 = vpack.c.bf16 %v1662_v7, %v1661_v24  ;;  %v6722_v62 = vpack.c.bf16 %v2801_v4, %v2800_v52  ;;  %v2295_v16 = vmul.f32 %v8203_v39, %v8374_v13  ;;  %v2296_v57 = vmul.f32 %v8370_v0, %v8203_v39 }
 0x216   : > { %6625 = vmatpush3.bf16.msra.mxu0 %v6622_v50  ;;  %6721 = vmatpush3.bf16.msra.mxu1 %v6718_v12  ;;  %v8390_v33 = vpop.f32.mrb[15].mxu1  ;;  %v1664_v34 = vmul.f32 %v8386_v41, %v8187_v35  ;;  %v2803_v27 = vmul.f32 %v8386_v41, %v8191_v36  ;;  %v1309_v50 = vmul.f32 %v8195_v37, %v8275_v51 }
 0x217   : > { %6121 = vmatmul.mubr.msk.f32.gmra.mrb[28].mxu0 %vm687_vm2, %v8370_v0  ;;  %v1310_v12 = vmul.f32 %v8268_v46, %v8195_v37  ;;  %6627 = vmatprep.subr.bf16.mxu0 %v6626_v54  ;;  %v1663_v7 = vmul.f32 %v8187_v35, %v8390_v33  ;;  %v2802_v4 = vmul.f32 %v8191_v36, %v8390_v33 }
 0x218   : > { %6723 = vmatprep.subr.bf16.mxu1 %v6722_v62  ;;  %6123 = vmatprep.mubr.msk.f32.mxu0 %vm687_vm2, %v8390_v33  ;;  %v1311_v35 = vmul.f32 %v8195_v37, %v8304_v30  ;;  %v8562_v17 = vpack.c.bf16 %v2296_v57, %v2295_v16  ;;  %v3353_v57 = vmul.f32 %v8199_v38, %v8374_v13 }
 0x219   : > { %v8406_v24 = vpack.c.bf16 %v1310_v12, %v1309_v50  ;;  %v6630_v52 = vpack.c.bf16 %v1664_v34, %v1663_v7  ;;  %v6726_v31 = vpack.c.bf16 %v2803_v27, %v2802_v4  ;;  %v1312_v27 = vmul.f32 %v8296_v9, %v8195_v37 }
 0x21a   : > { %6629 = vmatpush3.bf16.msra.mxu0 %v6626_v54  ;;  %6725 = vmatpush3.bf16.msra.mxu1 %v6722_v62  ;;  %v2287_v54 = vmul.f32 %v8203_v39, %v8275_v51  ;;  %v2288_v62 = vmul.f32 %v8268_v46, %v8203_v39  ;;  %v1314_v50 = vmul.f32 %v8328_v32, %v8195_v37 }
 0x21b   : > { %12154 = vst [vmem:[#allocation37_spill] sm:$0xff] %v8406_v24  ;;  %6124 = vmatmul.mubr.msk.f32.gmra.mrb[30].mxu0 %vm687_vm2, %v8386_v41  ;;  %6631 = vmatprep.subr.bf16.mxu0 %v6630_v52  ;;  %v8418_v36 = vpack.c.bf16 %v1312_v27, %v1311_v35  ;;  %v4860_v7 = vmul.f32 %v8207_v40, %v8275_v51  ;;  %12179 = vst [vmem:[#allocation62_spill] sm:$0xff] %v8562_v17 }
 0x21c   : > { %6727 = vmatprep.subr.bf16.mxu1 %v6726_v31  ;;  %v8424_v34 = vpack.c.bf16 %v2288_v62, %v2287_v54  ;;  %v4861_v4 = vmul.f32 %v8268_v46, %v8207_v40  ;;  %v2290_v35 = vmul.f32 %v8296_v9, %v8203_v39  ;;  %v3345_v62 = vmul.f32 %v8199_v38, %v8275_v51 }
 0x21d   : > { %12155 = vst [vmem:[#allocation38_spill] sm:$0xff] %v8418_v36  ;;  %v3354_v16 = vmul.f32 %v8370_v0, %v8199_v38  ;;  %v4363_v60 = vmul.f32 %v8217_v43, %v8374_v13  ;;  %v2298_v11 = vmul.f32 %v8386_v41, %v8203_v39 }
 0x21e   : > { %6633 = vmatpush3.bf16.msra.mxu0 %v6630_v52  ;;  %6729 = vmatpush3.bf16.msra.mxu1 %v6726_v31  ;;  %12156 = vst [vmem:[#allocation39_spill] sm:$0xff] %v8424_v34  ;;  %v1313_v31 = vmul.f32 %v8195_v37, %v8336_v6  ;;  %v2289_v52 = vmul.f32 %v8203_v39, %v8304_v30 }
 0x21f   : > { %6635 = vmatprep.subr.bf16.mxu0 %v8242_v1  ;;  %6731 = vmatprep.subr.bf16.mxu1 %v8244_v3  ;;  %v8440_v27 = vpack.c.bf16 %v4861_v4, %v4860_v7  ;;  %v4356_v7 = vmul.f32 %v8268_v46, %v8217_v43 }
 0x220   : > { %v8430_v12 = vpack.c.bf16 %v1314_v50, %v1313_v31  ;;  %v8442_v54 = vpack.c.bf16 %v2290_v35, %v2289_v52  ;;  %v3346_v31 = vmul.f32 %v8268_v46, %v8199_v38  ;;  %v3850_v50 = vmul.f32 %v8213_v42, %v8275_v51 }
 0x221   : > { %12158 = vst [vmem:[#allocation41_spill] sm:$0xff] %v8440_v27  ;;  %v8460_v35 = vpack.c.bf16 %v4356_v7, %v4355_v28  ;;  %v2291_v51 = vmul.f32 %v8203_v39, %v8336_v6  ;;  %v2292_v46 = vmul.f32 %v8328_v32, %v8203_v39  ;;  %v3348_v28 = vmul.f32 %v8296_v9, %v8199_v38 }
 0x222   : > { %12157 = vst [vmem:[#allocation40_spill] sm:$0xff] %v8430_v12  ;;  %12159 = vst [vmem:[#allocation42_spill] sm:$0xff] %v8442_v54  ;;  %v8456_v4 = vpack.c.bf16 %v3346_v31, %v3345_v62  ;;  %v8458_v52 = vpack.c.bf16 %v3851_v26, %v3850_v50  ;;  %v3347_v26 = vmul.f32 %v8199_v38, %v8304_v30 }
 0x223   : > { %12162 = vst [vmem:[#allocation45_spill] sm:$0xff] %v8460_v35  ;;  %v3852_v62 = vmul.f32 %v8213_v42, %v8304_v30  ;;  %v3853_v31 = vmul.f32 %v8296_v9, %v8213_v42  ;;  %v8480_v22 = vpack.c.bf16 %v2292_v46, %v2291_v51  ;;  %v4358_v50 = vmul.f32 %v8296_v9, %v8217_v43 }
 0x224   : > { %12160 = vst [vmem:[#allocation43_spill] sm:$0xff] %v8456_v4  ;;  %12161 = vst [vmem:[#allocation44_spill] sm:$0xff] %v8458_v52  ;;  %v8486_v7 = vpack.c.bf16 %v3348_v28, %v3347_v26  ;;  %v1315_v51 = vmul.f32 %v8195_v37, %v8358_v61  ;;  %v1316_v30 = vmul.f32 %v8354_v48, %v8195_v37  ;;  %v12210_v35 = vmov 10  }
 0x225   : > { %12164 = vst [vmem:[#allocation47_spill] sm:$0xff] %v8480_v22  ;;  %v8488_v5 = vpack.c.bf16 %v3853_v31, %v3852_v62  ;;  %v8490_v21 = vpack.c.bf16 %v4358_v50, %v4357_v23  ;;  %v8500_v46 = vpack.c.bf16 %v4865_v18, %v4864_v8  ;;  %v3349_v26 = vmul.f32 %v8199_v38, %v8336_v6 }
 0x226   : > { %12165 = vst [vmem:[#allocation48_spill] sm:$0xff] %v8486_v7  ;;  %v8502_v9 = vpack.c.bf16 %v1316_v30, %v1315_v51  ;;  %v3350_v28 = vmul.f32 %v8328_v32, %v8199_v38  ;;  %v3854_v62 = vmul.f32 %v8213_v42, %v8336_v6  ;;  %v3855_v31 = vmul.f32 %v8328_v32, %v8213_v42 }
 0x227   : > { %12166 = vst [vmem:[#allocation49_spill] sm:$0xff] %v8488_v5  ;;  %12167 = vst [vmem:[#allocation50_spill] sm:$0xff] %v8490_v21  ;;  %v4359_v23 = vmul.f32 %v8217_v43, %v8336_v6  ;;  %v4360_v8 = vmul.f32 %v8328_v32, %v8217_v43  ;;  %v2293_v30 = vmul.f32 %v8203_v39, %v8358_v61  ;;  %v12209_v21 = vmov 12  }
 0x228   : > { %12168 = vst [vmem:[#allocation51_spill] sm:$0xff] %v8500_v46  ;;  %12169 = vst [vmem:[#allocation52_spill] sm:$0xff] %v8502_v9  ;;  %v8516_v18 = vpack.c.bf16 %v3350_v28, %v3349_v26  ;;  %v8518_v50 = vpack.c.bf16 %v3855_v31, %v3854_v62  ;;  %v4866_v6 = vmul.f32 %v8207_v40, %v8358_v61 }
 0x229   : > { %v8520_v51 = vpack.c.bf16 %v4360_v8, %v4359_v23  ;;  %v8526_v63 = vpack.c.bf16 %v2294_v19, %v2293_v30  ;;  %v4867_v32 = vmul.f32 %v8354_v48, %v8207_v40  ;;  %v1317_v26 = vmul.f32 %v8195_v37, %v8374_v13 }
 0x22a   : > { %12170 = vst [vmem:[#allocation53_spill] sm:$0xff] %v8516_v18  ;;  %12171 = vst [vmem:[#allocation54_spill] sm:$0xff] %v8518_v50  ;;  %v1318_v28 = vmul.f32 %v8370_v0, %v8195_v37  ;;  %v3351_v19 = vmul.f32 %v8199_v38, %v8358_v61  ;;  %v3352_v23 = vmul.f32 %v8354_v48, %v8199_v38 }
 0x22b   : > { %12172 = vst [vmem:[#allocation55_spill] sm:$0xff] %v8520_v51  ;;  %12173 = vst [vmem:[#allocation56_spill] sm:$0xff] %v8526_v63  ;;  %v8536_v62 = vpack.c.bf16 %v4867_v32, %v4866_v6  ;;  %v3856_v8 = vmul.f32 %v8213_v42, %v8358_v61  ;;  %v3857_v30 = vmul.f32 %v8354_v48, %v8213_v42 }
 0x22c   : > { %v8538_v31 = vpack.c.bf16 %v1318_v28, %v1317_v26  ;;  %v4362_v6 = vmul.f32 %v8354_v48, %v8217_v43  ;;  %v8552_v32 = vpack.c.bf16 %v3352_v23, %v3351_v19  ;;  %v4868_v61 = vmul.f32 %v8207_v40, %v8374_v13 }
 0x22d   : > { %12174 = vst [vmem:[#allocation57_spill] sm:$0xff] %v8536_v62  ;;  %v8554_v26 = vpack.c.bf16 %v3857_v30, %v3856_v8  ;;  %v4869_v48 = vmul.f32 %v8370_v0, %v8207_v40  ;;  %v1319_v19 = vmul.f32 %v8195_v37, %v8390_v33  ;;  %v3858_v30 = vmul.f32 %v8213_v42, %v8374_v13 }
 0x22e   : > { %12175 = vst [vmem:[#allocation58_spill] sm:$0xff] %v8538_v31  ;;  %12176 = vst [vmem:[#allocation59_spill] sm:$0xff] %v8552_v32  ;;  %v8556_v28 = vpack.c.bf16 %v4362_v6, %v4361_v2  ;;  %v1320_v2 = vmul.f32 %v8386_v41, %v8195_v37  ;;  %v3859_v6 = vmul.f32 %v8370_v0, %v8213_v42 }
 0x22f   : > { %12177 = vst [vmem:[#allocation60_spill] sm:$0xff] %v8554_v26  ;;  %v8572_v23 = vpack.c.bf16 %v4869_v48, %v4868_v61  ;;  %v4364_v37 = vmul.f32 %v8370_v0, %v8217_v43  ;;  %v8588_v61 = vpack.c.bf16 %v3354_v16, %v3353_v57  ;;  %v4870_v13 = vmul.f32 %v8207_v40, %v8390_v33 }
 0x230   : > { %12178 = vst [vmem:[#allocation61_spill] sm:$0xff] %v8556_v28  ;;  %v8574_v8 = vpack.c.bf16 %v1320_v2, %v1319_v19  ;;  %v8590_v48 = vpack.c.bf16 %v3859_v6, %v3858_v30  ;;  %v2297_v2 = vmul.f32 %v8203_v39, %v8390_v33  ;;  %v4871_v0 = vmul.f32 %v8386_v41, %v8207_v40 }
 0x231   : > { %12180 = vst [vmem:[#allocation63_spill] sm:$0xff] %v8572_v23  ;;  %12182 = vst [vmem:[#allocation65_spill] sm:$0xff] %v8588_v61  ;;  %v8592_v19 = vpack.c.bf16 %v4364_v37, %v4363_v60  ;;  %v3355_v60 = vmul.f32 %v8199_v38, %v8390_v33  ;;  %v3356_v16 = vmul.f32 %v8386_v41, %v8199_v38 }
 0x232   : > { %12181 = vst [vmem:[#allocation64_spill] sm:$0xff] %v8574_v8  ;;  %12183 = vst [vmem:[#allocation66_spill] sm:$0xff] %v8590_v48  ;;  %v8598_v14 = vpack.c.bf16 %v2298_v11, %v2297_v2  ;;  %v8604_v57 = vpack.c.bf16 %v4871_v0, %v4870_v13  ;;  %v3860_v30 = vmul.f32 %v8213_v42, %v8390_v33  ;;  %v11821_v0 = vmov 11  }
 0x233   : > { %12184 = vst [vmem:[#allocation67_spill] sm:$0xff] %v8592_v19  ;;  %v3861_v11 = vmul.f32 %v8386_v41, %v8213_v42  ;;  %v4365_v39 = vmul.f32 %v8217_v43, %v8390_v33  ;;  %v4366_v40 = vmul.f32 %v8386_v41, %v8217_v43  ;;  %v8618_v6 = vpack.c.bf16 %v3356_v16, %v3355_v60 }
 0x234   : > { %12185 = vst [vmem:[#allocation68_spill] sm:$0xff] %v8598_v14  ;;  %12186 = vst [vmem:[#allocation69_spill] sm:$0xff] %v8604_v57  ;;  %v11818_v42 = vmov 13   ;;  %v11816_v33 = vmov 10  }
 0x235   : > { %12187 = vst [vmem:[#allocation70_spill] sm:$0xff] %v8618_v6  ;;  %v8620_v37 = vpack.c.bf16 %v3861_v11, %v3860_v30  ;;  %v8622_v2 = vpack.c.bf16 %v4366_v40, %v4365_v39  ;;  %v11826_v11 = vmov 12  }
 0x237   : > { %12188 = vst [vmem:[#allocation71_spill] sm:$0xff] %v8620_v37  ;;  %12189 = vst [vmem:[#allocation72_spill] sm:$0xff] %v8622_v2 }
 0x2cf   : > { %v8624_v13 = vpop.f32.mrb[16].mxu0 }
 0x2d0   : > { %12190 = vst [vmem:[#allocation73_spill] sm:$0xff] %v8624_v13  ;;  %1326 = vperm.xlu0 %7050, %v8624_v13   ;;  %968 = vperm.xlu1 %7049, %v8624_v13   ;;  %v8628_v38 = vpop.f32.mrb[17].mxu0 }
 0x2d1   : > { %12191 = vst [vmem:[#allocation74_spill] sm:$0xff] %v8628_v38 }
 0x2d4   : > { %7054 = vset.pattern.permute.xlu0 %v11818_v42  ;;  %7051 = vset.pattern.permute.xlu1 %v11816_v33  ;;  %v12200_v42 = vmov 8  }
 0x2d5   : > { %3523 = vperm.xlu0 %7054, %v8624_v13   ;;  %1960 = vperm.xlu1 %7051, %v8624_v13   ;;  %v8634_v43 = vpop.f32.mrb[18].mxu0 }
 0x2d6   : > { %12192 = vst [vmem:[#allocation75_spill] sm:$0xff] %v8634_v43  ;;  %v8636_v41 = vpop.f32.mrb[19].mxu0 }
 0x2d7   : > { %12193 = vst [vmem:[#allocation76_spill] sm:$0xff] %v8636_v41 }
 0x2d9   : > { %7057 = vset.pattern.permute.xlu0 %v11816_v33  ;;  %7052 = vset.pattern.permute.xlu1 %v11821_v0  ;;  %v8640_v60 = vpop.f32.mrb[20].mxu0 }
 0x2da   : > { %12194 = vst [vmem:[#allocation77_spill] sm:$0xff] %v8640_v60  ;;  %2465 = vperm.xlu1 %7052, %v8624_v13   ;;  %1956 = vperm.xlu0 %7057, %v8628_v38   ;;  %v8644_v16 = vpop.f32.mrb[21].mxu0 }
 0x2db   : > { %12195 = vst [vmem:[#allocation78_spill] sm:$0xff] %v8644_v16 }
 0x2dd   : > { %v8646_v30 = vpop.f32.mrb[22].mxu0 }
 0x2de   : > { %12196 = vst [vmem:[#allocation79_spill] sm:$0xff] %v8646_v30  ;;  %7053 = vset.pattern.permute.xlu1 %v11826_v11  ;;  %7058 = vset.pattern.permute.xlu0 %v11821_v0  ;;  %v8650_v39 = vpop.f32.mrb[23].mxu0 }
 0x2df   : > { %12197 = vst [vmem:[#allocation80_spill] sm:$0xff] %v8650_v39  ;;  %3018 = vperm.xlu1 %7053, %v8624_v13   ;;  %2461 = vperm.xlu0 %7058, %v8628_v38  }
 0x2e1   : > { %v8654_v40 = vpop.f32.mrb[24].mxu0 }
 0x2e2   : > { %12198 = vst [vmem:[#allocation81_spill] sm:$0xff] %v8654_v40  ;;  %v8656_v33 = vpop.f32.mrb[25].mxu0 }
 0x2e3   : > { %12199 = vst [vmem:[#allocation82_spill] sm:$0xff] %v8656_v33  ;;  %7055 = vset.pattern.permute.xlu1 %v12200_v42  ;;  %7059 = vset.pattern.permute.xlu0 %v11826_v11  ;;  %v12206_v11 = vmov 13  }
 0x2e4   : > { %3014 = vperm.xlu0 %7059, %v8628_v38   ;;  %963 = vperm.xlu1 %7055, %v8628_v38  }
 0x2e6   : > { %v8662_v55 = vpop.f32.mrb[26].mxu0 }
 0x2e7   : > { %12201 = vst [vmem:[#allocation83_spill] sm:$0xff] %v8662_v55  ;;  %v8664_v0 = vpop.f32.mrb[27].mxu0 }
 0x2e8   : > { %12202 = vst [vmem:[#allocation84_spill] sm:$0xff] %v8664_v0  ;;  %7056 = vset.pattern.permute.xlu1 %v12203_v53  ;;  %3026 = vperm.xlu0 %7059, %v8634_v43  }
 0x2e9   : > { %1322 = vperm.xlu1 %7056, %v8628_v38  }
 0x2ea   : > { %v8669_v2 = vpop.f32.mrb[28].mxu0 }
 0x2eb   : > { %12204 = vst [vmem:[#allocation85_spill] sm:$0xff] %v8669_v2  ;;  %v8671_v19 = vpop.f32.mrb[29].mxu0 }
 0x2ec   : > { %12205 = vst [vmem:[#allocation86_spill] sm:$0xff] %v8671_v19  ;;  %3034 = vperm.xlu0 %7059, %v8640_v60  }
 0x2ed   : > { %7060 = vset.pattern.permute.xlu1 %v12206_v11 }
 0x2ee   : > { %v8675_v28 = vpop.f32.mrb[30].mxu0  ;;  %3519 = vperm.xlu1 %7060, %v8628_v38  }
 0x2ef   : > { %12207 = vst [vmem:[#allocation87_spill] sm:$0xff] %v8675_v28  ;;  %v8678_v51 = vpop.f32.mrb[31].mxu0 }
 0x2f0   : > { %12208 = vst [vmem:[#allocation88_spill] sm:$0xff] %v8678_v51  ;;  %7082 = vset.pattern.permute.xlu0 %v12206_v11 }
 0x2f1   : > { %3535 = vperm.xlu0 %7082, %v8644_v16  }
 0x2f2   : > { %7061 = vset.pattern.permute.xlu1 %v12200_v42 }
 0x2f3   : > { %978 = vperm.xlu1 %7061, %v8634_v43  }
 0x2f5   : > { %7087 = vset.pattern.permute.xlu0 %v12209_v21 }
 0x2f6   : > { %3042 = vperm.xlu0 %7087, %v8646_v30  }
 0x2f7   : > { %7062 = vset.pattern.permute.xlu1 %v12203_v53 }
 0x2f8   : > { %1334 = vperm.xlu1 %7062, %v8634_v43  }
 0x2fa   : > { %7094 = vset.pattern.permute.xlu0 %v12206_v11 }
 0x2fb   : > { %3543 = vperm.xlu0 %7094, %v8650_v39  }
 0x2fc   : > { %7063 = vset.pattern.permute.xlu1 %v12210_v35 }
 0x2fd   : > { %1968 = vperm.xlu1 %7063, %v8634_v43  }
 0x2ff   : > { %7096 = vset.pattern.permute.xlu0 %v12203_v53 }
 0x300   : > { %1358 = vperm.xlu0 %7096, %v8654_v40  }
 0x301   : > { %7064 = vset.pattern.permute.xlu1 %v12211_v44 }
 0x302   : > { %2473 = vperm.xlu1 %7064, %v8634_v43  }
 0x304   : > { %7097 = vset.pattern.permute.xlu0 %v12210_v35 }
 0x305   : > { %1992 = vperm.xlu0 %7097, %v8654_v40  }
 0x306   : > { %7065 = vset.pattern.permute.xlu1 %v12206_v11 }
 0x307   : > { %3531 = vperm.xlu1 %7065, %v8634_v43  }
 0x309   : > { %7099 = vset.pattern.permute.xlu0 %v12209_v21 }
 0x30a   : > { %3050 = vperm.xlu0 %7099, %v8654_v40  }
 0x30b   : > { %7066 = vset.pattern.permute.xlu1 %v12200_v42 }
 0x30c   : > { %973 = vperm.xlu1 %7066, %v8636_v41  }
 0x30e   : > { %7104 = vset.pattern.permute.xlu0 %v12211_v44 }
 0x30f   : > { %2493 = vperm.xlu0 %7104, %v8656_v33  }
 0x310   : > { %7067 = vset.pattern.permute.xlu1 %v12203_v53 }
 0x311   : > { %1330 = vperm.xlu1 %7067, %v8636_v41  }
 0x313   : > { %7106 = vset.pattern.permute.xlu0 %v12206_v11 }
 0x314   : > { %3551 = vperm.xlu0 %7106, %v8656_v33  }
 0x315   : > { %7068 = vset.pattern.permute.xlu1 %v12210_v35 }
 0x316   : > { %1964 = vperm.xlu1 %7068, %v8636_v41  }
 0x318   : > { %7108 = vset.pattern.permute.xlu0 %v12203_v53 }
 0x319   : > { %1366 = vperm.xlu0 %7108, %v8662_v55  }
 0x31a   : > { %7069 = vset.pattern.permute.xlu1 %v12211_v44 }
 0x31b   : > { %2469 = vperm.xlu1 %7069, %v8636_v41  }
 0x31d   : > { %7109 = vset.pattern.permute.xlu0 %v12210_v35 }
 0x31e   : > { %2000 = vperm.xlu0 %7109, %v8662_v55  }
 0x31f   : > { %7070 = vset.pattern.permute.xlu1 %v12209_v21 }
 0x320   : > { %3022 = vperm.xlu1 %7070, %v8636_v41  }
 0x322   : > { %7111 = vset.pattern.permute.xlu0 %v12209_v21 }
 0x323   : > { %3058 = vperm.xlu0 %7111, %v8662_v55  }
 0x324   : > { %7071 = vset.pattern.permute.xlu1 %v12206_v11 }
 0x325   : > { %3527 = vperm.xlu1 %7071, %v8636_v41  }
 0x327   : > { %7116 = vset.pattern.permute.xlu0 %v12211_v44 }
 0x328   : > { %2501 = vperm.xlu0 %7116, %v8664_v0  }
 0x329   : > { %7072 = vset.pattern.permute.xlu1 %v12200_v42 }
 0x32a   : > { %988 = vperm.xlu1 %7072, %v8640_v60  }
 0x32c   : > { %7118 = vset.pattern.permute.xlu0 %v12206_v11 }
 0x32d   : > { %3559 = vperm.xlu0 %7118, %v8664_v0  }
 0x32e   : > { %7073 = vset.pattern.permute.xlu1 %v12203_v53 }
 0x32f   : > { %1342 = vperm.xlu1 %7073, %v8640_v60  }
 0x331   : > { %7120 = vset.pattern.permute.xlu0 %v12203_v53 }
 0x332   : > { %1374 = vperm.xlu0 %7120, %v8669_v2  }
 0x333   : > { %7074 = vset.pattern.permute.xlu1 %v12210_v35 }
 0x334   : > { %1976 = vperm.xlu1 %7074, %v8640_v60  }
 0x336   : > { %7121 = vset.pattern.permute.xlu0 %v12210_v35 }
 0x337   : > { %2008 = vperm.xlu0 %7121, %v8669_v2  }
 0x338   : > { %7075 = vset.pattern.permute.xlu1 %v12211_v44 }
 0x339   : > { %2481 = vperm.xlu1 %7075, %v8640_v60  }
 0x33b   : > { %7123 = vset.pattern.permute.xlu0 %v12209_v21 }
 0x33c   : > { %3066 = vperm.xlu0 %7123, %v8669_v2  }
 0x33d   : > { %7076 = vset.pattern.permute.xlu1 %v12206_v11 }
 0x33e   : > { %3539 = vperm.xlu1 %7076, %v8640_v60  }
 0x340   : > { %7128 = vset.pattern.permute.xlu0 %v12211_v44 }
 0x341   : > { %2509 = vperm.xlu0 %7128, %v8671_v19  }
 0x342   : > { %7077 = vset.pattern.permute.xlu1 %v12200_v42 }
 0x343   : > { %983 = vperm.xlu1 %7077, %v8644_v16  }
 0x345   : > { %7130 = vset.pattern.permute.xlu0 %v12206_v11 }
 0x346   : > { %3567 = vperm.xlu0 %7130, %v8671_v19  }
 0x347   : > { %7078 = vset.pattern.permute.xlu1 %v12203_v53 }
 0x348   : > { %1338 = vperm.xlu1 %7078, %v8644_v16  }
 0x34a   : > { %7132 = vset.pattern.permute.xlu0 %v12203_v53 }
 0x34b   : > { %1382 = vperm.xlu0 %7132, %v8675_v28  }
 0x34c   : > { %7079 = vset.pattern.permute.xlu1 %v12210_v35 }
 0x34d   : > { %1972 = vperm.xlu1 %7079, %v8644_v16  }
 0x34f   : > { %v8756_v29 = vpop.permute.xlu1 %968  ;;  %7133 = vset.pattern.permute.xlu0 %v12210_v35  ;;  %v8762_v37 = vpop.permute.xlu0 %1326 }
 0x350   : > { %2016 = vperm.xlu0 %7133, %v8675_v28  }
 0x351   : > { %7080 = vset.pattern.permute.xlu1 %v12211_v44 }
 0x352   : > { %2477 = vperm.xlu1 %7080, %v8644_v16  }
 0x354   : > { %v8764_v48 = vpop.permute.xlu1 %1960  ;;  %7135 = vset.pattern.permute.xlu0 %v12209_v21  ;;  %v8770_v26 = vpop.permute.xlu0 %3523 }
 0x355   : > { %3074 = vperm.xlu0 %7135, %v8675_v28   ;;  %12212 = vst [vmem:[#allocation89_spill] sm:$0xff] %v8770_v26 }
 0x356   : > { %7081 = vset.pattern.permute.xlu1 %v12209_v21 }
 0x357   : > { %3030 = vperm.xlu1 %7081, %v8644_v16  }
 0x359   : > { %v8772_v50 = vpop.permute.xlu1 %2465  ;;  %7140 = vset.pattern.permute.xlu0 %v12211_v44  ;;  %v8781_v52 = vpop.permute.xlu0 %1956 }
 0x35a   : > { %2517 = vperm.xlu0 %7140, %v8678_v51  }
 0x35b   : > { %7083 = vset.pattern.permute.xlu1 %v12200_v42 }
 0x35c   : > { %998 = vperm.xlu1 %7083, %v8646_v30  }
 0x35e   : > { %v8778_v5 = vpop.permute.xlu1 %3018  ;;  %7142 = vset.pattern.permute.xlu0 %v12206_v11  ;;  %v8788_v58 = vpop.permute.xlu0 %2461 }
 0x35f   : > { %12213 = vst [vmem:[#allocation90_spill] sm:$0xff] %v8778_v5  ;;  %3575 = vperm.xlu0 %7142, %v8678_v51  }
 0x360   : > { %7084 = vset.pattern.permute.xlu1 %v12203_v53 }
 0x361   : > { %1350 = vperm.xlu1 %7084, %v8646_v30  }
 0x363   : > { %v8786_v47 = vpop.permute.xlu1 %963  ;;  %v8795_v61 = vpop.permute.xlu0 %3014 }
 0x364   : > { %12214 = vst [vmem:[#allocation91_spill] sm:$0xff] %v8795_v61 }
 0x365   : > { %7085 = vset.pattern.permute.xlu1 %v12210_v35 }
 0x366   : > { %1984 = vperm.xlu1 %7085, %v8646_v30  }
 0x367   : > { %v8800_v18 = vpop.permute.xlu0 %3026 }
 0x368   : > { %v8792_v6 = vpop.permute.xlu1 %1322  ;;  %12216 = vst [vmem:[#allocation93_spill] sm:$0xff] %v8800_v18 }
 0x36a   : > { %7086 = vset.pattern.permute.xlu1 %v12211_v44 }
 0x36b   : > { %2489 = vperm.xlu1 %7086, %v8646_v30   ;;  %v8806_v4 = vpop.permute.xlu0 %3034 }
 0x36c   : > { %12217 = vst [vmem:[#allocation94_spill] sm:$0xff] %v8806_v4 }
 0x36d   : > { %v8798_v32 = vpop.permute.xlu1 %3519 }
 0x36e   : > { %12215 = vst [vmem:[#allocation92_spill] sm:$0xff] %v8798_v32 }
 0x36f   : > { %7088 = vset.pattern.permute.xlu1 %v12206_v11 }
 0x370   : > { %3547 = vperm.xlu1 %7088, %v8646_v30   ;;  %v8813_v3 = vpop.permute.xlu0 %3535 }
 0x371   : > { %12218 = vst [vmem:[#allocation95_spill] sm:$0xff] %v8813_v3 }
 0x372   : > { %v8804_v7 = vpop.permute.xlu1 %978 }
 0x374   : > { %7089 = vset.pattern.permute.xlu1 %v12200_v42 }
 0x375   : > { %993 = vperm.xlu1 %7089, %v8650_v39   ;;  %v8821_v23 = vpop.permute.xlu0 %3042 }
 0x376   : > { %12219 = vst [vmem:[#allocation96_spill] sm:$0xff] %v8821_v23 }
 0x377   : > { %v8810_v59 = vpop.permute.xlu1 %1334 }
 0x379   : > { %7090 = vset.pattern.permute.xlu1 %v12203_v53 }
 0x37a   : > { %1346 = vperm.xlu1 %7090, %v8650_v39   ;;  %v8829_v46 = vpop.permute.xlu0 %3543 }
 0x37b   : > { %12220 = vst [vmem:[#allocation97_spill] sm:$0xff] %v8829_v46 }
 0x37c   : > { %v8816_v57 = vpop.permute.xlu1 %1968 }
 0x37d   : > { %881 = vxpose.xlu0.b32.start [1/16] (narrow) %v8628_v38, 8  ;;  %v12236_v38 = vsub.s32 0, %v8172_v25 }
 0x37e   : > { %7091 = vset.pattern.permute.xlu1 %v12210_v35 }
 0x37f   : > { %1980 = vperm.xlu1 %7091, %v8650_v39   ;;  %v8838_v27 = vpop.permute.xlu0 %1358 }
 0x381   : > { %v8823_v62 = vpop.permute.xlu1 %2473  ;;  %882 = vxpose.xlu0.b32.cont [2/16] (narrow) %v8624_v13, 8 }
 0x383   : > { %7092 = vset.pattern.permute.xlu1 %v12211_v44 }
 0x384   : > { %2485 = vperm.xlu1 %7092, %v8650_v39   ;;  %v8846_v45 = vpop.permute.xlu0 %1992 }
 0x385   : > { %883 = vxpose.xlu0.b32.cont [3/16] (narrow) %v8636_v41, 8 }
 0x386   : > { %v8831_v3 = vpop.permute.xlu1 %3531 }
 0x387   : > { %12221 = vst [vmem:[#allocation98_spill] sm:$0xff] %v8831_v3 }
 0x388   : > { %7093 = vset.pattern.permute.xlu1 %v12209_v21 }
 0x389   : > { %3038 = vperm.xlu1 %7093, %v8650_v39   ;;  %884 = vxpose.xlu0.b32.cont [4/16] (narrow) %v8634_v43, 8  ;;  %v8854_v17 = vpop.permute.xlu0 %3050 }
 0x38a   : > { %12222 = vst [vmem:[#allocation99_spill] sm:$0xff] %v8854_v17 }
 0x38b   : > { %v8836_v20 = vpop.permute.xlu1 %973 }
 0x38d   : > { %7095 = vset.pattern.permute.xlu1 %v12200_v42  ;;  %885 = vxpose.xlu0.b32.cont [5/16] (narrow) %v8644_v16, 8 }
 0x38e   : > { %1008 = vperm.xlu1 %7095, %v8654_v40   ;;  %v8863_v22 = vpop.permute.xlu0 %2493 }
 0x390   : > { %v8843_v15 = vpop.permute.xlu1 %1330 }
 0x391   : > { %886 = vxpose.xlu0.b32.cont [6/16] (narrow) %v8640_v60, 8 }
 0x392   : > { %7098 = vset.pattern.permute.xlu1 %v12211_v44 }
 0x393   : > { %2497 = vperm.xlu1 %7098, %v8654_v40   ;;  %v8870_v34 = vpop.permute.xlu0 %3551 }
 0x394   : > { %12224 = vst [vmem:[#allocation101_spill] sm:$0xff] %v8870_v34 }
 0x395   : > { %v8850_v14 = vpop.permute.xlu1 %1964  ;;  %887 = vxpose.xlu0.b32.cont [7/16] (narrow) %v8650_v39, 8 }
 0x397   : > { %7100 = vset.pattern.permute.xlu1 %v12206_v11 }
 0x398   : > { %3555 = vperm.xlu1 %7100, %v8654_v40   ;;  %v8877_v46 = vpop.permute.xlu0 %1366 }
 0x399   : > { %888 = vxpose.xlu0.b32.cont [8/16] (narrow) %v8646_v30, 8 }
 0x39a   : > { %v8858_v63 = vpop.permute.xlu1 %2469 }
 0x39c   : > { %7101 = vset.pattern.permute.xlu1 %v12200_v42 }
 0x39d   : > { %1003 = vperm.xlu1 %7101, %v8656_v33   ;;  %889 = vxpose.xlu0.b32.cont [9/16] (narrow) %v8656_v33, 8  ;;  %v8885_v34 = vpop.permute.xlu0 %2000 }
 0x39f   : > { %v8865_v54 = vpop.permute.xlu1 %3022 }
 0x3a0   : > { %12223 = vst [vmem:[#allocation100_spill] sm:$0xff] %v8865_v54 }
 0x3a1   : > { %7102 = vset.pattern.permute.xlu1 %v12203_v53  ;;  %890 = vxpose.xlu0.b32.cont [10/16] (narrow) %v8654_v40, 8 }
 0x3a2   : > { %1354 = vperm.xlu1 %7102, %v8656_v33   ;;  %v8894_v26 = vpop.permute.xlu0 %3058 }
 0x3a3   : > { %12226 = vst [vmem:[#allocation103_spill] sm:$0xff] %v8894_v26  ;;  %v9000_v26 = vld [vmem:[%s7999_s11] sm:$0xff] }
 0x3a4   : > { %v8872_v56 = vpop.permute.xlu1 %3527  ;;  %vm913_vm3 = vcmp.gt.f32.partialorder %v9000_v26, 0.0 }
 0x3a5   : > { %12225 = vst [vmem:[#allocation102_spill] sm:$0xff] %v8872_v56  ;;  %891 = vxpose.xlu0.b32.cont [11/16] (narrow) %v8664_v0, 8 }
 0x3a6   : > { %7103 = vset.pattern.permute.xlu1 %v12210_v35 }
 0x3a7   : > { %1988 = vperm.xlu1 %7103, %v8656_v33   ;;  %v8902_v8 = vpop.permute.xlu0 %2501 }
 0x3a9   : > { %v8879_v3 = vpop.permute.xlu1 %988  ;;  %892 = vxpose.xlu0.b32.cont [12/16] (narrow) %v8662_v55, 8 }
 0x3ab   : > { %7105 = vset.pattern.permute.xlu1 %v12209_v21 }
 0x3ac   : > { %3046 = vperm.xlu1 %7105, %v8656_v33   ;;  %v8909_v9 = vpop.permute.xlu0 %3559 }
 0x3ad   : > { %893 = vxpose.xlu0.b32.cont [13/16] (narrow) %v8671_v19, 8  ;;  %12228 = vst [vmem:[#allocation105_spill] sm:$0xff] %v8909_v9 }
 0x3ae   : > { %v8887_v56 = vpop.permute.xlu1 %1342 }
 0x3b0   : > { %7107 = vset.pattern.permute.xlu1 %v12200_v42 }
 0x3b1   : > { %1018 = vperm.xlu1 %7107, %v8662_v55   ;;  %894 = vxpose.xlu0.b32.cont [14/16] (narrow) %v8669_v2, 8  ;;  %v8914_v12 = vpop.permute.xlu0 %1374 }
 0x3b3   : > { %v8892_v32 = vpop.permute.xlu1 %1976 }
 0x3b5   : > { %7110 = vset.pattern.permute.xlu1 %v12211_v44  ;;  %895 = vxpose.xlu0.b32.cont [15/16] (narrow) %v8678_v51, 8 }
 0x3b6   : > { %2505 = vperm.xlu1 %7110, %v8662_v55   ;;  %v8921_v36 = vpop.permute.xlu0 %2008 }
 0x3b8   : > { %v8899_v10 = vpop.permute.xlu1 %2481 }
 0x3b9   : > { %896 = vxpose.xlu0.b32.end [16/16] (narrow) %v8675_v28, 8 }
 0x3ba   : > { %7112 = vset.pattern.permute.xlu1 %v12206_v11 }
 0x3bb   : > { %3563 = vperm.xlu1 %7112, %v8662_v55   ;;  %v8928_v9 = vpop.permute.xlu0 %3066 }
 0x3bc   : > { %12229 = vst [vmem:[#allocation106_spill] sm:$0xff] %v8928_v9 }
 0x3bd   : > { %v8906_v31 = vpop.permute.xlu1 %3539 }
 0x3be   : > { %12227 = vst [vmem:[#allocation104_spill] sm:$0xff] %v8906_v31 }
 0x3bf   : > { %7113 = vset.pattern.permute.xlu1 %v12200_v42 }
 0x3c0   : > { %1013 = vperm.xlu1 %7113, %v8664_v0   ;;  %v8934_v24 = vpop.permute.xlu0 %2509 }
 0x3c2   : > { %v8912_v33 = vpop.permute.xlu1 %983 }
 0x3c4   : > { %7114 = vset.pattern.permute.xlu1 %v12203_v53 }
 0x3c5   : > { %1362 = vperm.xlu1 %7114, %v8664_v0   ;;  %v8942_v1 = vpop.permute.xlu0 %3567 }
 0x3c6   : > { %12231 = vst [vmem:[#allocation108_spill] sm:$0xff] %v8942_v1 }
 0x3c7   : > { %v8918_v39 = vpop.permute.xlu1 %1338 }
 0x3c9   : > { %7115 = vset.pattern.permute.xlu1 %v12210_v35 }
 0x3ca   : > { %1996 = vperm.xlu1 %7115, %v8664_v0   ;;  %v8946_v9 = vpop.permute.xlu0 %1382 }
 0x3cc   : > { %v8924_v31 = vpop.permute.xlu1 %1972 }
 0x3ce   : > { %7117 = vset.pattern.permute.xlu1 %v12209_v21 }
 0x3cf   : > { %3054 = vperm.xlu1 %7117, %v8664_v0   ;;  %v8954_v55 = vpop.permute.xlu0 %2016 }
 0x3d1   : > { %v8930_v16 = vpop.permute.xlu1 %2477 }
 0x3d3   : > { %7119 = vset.pattern.permute.xlu1 %v12200_v42 }
 0x3d4   : > { %1028 = vperm.xlu1 %7119, %v8669_v2   ;;  %v8960_v40 = vpop.permute.xlu0 %3074 }
 0x3d5   : > { %12232 = vst [vmem:[#allocation109_spill] sm:$0xff] %v8960_v40 }
 0x3d6   : > { %v8936_v41 = vpop.permute.xlu1 %3030 }
 0x3d7   : > { %12230 = vst [vmem:[#allocation107_spill] sm:$0xff] %v8936_v41  ;;  %v12237_v41 = vsub.s32 1, %v8172_v25 }
 0x3d8   : > { %7122 = vset.pattern.permute.xlu1 %v12211_v44 }
 0x3d9   : > { %2513 = vperm.xlu1 %7122, %v8669_v2   ;;  %v8967_v30 = vpop.permute.xlu0 %2517 }
 0x3db   : > { %v8940_v49 = vpop.permute.xlu1 %998 }
 0x3dd   : > { %7124 = vset.pattern.permute.xlu1 %v12206_v11 }
 0x3de   : > { %3571 = vperm.xlu1 %7124, %v8669_v2   ;;  %v8974_v40 = vpop.permute.xlu0 %3575 }
 0x3df   : > { %12234 = vst [vmem:[#allocation111_spill] sm:$0xff] %v8974_v40  ;;  %v12238_v40 = vsub.s32 2, %v8172_v25 }
 0x3e0   : > { %v8948_v0 = vpop.permute.xlu1 %1350 }
 0x3e2   : > { %7125 = vset.pattern.permute.xlu1 %v12200_v42 }
 0x3e3   : > { %1023 = vperm.xlu1 %7125, %v8671_v19  }
 0x3e5   : > { %v8952_v13 = vpop.permute.xlu1 %1984 }
 0x3e7   : > { %7126 = vset.pattern.permute.xlu1 %v12203_v53 }
 0x3e8   : > { %1370 = vperm.xlu1 %7126, %v8671_v19  }
 0x3ea   : > { %v8958_v1 = vpop.permute.xlu1 %2489 }
 0x3ec   : > { %7127 = vset.pattern.permute.xlu1 %v12210_v35 }
 0x3ed   : > { %2004 = vperm.xlu1 %7127, %v8671_v19  }
 0x3ef   : > { %v8964_v2 = vpop.permute.xlu1 %3547 }
 0x3f0   : > { %12233 = vst [vmem:[#allocation110_spill] sm:$0xff] %v8964_v2 }
 0x3f1   : > { %7129 = vset.pattern.permute.xlu1 %v12209_v21 }
 0x3f2   : > { %3062 = vperm.xlu1 %7129, %v8671_v19  }
 0x3f4   : > { %v8970_v60 = vpop.permute.xlu1 %993 }
 0x3f6   : > { %7131 = vset.pattern.permute.xlu1 %v12200_v42 }
 0x3f7   : > { %1038 = vperm.xlu1 %7131, %v8675_v28  }
 0x3f9   : > { %v8976_v43 = vpop.permute.xlu1 %1346 }
 0x3fb   : > { %7134 = vset.pattern.permute.xlu1 %v12211_v44 }
 0x3fc   : > { %2521 = vperm.xlu1 %7134, %v8675_v28  }
 0x3fd   : > { %v8980_v2 = vpop.trf.xlu0 }
 0x3fe   : > { %12235 = vst [vmem:[#allocation112_spill] sm:$0xff] %v8980_v2  ;;  %v8985_v19 = vrot.slane %v8980_v2, %v12236_v38  ;;  %v8990_v54 = vrot.slane %v8980_v2, %v12237_v41  ;;  %v8995_v61 = vrot.slane %v8980_v2, %v12238_v40  ;;  %v8997_v44 = vpop.permute.xlu1 %1980  ;;  %v12239_v41 = vsub.s32 3, %v8172_v25 }
 0x400   : > { %7136 = vset.pattern.permute.xlu1 %v12206_v11  ;;  %v1045_v38 = vadd.f32 %v8985_v19, %v8786_v47  ;;  %v1390_v17 = vadd.f32 %v8990_v54, %v8762_v37  ;;  %v9010_v23 = vrot.slane %v8980_v2, %v12239_v41  ;;  %v2024_v11 = vadd.f32 %v8995_v61, %v8764_v48  ;;  %v9019_v47 = vld [vmem:[%s7999_s11 + $0x8] sm:$0xff] }
 0x401   : > { %3579 = vperm.xlu1 %7136, %v8675_v28   ;;  %vm914_vm6 = vcmp.gt.f32.partialorder %v9019_v47, 0.0  ;;  %v1052_v25 = vadd.f32 %v8985_v19, %v8940_v49 }
 0x402   : > { %vm1061_vm4 = vcmp.gt.f32.partialorder %v1045_v38, 0.0  ;;  %v1077_v40 = vmul.f32 0.2, %v1045_v38  ;;  %v1422_v4 = vmul.f32 0.2, %v1390_v17  ;;  %vm1406_vm5 = vcmp.gt.f32.partialorder %v1390_v17, 0.0 }
 0x403   : > { %v9016_v18 = vpop.permute.xlu1 %2485  ;;  %v2056_v48 = vmul.f32 0.2, %v2024_v11  ;;  %v2528_v5 = vadd.f32 %v9010_v23, %v8788_v58  ;;  %vm2040_vm7 = vcmp.gt.f32.partialorder %v2024_v11, 0.0 }
 0x404   : > { %v1093_v37 = vsel %vm1061_vm4, %v1045_v38, %v1077_v40  ;;  %v1438_v28 = vsel %vm1406_vm5, %v1390_v17, %v1422_v4  ;;  %v1391_v17 = vadd.f32 %v8990_v54, %v8843_v15  ;;  %vm1068_vm5 = vcmp.gt.f32.partialorder %v1052_v25, 0.0 }
 0x405   : > { %7137 = vset.pattern.permute.xlu1 %v12200_v42  ;;  %v9024_v41 = vsel %vm913_vm3, %v1093_v37, -1e+09  ;;  %v9035_v42 = vsel %vm914_vm6, %v1438_v28, -1e+09  ;;  %v2072_v38 = vsel %vm2040_vm7, %v2024_v11, %v2056_v48  ;;  %v2560_v40 = vmul.f32 0.2, %v2528_v5 }
 0x406   : > { %1125 = vmax.xlane.f32.xlu0 %v9024_v41  ;;  %1033 = vperm.xlu1 %7137, %v8678_v51   ;;  %vm2544_vm8 = vcmp.gt.f32.partialorder %v2528_v5, 0.0  ;;  %v9046_v4 = vsel %vm914_vm6, %v2072_v38, -1e+09  ;;  %v1423_v37 = vmul.f32 0.2, %v1391_v17  ;;  %v9053_v11 = vld [vmem:[%s7999_s11 + $0x10] sm:$0xff] }
 0x407   : > { %v2576_v28 = vsel %vm2544_vm8, %v2528_v5, %v2560_v40  ;;  %vm1407_vm9 = vcmp.gt.f32.partialorder %v1391_v17, 0.0  ;;  %vm915_vm10 = vcmp.gt.f32.partialorder %v9053_v11, 0.0 }
 0x408   : > { %v9031_v2 = vpop.permute.xlu1 %3038  ;;  %v9058_v15 = vsel %vm913_vm3, %v2576_v28, -1e+09  ;;  %v1439_v5 = vsel %vm1407_vm9, %v1391_v17, %v1423_v37  ;;  %v1050_v17 = vadd.f32 %v8985_v19, %v8879_v3 }
 0x409   : > { %12240 = vst [vmem:[#allocation113_spill] sm:$0xff] %v9031_v2  ;;  %12241 = vst [vmem:[#allocation114_spill] sm:$0xff] %v9058_v15 }
 0x40a   : > { %1471 = vmax.xlane.f32.xlu0 %v9035_v42  ;;  %7138 = vset.pattern.permute.xlu1 %v12203_v53  ;;  %v2025_v53 = vadd.f32 %v8995_v61, %v8850_v14  ;;  %v2530_v14 = vadd.f32 %v9010_v23, %v8858_v63  ;;  %vm1066_vm13 = vcmp.gt.f32.partialorder %v1050_v17, 0.0 }
 0x40b   : > { %1378 = vperm.xlu1 %7138, %v8678_v51  }
 0x40c   : > { %v2057_v38 = vmul.f32 0.2, %v2025_v53  ;;  %vm2041_vm11 = vcmp.gt.f32.partialorder %v2025_v53, 0.0  ;;  %v2562_v28 = vmul.f32 0.2, %v2530_v14  ;;  %vm2546_vm12 = vcmp.gt.f32.partialorder %v2530_v14, 0.0 }
 0x40d   : > { %v9042_v58 = vpop.permute.xlu1 %1008 }
 0x40e   : > { %2105 = vmax.xlane.f32.xlu0 %v9046_v4  ;;  %v2073_v40 = vsel %vm2041_vm11, %v2025_v53, %v2057_v38  ;;  %v9085_v53 = vld [vmem:[%s7999_s11 + $0x28] sm:$0xff] }
 0x40f   : > { %7139 = vset.pattern.permute.xlu1 %v12210_v35  ;;  %v9070_v35 = vsel %vm915_vm10, %v1439_v5, -1e+09  ;;  %v9079_v63 = vsel %vm915_vm10, %v2073_v40, -1e+09  ;;  %v1082_v5 = vmul.f32 0.2, %v1050_v17 }
 0x410   : > { %2012 = vperm.xlu1 %7139, %v8678_v51   ;;  %12242 = vst [vmem:[#allocation115_spill] sm:$0xff] %v9070_v35  ;;  %12244 = vst [vmem:[#allocation117_spill] sm:$0xff] %v9079_v63  ;;  %vm11934_vm14 = vcmp.gt.f32.partialorder %v9085_v53, 0.0 }
 0x411   : > { %v1098_v40 = vsel %vm1066_vm13, %v1050_v17, %v1082_v5  ;;  %v2532_v17 = vadd.f32 %v9010_v23, %v8930_v16 }
 0x412   : > { %v9060_v48 = vpop.permute.xlu1 %2497  ;;  %2608 = vmax.xlane.f32.xlu0 %v9058_v15  ;;  %v1393_v15 = vadd.f32 %v8990_v54, %v8918_v39 }
 0x413   : > { %v2564_v2 = vmul.f32 0.2, %v2532_v17  ;;  %vm2548_vm4 = vcmp.gt.f32.partialorder %v2532_v17, 0.0 }
 0x414   : > { %7141 = vset.pattern.permute.xlu1 %v12209_v21  ;;  %v2578_v21 = vsel %vm2546_vm12, %v2530_v14, %v2562_v28  ;;  %v2027_v14 = vadd.f32 %v8995_v61, %v8924_v31  ;;  %v9098_v28 = vld [vmem:[%s7999_s11 + $0x20] sm:$0xff]  ;;  %vm1409_vm15 = vcmp.gt.f32.partialorder %v1393_v15, 0.0 }
 0x415   : > { %3070 = vperm.xlu1 %7141, %v8678_v51   ;;  %v9091_v3 = vsel %vm915_vm10, %v2578_v21, -1e+09  ;;  %v9102_v51 = vsel %vm11934_vm14, %v1098_v40, -1e+09  ;;  %vm11931_vm0 = vcmp.gt.f32.partialorder %v9098_v28, 0.0  ;;  %v2580_v16 = vsel %vm2548_vm4, %v2532_v17, %v2564_v2 }
 0x416   : > { %1473 = vmax.xlane.f32.xlu0 %v9070_v35  ;;  %12245 = vst [vmem:[#allocation118_spill] sm:$0xff] %v9091_v3  ;;  %12246 = vst [vmem:[#allocation119_spill] sm:$0xff] %v9102_v51  ;;  %vm2043_vm2 = vcmp.gt.f32.partialorder %v2027_v14, 0.0  ;;  %v9131_v49 = vsel %vm11931_vm0, %v2580_v16, -1e+09 }
 0x417   : > { %v9075_v37 = vpop.permute.xlu1 %3555  ;;  %12250 = vst [vmem:[#allocation123_spill] sm:$0xff] %v9131_v49 }
 0x418   : > { %12243 = vst [vmem:[#allocation116_spill] sm:$0xff] %v9075_v37  ;;  %v1425_v37 = vmul.f32 0.2, %v1393_v15 }
 0x41a   : > { %2107 = vmax.xlane.f32.xlu0 %v9079_v63  ;;  %v1441_v21 = vsel %vm1409_vm15, %v1393_v15, %v1425_v37  ;;  %v1084_v37 = vmul.f32 0.2, %v1052_v25  ;;  %v9161_v63 = vld [vmem:[%s7999_s11 + $0x18] sm:$0xff] }
 0x41b   : > { %v9110_v31 = vsel %vm11931_vm0, %v1441_v21, -1e+09  ;;  %v1395_v21 = vadd.f32 %v8990_v54, %v8976_v43  ;;  %v9140_v43 = vld [vmem:[%s7999_s11 + $0x30] sm:$0xff] }
 0x41c   : > { %v9087_v38 = vpop.permute.xlu1 %1003  ;;  %12247 = vst [vmem:[#allocation120_spill] sm:$0xff] %v9110_v31  ;;  %v1100_v2 = vsel %vm1068_vm5, %v1052_v25, %v1084_v37  ;;  %vm919_vm9 = vcmp.gt.f32.partialorder %v9140_v43, 0.0  ;;  %v2534_v25 = vadd.f32 %v9010_v23, %v9016_v18  ;;  %v1054_v18 = vadd.f32 %v8985_v19, %v9042_v58 }
 0x41d   : > { %v1427_v17 = vmul.f32 0.2, %v1395_v21  ;;  %vm1411_vm8 = vcmp.gt.f32.partialorder %v1395_v21, 0.0 }
 0x41e   : > { %2612 = vmax.xlane.f32.xlu0 %v9091_v3  ;;  %v2059_v3 = vmul.f32 0.2, %v2027_v14  ;;  %vm2550_vm15 = vcmp.gt.f32.partialorder %v2534_v25, 0.0  ;;  %vm1070_vm5 = vcmp.gt.f32.partialorder %v1054_v18, 0.0 }
 0x41f   : > { %v1443_v37 = vsel %vm1411_vm8, %v1395_v21, %v1427_v17  ;;  %v2566_v17 = vmul.f32 0.2, %v2534_v25 }
 0x420   : > { %v2075_v40 = vsel %vm2043_vm2, %v2027_v14, %v2059_v3  ;;  %v9127_v3 = vld [vmem:[%s7999_s11 + $0x38] sm:$0xff]  ;;  %v1046_v14 = vadd.f32 %v8985_v19, %v8756_v29  ;;  %vm916_vm2 = vcmp.gt.f32.partialorder %v9161_v63, 0.0 }
 0x421   : > { %v1355_v39 = vpop.permute.xlu1 %1354  ;;  %v9119_v15 = vsel %vm11931_vm0, %v2075_v40, -1e+09  ;;  %v2029_v40 = vadd.f32 %v8995_v61, %v8997_v44  ;;  %vm920_vm7 = vcmp.gt.f32.partialorder %v9127_v3, 0.0  ;;  %v1048_v44 = vadd.f32 %v8985_v19, %v8804_v7 }
 0x422   : > { %1135 = vmax.xlane.f32.xlu0 %v9102_v51  ;;  %12248 = vst [vmem:[#allocation121_spill] sm:$0xff] %v9119_v15  ;;  %v9146_v16 = vsel %vm920_vm7, %v1100_v2, -1e+09  ;;  %v1078_v29 = vmul.f32 0.2, %v1046_v14  ;;  %vm1062_vm11 = vcmp.gt.f32.partialorder %v1046_v14, 0.0  ;;  %v1389_v7 = vadd.f32 %v8990_v54, %v8792_v6 }
 0x423   : > { %12251 = vst [vmem:[#allocation124_spill] sm:$0xff] %v9146_v16  ;;  %vm2045_vm12 = vcmp.gt.f32.partialorder %v2029_v40, 0.0  ;;  %v9158_v2 = vsel %vm919_vm9, %v1443_v37, -1e+09  ;;  %v1080_v35 = vmul.f32 0.2, %v1048_v44 }
 0x424   : > { %12252 = vst [vmem:[#allocation125_spill] sm:$0xff] %v9158_v2  ;;  %vm1064_vm13 = vcmp.gt.f32.partialorder %v1048_v44, 0.0  ;;  %vm1405_vm4 = vcmp.gt.f32.partialorder %v1389_v7, 0.0 }
 0x425   : > { %v1096_v58 = vsel %vm1064_vm13, %v1048_v44, %v1080_v35 }
 0x426   : > { %v9112_v5 = vpop.permute.xlu1 %1988  ;;  %1477 = vmax.xlane.f32.xlu0 %v9110_v31  ;;  %v1094_v31 = vsel %vm1062_vm11, %v1046_v14, %v1078_v29  ;;  %v1421_v14 = vmul.f32 0.2, %v1389_v7 }
 0x427   : > { %v9170_v37 = vsel %vm914_vm6, %v1094_v31, -1e+09  ;;  %v2582_v31 = vsel %vm2550_vm15, %v2534_v25, %v2566_v17  ;;  %v2023_v25 = vadd.f32 %v8995_v61, %v8781_v52 }
 0x428   : > { %v9191_v35 = vsel %vm919_vm9, %v2582_v31, -1e+09 }
 0x429   : > { %12255 = vst [vmem:[#allocation128_spill] sm:$0xff] %v9191_v35  ;;  %vm2039_vm13 = vcmp.gt.f32.partialorder %v2023_v25, 0.0 }
 0x42a   : > { %2111 = vmax.xlane.f32.xlu0 %v9119_v15 }
 0x42b   : > { %v9124_v51 = vpop.permute.xlu1 %3046 }
 0x42c   : > { %12249 = vst [vmem:[#allocation122_spill] sm:$0xff] %v9124_v51 }
 0x42e   : > { %2616 = vmax.xlane.f32.xlu0 %v9131_v49  ;;  %v2061_v49 = vmul.f32 0.2, %v2029_v40 }
 0x430   : > { %v9142_v51 = vpop.permute.xlu1 %1018  ;;  %v2077_v21 = vsel %vm2045_vm12, %v2029_v40, %v2061_v49  ;;  %v1392_v49 = vadd.f32 %v8990_v54, %v8810_v59  ;;  %v1397_v40 = vadd.f32 %v8990_v54, %v1355_v39  ;;  %v1437_v59 = vsel %vm1405_vm4, %v1389_v7, %v1421_v14  ;;  %v9194_v39 = vld [vmem:[%s7999_s11 + $0x48] sm:$0xff]  ;;  %v9214_v14 = vld [vmem:[%s7999_s11 + $0x40] sm:$0xff] }
 0x431   : > { %v9176_v6 = vsel %vm919_vm9, %v2077_v21, -1e+09  ;;  %v2031_v21 = vadd.f32 %v8995_v61, %v9112_v5  ;;  %v9205_v7 = vsel %vm913_vm3, %v1437_v59, -1e+09  ;;  %vm11944_vm12 = vcmp.gt.f32.partialorder %v9194_v39, 0.0 }
 0x432   : > { %1139 = vmax.xlane.f32.xlu0 %v9146_v16  ;;  %12253 = vst [vmem:[#allocation126_spill] sm:$0xff] %v9176_v6  ;;  %v9186_v16 = vsel %vm916_vm2, %v1096_v58, -1e+09  ;;  %v1424_v44 = vmul.f32 0.2, %v1392_v49  ;;  %vm1408_vm8 = vcmp.gt.f32.partialorder %v1392_v49, 0.0 }
 0x433   : > { %v1429_v58 = vmul.f32 0.2, %v1397_v40  ;;  %vm1413_vm11 = vcmp.gt.f32.partialorder %v1397_v40, 0.0  ;;  %v2063_v59 = vmul.f32 0.2, %v2031_v21  ;;  %vm2047_vm15 = vcmp.gt.f32.partialorder %v2031_v21, 0.0 }
 0x434   : > { %v1440_v5 = vsel %vm1408_vm8, %v1392_v49, %v1424_v44  ;;  %vm11941_vm4 = vcmp.gt.f32.partialorder %v9214_v14, 0.0  ;;  %v2529_v44 = vadd.f32 %v9010_v23, %v8772_v50 }
 0x435   : > { %v9154_v15 = vpop.permute.xlu1 %2505  ;;  %v1445_v31 = vsel %vm1413_vm11, %v1397_v40, %v1429_v58  ;;  %v2079_v58 = vsel %vm2047_vm15, %v2031_v21, %v2063_v59  ;;  %v2531_v21 = vadd.f32 %v9010_v23, %v8823_v62  ;;  %v9259_v62 = vld [vmem:[%s7999_s11 + $0x58] sm:$0xff] }
 0x436   : > { %1481 = vmax.xlane.f32.xlu0 %v9158_v2  ;;  %v1086_v2 = vmul.f32 0.2, %v1054_v18  ;;  %v9243_v50 = vsel %vm11941_vm4, %v2079_v58, -1e+09  ;;  %vm2545_vm11 = vcmp.gt.f32.partialorder %v2529_v44, 0.0 }
 0x437   : > { %12258 = vst [vmem:[#allocation131_spill] sm:$0xff] %v9243_v50  ;;  %vm2547_vm15 = vcmp.gt.f32.partialorder %v2531_v21, 0.0 }
 0x438   : > { %v1102_v17 = vsel %vm1070_vm5, %v1054_v18, %v1086_v2  ;;  %v2055_v2 = vmul.f32 0.2, %v2023_v25  ;;  %v2026_v18 = vadd.f32 %v8995_v61, %v8816_v57  ;;  %v9229_v57 = vsel %vm11941_vm4, %v1445_v31, -1e+09 }
 0x439   : > { %1127 = vmax.xlane.f32.xlu1 %v9170_v37  ;;  %v9211_v52 = vsel %vm11944_vm12, %v1102_v17, -1e+09  ;;  %v9223_v17 = vsel %vm916_vm2, %v1440_v5, -1e+09  ;;  %12257 = vst [vmem:[#allocation130_spill] sm:$0xff] %v9229_v57 }
 0x43a   : > { %v9181_v29 = vpop.permute.xlu1 %3563  ;;  %2115 = vmax.xlane.f32.xlu0 %v9176_v6  ;;  %12256 = vst [vmem:[#allocation129_spill] sm:$0xff] %v9211_v52  ;;  %v2071_v49 = vsel %vm2039_vm13, %v2023_v25, %v2055_v2  ;;  %v2058_v40 = vmul.f32 0.2, %v2026_v18  ;;  %vm2042_vm5 = vcmp.gt.f32.partialorder %v2026_v18, 0.0 }
 0x43b   : > { %12254 = vst [vmem:[#allocation127_spill] sm:$0xff] %v9181_v29 }
 0x43c   : > { %v2074_v25 = vsel %vm2042_vm5, %v2026_v18, %v2058_v40 }
 0x43d   : > { %1131 = vmax.xlane.f32.xlu1 %v9186_v16 }
 0x43e   : > { %2620 = vmax.xlane.f32.xlu0 %v9191_v35  ;;  %v2536_v35 = vadd.f32 %v9010_v23, %v8863_v22  ;;  %v1056_v22 = vadd.f32 %v8985_v19, %v9142_v51  ;;  %v2561_v51 = vmul.f32 0.2, %v2529_v44 }
 0x43f   : > { %v9201_v29 = vpop.permute.xlu1 %1013 }
 0x440   : > { %v2568_v5 = vmul.f32 0.2, %v2536_v35  ;;  %vm2552_vm8 = vcmp.gt.f32.partialorder %v2536_v35, 0.0  ;;  %v1088_v2 = vmul.f32 0.2, %v1056_v22  ;;  %vm1072_vm13 = vcmp.gt.f32.partialorder %v1056_v22, 0.0 }
 0x441   : > { %1469 = vmax.xlane.f32.xlu1 %v9205_v7  ;;  %v2577_v40 = vsel %vm2545_vm11, %v2529_v44, %v2561_v51  ;;  %v9278_v51 = vld [vmem:[%s7999_s11 + $0x50] sm:$0xff] }
 0x442   : > { %1143 = vmax.xlane.f32.xlu0 %v9211_v52  ;;  %v9238_v52 = vsel %vm913_vm3, %v2071_v49, -1e+09  ;;  %v2584_v49 = vsel %vm2552_vm8, %v2536_v35, %v2568_v5  ;;  %v1047_v35 = vadd.f32 %v8985_v19, %v8836_v20  ;;  %v9269_v44 = vsel %vm914_vm6, %v2577_v40, -1e+09 }
 0x443   : > { %v9256_v18 = vsel %vm11941_vm4, %v2584_v49, -1e+09  ;;  %12261 = vst [vmem:[#allocation134_spill] sm:$0xff] %v9269_v44  ;;  %vm924_vm8 = vcmp.gt.f32.partialorder %v9259_v62, 0.0 }
 0x444   : > { %v1363_v6 = vpop.permute.xlu1 %1362  ;;  %12259 = vst [vmem:[#allocation132_spill] sm:$0xff] %v9256_v18  ;;  %v1079_v49 = vmul.f32 0.2, %v1047_v35  ;;  %vm1063_vm11 = vcmp.gt.f32.partialorder %v1047_v35, 0.0 }
 0x445   : > { %1475 = vmax.xlane.f32.xlu1 %v9223_v17  ;;  %v1399_v59 = vadd.f32 %v8990_v54, %v1363_v6  ;;  %v2563_v6 = vmul.f32 0.2, %v2531_v21 }
 0x446   : > { %1485 = vmax.xlane.f32.xlu0 %v9229_v57  ;;  %v9251_v57 = vsel %vm916_vm2, %v2074_v25, -1e+09  ;;  %v1104_v25 = vsel %vm1072_vm13, %v1056_v22, %v1088_v2  ;;  %v1394_v22 = vadd.f32 %v8990_v54, %v8887_v56 }
 0x447   : > { %v1431_v58 = vmul.f32 0.2, %v1399_v59  ;;  %vm1415_vm5 = vcmp.gt.f32.partialorder %v1399_v59, 0.0  ;;  %v9275_v20 = vsel %vm924_vm8, %v1104_v25, -1e+09 }
 0x449   : > { %v1997_v31 = vpop.permute.xlu1 %1996  ;;  %2103 = vmax.xlane.f32.xlu1 %v9238_v52  ;;  %v1447_v40 = vsel %vm1415_vm5, %v1399_v59, %v1431_v58  ;;  %v1426_v59 = vmul.f32 0.2, %v1394_v22  ;;  %vm1410_vm5 = vcmp.gt.f32.partialorder %v1394_v22, 0.0 }
 0x44a   : > { %2119 = vmax.xlane.f32.xlu0 %v9243_v50  ;;  %v2033_v5 = vadd.f32 %v8995_v61, %v1997_v31  ;;  %v2579_v31 = vsel %vm2547_vm15, %v2531_v21, %v2563_v6  ;;  %vm923_vm15 = vcmp.gt.f32.partialorder %v9278_v51, 0.0  ;;  %v1095_v21 = vsel %vm1063_vm11, %v1047_v35, %v1079_v49 }
 0x44b   : > { %v9287_v25 = vsel %vm916_vm2, %v2579_v31, -1e+09  ;;  %v9293_v56 = vsel %vm923_vm15, %v1447_v40, -1e+09  ;;  %v2028_v6 = vadd.f32 %v8995_v61, %v8892_v32  ;;  %v1442_v35 = vsel %vm1410_vm5, %v1394_v22, %v1426_v59 }
 0x44c   : > { %v2065_v2 = vmul.f32 0.2, %v2033_v5  ;;  %vm2049_vm13 = vcmp.gt.f32.partialorder %v2033_v5, 0.0  ;;  %12262 = vst [vmem:[#allocation135_spill] sm:$0xff] %v9287_v25  ;;  %12263 = vst [vmem:[#allocation136_spill] sm:$0xff] %v9293_v56 }
 0x44d   : > { %2109 = vmax.xlane.f32.xlu1 %v9251_v57  ;;  %vm2044_vm11 = vcmp.gt.f32.partialorder %v2028_v6, 0.0  ;;  %v9315_v40 = vsel %vm11934_vm14, %v1442_v35, -1e+09 }
 0x44e   : > { %v9264_v50 = vpop.permute.xlu1 %3054  ;;  %2624 = vmax.xlane.f32.xlu0 %v9256_v18  ;;  %v2538_v18 = vadd.f32 %v9010_v23, %v8902_v8  ;;  %v2081_v58 = vsel %vm2049_vm13, %v2033_v5, %v2065_v2  ;;  %v2533_v5 = vadd.f32 %v9010_v23, %v8899_v10  ;;  %v9325_v10 = vld [vmem:[%s7999_s11 + $0x68] sm:$0xff] }
 0x44f   : > { %12260 = vst [vmem:[#allocation133_spill] sm:$0xff] %v9264_v50  ;;  %v9308_v32 = vsel %vm923_vm15, %v2081_v58, -1e+09  ;;  %vm926_vm5 = vcmp.gt.f32.partialorder %v9325_v10, 0.0 }
 0x450   : > { %v2570_v31 = vmul.f32 0.2, %v2538_v18  ;;  %vm2554_vm1 = vcmp.gt.f32.partialorder %v2538_v18, 0.0  ;;  %12264 = vst [vmem:[#allocation137_spill] sm:$0xff] %v9308_v32  ;;  %v2565_v58 = vmul.f32 0.2, %v2533_v5 }
 0x451   : > { %2610 = vmax.xlane.f32.xlu1 %v9269_v44 }
 0x452   : > { %1147 = vmax.xlane.f32.xlu0 %v9275_v20  ;;  %v2586_v2 = vsel %vm2554_vm1, %v2538_v18, %v2570_v31  ;;  %v1049_v18 = vadd.f32 %v8985_v19, %v8912_v33  ;;  %vm2549_vm1 = vcmp.gt.f32.partialorder %v2533_v5, 0.0  ;;  %v1396_v33 = vadd.f32 %v8990_v54, %v8948_v0 }
 0x453   : > { %v1029_v44 = vpop.permute.xlu1 %1028  ;;  %v9322_v22 = vsel %vm923_vm15, %v2586_v2, -1e+09 }
 0x454   : > { %v1058_v8 = vadd.f32 %v8985_v19, %v1029_v44  ;;  %v2060_v44 = vmul.f32 0.2, %v2028_v6  ;;  %12266 = vst [vmem:[#allocation139_spill] sm:$0xff] %v9322_v22  ;;  %v1081_v2 = vmul.f32 0.2, %v1049_v18 }
 0x455   : > { %2614 = vmax.xlane.f32.xlu1 %v9287_v25  ;;  %v9303_v25 = vsel %vm915_vm10, %v1095_v21, -1e+09 }
 0x456   : > { %1489 = vmax.xlane.f32.xlu0 %v9293_v56  ;;  %v1090_v49 = vmul.f32 0.2, %v1058_v8  ;;  %vm1074_vm13 = vcmp.gt.f32.partialorder %v1058_v8, 0.0  ;;  %v2076_v59 = vsel %vm2044_vm11, %v2028_v6, %v2060_v44  ;;  %v2581_v44 = vsel %vm2549_vm1, %v2533_v5, %v2565_v58 }
 0x457   : > { %v9332_v35 = vsel %vm11934_vm14, %v2076_v59, -1e+09  ;;  %vm1065_vm11 = vcmp.gt.f32.partialorder %v1049_v18, 0.0  ;;  %v2030_v5 = vadd.f32 %v8995_v61, %v8952_v13  ;;  %v2540_v13 = vadd.f32 %v9010_v23, %v8934_v24 }
 0x458   : > { %v9299_v50 = vpop.permute.xlu1 %2513  ;;  %v1106_v31 = vsel %vm1074_vm13, %v1058_v8, %v1090_v49  ;;  %v9347_v49 = vsel %vm11934_vm14, %v2581_v44, -1e+09  ;;  %v1097_v59 = vsel %vm1065_vm11, %v1049_v18, %v1081_v2  ;;  %vm1412_vm13 = vcmp.gt.f32.partialorder %v1396_v33, 0.0 }
 0x459   : > { %1129 = vmax.xlane.f32.xlu1 %v9303_v25  ;;  %v9338_v6 = vsel %vm926_vm5, %v1106_v31, -1e+09  ;;  %12268 = vst [vmem:[#allocation141_spill] sm:$0xff] %v9347_v49  ;;  %v1428_v31 = vmul.f32 0.2, %v1396_v33  ;;  %vm2046_vm11 = vcmp.gt.f32.partialorder %v2030_v5, 0.0  ;;  %v1051_v24 = vadd.f32 %v8985_v19, %v8970_v60 }
 0x45a   : > { %2123 = vmax.xlane.f32.xlu0 %v9308_v32  ;;  %12267 = vst [vmem:[#allocation140_spill] sm:$0xff] %v9338_v6  ;;  %v2062_v18 = vmul.f32 0.2, %v2030_v5  ;;  %v2572_v56 = vmul.f32 0.2, %v2540_v13  ;;  %v1398_v60 = vadd.f32 %v8990_v54, %v8838_v27  ;;  %v2032_v27 = vadd.f32 %v8995_v61, %v8846_v45 }
 0x45b   : > { %v1444_v44 = vsel %vm1412_vm13, %v1396_v33, %v1428_v31 }
 0x45c   : > { %v2078_v32 = vsel %vm2046_vm11, %v2030_v5, %v2062_v18  ;;  %v1083_v18 = vmul.f32 0.2, %v1051_v24  ;;  %vm1067_vm11 = vcmp.gt.f32.partialorder %v1051_v24, 0.0 }
 0x45d   : > { %v9317_v21 = vpop.permute.xlu1 %3571  ;;  %1479 = vmax.xlane.f32.xlu1 %v9315_v40 }
 0x45e   : > { %12265 = vst [vmem:[#allocation138_spill] sm:$0xff] %v9317_v21  ;;  %2628 = vmax.xlane.f32.xlu0 %v9322_v22  ;;  %v9355_v22 = vsel %vm11931_vm0, %v1097_v59, -1e+09  ;;  %v2535_v21 = vadd.f32 %v9010_v23, %v8958_v1  ;;  %v9367_v59 = vsel %vm920_vm7, %v1444_v44, -1e+09 }
 0x460   : > { %vm2551_vm13 = vcmp.gt.f32.partialorder %v2535_v21, 0.0 }
 0x461   : > { %2113 = vmax.xlane.f32.xlu1 %v9332_v35 }
 0x462   : > { %v9342_v8 = vpop.permute.xlu1 %1023  ;;  %1151 = vmax.xlane.f32.xlu0 %v9338_v6  ;;  %v2567_v6 = vmul.f32 0.2, %v2535_v21 }
 0x464   : > { %v2583_v5 = vsel %vm2551_vm13, %v2535_v21, %v2567_v6  ;;  %v1099_v21 = vsel %vm1067_vm11, %v1051_v24, %v1083_v18  ;;  %v1430_v6 = vmul.f32 0.2, %v1398_v60  ;;  %v9413_v24 = vld [vmem:[%s7999_s11 + $0x78] sm:$0xff]  ;;  %v2064_v18 = vmul.f32 0.2, %v2032_v27 }
 0x465   : > { %2618 = vmax.xlane.f32.xlu1 %v9347_v49  ;;  %v9361_v49 = vld [vmem:[%s7999_s11 + $0x60] sm:$0xff]  ;;  %vm928_vm11 = vcmp.gt.f32.partialorder %v9413_v24, 0.0 }
 0x466   : > { %vm925_vm0 = vcmp.gt.f32.partialorder %v9361_v49, 0.0 }
 0x467   : > { %v1371_v58 = vpop.permute.xlu1 %1370 }
 0x468   : > { %v1401_v0 = vadd.f32 %v8990_v54, %v1371_v58 }
 0x469   : > { %1133 = vmax.xlane.f32.xlu1 %v9355_v22 }
 0x46a   : > { %v1433_v2 = vmul.f32 0.2, %v1401_v0  ;;  %vm1417_vm1 = vcmp.gt.f32.partialorder %v1401_v0, 0.0 }
 0x46c   : > { %v2005_v58 = vpop.permute.xlu1 %2004  ;;  %v1449_v1 = vsel %vm1417_vm1, %v1401_v0, %v1433_v2  ;;  %v9381_v0 = vsel %vm920_vm7, %v2078_v32, -1e+09  ;;  %vm2556_vm1 = vcmp.gt.f32.partialorder %v2540_v13, 0.0 }
 0x46d   : > { %v2035_v33 = vadd.f32 %v8995_v61, %v2005_v58  ;;  %1483 = vmax.xlane.f32.xlu1 %v9367_v59  ;;  %v9374_v31 = vsel %vm925_vm0, %v1449_v1, -1e+09  ;;  %v2588_v32 = vsel %vm2556_vm1, %v2540_v13, %v2572_v56  ;;  %v2537_v56 = vadd.f32 %v9010_v23, %v9060_v48 }
 0x46e   : > { %1493 = vmax.xlane.f32.xlu0 %v9374_v31  ;;  %v9410_v13 = vsel %vm919_vm9, %v1099_v21, -1e+09  ;;  %vm2048_vm1 = vcmp.gt.f32.partialorder %v2032_v27, 0.0 }
 0x46f   : > { %v2067_v44 = vmul.f32 0.2, %v2035_v33  ;;  %vm2051_vm14 = vcmp.gt.f32.partialorder %v2035_v33, 0.0 }
 0x471   : > { %v9383_v2 = vpop.permute.xlu1 %3062  ;;  %2117 = vmax.xlane.f32.xlu1 %v9381_v0  ;;  %v2083_v58 = vsel %vm2051_vm14, %v2035_v33, %v2067_v44  ;;  %v9402_v44 = vsel %vm925_vm0, %v2588_v32, -1e+09  ;;  %vm1414_vm14 = vcmp.gt.f32.partialorder %v1398_v60, 0.0 }
 0x472   : > { %12269 = vst [vmem:[#allocation142_spill] sm:$0xff] %v9383_v2  ;;  %v9390_v1 = vsel %vm925_vm0, %v2083_v58, -1e+09  ;;  %v9395_v2 = vsel %vm920_vm7, %v2583_v5, -1e+09  ;;  %12272 = vst [vmem:[#allocation145_spill] sm:$0xff] %v9402_v44  ;;  %v1446_v5 = vsel %vm1414_vm14, %v1398_v60, %v1430_v6  ;;  %v2080_v60 = vsel %vm2048_vm1, %v2032_v27, %v2064_v18 }
 0x473   : > { %12270 = vst [vmem:[#allocation143_spill] sm:$0xff] %v9390_v1  ;;  %2127 = vmax.xlane.f32.xlu0 %v9390_v1  ;;  %12271 = vst [vmem:[#allocation144_spill] sm:$0xff] %v9395_v2  ;;  %v9423_v21 = vsel %vm11944_vm12, %v1446_v5, -1e+09  ;;  %vm2553_vm14 = vcmp.gt.f32.partialorder %v2537_v56, 0.0 }
 0x475   : > { %2622 = vmax.xlane.f32.xlu1 %v9395_v2  ;;  %v1053_v2 = vadd.f32 %v8985_v19, %v9087_v38 }
 0x476   : > { %v1039_v33 = vpop.permute.xlu1 %1038 }
 0x477   : > { %v1060_v58 = vadd.f32 %v8985_v19, %v1039_v33  ;;  %2632 = vmax.xlane.f32.xlu0 %v9402_v44  ;;  %v2569_v44 = vmul.f32 0.2, %v2537_v56 }
 0x479   : > { %v1092_v45 = vmul.f32 0.2, %v1060_v58  ;;  %1137 = vmax.xlane.f32.xlu1 %v9410_v13  ;;  %vm1076_vm13 = vcmp.gt.f32.partialorder %v1060_v58, 0.0  ;;  %v2585_v5 = vsel %vm2553_vm14, %v2537_v56, %v2569_v44  ;;  %v2539_v44 = vadd.f32 %v9010_v23, %v9154_v15 }
 0x47a   : > { %v9440_v38 = vsel %vm11944_vm12, %v2585_v5, -1e+09  ;;  %v1055_v15 = vadd.f32 %v8985_v19, %v9201_v29 }
 0x47b   : > { %v2522_v32 = vpop.permute.xlu1 %2521  ;;  %v1108_v33 = vsel %vm1076_vm13, %v1060_v58, %v1092_v45  ;;  %v9433_v58 = vsel %vm11944_vm12, %v2080_v60, -1e+09  ;;  %v1085_v45 = vmul.f32 0.2, %v1053_v2  ;;  %vm1069_vm13 = vcmp.gt.f32.partialorder %v1053_v2, 0.0  ;;  %12275 = vst [vmem:[#allocation148_spill] sm:$0xff] %v9440_v38 }
 0x47c   : > { %v9419_v48 = vsel %vm928_vm11, %v1108_v33, -1e+09  ;;  %v1400_v33 = vadd.f32 %v8990_v54, %v8877_v46 }
 0x47d   : > { %12273 = vst [vmem:[#allocation146_spill] sm:$0xff] %v9419_v48  ;;  %1155 = vmax.xlane.f32.xlu0 %v9419_v48  ;;  %1487 = vmax.xlane.f32.xlu1 %v9423_v21  ;;  %v1101_v18 = vsel %vm1069_vm13, %v1053_v2, %v1085_v45  ;;  %v2571_v45 = vmul.f32 0.2, %v2539_v44  ;;  %v9460_v48 = vld [vmem:[%s7999_s11 + $0x70] sm:$0xff] }
 0x47e   : > { %v1432_v60 = vmul.f32 0.2, %v1400_v33  ;;  %vm1416_vm1 = vcmp.gt.f32.partialorder %v1400_v33, 0.0  ;;  %v9451_v46 = vsel %vm11941_vm4, %v1101_v18, -1e+09  ;;  %vm927_vm4 = vcmp.gt.f32.partialorder %v9460_v48, 0.0 }
 0x47f   : > { %12276 = vst [vmem:[#allocation149_spill] sm:$0xff] %v9451_v46 }
 0x480   : > { %v9429_v6 = vpop.permute.xlu1 %3579  ;;  %v1448_v56 = vsel %vm1416_vm1, %v1400_v33, %v1432_v60  ;;  %v2543_v33 = vadd.f32 %v9010_v23, %v2522_v32  ;;  %vm2555_vm1 = vcmp.gt.f32.partialorder %v2539_v44, 0.0 }
 0x481   : > { %12274 = vst [vmem:[#allocation147_spill] sm:$0xff] %v9429_v6  ;;  %2121 = vmax.xlane.f32.xlu1 %v9433_v58  ;;  %v2034_v6 = vadd.f32 %v8995_v61, %v8885_v34  ;;  %v9457_v34 = vsel %vm924_vm8, %v1448_v56, -1e+09  ;;  %v2587_v32 = vsel %vm2555_vm1, %v2539_v44, %v2571_v45 }
 0x482   : > { %12277 = vst [vmem:[#allocation150_spill] sm:$0xff] %v9457_v34  ;;  %vm2559_vm12 = vcmp.gt.f32.partialorder %v2543_v33, 0.0 }
 0x483   : > { %v2066_v5 = vmul.f32 0.2, %v2034_v6  ;;  %vm2050_vm14 = vcmp.gt.f32.partialorder %v2034_v6, 0.0 }
 0x485   : > { %2626 = vmax.xlane.f32.xlu1 %v9440_v38  ;;  %v9443_v27 = vpop.permute.xlu1 %1033 }
 0x489   : > { %1141 = vmax.xlane.f32.xlu1 %v9451_v46  ;;  %v2082_v46 = vsel %vm2050_vm14, %v2034_v6, %v2066_v5  ;;  %v1402_v6 = vadd.f32 %v8990_v54, %v8914_v12  ;;  %v2575_v5 = vmul.f32 0.2, %v2543_v33  ;;  %v2036_v12 = vadd.f32 %v8995_v61, %v8921_v36 }
 0x48a   : > { %v1379_v38 = vpop.permute.xlu1 %1378  ;;  %v9470_v1 = vsel %vm924_vm8, %v2082_v46, -1e+09  ;;  %v9482_v46 = vsel %vm924_vm8, %v2587_v32, -1e+09 }
 0x48b   : > { %v1403_v2 = vadd.f32 %v8990_v54, %v1379_v38  ;;  %12278 = vst [vmem:[#allocation151_spill] sm:$0xff] %v9470_v1  ;;  %12280 = vst [vmem:[#allocation153_spill] sm:$0xff] %v9482_v46  ;;  %v1434_v45 = vmul.f32 0.2, %v1402_v6  ;;  %vm1418_vm1 = vcmp.gt.f32.partialorder %v1402_v6, 0.0 }
 0x48c   : > { %v2068_v36 = vmul.f32 0.2, %v2036_v12 }
 0x48d   : > { %v1435_v18 = vmul.f32 0.2, %v1403_v2  ;;  %1491 = vmax.xlane.f32.xlu1 %v9457_v34  ;;  %vm1419_vm13 = vcmp.gt.f32.partialorder %v1403_v2, 0.0  ;;  %v1087_v34 = vmul.f32 0.2, %v1055_v15 }
 0x48f   : > { %v2013_v60 = vpop.permute.xlu1 %2012  ;;  %v1451_v38 = vsel %vm1419_vm13, %v1403_v2, %v1435_v18  ;;  %vm1071_vm13 = vcmp.gt.f32.partialorder %v1055_v15, 0.0 }
 0x490   : > { %v2037_v56 = vadd.f32 %v8995_v61, %v2013_v60  ;;  %v9474_v29 = vsel %vm927_vm4, %v1451_v38, -1e+09  ;;  %v1103_v44 = vsel %vm1071_vm13, %v1055_v15, %v1087_v34  ;;  %v1450_v15 = vsel %vm1418_vm1, %v1402_v6, %v1434_v45 }
 0x491   : > { %12279 = vst [vmem:[#allocation152_spill] sm:$0xff] %v9474_v29  ;;  %2125 = vmax.xlane.f32.xlu1 %v9470_v1  ;;  %1497 = vmax.xlane.f32.xlu0 %v9474_v29  ;;  %v2591_v29 = vsel %vm2559_vm12, %v2543_v33, %v2575_v5  ;;  %v9494_v32 = vsel %vm923_vm15, %v1103_v44, -1e+09  ;;  %vm2052_vm12 = vcmp.gt.f32.partialorder %v2036_v12, 0.0  ;;  %v9508_v5 = vsel %vm926_vm5, %v1450_v15, -1e+09 }
 0x492   : > { %v2069_v2 = vmul.f32 0.2, %v2037_v56  ;;  %vm2053_vm14 = vcmp.gt.f32.partialorder %v2037_v56, 0.0  ;;  %v9501_v34 = vsel %vm928_vm11, %v2591_v29, -1e+09  ;;  %v1404_v15 = vadd.f32 %v8990_v54, %v8946_v9 }
 0x493   : > { %v1126_v18 = vpop.xlane.xlu0 %1125  ;;  %12281 = vst [vmem:[#allocation154_spill] sm:$0xff] %v9501_v34  ;;  %v1059_v9 = vadd.f32 %v8985_v19, %v9443_v27 }
 0x494   : > { %v2085_v60 = vsel %vm2053_vm14, %v2037_v56, %v2069_v2  ;;  %v2541_v56 = vadd.f32 %v9010_v23, %v9299_v50  ;;  %v1057_v50 = vadd.f32 %v8985_v19, %v9342_v8  ;;  %vm1420_vm1 = vcmp.gt.f32.partialorder %v1404_v15, 0.0 }
 0x495   : > { %2630 = vmax.xlane.f32.xlu1 %v9482_v46  ;;  %v9487_v38 = vsel %vm927_vm4, %v2085_v60, -1e+09  ;;  %v2084_v60 = vsel %vm2052_vm12, %v2036_v12, %v2068_v36  ;;  %v1436_v36 = vmul.f32 0.2, %v1404_v15  ;;  %v1157_v46 = vsub.f32 %v9024_v41, %v1126_v18 }
 0x496   : > { %2131 = vmax.xlane.f32.xlu0 %v9487_v38  ;;  %v2573_v2 = vmul.f32 0.2, %v2541_v56  ;;  %vm2557_vm14 = vcmp.gt.f32.partialorder %v2541_v56, 0.0  ;;  %v9517_v6 = vsel %vm926_vm5, %v2084_v60, -1e+09  ;;  %vm1073_vm13 = vcmp.gt.f32.partialorder %v1057_v50, 0.0 }
 0x497   : > { %v1472_v1 = vpop.xlane.xlu0 %1471  ;;  %v1089_v44 = vmul.f32 0.2, %v1057_v50  ;;  %v2038_v60 = vadd.f32 %v8995_v61, %v8954_v55  ;;  %v1091_v41 = vmul.f32 0.2, %v1059_v9  ;;  %v2542_v19 = vadd.f32 %v9010_v23, %v8967_v30 }
 0x498   : > { %v2589_v45 = vsel %vm2557_vm14, %v2541_v56, %v2573_v2  ;;  %v1452_v2 = vsel %vm1420_vm1, %v1404_v15, %v1436_v36  ;;  %vm1075_vm14 = vcmp.gt.f32.partialorder %v1059_v9, 0.0 }
 0x499   : > { %1145 = vmax.xlane.f32.xlu1 %v9494_v32  ;;  %v9526_v8 = vsel %vm926_vm5, %v2589_v45, -1e+09  ;;  %v1105_v12 = vsel %vm1073_vm13, %v1057_v50, %v1089_v44  ;;  %v2070_v50 = vmul.f32 0.2, %v2038_v60  ;;  %v1173_v44 = vmul.f32 1.442695, %v1157_v46 }
 0x49a   : > { %2638 = vmax.xlane.f32.xlu0 %v9501_v34  ;;  %12283 = vst [vmem:[#allocation156_spill] sm:$0xff] %v9526_v8  ;;  %v9536_v54 = vsel %vm925_vm0, %v1105_v12, -1e+09  ;;  %v1502_v45 = vsub.f32 %v9035_v42, %v1472_v1  ;;  %vm2054_vm12 = vcmp.gt.f32.partialorder %v2038_v60, 0.0  ;;  %v9546_v61 = vsel %vm928_vm11, %v1452_v2, -1e+09 }
 0x49b   : > { %v9504_v33 = vpop.xlane.xlu0 %2105  ;;  %v2086_v18 = vsel %vm2054_vm12, %v2038_v60, %v2070_v50  ;;  %7179 = vpow2.f32 %v1173_v44  ;;  %v1107_v1 = vsel %vm1075_vm14, %v1059_v9, %v1091_v41  ;;  %v2574_v15 = vmul.f32 0.2, %v2542_v19 }
 0x49c   : > { %v1519_v27 = vmul.f32 1.442695, %v1502_v45  ;;  %v9555_v42 = vsel %vm928_vm11, %v2086_v18, -1e+09  ;;  %vm2558_vm13 = vcmp.gt.f32.partialorder %v2542_v19, 0.0  ;;  %v11949_v9 = vmov 0.0  }
 0x49d   : > { %1495 = vmax.xlane.f32.xlu1 %v9508_v5  ;;  %v9562_v23 = vsel %vm927_vm4, %v1107_v1, -1e+09  ;;  %v2590_v30 = vsel %vm2558_vm13, %v2542_v19, %v2574_v15  ;;  %v9574_v50 = vsel %vm913_vm3, 1.0, %v11949_v9  ;;  %v9585_v18 = vsel %vm914_vm6, 1.0, %v11949_v9 }
 0x49e   : > { %7181 = vpow2.f32 %v1519_v27  ;;  %v9569_v2 = vsel %vm927_vm4, %v2590_v30, -1e+09  ;;  %12286 = vst [vmem:[#allocation159_spill] sm:$0xff] %v9574_v50  ;;  %12289 = vst [vmem:[#allocation162_spill] sm:$0xff] %v9585_v18  ;;  %v9594_v27 = vpop.permute.xlu1 %3070  ;;  %vm12309_vm3 = vcmp.gt.f32.partialorder %v9085_v53, 0.0  ;;  %vm12313_vm6 = vcmp.gt.f32.partialorder %v9098_v28, 0.0 }
 0x49f   : > { %v9513_v29 = vpop.xlane.xlu0 %2608  ;;  %12285 = vst [vmem:[#allocation158_spill] sm:$0xff] %v9569_v2  ;;  %12290 = vst [vmem:[#allocation163_spill] sm:$0xff] %v9594_v27 }
 0x4a0   : > { %12282 = vst [vmem:[#allocation155_spill] sm:$0xff] %v9513_v29  ;;  %v2136_v29 = vsub.f32 %v9046_v4, %v9504_v33 }
 0x4a1   : > { %2129 = vmax.xlane.f32.xlu1 %v9517_v6 }
 0x4a3   : > { %v9522_v34 = vpop.xlane.xlu0 %1473 }
 0x4a5   : > { %2634 = vmax.xlane.f32.xlu1 %v9526_v8  ;;  %v7180_v60 = vpop.eup %7179 }
 0x4a6   : > { %v9580_v45 = vmul.f32 %v7180_v60, %v9574_v50 }
 0x4a7   : > { %v9532_v56 = vpop.xlane.xlu0 %2107 }
 0x4a8   : > { %12288 = vst [vmem:[#allocation161_spill] sm:$0xff] %v9580_v45  ;;  %v7182_v41 = vpop.eup %7181 }
 0x4a9   : > { %1149 = vmax.xlane.f32.xlu1 %v9536_v54  ;;  %v9591_v26 = vmul.f32 %v7182_v41, %v9585_v18 }
 0x4ab   : > { %v9542_v55 = vpop.xlane.xlu0 %2612 }
 0x4ac   : > { %12284 = vst [vmem:[#allocation157_spill] sm:$0xff] %v9542_v55 }
 0x4ad   : > { %1499 = vmax.xlane.f32.xlu1 %v9546_v61 }
 0x4af   : > { %v9551_v46 = vpop.xlane.xlu0 %1135 }
 0x4b1   : > { %2133 = vmax.xlane.f32.xlu1 %v9555_v42 }
 0x4b3   : > { %v9558_v12 = vpop.xlane.xlu0 %1477 }
 0x4b5   : > { %1153 = vmax.xlane.f32.xlu1 %v9562_v23 }
 0x4b7   : > { %v9565_v36 = vpop.xlane.xlu0 %2111 }
 0x4b9   : > { %2636 = vmax.xlane.f32.xlu1 %v9569_v2 }
 0x4bb   : > { %v9577_v44 = vpop.xlane.xlu0 %2616 }
 0x4bc   : > { %12287 = vst [vmem:[#allocation160_spill] sm:$0xff] %v9577_v44 }
 0x4bd   : > { %1221 = vadd.xlane.f32.xlu1 %v9580_v45 }
 0x4bf   : > { %v9588_v19 = vpop.xlane.xlu0 %1139 }
 0x4c1   : > { %1567 = vadd.xlane.f32.xlu1 %v9591_v26 }
 0x4c3   : > { %v9596_v1 = vpop.xlane.xlu0 %1481 }
 0x4c6   : > { %v1128_v15 = vpop.xlane.xlu1 %1127 }
 0x4c7   : > { %v1158_v30 = vsub.f32 %v9170_v37, %v1128_v15  ;;  %v9599_v60 = vpop.xlane.xlu0 %2115 }
 0x4c9   : > { %v1175_v47 = vmul.f32 1.442695, %v1158_v30 }
 0x4ca   : > { %v1132_v9 = vpop.xlane.xlu1 %1131 }
 0x4cb   : > { %7183 = vpow2.f32 %v1175_v47  ;;  %v1160_v2 = vsub.f32 %v9186_v16, %v1132_v9  ;;  %v9602_v8 = vpop.xlane.xlu0 %2620  ;;  %v2153_v47 = vmul.f32 1.442695, %v2136_v29  ;;  %v12292_v16 = vld [vmem:[#allocation115_spill] sm:$0xff]  ;;  %v12295_v29 = vld [vmem:[#allocation117_spill] sm:$0xff] }
 0x4cc   : > { %12291 = vst [vmem:[#allocation164_spill] sm:$0xff] %v9602_v8  ;;  %v1503_v9 = vsub.f32 %v12292_v16, %v9522_v34 }
 0x4cd   : > { %v1179_v41 = vmul.f32 1.442695, %v1160_v2 }
 0x4ce   : > { %v1470_v44 = vpop.xlane.xlu1 %1469  ;;  %v1521_v34 = vmul.f32 1.442695, %v1503_v9 }
 0x4cf   : > { %7185 = vpow2.f32 %v1179_v41  ;;  %v1501_v55 = vsub.f32 %v9205_v7, %v1470_v44  ;;  %v9607_v27 = vpop.xlane.xlu0 %1143  ;;  %v12293_v7 = vmov 0.0   ;;  %v2137_v44 = vsub.f32 %v12295_v29, %v9532_v56 }
 0x4d0   : > { %v9619_v33 = vsel %vm916_vm2, 1.0, %v12293_v7  ;;  %v9704_v53 = vsel %vm12313_vm6, 1.0, %v12293_v7  ;;  %v9866_v10 = vsel %vm925_vm0, 1.0, %v12293_v7 }
 0x4d1   : > { %v1517_v45 = vmul.f32 1.442695, %v1501_v55  ;;  %12294 = vst [vmem:[#allocation115_spill] sm:$0xff] %v9619_v33  ;;  %12314 = vst [vmem:[#allocation168_spill] sm:$0xff] %v9704_v53 }
 0x4d2   : > { %v1476_v37 = vpop.xlane.xlu1 %1475  ;;  %12351 = vst [vmem:[#allocation179_spill] sm:$0xff] %v9866_v10 }
 0x4d3   : > { %7187 = vpow2.f32 %v1517_v45  ;;  %v1504_v15 = vsub.f32 %v9223_v17, %v1476_v37  ;;  %v9621_v55 = vpop.xlane.xlu0 %1485 }
 0x4d5   : > { %v7184_v30 = vpop.eup %7183  ;;  %v1523_v2 = vmul.f32 1.442695, %v1504_v15 }
 0x4d6   : > { %v2104_v8 = vpop.xlane.xlu1 %2103  ;;  %v9613_v41 = vmul.f32 %v7184_v30, %v9585_v18  ;;  %v12296_v30 = vld [vmem:[#allocation119_spill] sm:$0xff] }
 0x4d7   : > { %7189 = vpow2.f32 %v1523_v2  ;;  %v2135_v4 = vsub.f32 %v9238_v52, %v2104_v8  ;;  %v2155_v8 = vmul.f32 1.442695, %v2137_v44  ;;  %v9633_v9 = vpop.xlane.xlu0 %2119 }
 0x4d8   : > { %1223 = vadd.xlane.f32.xlu0 %v9613_v41  ;;  %7191 = vpow2.f32 %v2153_v47  ;;  %v1162_v47 = vsub.f32 %v12296_v30, %v9551_v46  ;;  %v7863_v30 = vmov 14  }
 0x4d9   : > { %v7186_v17 = vpop.eup %7185  ;;  %v2151_v45 = vmul.f32 1.442695, %v2135_v4  ;;  %7144 = vset.pattern.permute.xlu0 %v7863_v30  ;;  %7143 = vset.pattern.permute.xlu1 %v7863_v30 }
 0x4da   : > { %v2110_v37 = vpop.xlane.xlu1 %2109  ;;  %v9627_v15 = vmul.f32 %v7186_v17, %v9619_v33  ;;  %v1183_v4 = vmul.f32 1.442695, %v1162_v47  ;;  %v12298_v17 = vld [vmem:[#allocation120_spill] sm:$0xff] }
 0x4db   : > { %7193 = vpow2.f32 %v2151_v45  ;;  %v2138_v63 = vsub.f32 %v9251_v57, %v2110_v37  ;;  %v9648_v45 = vpop.xlane.xlu0 %2624 }
 0x4dc   : > { %1227 = vadd.xlane.f32.xlu0 %v9627_v15  ;;  %7195 = vpow2.f32 %v1521_v34  ;;  %v1505_v34 = vsub.f32 %v12298_v17, %v9558_v12  ;;  %12300 = vst [vmem:[#allocation120_spill] sm:$0xff] %v9648_v45 }
 0x4dd   : > { %v7188_v52 = vpop.eup %7187  ;;  %v2157_v16 = vmul.f32 1.442695, %v2138_v63 }
 0x4de   : > { %v9635_v56 = vpop.xlane.xlu1 %2610  ;;  %v9638_v2 = vmul.f32 %v7188_v52, %v9574_v50  ;;  %v1525_v63 = vmul.f32 1.442695, %v1505_v34  ;;  %v12301_v52 = vld [vmem:[#allocation121_spill] sm:$0xff] }
 0x4df   : > { %12297 = vst [vmem:[#allocation117_spill] sm:$0xff] %v9635_v56  ;;  %7197 = vpow2.f32 %v2157_v16  ;;  %v9669_v30 = vpop.xlane.xlu0 %1147  ;;  %v12421_v56 = vld [vmem:[#allocation80_spill] sm:$0xff] }
 0x4e0   : > { %1565 = vadd.xlane.f32.xlu0 %v9638_v2  ;;  %7199 = vpow2.f32 %v2155_v8  ;;  %v2139_v8 = vsub.f32 %v12301_v52, %v9565_v36 }
 0x4e1   : > { %v7190_v57 = vpop.eup %7189  ;;  %7201 = vpow2.f32 %v1183_v4  ;;  %v9663_v4 = vsel %vm915_vm10, 1.0, %v12293_v7  ;;  %vm12326_vm10 = vcmp.gt.f32.partialorder %v9194_v39, 0.0 }
 0x4e2   : > { %v9643_v29 = vpop.xlane.xlu1 %2614  ;;  %v9646_v46 = vmul.f32 %v7190_v57, %v9619_v33  ;;  %v7192_v44 = vpop.eup %7191  ;;  %12304 = vst [vmem:[#allocation166_spill] sm:$0xff] %v9663_v4  ;;  %7203 = vpow2.f32 %v1525_v63  ;;  %v2159_v34 = vmul.f32 1.442695, %v2139_v8  ;;  %v12307_v63 = vld [vmem:[#allocation125_spill] sm:$0xff] }
 0x4e3   : > { %12299 = vst [vmem:[#allocation119_spill] sm:$0xff] %v9643_v29  ;;  %v9654_v47 = vmul.f32 %v7192_v44, %v9585_v18  ;;  %v12305_v44 = vld [vmem:[#allocation124_spill] sm:$0xff]  ;;  %v1507_v8 = vsub.f32 %v12307_v63, %v9596_v1  ;;  %v12407_v29 = vld [vmem:[#allocation83_spill] sm:$0xff] }
 0x4e4   : > { %1571 = vadd.xlane.f32.xlu1 %v9646_v46  ;;  %v1164_v52 = vsub.f32 %v12305_v44, %v9588_v19 }
 0x4e5   : > { %v7194_v37 = vpop.eup %7193  ;;  %12302 = vst [vmem:[#allocation121_spill] sm:$0xff] %v9654_v47  ;;  %v1529_v1 = vmul.f32 1.442695, %v1507_v8 }
 0x4e6   : > { %v1130_v12 = vpop.xlane.xlu1 %1129  ;;  %v9657_v16 = vmul.f32 %v7194_v37, %v9574_v50  ;;  %v7196_v57 = vpop.eup %7195  ;;  %v1187_v19 = vmul.f32 1.442695, %v1164_v52 }
 0x4e7   : > { %v1159_v17 = vsub.f32 %v9303_v25, %v1130_v12  ;;  %v9672_v25 = vmul.f32 %v7196_v57, %v9663_v4 }
 0x4e8   : > { %12303 = vst [vmem:[#allocation165_spill] sm:$0xff] %v9657_v16  ;;  %2201 = vadd.xlane.f32.xlu1 %v9654_v47  ;;  %2199 = vadd.xlane.f32.xlu0 %v9657_v16  ;;  %v12406_v47 = vld [vmem:[#allocation81_spill] sm:$0xff] }
 0x4e9   : > { %v7198_v36 = vpop.eup %7197  ;;  %v1177_v37 = vmul.f32 1.442695, %v1159_v17 }
 0x4ea   : > { %v1480_v45 = vpop.xlane.xlu1 %1479  ;;  %v9675_v11 = vmul.f32 %v7198_v36, %v9619_v33  ;;  %v7200_v12 = vpop.eup %7199 }
 0x4eb   : > { %7205 = vpow2.f32 %v1177_v37  ;;  %v1506_v18 = vsub.f32 %v9315_v40, %v1480_v45  ;;  %v9683_v57 = vmul.f32 %v7200_v12, %v9663_v4  ;;  %v7202_v36 = vpop.eup %7201  ;;  %v9689_v40 = vsel %vm12309_vm3, 1.0, %v12293_v7  ;;  %v9691_v45 = vpop.xlane.xlu0 %1489 }
 0x4ec   : > { %12306 = vst [vmem:[#allocation124_spill] sm:$0xff] %v9675_v11  ;;  %1569 = vadd.xlane.f32.xlu0 %v9672_v25  ;;  %2205 = vadd.xlane.f32.xlu1 %v9675_v11  ;;  %7207 = vpow2.f32 %v2159_v34  ;;  %12310 = vst [vmem:[#allocation167_spill] sm:$0xff] %v9689_v40  ;;  %v9699_v63 = vmul.f32 %v7202_v36, %v9689_v40 }
 0x4ed   : > { %v1527_v17 = vmul.f32 1.442695, %v1506_v18  ;;  %12308 = vst [vmem:[#allocation125_spill] sm:$0xff] %v9683_v57  ;;  %v12311_v18 = vld [vmem:[#allocation126_spill] sm:$0xff] }
 0x4ee   : > { %v2114_v44 = vpop.xlane.xlu1 %2113  ;;  %v2141_v34 = vsub.f32 %v12311_v18, %v9599_v60  ;;  %v12315_v60 = vld [vmem:[#allocation129_spill] sm:$0xff] }
 0x4ef   : > { %7209 = vpow2.f32 %v1527_v17  ;;  %v2140_v37 = vsub.f32 %v9332_v35, %v2114_v44  ;;  %v7204_v35 = vpop.eup %7203  ;;  %v1166_v17 = vsub.f32 %v12315_v60, %v9607_v27  ;;  %v9709_v44 = vpop.xlane.xlu0 %2123  ;;  %v12316_v27 = vld [vmem:[#allocation130_spill] sm:$0xff] }
 0x4f0   : > { %2203 = vadd.xlane.f32.xlu0 %v9683_v57  ;;  %7211 = vpow2.f32 %v1187_v19  ;;  %v2163_v8 = vmul.f32 1.442695, %v2141_v34  ;;  %v9712_v36 = vmul.f32 %v7204_v35, %v9704_v53  ;;  %v1509_v60 = vsub.f32 %v12316_v27, %v9621_v55  ;;  %v12403_v57 = vld [vmem:[#allocation77_spill] sm:$0xff] }
 0x4f1   : > { %v2161_v52 = vmul.f32 1.442695, %v2140_v37  ;;  %v1191_v34 = vmul.f32 1.442695, %v1166_v17 }
 0x4f2   : > { %v9696_v12 = vpop.xlane.xlu1 %2618 }
 0x4f3   : > { %12312 = vst [vmem:[#allocation126_spill] sm:$0xff] %v9696_v12  ;;  %7213 = vpow2.f32 %v2161_v52  ;;  %v9734_v17 = vpop.xlane.xlu0 %2628 }
 0x4f4   : > { %1231 = vadd.xlane.f32.xlu0 %v9699_v63  ;;  %7215 = vpow2.f32 %v1529_v1  ;;  %12319 = vst [vmem:[#allocation169_spill] sm:$0xff] %v9734_v17 }
 0x4f5   : > { %v7206_v19 = vpop.eup %7205  ;;  %7217 = vpow2.f32 %v2163_v8  ;;  %v9732_v8 = vsel %vm920_vm7, 1.0, %v12293_v7  ;;  %vm12330_vm7 = vcmp.gt.f32.partialorder %v9214_v14, 0.0 }
 0x4f6   : > { %v1134_v37 = vpop.xlane.xlu1 %1133  ;;  %v9715_v18 = vmul.f32 %v7206_v19, %v9663_v4  ;;  %v7208_v28 = vpop.eup %7207  ;;  %12318 = vst [vmem:[#allocation130_spill] sm:$0xff] %v9732_v8 }
 0x4f7   : > { %v1161_v52 = vsub.f32 %v9355_v22, %v1134_v37  ;;  %v9723_v35 = vmul.f32 %v7208_v28, %v9704_v53  ;;  %v1533_v37 = vmul.f32 1.442695, %v1509_v60  ;;  %v12320_v28 = vld [vmem:[#allocation131_spill] sm:$0xff] }
 0x4f8   : > { %1573 = vadd.xlane.f32.xlu0 %v9712_v36  ;;  %1225 = vadd.xlane.f32.xlu1 %v9715_v18 }
 0x4f9   : > { %v7210_v1 = vpop.eup %7209  ;;  %v1181_v33 = vmul.f32 1.442695, %v1161_v52  ;;  %12317 = vst [vmem:[#allocation129_spill] sm:$0xff] %v9723_v35  ;;  %v2143_v52 = vsub.f32 %v12320_v28, %v9633_v9 }
 0x4fa   : > { %v1484_v50 = vpop.xlane.xlu1 %1483  ;;  %v9726_v19 = vmul.f32 %v7210_v1, %v9689_v40  ;;  %v7212_v4 = vpop.eup %7211 }
 0x4fb   : > { %7219 = vpow2.f32 %v1181_v33  ;;  %v1508_v22 = vsub.f32 %v9367_v59, %v1484_v50  ;;  %v9741_v59 = vmul.f32 %v7212_v4, %v9732_v8  ;;  %v2167_v9 = vmul.f32 1.442695, %v2143_v52 }
 0x4fc   : > { %2207 = vadd.xlane.f32.xlu0 %v9723_v35  ;;  %1575 = vadd.xlane.f32.xlu1 %v9726_v19  ;;  %7221 = vpow2.f32 %v1191_v34  ;;  %v9750_v34 = vsel %vm919_vm9, 1.0, %v12293_v7  ;;  %v1168_v4 = vsub.f32 %v9275_v20, %v9669_v30 }
 0x4fd   : > { %v7214_v55 = vpop.eup %7213  ;;  %v1531_v33 = vmul.f32 1.442695, %v1508_v22  ;;  %12322 = vst [vmem:[#allocation170_spill] sm:$0xff] %v9750_v34  ;;  %v1152_v22 = vpop.xlane.xlu0 %1151 }
 0x4fe   : > { %v2118_v1 = vpop.xlane.xlu1 %2117  ;;  %v9744_v3 = vmul.f32 %v7214_v55, %v9689_v40  ;;  %v7216_v50 = vpop.eup %7215 }
 0x4ff   : > { %7223 = vpow2.f32 %v1531_v33  ;;  %v2142_v27 = vsub.f32 %v9381_v0, %v2118_v1  ;;  %v9759_v0 = vmul.f32 %v7216_v50, %v9750_v34  ;;  %v7218_v28 = vpop.eup %7217  ;;  %v1195_v33 = vmul.f32 1.442695, %v1168_v4  ;;  %v12328_v4 = vld [vmem:[#allocation137_spill] sm:$0xff] }
 0x500   : > { %12321 = vst [vmem:[#allocation131_spill] sm:$0xff] %v9744_v3  ;;  %1235 = vadd.xlane.f32.xlu0 %v9741_v59  ;;  %2209 = vadd.xlane.f32.xlu1 %v9744_v3  ;;  %7225 = vpow2.f32 %v1533_v37  ;;  %v12324_v37 = vld [vmem:[#allocation136_spill] sm:$0xff]  ;;  %v9765_v20 = vmul.f32 %v7218_v28, %v9750_v34  ;;  %v2145_v28 = vsub.f32 %v12328_v4, %v9709_v44 }
 0x501   : > { %v2165_v60 = vmul.f32 1.442695, %v2142_v27  ;;  %v1511_v52 = vsub.f32 %v12324_v37, %v9691_v45  ;;  %v1494_v1 = vpop.xlane.xlu0 %1493 }
 0x502   : > { %v9756_v55 = vpop.xlane.xlu1 %2622  ;;  %12325 = vst [vmem:[#allocation136_spill] sm:$0xff] %v9765_v20 }
 0x503   : > { %12323 = vst [vmem:[#allocation171_spill] sm:$0xff] %v9756_v55  ;;  %7227 = vpow2.f32 %v2165_v60  ;;  %v9774_v60 = vsel %vm12326_vm10, 1.0, %v12293_v7 }
 0x504   : > { %1577 = vadd.xlane.f32.xlu0 %v9759_v0  ;;  %7229 = vpow2.f32 %v2167_v9  ;;  %12327 = vst [vmem:[#allocation172_spill] sm:$0xff] %v9774_v60  ;;  %v1537_v9 = vmul.f32 1.442695, %v1511_v52 }
 0x505   : > { %v7220_v43 = vpop.eup %7219  ;;  %7231 = vpow2.f32 %v1195_v33  ;;  %v9790_v33 = vsel %vm12330_vm7, 1.0, %v12293_v7  ;;  %v2128_v52 = vpop.xlane.xlu0 %2127 }
 0x506   : > { %v1138_v40 = vpop.xlane.xlu1 %1137  ;;  %v9768_v30 = vmul.f32 %v7220_v43, %v9704_v53  ;;  %v7222_v50 = vpop.eup %7221  ;;  %12331 = vst [vmem:[#allocation173_spill] sm:$0xff] %v9790_v33 }
 0x507   : > { %v1163_v27 = vsub.f32 %v9410_v13, %v1138_v40  ;;  %v9781_v17 = vmul.f32 %v7222_v50, %v9774_v60  ;;  %v2171_v50 = vmul.f32 1.442695, %v2145_v28 }
 0x508   : > { %2211 = vadd.xlane.f32.xlu0 %v9765_v20  ;;  %1229 = vadd.xlane.f32.xlu1 %v9768_v30  ;;  %v9954_v20 = vld [vmem:[%s7999_s11 + $0xa8] sm:$0xff] }
 0x509   : > { %v7224_v45 = vpop.eup %7223  ;;  %v1185_v43 = vmul.f32 1.442695, %v1163_v27  ;;  %12329 = vst [vmem:[#allocation137_spill] sm:$0xff] %v9781_v17  ;;  %v12332_v27 = vld [vmem:[#allocation140_spill] sm:$0xff] }
 0x50a   : > { %v1488_v37 = vpop.xlane.xlu1 %1487  ;;  %v9784_v13 = vmul.f32 %v7224_v45, %v9732_v8  ;;  %v7226_v39 = vpop.eup %7225  ;;  %v1170_v45 = vsub.f32 %v12332_v27, %v1152_v22  ;;  %v1513_v22 = vsub.f32 %v9374_v31, %v1494_v1  ;;  %v12338_v1 = vld [vmem:[#allocation143_spill] sm:$0xff] }
 0x50b   : > { %7233 = vpow2.f32 %v1185_v43  ;;  %v1510_v40 = vsub.f32 %v9423_v21, %v1488_v37  ;;  %v9796_v43 = vmul.f32 %v7226_v39, %v9790_v33 }
 0x50c   : > { %1239 = vadd.xlane.f32.xlu0 %v9781_v17  ;;  %1579 = vadd.xlane.f32.xlu1 %v9784_v13  ;;  %7235 = vpow2.f32 %v1537_v9  ;;  %v1199_v9 = vmul.f32 1.442695, %v1170_v45  ;;  %v1541_v31 = vmul.f32 1.442695, %v1513_v22  ;;  %v10164_v17 = vld [vmem:[%s7999_s11 + $0xe8] sm:$0xff] }
 0x50d   : > { %v7228_v44 = vpop.eup %7227  ;;  %v1535_v4 = vmul.f32 1.442695, %v1510_v40  ;;  %v9805_v40 = vpop.xlane.xlu0 %2632 }
 0x50e   : > { %v2122_v53 = vpop.xlane.xlu1 %2121  ;;  %v9799_v21 = vmul.f32 %v7228_v44, %v9732_v8  ;;  %v7230_v14 = vpop.eup %7229  ;;  %12334 = vst [vmem:[#allocation174_spill] sm:$0xff] %v9805_v40  ;;  %v12340_v8 = vld [vmem:[#allocation149_spill] sm:$0xff]  ;;  %v9829_v40 = vsel %vm923_vm15, 1.0, %v12293_v7  ;;  %vm2970_vm15 = vcmp.gt.f32.partialorder %v9954_v20, 0.0 }
 0x50f   : > { %v2144_v37 = vsub.f32 %v9433_v58, %v2122_v53  ;;  %7237 = vpow2.f32 %v1535_v4  ;;  %v9810_v44 = vmul.f32 %v7230_v14, %v9790_v33  ;;  %v7232_v27 = vpop.eup %7231  ;;  %v9815_v58 = vsel %vm924_vm8, 1.0, %v12293_v7  ;;  %12341 = vst [vmem:[#allocation149_spill] sm:$0xff] %v9829_v40 }
 0x510   : > { %12333 = vst [vmem:[#allocation140_spill] sm:$0xff] %v9799_v21  ;;  %1581 = vadd.xlane.f32.xlu0 %v9796_v43  ;;  %2213 = vadd.xlane.f32.xlu1 %v9799_v21  ;;  %7239 = vpow2.f32 %v2171_v50  ;;  %12337 = vst [vmem:[#allocation177_spill] sm:$0xff] %v9815_v58  ;;  %v2147_v50 = vsub.f32 %v12338_v1, %v2128_v52 }
 0x511   : > { %v2169_v28 = vmul.f32 1.442695, %v2144_v37  ;;  %12336 = vst [vmem:[#allocation176_spill] sm:$0xff] %v9810_v44  ;;  %v1156_v45 = vpop.xlane.xlu0 %1155  ;;  %v9820_v37 = vmul.f32 %v7232_v27, %v9815_v58 }
 0x512   : > { %v9807_v39 = vpop.xlane.xlu1 %2626  ;;  %v2175_v52 = vmul.f32 1.442695, %v2147_v50 }
 0x513   : > { %12335 = vst [vmem:[#allocation175_spill] sm:$0xff] %v9807_v39  ;;  %7241 = vpow2.f32 %v2169_v28  ;;  %12339 = vst [vmem:[#allocation143_spill] sm:$0xff] %v9820_v37 }
 0x514   : > { %2215 = vadd.xlane.f32.xlu0 %v9810_v44  ;;  %7243 = vpow2.f32 %v1199_v9  ;;  %v12342_v9 = vld [vmem:[#allocation146_spill] sm:$0xff] }
 0x515   : > { %v7234_v53 = vpop.eup %7233  ;;  %7245 = vpow2.f32 %v1541_v31  ;;  %v1172_v22 = vsub.f32 %v12342_v9, %v1156_v45 }
 0x516   : > { %v1142_v4 = vpop.xlane.xlu1 %1141  ;;  %v9823_v14 = vmul.f32 %v7234_v53, %v9750_v34  ;;  %v7236_v28 = vpop.eup %7235 }
 0x517   : > { %v1165_v62 = vsub.f32 %v12340_v8, %v1142_v4  ;;  %v9835_v34 = vmul.f32 %v7236_v28, %v9829_v40  ;;  %v12343_v4 = vld [vmem:[#allocation150_spill] sm:$0xff]  ;;  %v1203_v31 = vmul.f32 1.442695, %v1172_v22  ;;  %v12348_v22 = vld [vmem:[#allocation152_spill] sm:$0xff] }
 0x518   : > { %1243 = vadd.xlane.f32.xlu0 %v9820_v37  ;;  %1233 = vadd.xlane.f32.xlu1 %v9823_v14 }
 0x519   : > { %v1189_v27 = vmul.f32 1.442695, %v1165_v62  ;;  %v7238_v1 = vpop.eup %7237 }
 0x51a   : > { %v1492_v53 = vpop.xlane.xlu1 %1491  ;;  %v7240_v8 = vpop.eup %7239  ;;  %v9839_v39 = vmul.f32 %v7238_v1, %v9774_v60  ;;  %v12346_v1 = vld [vmem:[#allocation151_spill] sm:$0xff] }
 0x51b   : > { %7247 = vpow2.f32 %v1189_v27  ;;  %v1512_v51 = vsub.f32 %v12343_v4, %v1492_v53  ;;  %v9844_v28 = vmul.f32 %v7240_v8, %v9829_v40 }
 0x51c   : > { %1585 = vadd.xlane.f32.xlu0 %v9835_v34  ;;  %7249 = vpow2.f32 %v2175_v52  ;;  %1583 = vadd.xlane.f32.xlu1 %v9839_v39  ;;  %v9853_v52 = vsel %vm926_vm5, 1.0, %v12293_v7 }
 0x51d   : > { %v7242_v44 = vpop.eup %7241  ;;  %v1539_v50 = vmul.f32 1.442695, %v1512_v51  ;;  %12344 = vst [vmem:[#allocation146_spill] sm:$0xff] %v9844_v28  ;;  %12347 = vst [vmem:[#allocation151_spill] sm:$0xff] %v9853_v52 }
 0x51e   : > { %v1498_v45 = vpop.xlane.xlu0 %1497  ;;  %v2126_v62 = vpop.xlane.xlu1 %2125  ;;  %v9847_v9 = vmul.f32 %v7242_v44, %v9774_v60 }
 0x51f   : > { %v7244_v27 = vpop.eup %7243  ;;  %7251 = vpow2.f32 %v1539_v50  ;;  %v2146_v53 = vsub.f32 %v12346_v1, %v2126_v62  ;;  %v1515_v4 = vsub.f32 %v12348_v22, %v1498_v45  ;;  %v12352_v1 = vld [vmem:[#allocation24_spill] sm:$0xff] }
 0x520   : > { %12345 = vst [vmem:[#allocation150_spill] sm:$0xff] %v9847_v9  ;;  %2219 = vadd.xlane.f32.xlu0 %v9844_v28  ;;  %7253 = vpow2.f32 %v1203_v31  ;;  %2217 = vadd.xlane.f32.xlu1 %v9847_v9  ;;  %v9861_v44 = vmul.f32 %v7244_v27, %v9853_v52  ;;  %v7246_v50 = vpop.eup %7245  ;;  %v12353_v60 = vsub.s32 4, %v12352_v1  ;;  %v12354_v31 = vld [vmem:[#allocation112_spill] sm:$0xff] }
 0x521   : > { %v2173_v51 = vmul.f32 1.442695, %v2146_v53  ;;  %v1545_v53 = vmul.f32 1.442695, %v1515_v4 }
 0x522   : > { %v9858_v8 = vpop.xlane.xlu1 %2630  ;;  %12350 = vst [vmem:[#allocation178_spill] sm:$0xff] %v9861_v44  ;;  %v9871_v28 = vrot.slane %v12354_v31, %v12353_v60  ;;  %v12356_v60 = vld [vmem:[#allocation90_spill] sm:$0xff] }
 0x523   : > { %12349 = vst [vmem:[#allocation152_spill] sm:$0xff] %v9858_v8  ;;  %v2132_v62 = vpop.xlane.xlu0 %2131  ;;  %7255 = vpow2.f32 %v2173_v51  ;;  %v9876_v8 = vmul.f32 %v7246_v50, %v9866_v10 }
 0x524   : > { %1247 = vadd.xlane.f32.xlu0 %v9861_v44  ;;  %v2149_v27 = vsub.f32 %v9487_v38, %v2132_v62  ;;  %v3082_v51 = vadd.f32 %v9871_v28, %v12356_v60  ;;  %7257 = vpow2.f32 %v1545_v53  ;;  %v9896_v60 = vsel %vm928_vm11, 1.0, %v12293_v7  ;;  %v9901_v53 = vld [vmem:[%s7999_s11 + $0x88] sm:$0xff] }
 0x525   : > { %v7248_v45 = vpop.eup %7247  ;;  %12358 = vst [vmem:[#allocation181_spill] sm:$0xff] %v9896_v60  ;;  %12359 = vst [vmem:[#allocation182_spill] sm:$0xff] %v9901_v53  ;;  %vm12030_vm9 = vcmp.gt.f32.partialorder %v9901_v53, 0.0 }
 0x526   : > { %v1146_v22 = vpop.xlane.xlu1 %1145  ;;  %v9879_v49 = vmul.f32 %v7248_v45, %v9790_v33  ;;  %v7250_v9 = vpop.eup %7249  ;;  %v2179_v38 = vmul.f32 1.442695, %v2149_v27  ;;  %vm3098_vm0 = vcmp.gt.f32.partialorder %v3082_v51, 0.0 }
 0x527   : > { %v1167_v21 = vsub.f32 %v9494_v32, %v1146_v22  ;;  %v9887_v55 = vmul.f32 %v7250_v9, %v9866_v10 }
 0x528   : > { %12355 = vst [vmem:[#allocation180_spill] sm:$0xff] %v9879_v49  ;;  %1589 = vadd.xlane.f32.xlu0 %v9876_v8  ;;  %1237 = vadd.xlane.f32.xlu1 %v9879_v49 }
 0x529   : > { %v7252_v4 = vpop.eup %7251  ;;  %v1193_v62 = vmul.f32 1.442695, %v1167_v21  ;;  %12357 = vst [vmem:[#allocation90_spill] sm:$0xff] %v9887_v55  ;;  %v3114_v21 = vmul.f32 0.2, %v3082_v51 }
 0x52a   : > { %v1496_v50 = vpop.xlane.xlu1 %1495  ;;  %v9890_v45 = vmul.f32 %v7252_v4, %v9815_v58  ;;  %v7254_v32 = vpop.eup %7253 }
 0x52b   : > { %7259 = vpow2.f32 %v1193_v62  ;;  %v1514_v22 = vsub.f32 %v9508_v5, %v1496_v50  ;;  %v9904_v62 = vmul.f32 %v7254_v32, %v9896_v60 }
 0x52c   : > { %2223 = vadd.xlane.f32.xlu0 %v9887_v55  ;;  %1587 = vadd.xlane.f32.xlu1 %v9890_v45  ;;  %7261 = vpow2.f32 %v2179_v38  ;;  %v3130_v38 = vsel %vm3098_vm0, %v3082_v51, %v3114_v21  ;;  %v12365_v51 = vld [vmem:[#allocation93_spill] sm:$0xff] }
 0x52d   : > { %v1543_v9 = vmul.f32 1.442695, %v1514_v22  ;;  %v7256_v27 = vpop.eup %7255  ;;  %12360 = vst [vmem:[#allocation183_spill] sm:$0xff] %v9904_v62  ;;  %v9917_v32 = vsel %vm12030_vm9, %v3130_v38, -1e+09  ;;  %v3084_v21 = vadd.f32 %v9871_v28, %v12365_v51 }
 0x52e   : > { %v2130_v4 = vpop.xlane.xlu1 %2129  ;;  %v9908_v5 = vmul.f32 %v7256_v27, %v9815_v58  ;;  %v7258_v33 = vpop.eup %7257  ;;  %12363 = vst [vmem:[#allocation186_spill] sm:$0xff] %v9917_v32 }
 0x52f   : > { %7263 = vpow2.f32 %v1543_v9  ;;  %v2148_v24 = vsub.f32 %v9517_v6, %v2130_v4  ;;  %v9922_v6 = vsel %vm927_vm4, 1.0, %v12293_v7  ;;  %v3116_v48 = vmul.f32 0.2, %v3084_v21  ;;  %v12367_v7 = vld [vmem:[#allocation94_spill] sm:$0xff] }
 0x530   : > { %12361 = vst [vmem:[#allocation184_spill] sm:$0xff] %v9908_v5  ;;  %1251 = vadd.xlane.f32.xlu0 %v9904_v62  ;;  %2221 = vadd.xlane.f32.xlu1 %v9908_v5  ;;  %12364 = vst [vmem:[#allocation187_spill] sm:$0xff] %v9922_v6  ;;  %v9928_v4 = vmul.f32 %v7258_v33, %v9922_v6  ;;  %vm3100_vm2 = vcmp.gt.f32.partialorder %v3084_v21, 0.0 }
 0x531   : > { %v2177_v50 = vmul.f32 1.442695, %v2148_v24 }
 0x532   : > { %v9913_v22 = vpop.xlane.xlu1 %2634 }
 0x533   : > { %12362 = vst [vmem:[#allocation185_spill] sm:$0xff] %v9913_v22  ;;  %7265 = vpow2.f32 %v2177_v50  ;;  %v9939_v22 = vld [vmem:[%s7999_s11 + $0x98] sm:$0xff] }
 0x534   : > { %3163 = vmax.xlane.f32.xlu0 %v9917_v32  ;;  %v3086_v32 = vadd.f32 %v9871_v28, %v12367_v7  ;;  %vm2968_vm4 = vcmp.gt.f32.partialorder %v9939_v22, 0.0  ;;  %v3132_v7 = vsel %vm3100_vm2, %v3084_v21, %v3116_v48 }
 0x535   : > { %v7260_v9 = vpop.eup %7259  ;;  %v9962_v21 = vsel %vm2968_vm4, %v3132_v7, -1e+09 }
 0x536   : > { %v1150_v27 = vpop.xlane.xlu1 %1149  ;;  %v9931_v24 = vmul.f32 %v7260_v9, %v9829_v40  ;;  %v7262_v38 = vpop.eup %7261  ;;  %v12369_v40 = vld [vmem:[#allocation96_spill] sm:$0xff]  ;;  %vm3102_vm8 = vcmp.gt.f32.partialorder %v3086_v32, 0.0  ;;  %12371 = vst [vmem:[#allocation188_spill] sm:$0xff] %v9962_v21 }
 0x537   : > { %v1169_v50 = vsub.f32 %v9536_v54, %v1150_v27  ;;  %v9942_v9 = vmul.f32 %v7262_v38, %v9922_v6  ;;  %v3088_v55 = vadd.f32 %v9871_v28, %v12369_v40 }
 0x538   : > { %12366 = vst [vmem:[#allocation93_spill] sm:$0xff] %v9931_v24  ;;  %1593 = vadd.xlane.f32.xlu0 %v9928_v4  ;;  %1241 = vadd.xlane.f32.xlu1 %v9931_v24 }
 0x539   : > { %v7264_v51 = vpop.eup %7263  ;;  %v1197_v58 = vmul.f32 1.442695, %v1169_v50  ;;  %12368 = vst [vmem:[#allocation94_spill] sm:$0xff] %v9942_v9  ;;  %v3118_v50 = vmul.f32 0.2, %v3086_v32  ;;  %vm3104_vm5 = vcmp.gt.f32.partialorder %v3088_v55, 0.0 }
 0x53a   : > { %v1500_v33 = vpop.xlane.xlu1 %1499  ;;  %v9945_v54 = vmul.f32 %v7264_v51, %v9853_v52  ;;  %v3120_v48 = vmul.f32 0.2, %v3088_v55 }
 0x53b   : > { %7267 = vpow2.f32 %v1197_v58  ;;  %v1516_v27 = vsub.f32 %v9546_v61, %v1500_v33  ;;  %v3134_v40 = vsel %vm3102_vm8, %v3086_v32, %v3118_v50  ;;  %v12372_v33 = vld [vmem:[#allocation99_spill] sm:$0xff] }
 0x53c   : > { %2227 = vadd.xlane.f32.xlu0 %v9942_v9  ;;  %1591 = vadd.xlane.f32.xlu1 %v9945_v54  ;;  %v3136_v32 = vsel %vm3104_vm5, %v3088_v55, %v3120_v48  ;;  %v9982_v9 = vld [vmem:[%s7999_s11 + $0xc8] sm:$0xff] }
 0x53d   : > { %v7266_v5 = vpop.eup %7265  ;;  %v1547_v38 = vmul.f32 1.442695, %v1516_v27  ;;  %vm2974_vm12 = vcmp.gt.f32.partialorder %v9982_v9, 0.0 }
 0x53e   : > { %v2134_v58 = vpop.xlane.xlu1 %2133  ;;  %v9957_v61 = vmul.f32 %v7266_v5, %v9853_v52  ;;  %v3090_v5 = vadd.f32 %v9871_v28, %v12372_v33  ;;  %v12375_v33 = vld [vmem:[#allocation103_spill] sm:$0xff] }
 0x53f   : > { %7269 = vpow2.f32 %v1547_v38  ;;  %v2150_v51 = vsub.f32 %v9555_v42, %v2134_v58  ;;  %v9970_v38 = vld [vmem:[%s7999_s11 + $0xb8] sm:$0xff]  ;;  %v9975_v58 = vsel %vm2970_vm15, %v3134_v40, -1e+09  ;;  %12376 = vst [vmem:[#allocation103_spill] sm:$0xff] %v9982_v9  ;;  %v7864_v9 = vmov 15  }
 0x540   : > { %12370 = vst [vmem:[#allocation96_spill] sm:$0xff] %v9957_v61  ;;  %3167 = vmax.xlane.f32.xlu0 %v9962_v21  ;;  %2225 = vadd.xlane.f32.xlu1 %v9957_v61  ;;  %12373 = vst [vmem:[#allocation99_spill] sm:$0xff] %v9970_v38  ;;  %vm2972_vm11 = vcmp.gt.f32.partialorder %v9970_v38, 0.0  ;;  %v3122_v50 = vmul.f32 0.2, %v3090_v5  ;;  %vm3106_vm1 = vcmp.gt.f32.partialorder %v3090_v5, 0.0 }
 0x541   : > { %v2181_v27 = vmul.f32 1.442695, %v2150_v51  ;;  %12374 = vst [vmem:[#allocation189_spill] sm:$0xff] %v9975_v58  ;;  %v3092_v51 = vadd.f32 %v9871_v28, %v12375_v33  ;;  %v9989_v40 = vsel %vm2972_vm11, %v3136_v32, -1e+09 }
 0x542   : > { %v1154_v42 = vpop.xlane.xlu1 %1153  ;;  %12378 = vst [vmem:[#allocation191_spill] sm:$0xff] %v9989_v40  ;;  %v3138_v55 = vsel %vm3106_vm1, %v3090_v5, %v3122_v50 }
 0x543   : > { %7271 = vpow2.f32 %v2181_v27  ;;  %v1171_v7 = vsub.f32 %v9562_v23, %v1154_v42  ;;  %v3124_v48 = vmul.f32 0.2, %v3092_v51  ;;  %v9995_v42 = vld [vmem:[%s7999_s11 + $0xd8] sm:$0xff]  ;;  %vm3108_vm14 = vcmp.gt.f32.partialorder %v3092_v51, 0.0 }
 0x544   : > { %3171 = vmax.xlane.f32.xlu0 %v9975_v58  ;;  %12379 = vst [vmem:[#allocation192_spill] sm:$0xff] %v9995_v42  ;;  %vm2976_vm13 = vcmp.gt.f32.partialorder %v9995_v42, 0.0 }
 0x545   : > { %v7268_v21 = vpop.eup %7267  ;;  %v1201_v52 = vmul.f32 1.442695, %v1171_v7  ;;  %v3140_v5 = vsel %vm3108_vm14, %v3092_v51, %v3124_v48  ;;  %v12381_v7 = vld [vmem:[#allocation91_spill] sm:$0xff] }
 0x546   : > { %v9985_v23 = vmul.f32 %v7268_v21, %v9866_v10  ;;  %v3081_v32 = vadd.f32 %v9871_v28, %v12381_v7  ;;  %v12388_v10 = vld [vmem:[#allocation113_spill] sm:$0xff]  ;;  %v10050_v3 = vpop.xlane.xlu1 %2636 }
 0x547   : > { %7273 = vpow2.f32 %v1201_v52  ;;  %v10002_v52 = vsel %vm2974_vm12, %v3138_v55, -1e+09 }
 0x548   : > { %12377 = vst [vmem:[#allocation190_spill] sm:$0xff] %v9985_v23  ;;  %3175 = vmax.xlane.f32.xlu0 %v9989_v40  ;;  %1245 = vadd.xlane.f32.xlu1 %v9985_v23  ;;  %12380 = vst [vmem:[#allocation193_spill] sm:$0xff] %v10002_v52  ;;  %v3113_v55 = vmul.f32 0.2, %v3081_v32  ;;  %v10021_v40 = vld [vmem:[%s7999_s11 + $0x80] sm:$0xff]  ;;  %vm3097_vm3 = vcmp.gt.f32.partialorder %v3081_v32, 0.0 }
 0x549   : > { %v7270_v27 = vpop.eup %7269  ;;  %vm2965_vm6 = vcmp.gt.f32.partialorder %v10021_v40, 0.0 }
 0x54a   : > { %v9998_v21 = vmul.f32 %v7270_v27, %v9896_v60  ;;  %v10014_v27 = vsel %vm2976_vm13, %v3140_v5, -1e+09  ;;  %v3129_v5 = vsel %vm3097_vm3, %v3081_v32, %v3113_v55 }
 0x54b   : > { %12383 = vst [vmem:[#allocation194_spill] sm:$0xff] %v10014_v27 }
 0x54c   : > { %3179 = vmax.xlane.f32.xlu0 %v10002_v52  ;;  %1595 = vadd.xlane.f32.xlu1 %v9998_v21  ;;  %v12384_v52 = vld [vmem:[#allocation100_spill] sm:$0xff] }
 0x54d   : > { %v7272_v50 = vpop.eup %7271  ;;  %v3083_v51 = vadd.f32 %v9871_v28, %v12384_v52  ;;  %v10035_v52 = vsel %vm2965_vm6, %v3129_v5, -1e+09  ;;  %v12391_v5 = vld [vmem:[#allocation122_spill] sm:$0xff] }
 0x54e   : > { %v10010_v33 = vmul.f32 %v7272_v50, %v9896_v60  ;;  %v10031_v60 = vld [vmem:[%s7999_s11 + $0x90] sm:$0xff]  ;;  %v3089_v61 = vadd.f32 %v9871_v28, %v12391_v5  ;;  %12392 = vst [vmem:[#allocation122_spill] sm:$0xff] %v10050_v3  ;;  %v10064_v3 = vpop.xlane.xlu0 %2638 }
 0x54f   : > { %v3115_v50 = vmul.f32 0.2, %v3083_v51  ;;  %vm3099_vm10 = vcmp.gt.f32.partialorder %v3083_v51, 0.0  ;;  %vm12080_vm7 = vcmp.gt.f32.partialorder %v10031_v60, 0.0 }
 0x550   : > { %12382 = vst [vmem:[#allocation91_spill] sm:$0xff] %v10010_v33  ;;  %3183 = vmax.xlane.f32.xlu0 %v10014_v27  ;;  %2229 = vadd.xlane.f32.xlu1 %v10010_v33  ;;  %v12386_v27 = vld [vmem:[#allocation107_spill] sm:$0xff]  ;;  %vm3105_vm5 = vcmp.gt.f32.partialorder %v3089_v61, 0.0 }
 0x551   : > { %v7274_v48 = vpop.eup %7273  ;;  %v3085_v58 = vadd.f32 %v9871_v28, %v12386_v27  ;;  %12387 = vst [vmem:[#allocation107_spill] sm:$0xff] %v10035_v52  ;;  %v3131_v32 = vsel %vm3099_vm10, %v3083_v51, %v3115_v50  ;;  %v10059_v50 = vld [vmem:[%s7999_s11 + $0xb0] sm:$0xff] }
 0x552   : > { %v10024_v7 = vmul.f32 %v7274_v48, %v9922_v6  ;;  %v3087_v48 = vadd.f32 %v9871_v28, %v12388_v10  ;;  %v10042_v6 = vld [vmem:[%s7999_s11 + $0xa0] sm:$0xff]  ;;  %v10046_v27 = vsel %vm12080_vm7, %v3131_v32, -1e+09  ;;  %v3121_v32 = vmul.f32 0.2, %v3089_v61  ;;  %v12643_v40 = vld [vmem:[#allocation194_spill] sm:$0xff] }
 0x553   : > { %v3117_v55 = vmul.f32 0.2, %v3085_v58  ;;  %12389 = vst [vmem:[#allocation113_spill] sm:$0xff] %v10042_v6  ;;  %vm3101_vm0 = vcmp.gt.f32.partialorder %v3085_v58, 0.0  ;;  %12390 = vst [vmem:[#allocation195_spill] sm:$0xff] %v10046_v27  ;;  %vm2969_vm2 = vcmp.gt.f32.partialorder %v10042_v6, 0.0 }
 0x554   : > { %12385 = vst [vmem:[#allocation100_spill] sm:$0xff] %v10024_v7  ;;  %1249 = vadd.xlane.f32.xlu1 %v10024_v7  ;;  %v3119_v33 = vmul.f32 0.2, %v3087_v48  ;;  %vm3103_vm8 = vcmp.gt.f32.partialorder %v3087_v48, 0.0  ;;  %vm2971_vm1 = vcmp.gt.f32.partialorder %v10059_v50, 0.0  ;;  %v12410_v7 = vld [vmem:[#allocation73_spill] sm:$0xff] }
 0x555   : > { %v3133_v10 = vsel %vm3101_vm0, %v3085_v58, %v3117_v55  ;;  %v10074_v55 = vld [vmem:[%s7999_s11 + $0xc0] sm:$0xff] }
 0x556   : > { %v10056_v51 = vsel %vm2969_vm2, %v3133_v10, -1e+09  ;;  %v3135_v5 = vsel %vm3103_vm8, %v3087_v48, %v3119_v33  ;;  %12397 = vst [vmem:[#allocation198_spill] sm:$0xff] %v10074_v55  ;;  %v12398_v33 = vld [vmem:[#allocation74_spill] sm:$0xff]  ;;  %vm2973_vm3 = vcmp.gt.f32.partialorder %v10074_v55, 0.0  ;;  %vm12089_vm8 = vcmp.gt.f32.partialorder %v10164_v17, 0.0 }
 0x557   : > { %12393 = vst [vmem:[#allocation196_spill] sm:$0xff] %v10056_v51  ;;  %v10071_v58 = vsel %vm2971_vm1, %v3135_v5, -1e+09 }
 0x558   : > { %3161 = vmax.xlane.f32.xlu1 %v10035_v52  ;;  %v12394_v52 = vld [vmem:[#allocation133_spill] sm:$0xff]  ;;  %12396 = vst [vmem:[#allocation197_spill] sm:$0xff] %v10071_v58 }
 0x559   : > { %v3091_v35 = vadd.f32 %v9871_v28, %v12394_v52  ;;  %12395 = vst [vmem:[#allocation133_spill] sm:$0xff] %v10064_v3  ;;  %v3137_v52 = vsel %vm3105_vm5, %v3089_v61, %v3121_v32  ;;  %v10086_v3 = vld [vmem:[%s7999_s11 + $0xd0] sm:$0xff]  ;;  %v12401_v61 = vld [vmem:[#allocation75_spill] sm:$0xff] }
 0x55a   : > { %v10083_v48 = vsel %vm2973_vm3, %v3137_v52, -1e+09  ;;  %12400 = vst [vmem:[#allocation199_spill] sm:$0xff] %v10086_v3  ;;  %vm2975_vm10 = vcmp.gt.f32.partialorder %v10086_v3, 0.0  ;;  %v12412_v3 = vld [vmem:[#allocation25_spill] sm:$0xff] }
 0x55b   : > { %v3123_v10 = vmul.f32 0.2, %v3091_v35  ;;  %vm3107_vm14 = vcmp.gt.f32.partialorder %v3091_v35, 0.0  ;;  %12399 = vst [vmem:[#allocation74_spill] sm:$0xff] %v10083_v48 }
 0x55c   : > { %3165 = vmax.xlane.f32.xlu1 %v10046_v27  ;;  %v10066_v27 = vpop.xlane.xlu1 %1221 }
 0x55d   : > { %v3139_v6 = vsel %vm3107_vm14, %v3091_v35, %v3123_v10  ;;  %v12404_v35 = vld [vmem:[#allocation79_spill] sm:$0xff] }
 0x560   : > { %3169 = vmax.xlane.f32.xlu1 %v10056_v51  ;;  %v1568_v5 = vpop.xlane.xlu1 %1567 }
 0x561   : > { %v1598_v32 = vmax.f32 %v1568_v5, 1e-09 }
 0x563   : > { %7275 = vrcp.f32 %v1598_v32 }
 0x564   : > { %3173 = vmax.xlane.f32.xlu1 %v10071_v58  ;;  %v10095_v58 = vsel %vm2975_vm10, %v3139_v6, -1e+09 }
 0x565   : > { %v10077_v51 = vpop.xlane.xlu0 %1223  ;;  %12402 = vst [vmem:[#allocation75_spill] sm:$0xff] %v10095_v58 }
 0x566   : > { %4024 = vperm.xlu0 %7144, %v12398_v33  }
 0x568   : > { %3177 = vmax.xlane.f32.xlu1 %v10083_v48 }
 0x569   : > { %v10089_v11 = vpop.xlane.xlu0 %1227 }
 0x56a   : > { %4036 = vperm.xlu0 %7144, %v12401_v61  }
 0x56c   : > { %3181 = vmax.xlane.f32.xlu1 %v10095_v58 }
 0x56d   : > { %v1566_v52 = vpop.xlane.xlu0 %1565  ;;  %v7276_v16 = vpop.eup %7275 }
 0x56e   : > { %v1597_v12 = vmax.f32 %v1566_v52, 1e-09  ;;  %4044 = vperm.xlu0 %7144, %v12403_v57  }
 0x570   : > { %7277 = vrcp.f32 %v1597_v12  ;;  %v1630_v12 = vmul.f32 %v7276_v16, %v9591_v26  ;;  %v12417_v26 = vld [vmem:[#allocation37_spill] sm:$0xff] }
 0x571   : > { %v1572_v10 = vpop.xlane.xlu1 %1571 }
 0x572   : > { %4052 = vperm.xlu0 %7144, %v12404_v35   ;;  %v1600_v5 = vmax.f32 %v1572_v10, 1e-09  ;;  %v12411_v10 = vld [vmem:[#allocation85_spill] sm:$0xff] }
 0x574   : > { %7279 = vrcp.f32 %v1600_v5 }
 0x575   : > { %v10100_v48 = vpop.xlane.xlu0 %2199  ;;  %v10104_v52 = vpop.xlane.xlu1 %2201 }
 0x576   : > { %12405 = vst [vmem:[#allocation77_spill] sm:$0xff] %v10100_v48  ;;  %4060 = vperm.xlu0 %7144, %v12406_v47   ;;  %12408 = vst [vmem:[#allocation81_spill] sm:$0xff] %v10104_v52  ;;  %v12435_v52 = vld [vmem:[#allocation109_spill] sm:$0xff] }
 0x579   : > { %v1570_v42 = vpop.xlane.xlu0 %1569  ;;  %v10114_v5 = vpop.xlane.xlu1 %2205 }
 0x57a   : > { %v7278_v6 = vpop.eup %7277  ;;  %v1599_v62 = vmax.f32 %v1570_v42, 1e-09  ;;  %4068 = vperm.xlu0 %7144, %v12407_v29   ;;  %v12413_v42 = vld [vmem:[#allocation29_spill] sm:$0xff]  ;;  %12414 = vst [vmem:[#allocation73_spill] sm:$0xff] %v10114_v5 }
 0x57b   : > { %v1629_v32 = vmul.f32 %v7278_v6, %v9638_v2  ;;  %v12415_v2 = vld [vmem:[#allocation76_spill] sm:$0xff] }
 0x57c   : > { %7281 = vrcp.f32 %v1599_v62  ;;  %v12416_v62 = vld [vmem:[#allocation87_spill] sm:$0xff]  ;;  %12434 = vst [vmem:[#allocation76_spill] sm:$0xff] %v10164_v17 }
 0x57d   : > { %6158 = vmatprep.mubr.f32.mxu0 %v1629_v32  ;;  %v10108_v58 = vpop.xlane.xlu0 %2203  ;;  %4028 = vperm.xlu1 %7143, %v12410_v7   ;;  %v12418_v32 = vld [vmem:[#allocation78_spill] sm:$0xff] }
 0x57e   : > { %12409 = vst [vmem:[#allocation83_spill] sm:$0xff] %v10108_v58  ;;  %4076 = vperm.xlu0 %7144, %v12411_v10   ;;  %6159 = vmatmul.mubr.f32.vlgmr.msra.gmra.mrb[32].mxu0 %v1630_v12  ;;  %v7280_v16 = vpop.eup %7279 }
 0x57f   : > { %6637 = vmatpush3.bf16.msra.mxu0 %v12412_v3 }
 0x580   : > { %6639 = vmatprep.subr.bf16.mxu0 %v12413_v42 }
 0x581   : > { %v10116_v44 = vpop.xlane.xlu0 %1231  ;;  %4032 = vperm.xlu1 %7143, %v12415_v2  }
 0x582   : > { %4084 = vperm.xlu0 %7144, %v12416_v62   ;;  %v12419_v62 = vld [vmem:[#allocation38_spill] sm:$0xff] }
 0x583   : > { %6641 = vmatpush3.bf16.msra.mxu0 %v12413_v42  ;;  %v1632_v42 = vmul.f32 %v7280_v16, %v9646_v46  ;;  %v12424_v46 = vld [vmem:[#allocation52_spill] sm:$0xff] }
 0x584   : > { %6643 = vmatprep.subr.bf16.mxu0 %v12417_v26 }
 0x585   : > { %v1574_v6 = vpop.xlane.xlu0 %1573  ;;  %4040 = vperm.xlu1 %7143, %v12418_v32   ;;  %v10123_v12 = vpop.xlane.xlu1 %1225 }
 0x586   : > { %v7282_v3 = vpop.eup %7281  ;;  %v1601_v23 = vmax.f32 %v1574_v6, 1e-09  ;;  %7145 = vset.pattern.permute.xlu0 %v7864_v9  ;;  %v12422_v6 = vld [vmem:[#allocation40_spill] sm:$0xff] }
 0x587   : > { %6645 = vmatpush3.bf16.msra.mxu0 %v12417_v26  ;;  %v1631_v37 = vmul.f32 %v7282_v3, %v9672_v25  ;;  %v12423_v25 = vld [vmem:[#allocation82_spill] sm:$0xff] }
 0x588   : > { %7283 = vrcp.f32 %v1601_v23  ;;  %6647 = vmatprep.subr.bf16.mxu0 %v12419_v62 }
 0x589   : > { %v10129_v35 = vpop.xlane.xlu0 %2207  ;;  %4048 = vperm.xlu1 %7143, %v12421_v56   ;;  %6161 = vmatprep.mubr.f32.mxu0 %v1631_v37  ;;  %v1576_v5 = vpop.xlane.xlu1 %1575  ;;  %v12426_v37 = vld [vmem:[#allocation84_spill] sm:$0xff] }
 0x58a   : > { %12420 = vst [vmem:[#allocation85_spill] sm:$0xff] %v10129_v35  ;;  %v1602_v24 = vmax.f32 %v1576_v5, 1e-09  ;;  %6162 = vmatmul.mubr.f32.gmra.mrb[34].mxu0 %v1632_v42 }
 0x58b   : > { %6649 = vmatpush3.bf16.msra.mxu0 %v12419_v62 }
 0x58c   : > { %6651 = vmatprep.subr.bf16.mxu0 %v12422_v6  ;;  %7285 = vrcp.f32 %v1602_v24  ;;  %v12427_v24 = vld [vmem:[#allocation58_spill] sm:$0xff] }
 0x58d   : > { %v10134_v26 = vpop.xlane.xlu0 %1235  ;;  %4056 = vperm.xlu1 %7143, %v12423_v25   ;;  %v10139_v23 = vpop.xlane.xlu1 %2209 }
 0x58e   : > { %12425 = vst [vmem:[#allocation25_spill] sm:$0xff] %v10139_v23  ;;  %v12430_v23 = vld [vmem:[#allocation106_spill] sm:$0xff] }
 0x58f   : > { %6653 = vmatpush3.bf16.msra.mxu0 %v12422_v6  ;;  %v12429_v6 = vld [vmem:[#allocation86_spill] sm:$0xff]  ;;  %v3094_v55 = vadd.f32 %v9871_v28, %v12430_v23 }
 0x590   : > { %6655 = vmatprep.subr.bf16.mxu0 %v12424_v46 }
 0x591   : > { %v1578_v16 = vpop.xlane.xlu0 %1577  ;;  %4064 = vperm.xlu1 %7143, %v12426_v37   ;;  %v3126_v23 = vmul.f32 0.2, %v3094_v55  ;;  %vm3110_vm0 = vcmp.gt.f32.partialorder %v3094_v55, 0.0 }
 0x592   : > { %v7284_v5 = vpop.eup %7283  ;;  %v1603_v3 = vmax.f32 %v1578_v16, 1e-09  ;;  %v12432_v16 = vsub.s32 5, %v12352_v1  ;;  %v12437_v1 = vld [vmem:[#allocation89_spill] sm:$0xff] }
 0x593   : > { %6657 = vmatpush3.bf16.msra.mxu0 %v12424_v46  ;;  %v1633_v62 = vmul.f32 %v7284_v5, %v9712_v36  ;;  %v12431_v46 = vld [vmem:[#allocation64_spill] sm:$0xff] }
 0x594   : > { %7287 = vrcp.f32 %v1603_v3  ;;  %6659 = vmatprep.subr.bf16.mxu0 %v12427_v24  ;;  %v10158_v5 = vrot.slane %v12354_v31, %v12432_v16  ;;  %v3142_v16 = vsel %vm3110_vm0, %v3094_v55, %v3126_v23 }
 0x595   : > { %v10145_v42 = vpop.xlane.xlu0 %2211  ;;  %4072 = vperm.xlu1 %7143, %v12429_v6   ;;  %6164 = vmatprep.mubr.f32.mxu0 %v1633_v62  ;;  %v10148_v35 = vpop.xlane.xlu1 %1229  ;;  %v12433_v62 = vld [vmem:[#allocation88_spill] sm:$0xff] }
 0x596   : > { %12428 = vst [vmem:[#allocation29_spill] sm:$0xff] %v10145_v42  ;;  %v7286_v58 = vpop.eup %7285 }
 0x597   : > { %6661 = vmatpush3.bf16.msra.mxu0 %v12427_v24  ;;  %v1634_v36 = vmul.f32 %v7286_v58, %v9726_v19  ;;  %v3096_v24 = vadd.f32 %v9871_v28, %v12435_v52  ;;  %v12436_v19 = vld [vmem:[#allocation27_spill] sm:$0xff] }
 0x598   : > { %6663 = vmatprep.subr.bf16.mxu0 %v12431_v46  ;;  %v10174_v52 = vld [vmem:[%s7999_s11 + $0xf8] sm:$0xff] }
 0x599   : > { %v10160_v3 = vpop.xlane.xlu0 %1239  ;;  %4080 = vperm.xlu1 %7143, %v12433_v62   ;;  %v1580_v42 = vpop.xlane.xlu1 %1579  ;;  %6165 = vmatmul.mubr.f32.gmra.mrb[36].mxu0 %v1634_v36  ;;  %v3128_v31 = vmul.f32 0.2, %v3096_v24  ;;  %v3587_v62 = vadd.f32 %v10158_v5, %v12437_v1  ;;  %12438 = vst [vmem:[#allocation37_spill] sm:$0xff] %v10174_v52  ;;  %vm3112_vm5 = vcmp.gt.f32.partialorder %v3096_v24, 0.0  ;;  %vm12031_vm14 = vcmp.gt.f32.partialorder %v10174_v52, 0.0 }
 0x59a   : > { %v1604_v49 = vmax.f32 %v1580_v42, 1e-09 }
 0x59b   : > { %6665 = vmatpush3.bf16.msra.mxu0 %v12431_v46  ;;  %v10179_v46 = vsel %vm12089_vm8, %v3142_v16, -1e+09  ;;  %v3144_v1 = vsel %vm3112_vm5, %v3096_v24, %v3128_v31  ;;  %vm3603_vm0 = vcmp.gt.f32.partialorder %v3587_v62, 0.0 }
 0x59c   : > { %6667 = vmatprep.subr.bf16.mxu0 %v12436_v19  ;;  %7289 = vrcp.f32 %v1604_v49  ;;  %12439 = vst [vmem:[#allocation78_spill] sm:$0xff] %v10179_v46 }
 0x59d   : > { %v1582_v58 = vpop.xlane.xlu0 %1581  ;;  %7146 = vset.pattern.permute.xlu1 %v7864_v9  ;;  %v10181_v49 = vpop.xlane.xlu1 %2213  ;;  %v3619_v9 = vmul.f32 0.2, %v3587_v62 }
 0x59e   : > { %v7288_v38 = vpop.eup %7287  ;;  %v1605_v48 = vmax.f32 %v1582_v58, 1e-09 }
 0x59f   : > { %v1635_v42 = vmul.f32 %v7288_v38, %v9759_v0  ;;  %v10189_v0 = vsel %vm12031_vm14, %v3144_v1, -1e+09  ;;  %v3635_v36 = vsel %vm3603_vm0, %v3587_v62, %v3619_v9  ;;  %v12444_v9 = vld [vmem:[#allocation142_spill] sm:$0xff] }
 0x5a0   : > { %7291 = vrcp.f32 %v1605_v48  ;;  %12441 = vst [vmem:[#allocation80_spill] sm:$0xff] %v10189_v0  ;;  %v10198_v58 = vsel %vm12030_vm9, %v3635_v36, -1e+09  ;;  %v3093_v36 = vadd.f32 %v9871_v28, %v12444_v9  ;;  %v10218_v9 = vld [vmem:[%s7999_s11 + $0xe0] sm:$0xff] }
 0x5a1   : > { %3187 = vmax.xlane.f32.xlu0 %v10179_v46  ;;  %v10184_v55 = vpop.xlane.xlu0 %2215  ;;  %6167 = vmatprep.mubr.f32.mxu0 %v1635_v42  ;;  %12442 = vst [vmem:[#allocation40_spill] sm:$0xff] %v10198_v58  ;;  %vm2977_vm9 = vcmp.gt.f32.partialorder %v10218_v9, 0.0 }
 0x5a2   : > { %12440 = vst [vmem:[#allocation38_spill] sm:$0xff] %v10184_v55  ;;  %vm3109_vm5 = vcmp.gt.f32.partialorder %v3093_v36, 0.0 }
 0x5a5   : > { %3191 = vmax.xlane.f32.xlu0 %v10189_v0  ;;  %v10192_v38 = vpop.xlane.xlu0 %1243  ;;  %v10194_v48 = vpop.xlane.xlu1 %1233 }
 0x5a6   : > { %v7290_v23 = vpop.eup %7289 }
 0x5a7   : > { %v1636_v31 = vmul.f32 %v7290_v23, %v9784_v13 }
 0x5a9   : > { %3668 = vmax.xlane.f32.xlu0 %v10198_v58  ;;  %v1586_v24 = vpop.xlane.xlu0 %1585  ;;  %6168 = vmatmul.mubr.f32.gmra.mrb[38].mxu0 %v1636_v31  ;;  %v1584_v1 = vpop.xlane.xlu1 %1583  ;;  %v3125_v58 = vmul.f32 0.2, %v3093_v36 }
 0x5aa   : > { %v7292_v16 = vpop.eup %7291  ;;  %v1607_v42 = vmax.f32 %v1586_v24, 1e-09  ;;  %v1606_v0 = vmax.f32 %v1584_v1, 1e-09  ;;  %v12446_v24 = vld [vmem:[#allocation163_spill] sm:$0xff] }
 0x5ab   : > { %v1637_v46 = vmul.f32 %v7292_v16, %v9796_v43  ;;  %v3095_v31 = vadd.f32 %v9871_v28, %v12446_v24  ;;  %v12447_v28 = vld [vmem:[#allocation92_spill] sm:$0xff] }
 0x5ac   : > { %7293 = vrcp.f32 %v1607_v42  ;;  %v3586_v24 = vadd.f32 %v10158_v5, %v12447_v28 }
 0x5ad   : > { %7295 = vrcp.f32 %v1606_v0  ;;  %v10203_v62 = vpop.xlane.xlu0 %2219  ;;  %6170 = vmatprep.mubr.f32.mxu0 %v1637_v46  ;;  %v10207_v13 = vpop.xlane.xlu1 %2217  ;;  %v3127_v52 = vmul.f32 0.2, %v3095_v31  ;;  %vm3111_vm0 = vcmp.gt.f32.partialorder %v3095_v31, 0.0 }
 0x5ae   : > { %12443 = vst [vmem:[#allocation82_spill] sm:$0xff] %v10203_v62  ;;  %12445 = vst [vmem:[#allocation52_spill] sm:$0xff] %v10207_v13  ;;  %v3141_v13 = vsel %vm3109_vm5, %v3093_v36, %v3125_v58  ;;  %v3618_v36 = vmul.f32 0.2, %v3586_v24  ;;  %vm3602_vm5 = vcmp.gt.f32.partialorder %v3586_v24, 0.0 }
 0x5af   : > { %v3143_v58 = vsel %vm3111_vm0, %v3095_v31, %v3127_v52 }
 0x5b0   : > { %v3634_v52 = vsel %vm3602_vm5, %v3586_v24, %v3618_v36 }
 0x5b1   : > { %v10209_v23 = vpop.xlane.xlu0 %1247 }
 0x5b5   : > { %v1590_v1 = vpop.xlane.xlu0 %1589  ;;  %v10213_v53 = vpop.xlane.xlu1 %1237 }
 0x5b6   : > { %v7294_v43 = vpop.eup %7293  ;;  %v1609_v46 = vmax.f32 %v1590_v1, 1e-09 }
 0x5b7   : > { %v7296_v0 = vpop.eup %7295  ;;  %v1639_v16 = vmul.f32 %v7294_v43, %v9835_v34  ;;  %v10227_v34 = vsel %vm2977_vm9, %v3141_v13, -1e+09  ;;  %v12448_v43 = vld [vmem:[#allocation102_spill] sm:$0xff] }
 0x5b8   : > { %v1638_v42 = vmul.f32 %v7296_v0, %v9839_v39  ;;  %7297 = vrcp.f32 %v1609_v46  ;;  %v10230_v39 = vld [vmem:[%s7999_s11 + $0xf0] sm:$0xff]  ;;  %s7865_s11 = smov 96  }
 0x5b9   : > { %v10220_v17 = vpop.xlane.xlu0 %2223  ;;  %v1588_v62 = vpop.xlane.xlu1 %1587  ;;  %vm12053_vm14 = vcmp.gt.f32.partialorder %v10230_v39, 0.0 }
 0x5ba   : > { %6171 = vmatmul.mubr.f32.gmra.mrb[40].mxu0 %v1638_v42  ;;  %v1608_v55 = vmax.f32 %v1588_v62, 1e-09  ;;  %v3588_v62 = vadd.f32 %v10158_v5, %v12448_v43  ;;  %v10241_v13 = vsel %vm12053_vm14, %v3143_v58, -1e+09 }
 0x5bb   : > { %6173 = vmatprep.mubr.f32.mxu0 %v1639_v16 }
 0x5bc   : > { %7299 = vrcp.f32 %v1608_v55  ;;  %v3620_v31 = vmul.f32 0.2, %v3588_v62  ;;  %vm3604_vm0 = vcmp.gt.f32.partialorder %v3588_v62, 0.0 }
 0x5bd   : > { %v10232_v1 = vpop.xlane.xlu0 %1251  ;;  %3185 = vmax.xlane.f32.xlu1 %v10227_v34  ;;  %v10243_v0 = vpop.xlane.xlu1 %2221 }
 0x5be   : > { %v3636_v42 = vsel %vm3604_vm0, %v3588_v62, %v3620_v31 }
 0x5bf   : > { %4561 = vperm.xlu0 %7145, %v12423_v25   ;;  %v10251_v25 = vsel %vm2965_vm6, %v3634_v52, -1e+09  ;;  %v10259_v24 = vsel %vm12080_vm7, %v3636_v42, -1e+09 }
 0x5c0   : > { %12449 = vst [vmem:[#allocation84_spill] sm:$0xff] %v10251_v25  ;;  %12450 = vst [vmem:[#allocation58_spill] sm:$0xff] %v10259_v24 }
 0x5c1   : > { %v10245_v55 = vpop.xlane.xlu0 %3163  ;;  %3189 = vmax.xlane.f32.xlu1 %v10241_v13 }
 0x5c2   : > { %v7298_v28 = vpop.eup %7297 }
 0x5c3   : > { %4545 = vperm.xlu0 %7145, %v12418_v32   ;;  %v1641_v52 = vmul.f32 %v7298_v28, %v9876_v8 }
 0x5c5   : > { %v1594_v16 = vpop.xlane.xlu0 %1593  ;;  %3666 = vmax.xlane.f32.xlu1 %v10251_v25  ;;  %v10254_v46 = vpop.xlane.xlu1 %1241 }
 0x5c6   : > { %v7300_v58 = vpop.eup %7299  ;;  %v1611_v43 = vmax.f32 %v1594_v16, 1e-09  ;;  %v1253_v16 = vmax.f32 %v10066_v27, 1e-09 }
 0x5c7   : > { %4577 = vperm.xlu0 %7145, %v12429_v6   ;;  %v1640_v32 = vmul.f32 %v7300_v58, %v9890_v45  ;;  %v1254_v58 = vmax.f32 %v10077_v51, 1e-09  ;;  %v1258_v51 = vmax.f32 %v10116_v44, 1e-09  ;;  %v12659_v50 = vld [vmem:[#allocation58_spill] sm:$0xff] }
 0x5c8   : > { %7301 = vrcp.f32 %v1611_v43 }
 0x5c9   : > { %3670 = vmax.xlane.f32.xlu1 %v10259_v24  ;;  %v1592_v36 = vpop.xlane.xlu1 %1591  ;;  %6174 = vmatmul.mubr.f32.gmra.mrb[42].mxu0 %v1640_v32 }
 0x5ca   : > { %v1610_v25 = vmax.f32 %v1592_v36, 1e-09  ;;  %6176 = vmatprep.mubr.f32.mxu0 %v1641_v52  ;;  %v12453_v52 = vld [vmem:[#allocation161_spill] sm:$0xff] }
 0x5cb   : > { %4549 = vperm.xlu0 %7145, %v12403_v57  }
 0x5cc   : > { %7303 = vrcp.f32 %v1610_v25  ;;  %v1256_v25 = vmax.f32 %v10089_v11, 1e-09  ;;  %v1260_v11 = vmax.f32 %v10134_v26, 1e-09  ;;  %v1262_v26 = vmax.f32 %v10160_v3, 1e-09 }
 0x5cd   : > { %v10266_v6 = vpop.xlane.xlu1 %2225  ;;  %7305 = vrcp.f32 %v1253_v16  ;;  %v12454_v16 = vld [vmem:[#allocation97_spill] sm:$0xff] }
 0x5cf   : > { %4581 = vperm.xlu0 %7145, %v12411_v10   ;;  %v1255_v10 = vmax.f32 %v10123_v12, 1e-09 }
 0x5d2   : > { %v7302_v31 = vpop.eup %7301 }
 0x5d3   : > { %v1643_v28 = vmul.f32 %v7302_v31, %v9928_v4  ;;  %v12451_v4 = vld [vmem:[#allocation98_spill] sm:$0xff] }
 0x5d4   : > { %v3589_v27 = vadd.f32 %v10158_v5, %v12451_v4 }
 0x5d5   : > { %v10268_v62 = vpop.xlane.xlu1 %1245 }
 0x5d6   : > { %v7304_v45 = vpop.eup %7303  ;;  %v3621_v43 = vmul.f32 0.2, %v3589_v27  ;;  %vm3605_vm5 = vcmp.gt.f32.partialorder %v3589_v27, 0.0  ;;  %v1265_v4 = vmax.f32 %v10268_v62, 1e-09 }
 0x5d7   : > { %v1642_v42 = vmul.f32 %v7304_v45, %v9945_v54  ;;  %v1257_v54 = vmax.f32 %v10148_v35, 1e-09  ;;  %v7306_v12 = vpop.eup %7305 }
 0x5d8   : > { %v3637_v31 = vsel %vm3605_vm5, %v3589_v27, %v3621_v43  ;;  %v12456_v27 = vld [vmem:[#allocation30_spill] sm:$0xff] }
 0x5d9   : > { %v1596_v8 = vpop.xlane.xlu1 %1595  ;;  %6177 = vmatmul.mubr.f32.gmra.mrb[44].mxu0 %v1642_v42  ;;  %v3592_v42 = vadd.f32 %v10158_v5, %v12454_v16  ;;  %v10301_v3 = vsel %vm2968_vm4, %v3637_v31, -1e+09  ;;  %v12462_v16 = vld [vmem:[#allocation42_spill] sm:$0xff] }
 0x5da   : > { %v1612_v57 = vmax.f32 %v1596_v8, 1e-09  ;;  %4529 = vperm.xlu1 %7146, %v12398_v33   ;;  %6179 = vmatprep.mubr.f32.mxu0 %v1643_v28  ;;  %v1259_v33 = vmax.f32 %v10194_v48, 1e-09  ;;  %v1285_v48 = vmul.f32 %v7306_v12, %v12453_v52  ;;  %v1263_v28 = vmax.f32 %v10254_v46, 1e-09 }
 0x5db   : > { %v3624_v46 = vmul.f32 0.2, %v3592_v42  ;;  %vm3608_vm5 = vcmp.gt.f32.partialorder %v3592_v42, 0.0 }
 0x5dc   : > { %7307 = vrcp.f32 %v1612_v57 }
 0x5dd   : > { %7309 = vrcp.f32 %v1254_v58  ;;  %v12455_v58 = vld [vmem:[#allocation110_spill] sm:$0xff]  ;;  %v3640_v62 = vsel %vm3608_vm5, %v3592_v42, %v3624_v46 }
 0x5de   : > { %4533 = vperm.xlu1 %7146, %v12410_v7   ;;  %7311 = vrcp.f32 %v1255_v10  ;;  %v12452_v7 = vld [vmem:[#allocation104_spill] sm:$0xff]  ;;  %v3593_v57 = vadd.f32 %v10158_v5, %v12455_v58  ;;  %v12468_v46 = vld [vmem:[#allocation114_spill] sm:$0xff] }
 0x5df   : > { %7313 = vrcp.f32 %v1256_v25  ;;  %v3591_v35 = vadd.f32 %v10158_v5, %v12452_v7  ;;  %v1264_v25 = vmax.f32 %v10192_v38, 1e-09 }
 0x5e0   : > { %7315 = vrcp.f32 %v1257_v54  ;;  %v3625_v43 = vmul.f32 0.2, %v3593_v57 }
 0x5e1   : > { %7317 = vrcp.f32 %v1258_v51  ;;  %vm3607_vm0 = vcmp.gt.f32.partialorder %v3591_v35, 0.0 }
 0x5e2   : > { %4565 = vperm.xlu1 %7146, %v12406_v47   ;;  %7319 = vrcp.f32 %v1259_v33  ;;  %v1261_v47 = vmax.f32 %v10213_v53, 1e-09  ;;  %v12457_v33 = vld [vmem:[#allocation101_spill] sm:$0xff] }
 0x5e3   : > { %7321 = vrcp.f32 %v1260_v11 }
 0x5e4   : > { %7323 = vrcp.f32 %v1261_v47 }
 0x5e5   : > { %7325 = vrcp.f32 %v1262_v26  ;;  %v12461_v26 = vld [vmem:[#allocation77_spill] sm:$0xff] }
 0x5e6   : > { %v7308_v32 = vpop.eup %7307  ;;  %4537 = vperm.xlu1 %7146, %v12415_v2   ;;  %v3623_v2 = vmul.f32 0.2, %v3591_v35  ;;  %7327 = vrcp.f32 %v1263_v28  ;;  %v12465_v28 = vld [vmem:[#allocation105_spill] sm:$0xff] }
 0x5e7   : > { %v1644_v36 = vmul.f32 %v7308_v32, %v9998_v21  ;;  %v7310_v44 = vpop.eup %7309  ;;  %v10295_v21 = vpop.xlane.xlu1 %2229  ;;  %7329 = vrcp.f32 %v1264_v25 }
 0x5e8   : > { %v7312_v45 = vpop.eup %7311  ;;  %v1286_v8 = vmul.f32 %v7310_v44, %v9613_v41  ;;  %v3639_v41 = vsel %vm3607_vm0, %v3591_v35, %v3623_v2  ;;  %v10323_v32 = vpop.xlane.xlu0 %2227  ;;  %vm3609_vm0 = vcmp.gt.f32.partialorder %v3593_v57, 0.0  ;;  %7331 = vrcp.f32 %v1265_v4  ;;  %v12458_v35 = vld [vmem:[#allocation39_spill] sm:$0xff]  ;;  %v12470_v4 = vld [vmem:[#allocation137_spill] sm:$0xff] }
 0x5e9   : > { %6180 = vmatmul.mubr.f32.gmra.mrb[46].mxu0 %v1644_v36  ;;  %v7314_v53 = vpop.eup %7313  ;;  %v10332_v44 = vsel %vm2971_vm1, %v3640_v62, -1e+09  ;;  %v3641_v52 = vsel %vm3609_vm0, %v3593_v57, %v3625_v43  ;;  %v2231_v2 = vmax.f32 %v12461_v26, 1e-09  ;;  %v12466_v57 = vld [vmem:[#allocation81_spill] sm:$0xff] }
 0x5ea   : > { %4569 = vperm.xlu1 %7146, %v12426_v37   ;;  %6214 = vmatprep.mubr.f32.mxu0 %v1285_v48  ;;  %v1287_v37 = vmul.f32 %v7312_v45, %v9715_v18  ;;  %v7316_v10 = vpop.eup %7315  ;;  %v1288_v54 = vmul.f32 %v7314_v53, %v9627_v15  ;;  %v1266_v15 = vmax.f32 %v10209_v23, 1e-09  ;;  %v12459_v23 = vld [vmem:[#allocation116_spill] sm:$0xff]  ;;  %12460 = vst [vmem:[#allocation86_spill] sm:$0xff] %v10332_v44 }
 0x5eb   : > { %v7318_v18 = vpop.eup %7317  ;;  %v1250_v51 = vpop.xlane.xlu1 %1249  ;;  %v1289_v38 = vmul.f32 %v7316_v10, %v9768_v30  ;;  %v3595_v36 = vadd.f32 %v10158_v5, %v12459_v23  ;;  %v2232_v10 = vmax.f32 %v12466_v57, 1e-09  ;;  %v12477_v23 = vld [vmem:[#allocation73_spill] sm:$0xff]  ;;  %v12483_v57 = vld [vmem:[#allocation56_spill] sm:$0xff] }
 0x5ec   : > { %v7320_v12 = vpop.eup %7319  ;;  %v1290_v30 = vmul.f32 %v7318_v18, %v9699_v63  ;;  %v1267_v7 = vmax.f32 %v1250_v51, 1e-09  ;;  %7333 = vrcp.f32 %v1266_v15  ;;  %v1268_v63 = vmax.f32 %v10232_v1, 1e-09  ;;  %v10344_v1 = vpop.xlane.xlu0 %3167  ;;  %v12469_v18 = vld [vmem:[#allocation88_spill] sm:$0xff]  ;;  %v12473_v15 = vld [vmem:[#allocation127_spill] sm:$0xff] }
 0x5ed   : > { %6215 = vmatmul.mubr.f32.vlgmr.msra.gmra.mrb[32].mxu0 %v1286_v8  ;;  %v7322_v11 = vpop.eup %7321  ;;  %v1291_v47 = vmul.f32 %v7320_v12, %v9823_v14  ;;  %v10348_v8 = vsel %vm2972_vm11, %v3641_v52, -1e+09  ;;  %v3627_v58 = vmul.f32 0.2, %v3595_v36  ;;  %vm3611_vm0 = vcmp.gt.f32.partialorder %v3595_v36, 0.0  ;;  %v12472_v12 = vld [vmem:[#allocation47_spill] sm:$0xff] }
 0x5ee   : > { %6669 = vmatpush3.bf16.msra.mxu0 %v12436_v19  ;;  %3672 = vmax.xlane.f32.xlu0 %v10301_v3  ;;  %v10315_v19 = vsel %vm2970_vm15, %v3639_v41, -1e+09  ;;  %v1292_v31 = vmul.f32 %v7322_v11, %v9741_v59  ;;  %7335 = vrcp.f32 %v1267_v7  ;;  %v3596_v59 = vadd.f32 %v10158_v5, %v12465_v28  ;;  %v12467_v41 = vld [vmem:[#allocation155_spill] sm:$0xff]  ;;  %v12482_v28 = vld [vmem:[#allocation85_spill] sm:$0xff] }
 0x5ef   : > { %4541 = vperm.xlu1 %7146, %v12401_v61   ;;  %6217 = vmatprep.mubr.f32.mxu0 %v1287_v37  ;;  %v3594_v61 = vadd.f32 %v10158_v5, %v12457_v33  ;;  %v10341_v14 = vpop.xlane.xlu1 %3161  ;;  %7337 = vrcp.f32 %v1268_v63  ;;  %v3597_v62 = vadd.f32 %v10158_v5, %v12473_v15  ;;  %v3643_v63 = vsel %vm3611_vm0, %v3595_v36, %v3627_v58 }
 0x5f0   : > { %6671 = vmatprep.subr.bf16.mxu0 %v12456_v27  ;;  %7339 = vrcp.f32 %v2231_v2  ;;  %v3628_v7 = vmul.f32 0.2, %v3596_v59  ;;  %v10378_v26 = vpop.xlane.xlu0 %3171  ;;  %v12480_v2 = vld [vmem:[#allocation79_spill] sm:$0xff]  ;;  %v10386_v58 = vsel %vm2974_vm12, %v3643_v63, -1e+09  ;;  %v12493_v63 = vld [vmem:[#allocation62_spill] sm:$0xff] }
 0x5f1   : > { %6218 = vmatmul.mubr.f32.gmra.mrb[34].mxu0 %v1288_v54  ;;  %v3626_v48 = vmul.f32 0.2, %v3594_v61  ;;  %vm3610_vm5 = vcmp.gt.f32.partialorder %v3594_v61, 0.0  ;;  %v2640_v54 = vsub.f32 %v12468_v46, %v12467_v41  ;;  %7341 = vrcp.f32 %v2232_v10 }
 0x5f2   : > { %6673 = vmatpush3.bf16.msra.mxu0 %v12456_v27  ;;  %3676 = vmax.xlane.f32.xlu0 %v10315_v19  ;;  %v3629_v10 = vmul.f32 0.2, %v3597_v62  ;;  %vm3613_vm0 = vcmp.gt.f32.partialorder %v3597_v62, 0.0 }
 0x5f3   : > { %4573 = vperm.xlu1 %7146, %v12407_v29   ;;  %6220 = vmatprep.mubr.f32.mxu0 %v1289_v38  ;;  %v7324_v29 = vpop.eup %7323  ;;  %v3642_v25 = vsel %vm3610_vm5, %v3594_v61, %v3626_v48  ;;  %v12471_v38 = vld [vmem:[#allocation83_spill] sm:$0xff]  ;;  %vm3612_vm5 = vcmp.gt.f32.partialorder %v3596_v59, 0.0  ;;  %v2656_v52 = vmul.f32 1.442695, %v2640_v54  ;;  %v12478_v48 = vld [vmem:[#allocation117_spill] sm:$0xff] }
 0x5f4   : > { %6675 = vmatprep.subr.bf16.mxu0 %v12458_v35  ;;  %v7326_v45 = vpop.eup %7325  ;;  %v2233_v33 = vmax.f32 %v12471_v38, 1e-09  ;;  %v10367_v43 = vsel %vm2973_vm3, %v3642_v25, -1e+09  ;;  %v12485_v25 = vld [vmem:[#allocation190_spill] sm:$0xff]  ;;  %v3644_v46 = vsel %vm3612_vm5, %v3596_v59, %v3628_v7  ;;  %v12488_v38 = vld [vmem:[#allocation157_spill] sm:$0xff] }
 0x5f5   : > { %6221 = vmatmul.mubr.f32.gmra.mrb[36].mxu0 %v1290_v30  ;;  %v7328_v37 = vpop.eup %7327  ;;  %v1294_v27 = vmul.f32 %v7326_v45, %v12470_v4  ;;  %12475 = vst [vmem:[#allocation106_spill] sm:$0xff] %v10367_v43  ;;  %v12476_v30 = vld [vmem:[#allocation93_spill] sm:$0xff]  ;;  %v12491_v59 = vld [vmem:[#allocation178_spill] sm:$0xff] }
 0x5f6   : > { %6677 = vmatpush3.bf16.msra.mxu0 %v12458_v35  ;;  %3678 = vmax.xlane.f32.xlu0 %v10332_v44  ;;  %v7330_v51 = vpop.eup %7329  ;;  %v1295_v11 = vmul.f32 %v7328_v37, %v12476_v30  ;;  %7343 = vrcp.f32 %v2233_v33  ;;  %v2235_v37 = vmax.f32 %v12482_v28, 1e-09  ;;  %v12489_v33 = vld [vmem:[#allocation118_spill] sm:$0xff]  ;;  %v12490_v30 = vld [vmem:[#allocation87_spill] sm:$0xff] }
 0x5f7   : > { %4553 = vperm.xlu1 %7146, %v12421_v56   ;;  %6223 = vmatprep.mubr.f32.mxu0 %v1291_v47  ;;  %v12464_v56 = vld [vmem:[#allocation180_spill] sm:$0xff]  ;;  %v7332_v35 = vpop.eup %7331  ;;  %v2234_v47 = vmax.f32 %v12477_v23, 1e-09 }
 0x5f8   : > { %6679 = vmatprep.subr.bf16.mxu0 %v12462_v16  ;;  %v1293_v53 = vmul.f32 %v7324_v29, %v12464_v56  ;;  %v10371_v29 = vpop.xlane.xlu1 %3165  ;;  %v1297_v41 = vmul.f32 %v7332_v35, %v12485_v25  ;;  %v12492_v35 = vld [vmem:[#allocation29_spill] sm:$0xff]  ;;  %v12498_v25 = vld [vmem:[#allocation135_spill] sm:$0xff] }
 0x5f9   : > { %6224 = vmatmul.mubr.f32.gmra.mrb[38].mxu0 %v1292_v31  ;;  %v12479_v31 = vld [vmem:[#allocation134_spill] sm:$0xff]  ;;  %7345 = vrcp.f32 %v2234_v47  ;;  %v2237_v23 = vmax.f32 %v12492_v35, 1e-09  ;;  %v12506_v35 = vld [vmem:[#allocation123_spill] sm:$0xff] }
 0x5fa   : > { %6681 = vmatpush3.bf16.msra.mxu0 %v12462_v16  ;;  %3680 = vmax.xlane.f32.xlu0 %v10348_v8  ;;  %v2641_v45 = vsub.f32 %v12479_v31, %v12478_v48  ;;  %v12481_v16 = vld [vmem:[#allocation143_spill] sm:$0xff]  ;;  %7347 = vpow2.f32 %v2656_v52  ;;  %v10402_v48 = vpop.xlane.xlu0 %3175  ;;  %v10406_v31 = vsel %vm2975_vm10, %v3644_v46, -1e+09  ;;  %v12499_v46 = vld [vmem:[#allocation68_spill] sm:$0xff] }
 0x5fb   : > { %4585 = vperm.xlu1 %7146, %v12469_v18   ;;  %6226 = vmatprep.mubr.f32.mxu0 %v1293_v53  ;;  %v1296_v56 = vmul.f32 %v7330_v51, %v12481_v16  ;;  %v7334_v53 = vpop.eup %7333  ;;  %v12486_v18 = vld [vmem:[#allocation25_spill] sm:$0xff]  ;;  %7349 = vrcp.f32 %v2235_v37  ;;  %12495 = vst [vmem:[#allocation64_spill] sm:$0xff] %v10406_v31  ;;  %v3645_v16 = vsel %vm3613_vm0, %v3597_v62, %v3629_v10 }
 0x5fc   : > { %6683 = vmatprep.subr.bf16.mxu0 %v12472_v12  ;;  %v7336_v54 = vpop.eup %7335  ;;  %v2236_v4 = vmax.f32 %v12486_v18, 1e-09  ;;  %v2658_v15 = vmul.f32 1.442695, %v2641_v45  ;;  %v10399_v47 = vpop.xlane.xlu1 %3169  ;;  %v12496_v45 = vld [vmem:[#allocation100_spill] sm:$0xff]  ;;  %v12501_v18 = vld [vmem:[#allocation38_spill] sm:$0xff] }
 0x5fd   : > { %6227 = vmatmul.mubr.f32.gmra.mrb[40].mxu0 %v1294_v27  ;;  %v12487_v27 = vld [vmem:[#allocation108_spill] sm:$0xff]  ;;  %v7338_v7 = vpop.eup %7337 }
 0x5fe   : > { %6685 = vmatpush3.bf16.msra.mxu0 %v12472_v12  ;;  %3682 = vmax.xlane.f32.xlu0 %v10367_v43  ;;  %v3598_v51 = vadd.f32 %v10158_v5, %v12487_v27  ;;  %v2642_v12 = vsub.f32 %v12489_v33, %v12488_v38  ;;  %7351 = vrcp.f32 %v2236_v4  ;;  %v10420_v27 = vsel %vm2976_vm13, %v3645_v16, -1e+09  ;;  %v12503_v38 = vld [vmem:[#allocation165_spill] sm:$0xff] }
 0x5ff   : > { %4557 = vperm.xlu1 %7146, %v12480_v2   ;;  %6229 = vmatprep.mubr.f32.mxu0 %v1295_v11  ;;  %v1298_v11 = vmul.f32 %v7334_v53, %v12491_v59  ;;  %v1299_v2 = vmul.f32 %v7336_v54, %v12496_v45  ;;  %v2238_v53 = vmax.f32 %v10181_v49, 1e-09  ;;  %7353 = vpow2.f32 %v2658_v15  ;;  %v12500_v54 = vld [vmem:[#allocation183_spill] sm:$0xff]  ;;  %v12504_v15 = vld [vmem:[#allocation52_spill] sm:$0xff]  ;;  %v10431_v45 = vpop.xlane.xlu0 %3179  ;;  %v12508_v16 = vld [vmem:[#allocation121_spill] sm:$0xff] }
 0x600   : > { %6687 = vmatprep.subr.bf16.mxu0 %v12483_v57  ;;  %vm3614_vm5 = vcmp.gt.f32.partialorder %v3598_v51, 0.0  ;;  %v3630_v28 = vmul.f32 0.2, %v3598_v51  ;;  %v2660_v37 = vmul.f32 1.442695, %v2642_v12  ;;  %v1300_v62 = vmul.f32 %v7338_v7, %v12500_v54  ;;  %v10424_v59 = vpop.xlane.xlu1 %3173  ;;  %v12505_v7 = vld [vmem:[#allocation160_spill] sm:$0xff] }
 0x601   : > { %6230 = vmatmul.mubr.f32.gmra.mrb[42].mxu0 %v1296_v56  ;;  %v7340_v56 = vpop.eup %7339  ;;  %7355 = vrcp.f32 %v2237_v23  ;;  %v2239_v49 = vmax.f32 %v12501_v18, 1e-09  ;;  %v2644_v23 = vsub.f32 %v12506_v35, %v12505_v7  ;;  %v2242_v54 = vmax.f32 %v10243_v0, 1e-09  ;;  %v12513_v18 = vld [vmem:[#allocation141_spill] sm:$0xff]  ;;  %v12516_v0 = vld [vmem:[#allocation159_spill] sm:$0xff] }
 0x602   : > { %6689 = vmatpush3.bf16.msra.mxu0 %v12483_v57  ;;  %3684 = vmax.xlane.f32.xlu0 %v10386_v58  ;;  %v12497_v57 = vld [vmem:[#allocation119_spill] sm:$0xff]  ;;  %v7342_v10 = vpop.eup %7341  ;;  %v2263_v33 = vmul.f32 %v7340_v56, %v12503_v38  ;;  %7357 = vrcp.f32 %v2238_v53 }
 0x603   : > { %4589 = vperm.xlu1 %7146, %v12490_v30   ;;  %6232 = vmatprep.mubr.f32.mxu0 %v1297_v41  ;;  %v2643_v41 = vsub.f32 %v12498_v25, %v12497_v57  ;;  %v7344_v12 = vpop.eup %7343  ;;  %v2240_v30 = vmax.f32 %v12504_v15, 1e-09  ;;  %7359 = vpow2.f32 %v2660_v37  ;;  %v2264_v56 = vmul.f32 %v7342_v10, %v12508_v16  ;;  %v12509_v57 = vld [vmem:[#allocation82_spill] sm:$0xff]  ;;  %v12514_v38 = vld [vmem:[#allocation31_spill] sm:$0xff] }
 0x604   : > { %6691 = vmatprep.subr.bf16.mxu0 %v12493_v63  ;;  %v7346_v53 = vpop.eup %7345  ;;  %7361 = vrcp.f32 %v2239_v49  ;;  %v2241_v25 = vmax.f32 %v12509_v57, 1e-09  ;;  %v12512_v10 = vld [vmem:[#allocation126_spill] sm:$0xff]  ;;  %v2244_v57 = vmax.f32 %v10266_v6, 1e-09 }
 0x605   : > { %6233 = vmatmul.mubr.f32.gmra.mrb[44].mxu0 %v1298_v11  ;;  %v3646_v11 = vsel %vm3614_vm5, %v3598_v51, %v3630_v28  ;;  %v12511_v28 = vld [vmem:[#allocation125_spill] sm:$0xff]  ;;  %7363 = vrcp.f32 %v2240_v30  ;;  %v2645_v49 = vsub.f32 %v12513_v18, %v12512_v10  ;;  %v10449_v30 = vpop.xlane.xlu1 %3177 }
 0x606   : > { %6693 = vmatpush3.bf16.msra.mxu0 %v12493_v63  ;;  %3686 = vmax.xlane.f32.xlu0 %v10406_v31  ;;  %v2662_v63 = vmul.f32 1.442695, %v2643_v41  ;;  %v10438_v51 = vsel %vm2977_vm9, %v3646_v11, -1e+09  ;;  %v2265_v37 = vmul.f32 %v7344_v12, %v12511_v28  ;;  %v2243_v12 = vmax.f32 %v10220_v17, 1e-09 }
 0x607   : > { %6235 = vmatprep.mubr.f32.mxu0 %v1299_v2  ;;  %6695 = vmatprep.subr.bf16.mxu0 %v12499_v46  ;;  %v12507_v2 = vld [vmem:[#allocation28_spill] sm:$0xff]  ;;  %12510 = vst [vmem:[#allocation109_spill] sm:$0xff] %v10438_v51  ;;  %v12521_v28 = vld [vmem:[#allocation41_spill] sm:$0xff] }
 0x608   : > { %7365 = vpow2.f32 %v2662_v63  ;;  %v12518_v63 = vld [vmem:[#allocation129_spill] sm:$0xff]  ;;  %v12519_v17 = vld [vmem:[#allocation164_spill] sm:$0xff] }
 0x609   : > { %6236 = vmatmul.mubr.f32.gmra.mrb[46].mxu0 %v1300_v62  ;;  %v2664_v62 = vmul.f32 1.442695, %v2644_v23  ;;  %7367 = vrcp.f32 %v2241_v25  ;;  %v10454_v23 = vpop.xlane.xlu0 %3183 }
 0x60a   : > { %6697 = vmatpush3.bf16.msra.mxu0 %v12499_v46  ;;  %3688 = vmax.xlane.f32.xlu0 %v10420_v27  ;;  %v7348_v46 = vpop.eup %7347  ;;  %7369 = vrcp.f32 %v2242_v54  ;;  %v12523_v54 = vld [vmem:[#allocation162_spill] sm:$0xff] }
 0x60b   : > { %6270 = vmatprep.mubr.f32.mxu0 %v2263_v33  ;;  %6827 = vmatprep.subr.bf16.mxu0 %v12507_v2  ;;  %v7350_v41 = vpop.eup %7349  ;;  %v12515_v33 = vld [vmem:[#allocation124_spill] sm:$0xff]  ;;  %v10452_v7 = vmul.f32 %v7348_v46, %v12516_v0  ;;  %7371 = vpow2.f32 %v2664_v62  ;;  %v2666_v46 = vmul.f32 1.442695, %v2645_v49  ;;  %v2246_v49 = vmax.f32 %v10295_v21, 1e-09 }
 0x60c   : > { %v2266_v15 = vmul.f32 %v7346_v53, %v12515_v33  ;;  %v7352_v11 = vpop.eup %7351  ;;  %v2267_v16 = vmul.f32 %v7350_v41, %v12518_v63  ;;  %v12520_v53 = vld [vmem:[#allocation128_spill] sm:$0xff]  ;;  %7373 = vrcp.f32 %v2243_v12  ;;  %v2245_v41 = vmax.f32 %v10323_v32, 1e-09 }
 0x60d   : > { %6271 = vmatmul.mubr.f32.vlgmr.msra.gmra.mrb[32].mxu0 %v2264_v56  ;;  %12517 = vst [vmem:[#allocation27_spill] sm:$0xff] %v10452_v7  ;;  %v7354_v35 = vpop.eup %7353  ;;  %v2646_v25 = vsub.f32 %v12520_v53, %v12519_v17  ;;  %v12525_v62 = vld [vmem:[#allocation136_spill] sm:$0xff]  ;;  %7375 = vrcp.f32 %v2244_v57  ;;  %v12528_v17 = vld [vmem:[#allocation46_spill] sm:$0xff] }
 0x60e   : > { %6829 = vmatpush3.bf16.msra.mxu0 %v12507_v2  ;;  %3690 = vmax.xlane.f32.xlu0 %v10438_v51  ;;  %v7356_v56 = vpop.eup %7355  ;;  %v10466_v6 = vmul.f32 %v7354_v35, %v12523_v54  ;;  %7377 = vpow2.f32 %v2666_v46  ;;  %v12527_v12 = vld [vmem:[#allocation144_spill] sm:$0xff]  ;;  %v12530_v57 = vld [vmem:[#allocation166_spill] sm:$0xff] }
 0x60f   : > { %6273 = vmatprep.mubr.f32.mxu0 %v2265_v37  ;;  %6831 = vmatprep.subr.bf16.mxu0 %v12514_v38  ;;  %v12522_v37 = vld [vmem:[#allocation131_spill] sm:$0xff]  ;;  %v7358_v18 = vpop.eup %7357  ;;  %v2269_v0 = vmul.f32 %v7356_v56, %v12525_v62  ;;  %v2668_v32 = vmul.f32 1.442695, %v2646_v25  ;;  %v12529_v53 = vld [vmem:[#allocation140_spill] sm:$0xff]  ;;  %7379 = vrcp.f32 %v2245_v41 }
 0x610   : > { %v2268_v10 = vmul.f32 %v7352_v11, %v12522_v37  ;;  %12524 = vst [vmem:[#allocation89_spill] sm:$0xff] %v10466_v6  ;;  %v7360_v33 = vpop.eup %7359  ;;  %v12526_v11 = vld [vmem:[#allocation171_spill] sm:$0xff]  ;;  %v2270_v56 = vmul.f32 %v7358_v18, %v12529_v53  ;;  %v12532_v54 = vld [vmem:[#allocation176_spill] sm:$0xff]  ;;  %7381 = vrcp.f32 %v2246_v49 }
 0x611   : > { %6274 = vmatmul.mubr.f32.gmra.mrb[34].mxu0 %v2266_v15  ;;  %v10468_v15 = vpop.permute.xlu0 %4024  ;;  %v7362_v63 = vpop.eup %7361  ;;  %v2647_v35 = vsub.f32 %v12527_v12, %v12526_v11  ;;  %v10481_v21 = vmul.f32 %v7360_v33, %v12530_v57  ;;  %v12533_v25 = vld [vmem:[#allocation95_spill] sm:$0xff]  ;;  %7383 = vpow2.f32 %v2668_v32  ;;  %v12534_v18 = vld [vmem:[#allocation120_spill] sm:$0xff] }
 0x612   : > { %6833 = vmatpush3.bf16.msra.mxu0 %v12514_v38  ;;  %2704 = vadd.xlane.f32.xlu0 %v10452_v7  ;;  %v7364_v37 = vpop.eup %7363  ;;  %v2271_v62 = vmul.f32 %v7362_v63, %v12532_v54  ;;  %v3590_v46 = vadd.f32 %v10158_v5, %v12533_v25  ;;  %v12536_v12 = vld [vmem:[#allocation51_spill] sm:$0xff]  ;;  %v12537_v63 = vld [vmem:[#allocation150_spill] sm:$0xff]  ;;  %v12543_v38 = vld [vmem:[#allocation148_spill] sm:$0xff] }
 0x613   : > { %6276 = vmatprep.mubr.f32.mxu0 %v2267_v16  ;;  %6835 = vmatprep.subr.bf16.mxu0 %v12521_v28  ;;  %v10472_v16 = vpop.xlane.xlu1 %3181  ;;  %12531 = vst [vmem:[#allocation142_spill] sm:$0xff] %v10481_v21  ;;  %v2670_v11 = vmul.f32 1.442695, %v2647_v35  ;;  %v2272_v53 = vmul.f32 %v7364_v37, %v12537_v63  ;;  %v12538_v57 = vld [vmem:[#allocation115_spill] sm:$0xff]  ;;  %v12540_v25 = vld [vmem:[#allocation138_spill] sm:$0xff]  ;;  %v12545_v2 = vld [vmem:[#allocation184_spill] sm:$0xff] }
 0x614   : > { %v3599_v32 = vadd.f32 %v10158_v5, %v12540_v25  ;;  %vm3606_vm0 = vcmp.gt.f32.partialorder %v3590_v46, 0.0  ;;  %v3622_v37 = vmul.f32 0.2, %v3590_v46  ;;  %v12542_v63 = vld [vmem:[#allocation175_spill] sm:$0xff]  ;;  %v12546_v51 = vld [vmem:[#allocation168_spill] sm:$0xff] }
 0x615   : > { %6277 = vmatmul.mubr.f32.gmra.mrb[36].mxu0 %v2268_v10  ;;  %v7366_v10 = vpop.eup %7365  ;;  %v10490_v33 = vpop.permute.xlu0 %4036  ;;  %7385 = vpow2.f32 %v2670_v11 }
 0x616   : > { %6837 = vmatpush3.bf16.msra.mxu0 %v12521_v28  ;;  %2706 = vadd.xlane.f32.xlu0 %v10466_v6  ;;  %v7368_v28 = vpop.eup %7367  ;;  %v10497_v54 = vmul.f32 %v7366_v10, %v12538_v57  ;;  %v2649_v10 = vsub.f32 %v12543_v38, %v12542_v63  ;;  %v12544_v57 = vld [vmem:[#allocation57_spill] sm:$0xff]  ;;  %vm3615_vm5 = vcmp.gt.f32.partialorder %v3599_v32, 0.0  ;;  %v12549_v38 = vld [vmem:[#allocation111_spill] sm:$0xff] }
 0x617   : > { %6279 = vmatprep.mubr.f32.mxu0 %v2269_v0  ;;  %6839 = vmatprep.subr.bf16.mxu0 %v12528_v17  ;;  %v12535_v0 = vld [vmem:[#allocation132_spill] sm:$0xff]  ;;  %v7370_v49 = vpop.eup %7369 }
 0x618   : > { %v2648_v41 = vsub.f32 %v12535_v0, %v12534_v18  ;;  %12539 = vst [vmem:[#allocation163_spill] sm:$0xff] %v10497_v54  ;;  %v12541_v18 = vld [vmem:[#allocation146_spill] sm:$0xff]  ;;  %v2274_v25 = vmul.f32 %v7370_v49, %v12545_v2  ;;  %v3638_v2 = vsel %vm3606_vm0, %v3590_v46, %v3622_v37  ;;  %v12551_v49 = vld [vmem:[#allocation139_spill] sm:$0xff]  ;;  %v2674_v63 = vmul.f32 1.442695, %v2649_v10 }
 0x619   : > { %6280 = vmatmul.mubr.f32.gmra.mrb[38].mxu0 %v2270_v56  ;;  %v10494_v56 = vpop.permute.xlu1 %4028  ;;  %v2273_v35 = vmul.f32 %v7368_v28, %v12541_v18  ;;  %v10511_v31 = vpop.permute.xlu0 %4044  ;;  %v12556_v46 = vld [vmem:[#allocation94_spill] sm:$0xff] }
 0x61a   : > { %6841 = vmatpush3.bf16.msra.mxu0 %v12528_v17  ;;  %2708 = vadd.xlane.f32.xlu0 %v10481_v21  ;;  %v7372_v17 = vpop.eup %7371 }
 0x61b   : > { %6282 = vmatprep.mubr.f32.mxu0 %v2271_v62  ;;  %6843 = vmatprep.subr.bf16.mxu0 %v12536_v12  ;;  %v7374_v0 = vpop.eup %7373  ;;  %v2672_v62 = vmul.f32 1.442695, %v2648_v41  ;;  %v10509_v28 = vmul.f32 %v7372_v17, %v12546_v51  ;;  %v3600_v51 = vadd.f32 %v10158_v5, %v12549_v38  ;;  %v12550_v17 = vld [vmem:[#allocation169_spill] sm:$0xff]  ;;  %v12557_v38 = vld [vmem:[#allocation147_spill] sm:$0xff] }
 0x61d   : > { %6283 = vmatmul.mubr.f32.gmra.mrb[40].mxu0 %v2272_v53  ;;  %v7376_v53 = vpop.eup %7375  ;;  %12547 = vst [vmem:[#allocation92_spill] sm:$0xff] %v10509_v28  ;;  %v10514_v43 = vpop.permute.xlu1 %4032  ;;  %7387 = vpow2.f32 %v2672_v62  ;;  %v3601_v62 = vadd.f32 %v10158_v5, %v12557_v38  ;;  %vm3616_vm0 = vcmp.gt.f32.partialorder %v3600_v51, 0.0  ;;  %v12562_v5 = vld [vmem:[#allocation91_spill] sm:$0xff]  ;;  %v12568_v38 = vld [vmem:[#allocation112_spill] sm:$0xff] }
 0x61e   : > { %6845 = vmatpush3.bf16.msra.mxu0 %v12536_v12  ;;  %2710 = vadd.xlane.f32.xlu0 %v10497_v54  ;;  %v7378_v18 = vpop.eup %7377  ;;  %v3631_v12 = vmul.f32 0.2, %v3599_v32  ;;  %v12548_v54 = vld [vmem:[#allocation90_spill] sm:$0xff]  ;;  %7389 = vpow2.f32 %v2674_v63 }
 0x61f   : > { %6285 = vmatprep.mubr.f32.mxu0 %v2273_v35  ;;  %6847 = vmatprep.subr.bf16.mxu0 %v12544_v57  ;;  %v2275_v41 = vmul.f32 %v7374_v0, %v12548_v54  ;;  %v7380_v11 = vpop.eup %7379  ;;  %v2650_v35 = vsub.f32 %v12551_v49, %v12550_v17  ;;  %v12552_v54 = vld [vmem:[#allocation63_spill] sm:$0xff]  ;;  %v12553_v0 = vld [vmem:[#allocation96_spill] sm:$0xff]  ;;  %v12561_v17 = vld [vmem:[#allocation153_spill] sm:$0xff] }
 0x620   : > { %v7382_v21 = vpop.eup %7381  ;;  %v2277_v37 = vmul.f32 %v7380_v11, %v12556_v46  ;;  %v3647_v6 = vsel %vm3615_vm5, %v3599_v32, %v3631_v12  ;;  %v10539_v11 = vpop.permute.xlu0 %4052  ;;  %vm3617_vm5 = vcmp.gt.f32.partialorder %v3601_v62, 0.0 }
 0x621   : > { %6286 = vmatmul.mubr.f32.gmra.mrb[42].mxu0 %v2274_v25  ;;  %v2276_v25 = vmul.f32 %v7376_v53, %v12553_v0  ;;  %v3632_v53 = vmul.f32 0.2, %v3600_v51  ;;  %v2278_v12 = vmul.f32 %v7382_v21, %v12562_v5  ;;  %v10543_v32 = vpop.permute.xlu1 %4040  ;;  %v12563_v0 = vld [vmem:[#allocation69_spill] sm:$0xff]  ;;  %v12571_v21 = vld [vmem:[#allocation76_spill] sm:$0xff]  ;;  %v3633_v5 = vmul.f32 0.2, %v3601_v62 }
 0x622   : > { %6849 = vmatpush3.bf16.msra.mxu0 %v12544_v57  ;;  %2712 = vadd.xlane.f32.xlu0 %v10509_v28  ;;  %v12554_v57 = vld [vmem:[#allocation167_spill] sm:$0xff]  ;;  %v7384_v28 = vpop.eup %7383 }
 0x623   : > { %6288 = vmatprep.mubr.f32.mxu0 %v2275_v41  ;;  %6851 = vmatprep.subr.bf16.mxu0 %v12552_v54  ;;  %v10526_v44 = vmul.f32 %v7378_v18, %v12554_v57  ;;  %v10535_v41 = vsel %vm2969_vm2, %v3638_v2, -1e+09  ;;  %v2676_v57 = vmul.f32 1.442695, %v2650_v35  ;;  %v12560_v18 = vld [vmem:[#allocation152_spill] sm:$0xff]  ;;  %v12564_v2 = vld [vmem:[#allocation170_spill] sm:$0xff]  ;;  %v7386_v46 = vpop.eup %7385 }
 0x624   : > { %12559 = vst [vmem:[#allocation98_spill] sm:$0xff] %v10535_v41  ;;  %v2651_v49 = vsub.f32 %v12561_v17, %v12560_v18  ;;  %v12566_v35 = vld [vmem:[#allocation24_spill] sm:$0xff]  ;;  %v12569_v18 = vld [vmem:[#allocation174_spill] sm:$0xff]  ;;  %v12570_v17 = vld [vmem:[#allocation145_spill] sm:$0xff] }
 0x625   : > { %12555 = vst [vmem:[#allocation102_spill] sm:$0xff] %v10526_v44  ;;  %6289 = vmatmul.mubr.f32.gmra.mrb[44].mxu0 %v2276_v25  ;;  %v10547_v25 = vmul.f32 %v7384_v28, %v12564_v2  ;;  %v12567_v63 = vsub.s32 6, %v12566_v35  ;;  %v3648_v28 = vsel %vm3616_vm0, %v3600_v51, %v3632_v53  ;;  %7391 = vpow2.f32 %v2676_v57  ;;  %v10573_v51 = vpop.permute.xlu1 %4048 }
 0x626   : > { %6853 = vmatpush3.bf16.msra.mxu0 %v12552_v54  ;;  %2714 = vadd.xlane.f32.xlu0 %v10526_v44  ;;  %v2652_v44 = vsub.f32 %v12570_v17, %v12569_v18  ;;  %v2678_v2 = vmul.f32 1.442695, %v2651_v49  ;;  %v3649_v49 = vsel %vm3617_vm5, %v3601_v62, %v3633_v5 }
 0x627   : > { %3674 = vmax.xlane.f32.xlu1 %v10535_v41  ;;  %6291 = vmatprep.mubr.f32.mxu0 %v2277_v37  ;;  %12565 = vst [vmem:[#allocation104_spill] sm:$0xff] %v10547_v25  ;;  %v10552_v54 = vrot.slane %v12568_v38, %v12567_v63  ;;  %v10560_v37 = vsel %vm12089_vm8, %v3647_v6, -1e+09  ;;  %v7388_v17 = vpop.eup %7387  ;;  %v12575_v6 = vld [vmem:[#allocation185_spill] sm:$0xff]  ;;  %v12576_v41 = vld [vmem:[#allocation156_spill] sm:$0xff] }
 0x628   : > { %6855 = vmatprep.subr.bf16.mxu0 %v12563_v0  ;;  %12572 = vst [vmem:[#allocation161_spill] sm:$0xff] %v10560_v37  ;;  %v2653_v7 = vsub.f32 %v12576_v41, %v12575_v6  ;;  %7393 = vpow2.f32 %v2678_v2  ;;  %v7390_v41 = vpop.eup %7389  ;;  %v12580_v6 = vld [vmem:[#allocation37_spill] sm:$0xff]  ;;  %v12583_v2 = vld [vmem:[#allocation122_spill] sm:$0xff] }
 0x629   : > { %6292 = vmatmul.mubr.f32.gmra.mrb[46].mxu0 %v2278_v12  ;;  %v4091_v63 = vadd.f32 %v10552_v54, %v10468_v15  ;;  %v12573_v12 = vld [vmem:[#allocation130_spill] sm:$0xff]  ;;  %v10578_v15 = vsel %vm12053_vm14, %v3648_v28, -1e+09  ;;  %v4092_v57 = vadd.f32 %v10552_v54, %v10494_v56  ;;  %vm12581_vm14 = vcmp.gt.f32.partialorder %v12580_v6, 0.0 }
 0x62a   : > { %6857 = vmatpush3.bf16.msra.mxu0 %v12563_v0  ;;  %2716 = vadd.xlane.f32.xlu0 %v10547_v25  ;;  %v10567_v18 = vmul.f32 %v7386_v46, %v12573_v12  ;;  %v10569_v0 = vpop.permute.xlu0 %4060  ;;  %v2680_v25 = vmul.f32 1.442695, %v2652_v44  ;;  %12577 = vst [vmem:[#allocation110_spill] sm:$0xff] %v10578_v15  ;;  %v12578_v44 = vld [vmem:[#allocation173_spill] sm:$0xff]  ;;  %v2682_v12 = vmul.f32 1.442695, %v2653_v7  ;;  %v4093_v62 = vadd.f32 %v10552_v54, %v10514_v43 }
 0x62b   : > { %3692 = vmax.xlane.f32.xlu1 %v10560_v37  ;;  %v4123_v53 = vmul.f32 0.2, %v4091_v63  ;;  %v10584_v46 = vmul.f32 %v7388_v17, %v12578_v44  ;;  %vm4107_vm0 = vcmp.gt.f32.partialorder %v4091_v63, 0.0  ;;  %v10589_v28 = vsel %vm12581_vm14, %v3649_v49, -1e+09  ;;  %v12585_v7 = vld [vmem:[#allocation172_spill] sm:$0xff] }
 0x62c   : > { %12574 = vst [vmem:[#allocation97_spill] sm:$0xff] %v10567_v18  ;;  %7395 = vpow2.f32 %v2680_v25  ;;  %12582 = vst [vmem:[#allocation101_spill] sm:$0xff] %v10589_v28  ;;  %v10598_v25 = vpop.permute.xlu1 %4056  ;;  %v10601_v17 = vmul.f32 %v7390_v41, %v12585_v7  ;;  %vm4108_vm5 = vcmp.gt.f32.partialorder %v4092_v57, 0.0  ;;  %v12587_v44 = vld [vmem:[#allocation133_spill] sm:$0xff]  ;;  %vm4109_vm14 = vcmp.gt.f32.partialorder %v4093_v62, 0.0 }
 0x62d   : > { %12579 = vst [vmem:[#allocation30_spill] sm:$0xff] %v10584_v46  ;;  %v4139_v5 = vsel %vm4107_vm0, %v4091_v63, %v4123_v53  ;;  %7397 = vpow2.f32 %v2682_v12  ;;  %v4094_v63 = vadd.f32 %v10552_v54, %v10490_v33  ;;  %v4125_v53 = vmul.f32 0.2, %v4093_v62  ;;  %v12593_v33 = vld [vmem:[#allocation182_spill] sm:$0xff] }
 0x62e   : > { %2718 = vadd.xlane.f32.xlu0 %v10567_v18  ;;  %v12584_v18 = vld [vmem:[#allocation158_spill] sm:$0xff]  ;;  %v10593_v56 = vpop.permute.xlu0 %4068  ;;  %12586 = vst [vmem:[#allocation39_spill] sm:$0xff] %v10601_v17  ;;  %vm12594_vm0 = vcmp.gt.f32.partialorder %v12593_v33, 0.0 }
 0x62f   : > { %3694 = vmax.xlane.f32.xlu1 %v10578_v15  ;;  %v2654_v37 = vsub.f32 %v12584_v18, %v12583_v2  ;;  %v4124_v15 = vmul.f32 0.2, %v4092_v57  ;;  %v7392_v49 = vpop.eup %7391  ;;  %v10608_v18 = vsel %vm2965_vm6, %v4139_v5, -1e+09  ;;  %v12590_v2 = vld [vmem:[#allocation149_spill] sm:$0xff] }
 0x630   : > { %12589 = vst [vmem:[#allocation116_spill] sm:$0xff] %v10608_v18  ;;  %v10614_v7 = vmul.f32 %v7392_v49, %v12590_v2  ;;  %v4141_v49 = vsel %vm4109_vm14, %v4093_v62, %v4125_v53  ;;  %v12596_v2 = vld [vmem:[#allocation177_spill] sm:$0xff] }
 0x631   : > { %v2684_v43 = vmul.f32 1.442695, %v2654_v37  ;;  %v4140_v41 = vsel %vm4108_vm5, %v4092_v57, %v4124_v15  ;;  %v4126_v15 = vmul.f32 0.2, %v4094_v63  ;;  %v4095_v57 = vadd.f32 %v10552_v54, %v10543_v32 }
 0x632   : > { %2720 = vadd.xlane.f32.xlu0 %v10584_v46  ;;  %v12588_v46 = vld [vmem:[#allocation154_spill] sm:$0xff]  ;;  %12591 = vst [vmem:[#allocation77_spill] sm:$0xff] %v10614_v7  ;;  %v10616_v12 = vpop.permute.xlu0 %4076  ;;  %v10625_v37 = vsel %vm12594_vm0, %v4140_v41, -1e+09  ;;  %vm4110_vm5 = vcmp.gt.f32.partialorder %v4094_v63, 0.0  ;;  %v4096_v32 = vadd.f32 %v10552_v54, %v10511_v31 }
 0x633   : > { %3696 = vmax.xlane.f32.xlu1 %v10589_v28  ;;  %v2655_v24 = vsub.f32 %v12588_v46, %v12587_v44  ;;  %v7394_v46 = vpop.eup %7393  ;;  %v10620_v28 = vpop.permute.xlu1 %4064  ;;  %12595 = vst [vmem:[#allocation42_spill] sm:$0xff] %v10625_v37  ;;  %7399 = vpow2.f32 %v2684_v43  ;;  %v10638_v43 = vsel %vm12080_vm7, %v4141_v49, -1e+09  ;;  %v4127_v53 = vmul.f32 0.2, %v4095_v57 }
 0x634   : > { %12599 = vst [vmem:[#allocation180_spill] sm:$0xff] %v10638_v43  ;;  %v4142_v41 = vsel %vm4110_vm5, %v4094_v63, %v4126_v15  ;;  %vm4111_vm14 = vcmp.gt.f32.partialorder %v4095_v57, 0.0  ;;  %v4097_v63 = vadd.f32 %v10552_v54, %v10573_v51  ;;  %vm4112_vm0 = vcmp.gt.f32.partialorder %v4096_v32, 0.0 }
 0x635   : > { %v2686_v44 = vmul.f32 1.442695, %v2655_v24  ;;  %v10653_v31 = vsel %vm2968_vm4, %v4142_v41, -1e+09  ;;  %v12606_v41 = vld [vmem:[#allocation188_spill] sm:$0xff] }
 0x636   : > { %2722 = vadd.xlane.f32.xlu0 %v10601_v17  ;;  %v12592_v17 = vld [vmem:[#allocation107_spill] sm:$0xff]  ;;  %v7396_v24 = vpop.eup %7395  ;;  %v10642_v62 = vpop.permute.xlu0 %4084  ;;  %12602 = vst [vmem:[#allocation81_spill] sm:$0xff] %v10653_v31  ;;  %vm4113_vm5 = vcmp.gt.f32.partialorder %v4097_v63, 0.0 }
 0x637   : > { %4171 = vmax.xlane.f32.xlu1 %v10608_v18  ;;  %v3193_v5 = vsub.f32 %v12592_v17, %v10341_v14  ;;  %v10631_v18 = vmul.f32 %v7394_v46, %v12596_v2  ;;  %v12598_v14 = vld [vmem:[#allocation186_spill] sm:$0xff]  ;;  %7401 = vpow2.f32 %v2686_v44  ;;  %v7398_v46 = vpop.eup %7397  ;;  %v10645_v2 = vpop.permute.xlu1 %4072  ;;  %v12603_v44 = vld [vmem:[#allocation195_spill] sm:$0xff] }
 0x638   : > { %v3194_v17 = vsub.f32 %v12598_v14, %v10245_v55  ;;  %v12600_v55 = vld [vmem:[#allocation179_spill] sm:$0xff]  ;;  %v3195_v49 = vsub.f32 %v12603_v44, %v10371_v29 }
 0x639   : > { %12597 = vst [vmem:[#allocation99_spill] sm:$0xff] %v10631_v18 }
 0x63a   : > { %2724 = vadd.xlane.f32.xlu0 %v10614_v7  ;;  %v3209_v7 = vmul.f32 1.442695, %v3193_v5  ;;  %v10648_v5 = vmul.f32 %v7396_v24, %v12600_v55  ;;  %v3211_v14 = vmul.f32 1.442695, %v3194_v17  ;;  %v10659_v15 = vpop.xlane.xlu0 %3187  ;;  %v4143_v24 = vsel %vm4111_vm14, %v4095_v57, %v4127_v53  ;;  %v12604_v17 = vld [vmem:[#allocation151_spill] sm:$0xff] }
 0x63b   : > { %4173 = vmax.xlane.f32.xlu1 %v10625_v37  ;;  %v10672_v29 = vsel %vm2969_vm2, %v4143_v24, -1e+09  ;;  %v3213_v51 = vmul.f32 1.442695, %v3195_v49  ;;  %v4098_v57 = vadd.f32 %v10552_v54, %v10539_v11  ;;  %v4129_v53 = vmul.f32 0.2, %v4097_v63 }
 0x63c   : > { %12601 = vst [vmem:[#allocation105_spill] sm:$0xff] %v10648_v5  ;;  %7403 = vpow2.f32 %v3209_v7  ;;  %v10663_v7 = vmul.f32 %v7398_v46, %v12604_v17  ;;  %12607 = vst [vmem:[#allocation114_spill] sm:$0xff] %v10672_v29 }
 0x63d   : > { %v7400_v55 = vpop.eup %7399  ;;  %7405 = vpow2.f32 %v3211_v14  ;;  %v12608_v14 = vld [vmem:[#allocation187_spill] sm:$0xff]  ;;  %v4130_v11 = vmul.f32 0.2, %v4098_v57  ;;  %vm4114_vm14 = vcmp.gt.f32.partialorder %v4098_v57, 0.0 }
 0x63e   : > { %2726 = vadd.xlane.f32.xlu0 %v10631_v18  ;;  %v4128_v18 = vmul.f32 0.2, %v4096_v32  ;;  %12605 = vst [vmem:[#allocation155_spill] sm:$0xff] %v10663_v7  ;;  %v10678_v44 = vmul.f32 %v7400_v55, %v12608_v14  ;;  %v10680_v17 = vpop.xlane.xlu0 %3191  ;;  %7407 = vpow2.f32 %v3213_v51  ;;  %v12611_v14 = vld [vmem:[#allocation181_spill] sm:$0xff] }
 0x63f   : > { %4175 = vmax.xlane.f32.xlu1 %v10638_v43  ;;  %v10667_v43 = vpop.permute.xlu1 %4080 }
 0x640   : > { %v4144_v46 = vsel %vm4112_vm0, %v4096_v32, %v4128_v18  ;;  %12609 = vst [vmem:[#allocation88_spill] sm:$0xff] %v10678_v44  ;;  %v4099_v18 = vadd.f32 %v10552_v54, %v10598_v25  ;;  %v4145_v32 = vsel %vm4113_vm5, %v4097_v63, %v4129_v53  ;;  %v4100_v63 = vadd.f32 %v10552_v54, %v10569_v0 }
 0x641   : > { %v10685_v49 = vsel %vm2970_vm15, %v4144_v46, -1e+09  ;;  %v10703_v51 = vsel %vm2971_vm1, %v4145_v32, -1e+09  ;;  %vm12616_vm5 = vcmp.gt.f32.partialorder %v12593_v33, 0.0 }
 0x642   : > { %2728 = vadd.xlane.f32.xlu0 %v10648_v5  ;;  %v3196_v5 = vsub.f32 %v12606_v41, %v10344_v1  ;;  %v7402_v1 = vpop.eup %7401  ;;  %12610 = vst [vmem:[#allocation137_spill] sm:$0xff] %v10685_v49  ;;  %12614 = vst [vmem:[#allocation47_spill] sm:$0xff] %v10703_v51  ;;  %v4131_v53 = vmul.f32 0.2, %v4099_v18  ;;  %vm4115_vm0 = vcmp.gt.f32.partialorder %v4099_v18, 0.0 }
 0x643   : > { %4177 = vmax.xlane.f32.xlu1 %v10653_v31  ;;  %v12619_v31 = vsub.s32 7, %v12566_v35 }
 0x644   : > { %v3215_v41 = vmul.f32 1.442695, %v3196_v5  ;;  %v12613_v5 = vmov 0.0  }
 0x645   : > { %v10698_v46 = vsel %vm2965_vm6, 1.0, %v12613_v5  ;;  %v10718_v32 = vsel %vm12616_vm5, 1.0, %v12613_v5  ;;  %v10872_v22 = vsel %vm2969_vm2, 1.0, %v12613_v5 }
 0x646   : > { %2730 = vadd.xlane.f32.xlu0 %v10663_v7  ;;  %v7404_v55 = vpop.eup %7403  ;;  %v10693_v7 = vmul.f32 %v7402_v1, %v12611_v14  ;;  %7409 = vpow2.f32 %v3215_v41  ;;  %v10709_v1 = vpop.xlane.xlu0 %3668  ;;  %v4146_v14 = vsel %vm4114_vm14, %v4098_v57, %v4130_v11  ;;  %v12617_v41 = vld [vmem:[#allocation189_spill] sm:$0xff]  ;;  %v4132_v11 = vmul.f32 0.2, %v4100_v63 }
 0x647   : > { %4179 = vmax.xlane.f32.xlu1 %v10672_v29  ;;  %v10725_v0 = vsel %vm2972_vm11, %v4146_v14, -1e+09  ;;  %v4147_v29 = vsel %vm4115_vm0, %v4099_v18, %v4131_v53  ;;  %vm4116_vm14 = vcmp.gt.f32.partialorder %v4100_v63, 0.0 }
 0x648   : > { %12612 = vst [vmem:[#allocation83_spill] sm:$0xff] %v10693_v7  ;;  %12618 = vst [vmem:[#allocation198_spill] sm:$0xff] %v10725_v0  ;;  %v10749_v35 = vsel %vm2973_vm3, %v4147_v29, -1e+09  ;;  %v4148_v18 = vsel %vm4116_vm14, %v4100_v63, %v4132_v11  ;;  %v4103_v11 = vadd.f32 %v10552_v54, %v10645_v2 }
 0x649   : > { %12622 = vst [vmem:[#allocation117_spill] sm:$0xff] %v10749_v35 }
 0x64a   : > { %2732 = vadd.xlane.f32.xlu0 %v10678_v44  ;;  %v10687_v24 = vpop.xlane.xlu1 %3185  ;;  %v7406_v44 = vpop.eup %7405  ;;  %v4135_v2 = vmul.f32 0.2, %v4103_v11 }
 0x64b   : > { %4181 = vmax.xlane.f32.xlu1 %v10685_v49  ;;  %v10713_v49 = vmul.f32 %v7404_v55, %v10698_v46  ;;  %v4101_v55 = vadd.f32 %v10552_v54, %v10620_v28  ;;  %v7408_v14 = vpop.eup %7407 }
 0x64d   : > { %12615 = vst [vmem:[#allocation127_spill] sm:$0xff] %v10713_v49  ;;  %vm4117_vm0 = vcmp.gt.f32.partialorder %v4101_v55, 0.0 }
 0x64e   : > { %2734 = vadd.xlane.f32.xlu0 %v10693_v7  ;;  %v10705_v25 = vpop.xlane.xlu1 %3189  ;;  %v3198_v7 = vsub.f32 %v12617_v41, %v10378_v26  ;;  %v10735_v26 = vrot.slane %v12568_v38, %v12619_v31  ;;  %v10738_v41 = vmul.f32 %v7406_v44, %v10718_v32  ;;  %v4102_v31 = vadd.f32 %v10552_v54, %v10593_v56 }
 0x64f   : > { %4183 = vmax.xlane.f32.xlu1 %v10703_v51  ;;  %v4562_v51 = vpop.permute.xlu0 %4561  ;;  %v4133_v44 = vmul.f32 0.2, %v4101_v55  ;;  %v10767_v56 = vsel %vm2974_vm12, %v4148_v18, -1e+09 }
 0x650   : > { %12620 = vst [vmem:[#allocation93_spill] sm:$0xff] %v10738_v41  ;;  %v3219_v28 = vmul.f32 1.442695, %v3198_v7  ;;  %v4604_v37 = vadd.f32 %v10735_v26, %v4562_v51  ;;  %v7410_v7 = vpop.eup %7409  ;;  %v10762_v51 = vsel %vm2968_vm4, 1.0, %v12613_v5  ;;  %12624 = vst [vmem:[#allocation79_spill] sm:$0xff] %v10767_v56  ;;  %vm4118_vm14 = vcmp.gt.f32.partialorder %v4102_v31, 0.0 }
 0x651   : > { %v4134_v63 = vmul.f32 0.2, %v4102_v31 }
 0x652   : > { %3257 = vadd.xlane.f32.xlu0 %v10713_v49  ;;  %v10727_v57 = vpop.xlane.xlu1 %3666  ;;  %v10743_v49 = vsel %vm12080_vm7, 1.0, %v12613_v5  ;;  %7411 = vpow2.f32 %v3219_v28  ;;  %v4636_v29 = vmul.f32 0.2, %v4604_v37  ;;  %vm4620_vm5 = vcmp.gt.f32.partialorder %v4604_v37, 0.0 }
 0x653   : > { %4185 = vmax.xlane.f32.xlu1 %v10725_v0  ;;  %12621 = vst [vmem:[#allocation73_spill] sm:$0xff] %v10743_v49  ;;  %v10757_v53 = vmul.f32 %v7408_v14, %v10743_v49  ;;  %v4149_v14 = vsel %vm4117_vm0, %v4101_v55, %v4133_v44  ;;  %v4104_v0 = vadd.f32 %v10552_v54, %v10616_v12  ;;  %vm4119_vm0 = vcmp.gt.f32.partialorder %v4103_v11, 0.0 }
 0x654   : > { %v10778_v28 = vsel %vm2975_vm10, %v4149_v14, -1e+09  ;;  %v4150_v44 = vsel %vm4118_vm14, %v4102_v31, %v4134_v63  ;;  %v12628_v14 = vld [vmem:[#allocation191_spill] sm:$0xff]  ;;  %v4105_v31 = vadd.f32 %v10552_v54, %v10667_v43  ;;  %v4151_v63 = vsel %vm4119_vm0, %v4103_v11, %v4135_v2 }
 0x655   : > { %12623 = vst [vmem:[#allocation134_spill] sm:$0xff] %v10757_v53  ;;  %12626 = vst [vmem:[#allocation85_spill] sm:$0xff] %v10778_v28  ;;  %v10793_v12 = vsel %vm2976_vm13, %v4150_v44, -1e+09  ;;  %vm4120_vm14 = vcmp.gt.f32.partialorder %v4104_v0, 0.0  ;;  %v10804_v44 = vpop.permute.xlu0 %4545 }
 0x656   : > { %3259 = vadd.xlane.f32.xlu0 %v10738_v41  ;;  %v10751_v38 = vpop.xlane.xlu1 %3670  ;;  %v10813_v11 = vsel %vm2977_vm9, %v4151_v63, -1e+09 }
 0x657   : > { %4187 = vmax.xlane.f32.xlu1 %v10749_v35  ;;  %v10773_v35 = vmul.f32 %v7410_v7, %v10762_v51 }
 0x659   : > { %12625 = vst [vmem:[#allocation143_spill] sm:$0xff] %v10773_v35 }
 0x65a   : > { %3261 = vadd.xlane.f32.xlu0 %v10757_v53  ;;  %v4530_v41 = vpop.permute.xlu1 %4529  ;;  %v4652_v53 = vsel %vm4620_vm5, %v4604_v37, %v4636_v29  ;;  %v4136_v29 = vmul.f32 0.2, %v4104_v0  ;;  %vm12630_vm5 = vcmp.gt.f32.partialorder %v12593_v33, 0.0  ;;  %v4106_v33 = vadd.f32 %v10552_v54, %v10642_v62 }
 0x65b   : > { %4189 = vmax.xlane.f32.xlu1 %v10767_v56  ;;  %v3200_v56 = vsub.f32 %v12628_v14, %v10402_v48  ;;  %v10809_v14 = vsel %vm2970_vm15, 1.0, %v12613_v5  ;;  %v4596_v54 = vadd.f32 %v10735_v26, %v4530_v41 }
 0x65c   : > { %v4152_v2 = vsel %vm4120_vm14, %v4104_v0, %v4136_v29  ;;  %vm4122_vm0 = vcmp.gt.f32.partialorder %v4106_v33, 0.0  ;;  %v12633_v29 = vld [vmem:[#allocation193_spill] sm:$0xff]  ;;  %vm12634_vm14 = vcmp.gt.f32.partialorder %v10230_v39, 0.0 }
 0x65d   : > { %v3223_v43 = vmul.f32 1.442695, %v3200_v56  ;;  %v10824_v56 = vsel %vm12089_vm8, %v4152_v2, -1e+09  ;;  %vm12638_vm8 = vcmp.gt.f32.partialorder %v12580_v6, 0.0 }
 0x65e   : > { %3263 = vadd.xlane.f32.xlu0 %v10773_v35  ;;  %v4534_v18 = vpop.permute.xlu1 %4533  ;;  %v10786_v35 = vsel %vm2973_vm3, %v4652_v53, -1e+09 }
 0x65f   : > { %4191 = vmax.xlane.f32.xlu1 %v10778_v28  ;;  %v4597_v55 = vadd.f32 %v10735_v26, %v4534_v18  ;;  %12627 = vst [vmem:[#allocation56_spill] sm:$0xff] %v10786_v35  ;;  %v7412_v18 = vpop.eup %7411  ;;  %v12629_v28 = vld [vmem:[#allocation196_spill] sm:$0xff]  ;;  %7413 = vpow2.f32 %v3223_v43 }
 0x660   : > { %v3197_v49 = vsub.f32 %v12629_v28, %v10399_v47  ;;  %v4137_v28 = vmul.f32 0.2, %v4105_v31 }
 0x661   : > { %v4629_v7 = vmul.f32 0.2, %v4597_v55  ;;  %vm4613_vm7 = vcmp.gt.f32.partialorder %v4597_v55, 0.0 }
 0x662   : > { %4692 = vmax.xlane.f32.xlu0 %v10786_v35  ;;  %v4566_v37 = vpop.permute.xlu1 %4565 }
 0x663   : > { %4193 = vmax.xlane.f32.xlu1 %v10793_v12  ;;  %v4645_v53 = vsel %vm4613_vm7, %v4597_v55, %v4629_v7  ;;  %v3217_v55 = vmul.f32 1.442695, %v3197_v49  ;;  %v10820_v7 = vmul.f32 %v7412_v18, %v10809_v14  ;;  %vm4121_vm7 = vcmp.gt.f32.partialorder %v4105_v31, 0.0 }
 0x664   : > { %v10802_v48 = vsel %vm12630_vm5, %v4645_v53, -1e+09  ;;  %v4138_v53 = vmul.f32 0.2, %v4106_v33  ;;  %v4153_v49 = vsel %vm4121_vm7, %v4105_v31, %v4137_v28  ;;  %v3202_v18 = vsub.f32 %v12633_v29, %v10431_v45  ;;  %v12636_v31 = vld [vmem:[#allocation197_spill] sm:$0xff] }
 0x665   : > { %12631 = vst [vmem:[#allocation103_spill] sm:$0xff] %v10802_v48  ;;  %12632 = vst [vmem:[#allocation190_spill] sm:$0xff] %v10820_v7  ;;  %7415 = vpow2.f32 %v3217_v55  ;;  %v10834_v43 = vsel %vm12634_vm14, %v4153_v49, -1e+09  ;;  %v3199_v28 = vsub.f32 %v12636_v31, %v10424_v59  ;;  %vm4612_vm7 = vcmp.gt.f32.partialorder %v4596_v54, 0.0 }
 0x666   : > { %4678 = vmax.xlane.f32.xlu0 %v10802_v48  ;;  %v4538_v47 = vpop.permute.xlu1 %4537  ;;  %v4578_v48 = vpop.permute.xlu0 %4577  ;;  %12635 = vst [vmem:[#allocation25_spill] sm:$0xff] %v10834_v43  ;;  %v4605_v59 = vadd.f32 %v10735_v26, %v4566_v37 }
 0x667   : > { %4195 = vmax.xlane.f32.xlu1 %v10813_v11  ;;  %v4608_v45 = vadd.f32 %v10735_v26, %v4578_v48 }
 0x66a   : > { %3267 = vadd.xlane.f32.xlu0 %v10820_v7  ;;  %v4570_v63 = vpop.permute.xlu1 %4569  ;;  %v4628_v7 = vmul.f32 0.2, %v4596_v54  ;;  %v4550_v49 = vpop.permute.xlu0 %4549 }
 0x66b   : > { %4197 = vmax.xlane.f32.xlu1 %v10824_v56  ;;  %v4606_v62 = vadd.f32 %v10735_v26, %v4570_v63  ;;  %v4154_v63 = vsel %vm4122_vm0, %v4106_v33, %v4138_v53  ;;  %v4601_v31 = vadd.f32 %v10735_v26, %v4550_v49  ;;  %v4598_v49 = vadd.f32 %v10735_v26, %v4538_v47 }
 0x66c   : > { %v4644_v53 = vsel %vm4612_vm7, %v4596_v54, %v4628_v7 }
 0x66d   : > { %v4638_v0 = vmul.f32 0.2, %v4606_v62  ;;  %vm4622_vm5 = vcmp.gt.f32.partialorder %v4606_v62, 0.0  ;;  %v10865_v7 = vsel %vm2965_vm6, %v4644_v53, -1e+09  ;;  %vm4621_vm6 = vcmp.gt.f32.partialorder %v4605_v59, 0.0 }
 0x66e   : > { %v4542_v2 = vpop.permute.xlu1 %4541  ;;  %12641 = vst [vmem:[#allocation87_spill] sm:$0xff] %v10865_v7  ;;  %v4630_v47 = vmul.f32 0.2, %v4598_v49  ;;  %vm4614_vm0 = vcmp.gt.f32.partialorder %v4598_v49, 0.0 }
 0x66f   : > { %4199 = vmax.xlane.f32.xlu1 %v10834_v43  ;;  %v4599_v41 = vadd.f32 %v10735_v26, %v4542_v2  ;;  %v4654_v35 = vsel %vm4622_vm5, %v4606_v62, %v4638_v0  ;;  %v3227_v43 = vmul.f32 1.442695, %v3202_v18  ;;  %v10848_v62 = vsel %vm12638_vm8, %v4154_v63, -1e+09  ;;  %v7414_v0 = vpop.eup %7413 }
 0x670   : > { %v10842_v55 = vsel %vm2975_vm10, %v4654_v35, -1e+09  ;;  %12639 = vst [vmem:[#allocation157_spill] sm:$0xff] %v10848_v62  ;;  %v3221_v2 = vmul.f32 1.442695, %v3199_v28  ;;  %v10859_v18 = vsel %vm2972_vm11, 1.0, %v12613_v5  ;;  %v7416_v37 = vpop.eup %7415 }
 0x671   : > { %12637 = vst [vmem:[#allocation108_spill] sm:$0xff] %v10842_v55  ;;  %v4631_v29 = vmul.f32 0.2, %v4599_v41  ;;  %4696 = vmax.xlane.f32.xlu0 %v10842_v55  ;;  %vm4615_vm14 = vcmp.gt.f32.partialorder %v4599_v41, 0.0  ;;  %v4640_v63 = vmul.f32 0.2, %v4608_v45  ;;  %7417 = vpow2.f32 %v3227_v43 }
 0x672   : > { %v4574_v33 = vpop.permute.xlu1 %4573  ;;  %v4637_v28 = vmul.f32 0.2, %v4605_v59  ;;  %v10879_v43 = vmul.f32 %v7414_v0, %v10859_v18  ;;  %7419 = vpow2.f32 %v3221_v2  ;;  %v10885_v53 = vmul.f32 %v7416_v37, %v10872_v22  ;;  %v12645_v2 = vld [vmem:[#allocation74_spill] sm:$0xff] }
 0x673   : > { %4201 = vmax.xlane.f32.xlu1 %v10848_v62  ;;  %v4647_v35 = vsel %vm4615_vm14, %v4599_v41, %v4631_v29  ;;  %v10874_v41 = vpop.permute.xlu0 %4581  ;;  %v3204_v29 = vsub.f32 %v12643_v40, %v10454_v23  ;;  %vm4617_vm8 = vcmp.gt.f32.partialorder %v4601_v31, 0.0  ;;  %v3201_v62 = vsub.f32 %v12645_v2, %v10449_v30 }
 0x674   : > { %v10854_v48 = vsel %vm2968_vm4, %v4647_v35, -1e+09  ;;  %vm4624_vm4 = vcmp.gt.f32.partialorder %v4608_v45, 0.0  ;;  %12642 = vst [vmem:[#allocation178_spill] sm:$0xff] %v10879_v43  ;;  %v4633_v35 = vmul.f32 0.2, %v4601_v31  ;;  %v4653_v0 = vsel %vm4621_vm6, %v4605_v59, %v4637_v28 }
 0x675   : > { %12640 = vst [vmem:[#allocation118_spill] sm:$0xff] %v10854_v48  ;;  %4682 = vmax.xlane.f32.xlu0 %v10854_v48  ;;  %12644 = vst [vmem:[#allocation29_spill] sm:$0xff] %v10885_v53  ;;  %v4656_v48 = vsel %vm4624_vm4, %v4608_v45, %v4640_v63  ;;  %v3231_v40 = vmul.f32 1.442695, %v3204_v29  ;;  %v12647_v63 = vld [vmem:[#allocation78_spill] sm:$0xff]  ;;  %v4607_v30 = vadd.f32 %v10735_v26, %v4574_v33  ;;  %vm12654_vm14 = vcmp.gt.f32.partialorder %v10230_v39, 0.0 }
 0x676   : > { %v10867_v54 = vpop.permute.xlu1 %4553  ;;  %v10894_v23 = vsel %vm2977_vm9, %v4656_v48, -1e+09  ;;  %v4649_v45 = vsel %vm4617_vm8, %v4601_v31, %v4633_v35  ;;  %v10902_v59 = vsel %vm2974_vm12, %v4653_v0, -1e+09  ;;  %v4646_v29 = vsel %vm4614_vm0, %v4598_v49, %v4630_v47  ;;  %v12649_v47 = vld [vmem:[#allocation80_spill] sm:$0xff] }
 0x677   : > { %4676 = vmax.xlane.f32.xlu1 %v10865_v7  ;;  %12646 = vst [vmem:[#allocation62_spill] sm:$0xff] %v10894_v23  ;;  %v10910_v31 = vsel %vm2970_vm15, %v4649_v45, -1e+09  ;;  %7421 = vpow2.f32 %v3231_v40  ;;  %v10922_v49 = vsel %vm2971_vm1, 1.0, %v12613_v5  ;;  %v3208_v0 = vsub.f32 %v12649_v47, %v10680_v17 }
 0x678   : > { %12648 = vst [vmem:[#allocation199_spill] sm:$0xff] %v10910_v31  ;;  %vm12650_vm15 = vcmp.gt.f32.partialorder %v10031_v60, 0.0  ;;  %v4600_v40 = vadd.f32 %v10735_v26, %v10804_v44  ;;  %v4639_v45 = vmul.f32 0.2, %v4607_v30  ;;  %vm4623_vm5 = vcmp.gt.f32.partialorder %v4607_v30, 0.0  ;;  %v12652_v44 = vld [vmem:[#allocation40_spill] sm:$0xff] }
 0x679   : > { %3271 = vadd.xlane.f32.xlu0 %v10879_v43  ;;  %v3206_v43 = vsub.f32 %v12647_v63, %v10659_v15  ;;  %v10915_v15 = vsel %vm2974_vm12, 1.0, %v12613_v5  ;;  %v10928_v36 = vsel %vm12650_vm15, %v4646_v29, -1e+09  ;;  %v3239_v29 = vmul.f32 1.442695, %v3208_v0 }
 0x67a   : > { %v4586_v55 = vpop.permute.xlu1 %4585  ;;  %v3699_v47 = vsub.f32 %v12652_v44, %v10709_v1  ;;  %vm4616_vm4 = vcmp.gt.f32.partialorder %v4600_v40, 0.0 }
 0x67b   : > { %3265 = vadd.xlane.f32.xlu1 %v10885_v53  ;;  %v10888_v7 = vpop.xlane.xlu0 %3672  ;;  %v4610_v37 = vadd.f32 %v10735_v26, %v4586_v55  ;;  %v7418_v2 = vpop.eup %7417  ;;  %v3225_v55 = vmul.f32 1.442695, %v3201_v62  ;;  %v3235_v20 = vmul.f32 1.442695, %v3206_v43 }
 0x67c   : > { %v7420_v62 = vpop.eup %7419  ;;  %v3701_v1 = vsub.f32 %v10301_v3, %v10888_v7  ;;  %v10970_v3 = vsel %vm2976_vm13, 1.0, %v12613_v5  ;;  %v10976_v7 = vsel %vm2973_vm3, 1.0, %v12613_v5 }
 0x67d   : > { %4700 = vmax.xlane.f32.xlu0 %v10894_v23  ;;  %v4642_v35 = vmul.f32 0.2, %v4610_v37  ;;  %vm4626_vm12 = vcmp.gt.f32.partialorder %v4610_v37, 0.0  ;;  %7423 = vpow2.f32 %v3225_v55  ;;  %v10940_v60 = vmul.f32 %v7420_v62, %v10922_v49  ;;  %v12653_v55 = vld [vmem:[#allocation75_spill] sm:$0xff] }
 0x67e   : > { %v4558_v28 = vpop.permute.xlu1 %4557  ;;  %7425 = vpow2.f32 %v3235_v20  ;;  %v4655_v23 = vsel %vm4623_vm5, %v4607_v30, %v4639_v45  ;;  %v3203_v53 = vsub.f32 %v12653_v55, %v10472_v16  ;;  %v4609_v16 = vadd.f32 %v10735_v26, %v10874_v41 }
 0x67f   : > { %4694 = vmax.xlane.f32.xlu1 %v10902_v59  ;;  %v10906_v48 = vpop.xlane.xlu0 %3676  ;;  %v4603_v33 = vadd.f32 %v10735_v26, %v4558_v28  ;;  %v10936_v28 = vmul.f32 %v7418_v2, %v10915_v15  ;;  %v4658_v17 = vsel %vm4626_vm12, %v4610_v37, %v4642_v35  ;;  %7427 = vpow2.f32 %v3239_v29 }
 0x680   : > { %v3716_v35 = vmul.f32 1.442695, %v3699_v47  ;;  %v10956_v62 = vsel %vm2976_vm13, %v4655_v23, -1e+09  ;;  %v3229_v45 = vmul.f32 1.442695, %v3203_v53  ;;  %v3703_v42 = vsub.f32 %v10315_v19, %v10906_v48 }
 0x681   : > { %4686 = vmax.xlane.f32.xlu0 %v10910_v31  ;;  %12651 = vst [vmem:[#allocation100_spill] sm:$0xff] %v10936_v28  ;;  %v4635_v43 = vmul.f32 0.2, %v4603_v33  ;;  %vm4619_vm7 = vcmp.gt.f32.partialorder %v4603_v33, 0.0  ;;  %v4632_v31 = vmul.f32 0.2, %v4600_v40  ;;  %v7422_v30 = vpop.eup %7421 }
 0x682   : > { %7429 = vpow2.f32 %v3716_v35  ;;  %v3720_v23 = vmul.f32 1.442695, %v3701_v1  ;;  %v4641_v4 = vmul.f32 0.2, %v4609_v16  ;;  %v10988_v61 = vmul.f32 %v7422_v30, %v10970_v3  ;;  %v4590_v35 = vpop.permute.xlu1 %4589 }
 0x683   : > { %4680 = vmax.xlane.f32.xlu1 %v10928_v36  ;;  %v10933_v63 = vpop.xlane.xlu0 %3678  ;;  %v4651_v37 = vsel %vm4619_vm7, %v4603_v33, %v4635_v43  ;;  %v4648_v0 = vsel %vm4616_vm4, %v4600_v40, %v4632_v31  ;;  %v4602_v31 = vadd.f32 %v10735_v26, %v10867_v54  ;;  %7431 = vpow2.f32 %v3229_v45 }
 0x684   : > { %v10965_v33 = vsel %vm2972_vm11, %v4651_v37, -1e+09  ;;  %v10982_v53 = vsel %vm2969_vm2, %v4648_v0, -1e+09  ;;  %vm12655_vm11 = vcmp.gt.f32.partialorder %v12571_v21, 0.0  ;;  %vm4625_vm13 = vcmp.gt.f32.partialorder %v4609_v16, 0.0 }
 0x685   : > { %3275 = vadd.xlane.f32.xlu0 %v10936_v28  ;;  %v10949_v28 = vsel %vm12654_vm14, %v4658_v17, -1e+09  ;;  %v3205_v17 = vsub.f32 %v10227_v34, %v10687_v24  ;;  %v10995_v19 = vsel %vm12655_vm11, 1.0, %v12613_v5  ;;  %7433 = vpow2.f32 %v3720_v23  ;;  %vm12657_vm6 = vmmov %vm12655_vm11  ;;  %v12658_v23 = vld [vmem:[#allocation84_spill] sm:$0xff] }
 0x686   : > { %v3724_v54 = vmul.f32 1.442695, %v3703_v42  ;;  %v4634_v29 = vmul.f32 0.2, %v4602_v31  ;;  %v4657_v24 = vsel %vm4625_vm13, %v4609_v16, %v4641_v4  ;;  %v3207_v37 = vsub.f32 %v10241_v13, %v10705_v25 }
 0x687   : > { %3269 = vadd.xlane.f32.xlu1 %v10940_v60  ;;  %v3681_v2 = vpop.xlane.xlu0 %3680  ;;  %v7424_v41 = vpop.eup %7423  ;;  %v3233_v55 = vmul.f32 1.442695, %v3205_v17  ;;  %vm12656_vm2 = vcmp.gt.f32.partialorder %v12580_v6, 0.0  ;;  %vm4618_vm3 = vcmp.gt.f32.partialorder %v4602_v31, 0.0  ;;  %v11019_v30 = vsel %vm12657_vm6, %v4657_v24, -1e+09 }
 0x688   : > { %v7426_v43 = vpop.eup %7425  ;;  %v10999_v10 = vmul.f32 %v7424_v41, %v10976_v7  ;;  %v3705_v48 = vsub.f32 %v10348_v8, %v3681_v2  ;;  %v11013_v1 = vsel %vm12656_vm2, 1.0, %v12613_v5  ;;  %7435 = vpow2.f32 %v3724_v54 }
 0x689   : > { %4704 = vmax.xlane.f32.xlu0 %v10949_v28  ;;  %v11006_v34 = vmul.f32 %v7426_v43, %v10995_v19  ;;  %v7428_v47 = vpop.eup %7427  ;;  %v4611_v16 = vadd.f32 %v10735_v26, %v4590_v35  ;;  %v4650_v0 = vsel %vm4618_vm3, %v4602_v31, %v4634_v29  ;;  %7437 = vpow2.f32 %v3233_v55 }
 0x68a   : > { %v3728_v8 = vmul.f32 1.442695, %v3705_v48  ;;  %v11024_v25 = vmul.f32 %v7428_v47, %v11013_v1  ;;  %v3237_v41 = vmul.f32 1.442695, %v3207_v37  ;;  %v3698_v42 = vsub.f32 %v12658_v23, %v10727_v57 }
 0x68b   : > { %4698 = vmax.xlane.f32.xlu1 %v10956_v62  ;;  %v10961_v20 = vpop.xlane.xlu0 %3682  ;;  %v11032_v4 = vsel %vm2971_vm1, %v4650_v0, -1e+09  ;;  %v11037_v31 = vsel %vm2975_vm10, 1.0, %v12613_v5  ;;  %v3700_v54 = vsub.f32 %v12659_v50, %v10751_v38  ;;  %vm4627_vm1 = vcmp.gt.f32.partialorder %v4611_v16, 0.0  ;;  %vm12660_vm10 = vmmov %vm12656_vm2 }
 0x68c   : > { %v7430_v45 = vpop.eup %7429  ;;  %7439 = vpow2.f32 %v3728_v8  ;;  %v3714_v17 = vmul.f32 1.442695, %v3698_v42 }
 0x68d   : > { %4690 = vmax.xlane.f32.xlu0 %v10965_v33  ;;  %v7432_v21 = vpop.eup %7431  ;;  %7441 = vpow2.f32 %v3237_v41  ;;  %v3718_v37 = vmul.f32 1.442695, %v3700_v54 }
 0x68e   : > { %v11049_v52 = vmul.f32 %v7432_v21, %v11037_v31 }
 0x68f   : > { %4684 = vmax.xlane.f32.xlu1 %v10982_v53  ;;  %v3685_v40 = vpop.xlane.xlu0 %3684  ;;  %v7434_v43 = vpop.eup %7433 }
 0x690   : > { %v3707_v2 = vsub.f32 %v10386_v58, %v3685_v40  ;;  %v4643_v40 = vmul.f32 0.2, %v4611_v16  ;;  %v11053_v24 = vmul.f32 %v7434_v43, %v10762_v51 }
 0x691   : > { %3279 = vadd.xlane.f32.xlu0 %v10988_v61 }
 0x692   : > { %v3732_v26 = vmul.f32 1.442695, %v3707_v2  ;;  %v4659_v47 = vsel %vm4627_vm1, %v4611_v16, %v4643_v40  ;;  %v7436_v55 = vpop.eup %7435  ;;  %v11063_v2 = vsel %vm2977_vm9, 1.0, %v12613_v5  ;;  %vm12661_vm9 = vmmov %vm12654_vm14 }
 0x693   : > { %3273 = vadd.xlane.f32.xlu1 %v10999_v10  ;;  %v11003_v44 = vpop.xlane.xlu0 %3686  ;;  %v7438_v38 = vpop.eup %7437  ;;  %v11058_v8 = vsel %vm12660_vm10, %v4659_v47, -1e+09  ;;  %v11076_v9 = vsel %vm12661_vm9, 1.0, %v12613_v5 }
 0x694   : > { %7443 = vpow2.f32 %v3732_v26  ;;  %v11071_v6 = vmul.f32 %v7438_v38, %v11063_v2 }
 0x695   : > { %3283 = vadd.xlane.f32.xlu0 %v11006_v34  ;;  %7445 = vpow2.f32 %v3714_v17 }
 0x696   : > { %v7440_v0 = vpop.eup %7439 }
 0x697   : > { %4702 = vmax.xlane.f32.xlu1 %v11019_v30  ;;  %v3689_v13 = vpop.xlane.xlu0 %3688  ;;  %v7442_v41 = vpop.eup %7441  ;;  %v11080_v42 = vmul.f32 %v7440_v0, %v10859_v18 }
 0x698   : > { %v3709_v58 = vsub.f32 %v10420_v27, %v3689_v13  ;;  %v11043_v27 = vmul.f32 %v7430_v45, %v10718_v32  ;;  %v11067_v13 = vmul.f32 %v7436_v55, %v10809_v14  ;;  %v11084_v26 = vmul.f32 %v7442_v41, %v11076_v9 }
 0x699   : > { %3287 = vadd.xlane.f32.xlu0 %v11024_v25 }
 0x69a   : > { %v3736_v48 = vmul.f32 1.442695, %v3709_v58 }
 0x69b   : > { %4688 = vmax.xlane.f32.xlu1 %v11032_v4  ;;  %v11040_v57 = vpop.xlane.xlu0 %3690 }
 0x69c   : > { %7447 = vpow2.f32 %v3736_v48  ;;  %v12663_v48 = vld [vmem:[#allocation27_spill] sm:$0xff] }
 0x69d   : > { %3764 = vadd.xlane.f32.xlu0 %v11043_v27 }
 0x69e   : > { %v7444_v58 = vpop.eup %7443 }
 0x69f   : > { %3277 = vadd.xlane.f32.xlu1 %v11049_v52  ;;  %v2705_v29 = vpop.xlane.xlu0 %2704  ;;  %v7446_v40 = vpop.eup %7445  ;;  %v11088_v5 = vmul.f32 %v7444_v58, %v10915_v15 }
 0x6a0   : > { %v2736_v35 = vmax.f32 %v2705_v29, 1e-09  ;;  %v11092_v54 = vmul.f32 %v7446_v40, %v10698_v46 }
 0x6a1   : > { %3768 = vadd.xlane.f32.xlu0 %v11053_v24  ;;  %12662 = vst [vmem:[#allocation119_spill] sm:$0xff] %v11088_v5 }
 0x6a2   : > { %7449 = vrcp.f32 %v2736_v35 }
 0x6a3   : > { %4706 = vmax.xlane.f32.xlu1 %v11058_v8  ;;  %v2707_v16 = vpop.xlane.xlu0 %2706  ;;  %7451 = vpow2.f32 %v3718_v37 }
 0x6a4   : > { %v2737_v45 = vmax.f32 %v2707_v16, 1e-09  ;;  %v12665_v16 = vld [vmem:[#allocation73_spill] sm:$0xff] }
 0x6a5   : > { %3772 = vadd.xlane.f32.xlu0 %v11067_v13 }
 0x6a6   : > { %7453 = vrcp.f32 %v2737_v45  ;;  %v7448_v43 = vpop.eup %7447  ;;  %v12666_v45 = vld [vmem:[#allocation89_spill] sm:$0xff] }
 0x6a7   : > { %3281 = vadd.xlane.f32.xlu1 %v11071_v6  ;;  %v2709_v23 = vpop.xlane.xlu0 %2708  ;;  %v11097_v37 = vmul.f32 %v7448_v43, %v10970_v3  ;;  %v12668_v43 = vld [vmem:[#allocation26_spill] sm:$0xff] }
 0x6a8   : > { %v2738_v21 = vmax.f32 %v2709_v23, 1e-09  ;;  %v12667_v23 = vld [vmem:[#allocation86_spill] sm:$0xff] }
 0x6a9   : > { %3776 = vadd.xlane.f32.xlu0 %v11080_v42  ;;  %12664 = vst [vmem:[#allocation135_spill] sm:$0xff] %v11097_v37  ;;  %v3704_v58 = vsub.f32 %v12667_v23, %v10933_v63 }
 0x6aa   : > { %7455 = vrcp.f32 %v2738_v21 }
 0x6ab   : > { %3285 = vadd.xlane.f32.xlu1 %v11084_v26  ;;  %v2711_v39 = vpop.xlane.xlu0 %2710 }
 0x6ac   : > { %v7450_v17 = vpop.eup %7449  ;;  %v2739_v50 = vmax.f32 %v2711_v39, 1e-09 }
 0x6ad   : > { %3780 = vadd.xlane.f32.xlu0 %v11088_v5  ;;  %v2768_v29 = vmul.f32 %v7450_v17, %v12663_v48  ;;  %v7452_v47 = vpop.eup %7451  ;;  %v12675_v5 = vld [vmem:[#allocation163_spill] sm:$0xff] }
 0x6ae   : > { %7457 = vrcp.f32 %v2739_v50  ;;  %v11101_v0 = vmul.f32 %v7452_v47, %v12665_v16  ;;  %v12669_v50 = vld [vmem:[#allocation98_spill] sm:$0xff] }
 0x6af   : > { %3762 = vadd.xlane.f32.xlu1 %v11092_v54  ;;  %6326 = vmatprep.mubr.f32.mxu1 %v2768_v29  ;;  %v2713_v55 = vpop.xlane.xlu0 %2712  ;;  %v12670_v29 = vld [vmem:[#allocation33_spill] sm:$0xff]  ;;  %v12671_v47 = vld [vmem:[#allocation142_spill] sm:$0xff] }
 0x6b0   : > { %v7454_v35 = vpop.eup %7453  ;;  %v2740_v38 = vmax.f32 %v2713_v55, 1e-09 }
 0x6b1   : > { %3784 = vadd.xlane.f32.xlu0 %v11097_v37  ;;  %v2769_v41 = vmul.f32 %v7454_v35, %v12666_v45  ;;  %v3726_v35 = vmul.f32 1.442695, %v3704_v58  ;;  %v12673_v37 = vld [vmem:[#allocation161_spill] sm:$0xff] }
 0x6b2   : > { %7459 = vrcp.f32 %v2740_v38  ;;  %v12672_v38 = vld [vmem:[#allocation106_spill] sm:$0xff] }
 0x6b3   : > { %3766 = vadd.xlane.f32.xlu1 %v11101_v0  ;;  %6327 = vmatmul.mubr.f32.vlgmr.msra.gmra.mrb[16].mxu1 %v2769_v41  ;;  %v2715_v21 = vpop.xlane.xlu0 %2714  ;;  %v3706_v63 = vsub.f32 %v12672_v38, %v10961_v20  ;;  %v12676_v20 = vld [vmem:[#allocation64_spill] sm:$0xff] }
 0x6b4   : > { %v7456_v40 = vpop.eup %7455  ;;  %6733 = vmatpush3.bf16.msra.mxu1 %v12668_v43  ;;  %v2741_v39 = vmax.f32 %v2715_v21, 1e-09  ;;  %v3675_v17 = vpop.xlane.xlu1 %3674 }
 0x6b5   : > { %v3702_v48 = vsub.f32 %v12669_v50, %v3675_v17  ;;  %6735 = vmatprep.subr.bf16.mxu1 %v12670_v29  ;;  %v2770_v55 = vmul.f32 %v7456_v40, %v12671_v47  ;;  %v12674_v50 = vld [vmem:[#allocation43_spill] sm:$0xff]  ;;  %v3730_v58 = vmul.f32 1.442695, %v3706_v63 }
 0x6b6   : > { %7461 = vrcp.f32 %v2741_v39  ;;  %v3708_v39 = vsub.f32 %v12676_v20, %v11003_v44  ;;  %v12682_v20 = vld [vmem:[#allocation102_spill] sm:$0xff] }
 0x6b7   : > { %v3722_v45 = vmul.f32 1.442695, %v3702_v48  ;;  %6329 = vmatprep.mubr.f32.mxu1 %v2770_v55  ;;  %v2717_v41 = vpop.xlane.xlu0 %2716 }
 0x6b8   : > { %v7458_v23 = vpop.eup %7457  ;;  %6737 = vmatpush3.bf16.msra.mxu1 %v12670_v29  ;;  %v2742_v43 = vmax.f32 %v2717_v41, 1e-09  ;;  %v3693_v21 = vpop.xlane.xlu1 %3692 }
 0x6b9   : > { %7463 = vpow2.f32 %v3722_v45  ;;  %v3711_v17 = vsub.f32 %v12673_v37, %v3693_v21  ;;  %6739 = vmatprep.subr.bf16.mxu1 %v12674_v50  ;;  %v2771_v40 = vmul.f32 %v7458_v23, %v12675_v5  ;;  %v12677_v37 = vld [vmem:[#allocation48_spill] sm:$0xff]  ;;  %v3734_v5 = vmul.f32 1.442695, %v3708_v39  ;;  %v12683_v39 = vld [vmem:[#allocation110_spill] sm:$0xff] }
 0x6ba   : > { %7465 = vrcp.f32 %v2742_v43  ;;  %v12678_v45 = vld [vmem:[#allocation92_spill] sm:$0xff] }
 0x6bb   : > { %7467 = vpow2.f32 %v3726_v35  ;;  %v3740_v48 = vmul.f32 1.442695, %v3711_v17  ;;  %6330 = vmatmul.mubr.f32.gmra.mrb[18].mxu1 %v2771_v40  ;;  %v2719_v47 = vpop.xlane.xlu0 %2718  ;;  %v12679_v35 = vld [vmem:[#allocation109_spill] sm:$0xff] }
 0x6bc   : > { %v7460_v55 = vpop.eup %7459  ;;  %6741 = vmatpush3.bf16.msra.mxu1 %v12674_v50  ;;  %v2743_v29 = vmax.f32 %v2719_v47, 1e-09  ;;  %v3695_v38 = vpop.xlane.xlu1 %3694  ;;  %v3710_v63 = vsub.f32 %v12679_v35, %v11040_v57  ;;  %v12680_v17 = vld [vmem:[#allocation101_spill] sm:$0xff] }
 0x6bd   : > { %7469 = vpow2.f32 %v3740_v48  ;;  %6743 = vmatprep.subr.bf16.mxu1 %v12677_v37  ;;  %v2772_v41 = vmul.f32 %v7460_v55, %v12678_v45  ;;  %v12681_v40 = vld [vmem:[#allocation53_spill] sm:$0xff]  ;;  %v3712_v55 = vsub.f32 %v12683_v39, %v3695_v38 }
 0x6be   : > { %7471 = vrcp.f32 %v2743_v29 }
 0x6bf   : > { %7473 = vpow2.f32 %v3730_v58  ;;  %6332 = vmatprep.mubr.f32.mxu1 %v2772_v41  ;;  %v2721_v44 = vpop.xlane.xlu0 %2720  ;;  %v3738_v58 = vmul.f32 1.442695, %v3710_v63  ;;  %v3742_v63 = vmul.f32 1.442695, %v3712_v55  ;;  %v12690_v55 = vld [vmem:[#allocation97_spill] sm:$0xff] }
 0x6c0   : > { %v7462_v23 = vpop.eup %7461  ;;  %6745 = vmatpush3.bf16.msra.mxu1 %v12677_v37  ;;  %v2744_v43 = vmax.f32 %v2721_v44, 1e-09  ;;  %v3697_v21 = vpop.xlane.xlu1 %3696 }
 0x6c1   : > { %v3713_v50 = vsub.f32 %v12680_v17, %v3697_v21  ;;  %6747 = vmatprep.subr.bf16.mxu1 %v12681_v40  ;;  %v2773_v48 = vmul.f32 %v7462_v23, %v12682_v20  ;;  %v12684_v23 = vld [vmem:[#allocation59_spill] sm:$0xff]  ;;  %v12686_v21 = vld [vmem:[#allocation116_spill] sm:$0xff] }
 0x6c2   : > { %7475 = vrcp.f32 %v2744_v43  ;;  %v12685_v43 = vld [vmem:[#allocation104_spill] sm:$0xff] }
 0x6c3   : > { %v7464_v47 = vpop.eup %7463  ;;  %7477 = vpow2.f32 %v3734_v5  ;;  %v3744_v57 = vmul.f32 1.442695, %v3713_v50  ;;  %6333 = vmatmul.mubr.f32.gmra.mrb[20].mxu1 %v2773_v48  ;;  %v2723_v29 = vpop.xlane.xlu0 %2722 }
 0x6c4   : > { %v7466_v45 = vpop.eup %7465  ;;  %6749 = vmatpush3.bf16.msra.mxu1 %v12681_v40  ;;  %v2745_v37 = vmax.f32 %v2723_v29, 1e-09  ;;  %v4172_v41 = vpop.xlane.xlu1 %4171  ;;  %v11131_v35 = vmul.f32 %v7464_v47, %v10872_v22  ;;  %v12688_v29 = vld [vmem:[#allocation42_spill] sm:$0xff] }
 0x6c5   : > { %v7468_v44 = vpop.eup %7467  ;;  %7479 = vpow2.f32 %v3744_v57  ;;  %6751 = vmatprep.subr.bf16.mxu1 %v12684_v23  ;;  %v2774_v5 = vmul.f32 %v7466_v45, %v12685_v43  ;;  %v4203_v17 = vsub.f32 %v12686_v21, %v4172_v41 }
 0x6c6   : > { %7481 = vrcp.f32 %v2745_v37  ;;  %3770 = vadd.xlane.f32.xlu1 %v11131_v35  ;;  %v11139_v47 = vmul.f32 %v7468_v44, %v10922_v49 }
 0x6c7   : > { %v7470_v38 = vpop.eup %7469  ;;  %7483 = vpow2.f32 %v3738_v58  ;;  %6335 = vmatprep.mubr.f32.mxu1 %v2774_v5  ;;  %v2725_v50 = vpop.xlane.xlu0 %2724  ;;  %v12689_v58 = vld [vmem:[#allocation65_spill] sm:$0xff]  ;;  %v4219_v41 = vmul.f32 1.442695, %v4203_v17 }
 0x6c8   : > { %v7472_v40 = vpop.eup %7471  ;;  %6753 = vmatpush3.bf16.msra.mxu1 %v12684_v23  ;;  %v2746_v20 = vmax.f32 %v2725_v50, 1e-09  ;;  %v4174_v48 = vpop.xlane.xlu1 %4173  ;;  %v11142_v39 = vmul.f32 %v7470_v38, %v10995_v19 }
 0x6c9   : > { %v7474_v57 = vpop.eup %7473  ;;  %v4204_v45 = vsub.f32 %v12688_v29, %v4174_v48  ;;  %6755 = vmatprep.subr.bf16.mxu1 %v12689_v58  ;;  %v2775_v37 = vmul.f32 %v7472_v40, %v12690_v55  ;;  %v12691_v40 = vld [vmem:[#allocation180_spill] sm:$0xff]  ;;  %v12692_v48 = vld [vmem:[#allocation70_spill] sm:$0xff] }
 0x6ca   : > { %12687 = vst [vmem:[#allocation68_spill] sm:$0xff] %v11142_v39  ;;  %7485 = vrcp.f32 %v2746_v20  ;;  %3774 = vadd.xlane.f32.xlu1 %v11139_v47  ;;  %3788 = vadd.xlane.f32.xlu0 %v11142_v39  ;;  %v11151_v21 = vmul.f32 %v7474_v57, %v10976_v7  ;;  %v12693_v29 = vld [vmem:[#allocation30_spill] sm:$0xff] }
 0x6cb   : > { %7487 = vpow2.f32 %v3742_v63  ;;  %v4221_v23 = vmul.f32 1.442695, %v4204_v45  ;;  %6336 = vmatmul.mubr.f32.gmra.mrb[22].mxu1 %v2775_v37  ;;  %v2727_v44 = vpop.xlane.xlu0 %2726 }
 0x6cc   : > { %v7476_v43 = vpop.eup %7475  ;;  %6757 = vmatpush3.bf16.msra.mxu1 %v12689_v58  ;;  %v2747_v5 = vmax.f32 %v2727_v44, 1e-09  ;;  %v4176_v38 = vpop.xlane.xlu1 %4175 }
 0x6cd   : > { %v7478_v50 = vpop.eup %7477  ;;  %7489 = vpow2.f32 %v4221_v23  ;;  %v4205_v20 = vsub.f32 %v12691_v40, %v4176_v38  ;;  %6759 = vmatprep.subr.bf16.mxu1 %v12692_v48  ;;  %v2776_v63 = vmul.f32 %v7476_v43, %v12693_v29  ;;  %v12697_v40 = vld [vmem:[#allocation32_spill] sm:$0xff] }
 0x6ce   : > { %7491 = vrcp.f32 %v2747_v5  ;;  %3778 = vadd.xlane.f32.xlu1 %v11151_v21  ;;  %v11159_v23 = vmul.f32 %v7478_v50, %v11037_v31  ;;  %v12696_v5 = vld [vmem:[#allocation81_spill] sm:$0xff] }
 0x6cf   : > { %v7480_v17 = vpop.eup %7479  ;;  %7493 = vpow2.f32 %v4219_v41  ;;  %v4223_v45 = vmul.f32 1.442695, %v4205_v20  ;;  %6338 = vmatprep.mubr.f32.mxu1 %v2776_v63  ;;  %v2729_v58 = vpop.xlane.xlu0 %2728  ;;  %v12698_v41 = vld [vmem:[#allocation39_spill] sm:$0xff] }
 0x6d0   : > { %v7482_v55 = vpop.eup %7481  ;;  %6761 = vmatpush3.bf16.msra.mxu1 %v12692_v48  ;;  %v2748_v57 = vmax.f32 %v2729_v58, 1e-09  ;;  %v4178_v37 = vpop.xlane.xlu1 %4177  ;;  %12694 = vst [vmem:[#allocation183_spill] sm:$0xff] %v11159_v23  ;;  %v11162_v44 = vmul.f32 %v7480_v17, %v11013_v1 }
 0x6d1   : > { %v7484_v43 = vpop.eup %7483  ;;  %v4206_v38 = vsub.f32 %v12696_v5, %v4178_v37  ;;  %6763 = vmatprep.subr.bf16.mxu1 %v12697_v40  ;;  %v2777_v20 = vmul.f32 %v7482_v55, %v12698_v41  ;;  %v12700_v5 = vld [vmem:[#allocation114_spill] sm:$0xff]  ;;  %v12701_v55 = vld [vmem:[#allocation77_spill] sm:$0xff] }
 0x6d2   : > { %12695 = vst [vmem:[#allocation38_spill] sm:$0xff] %v11162_v44  ;;  %7495 = vrcp.f32 %v2748_v57  ;;  %3782 = vadd.xlane.f32.xlu1 %v11159_v23  ;;  %3792 = vadd.xlane.f32.xlu0 %v11162_v44  ;;  %v11170_v58 = vmul.f32 %v7484_v43, %v11063_v2 }
 0x6d3   : > { %7497 = vpow2.f32 %v4223_v45  ;;  %v4225_v48 = vmul.f32 1.442695, %v4206_v38  ;;  %6339 = vmatmul.mubr.f32.gmra.mrb[24].mxu1 %v2777_v20  ;;  %v2731_v50 = vpop.xlane.xlu0 %2730 }
 0x6d4   : > { %v7486_v29 = vpop.eup %7485  ;;  %v2749_v63 = vmax.f32 %v2731_v50, 1e-09  ;;  %v4180_v17 = vpop.xlane.xlu1 %4179  ;;  %12699 = vst [vmem:[#allocation192_spill] sm:$0xff] %v11170_v58 }
 0x6d5   : > { %v7488_v37 = vpop.eup %7487  ;;  %7499 = vpow2.f32 %v4225_v48  ;;  %v4207_v39 = vsub.f32 %v12700_v5, %v4180_v17  ;;  %v2778_v57 = vmul.f32 %v7486_v29, %v12701_v55  ;;  %v12704_v17 = vld [vmem:[#allocation137_spill] sm:$0xff] }
 0x6d6   : > { %7501 = vrcp.f32 %v2749_v63  ;;  %3786 = vadd.xlane.f32.xlu1 %v11170_v58  ;;  %v11176_v23 = vmul.f32 %v7488_v37, %v11076_v9  ;;  %v12705_v63 = vld [vmem:[#allocation99_spill] sm:$0xff] }
 0x6d7   : > { %v7490_v41 = vpop.eup %7489  ;;  %v4227_v45 = vmul.f32 1.442695, %v4207_v39  ;;  %6341 = vmatprep.mubr.f32.mxu1 %v2778_v57  ;;  %v2733_v38 = vpop.xlane.xlu0 %2732 }
 0x6d8   : > { %v7492_v20 = vpop.eup %7491  ;;  %v2750_v44 = vmax.f32 %v2733_v38, 1e-09  ;;  %v4182_v50 = vpop.xlane.xlu1 %4181  ;;  %12702 = vst [vmem:[#allocation165_spill] sm:$0xff] %v11176_v23  ;;  %v11179_v43 = vmul.f32 %v7490_v41, %v10718_v32 }
 0x6d9   : > { %v7494_v48 = vpop.eup %7493  ;;  %7503 = vpow2.f32 %v4227_v45  ;;  %v4208_v29 = vsub.f32 %v12704_v17, %v4182_v50  ;;  %v2779_v5 = vmul.f32 %v7492_v20, %v12705_v63  ;;  %v12707_v45 = vld [vmem:[#allocation47_spill] sm:$0xff]  ;;  %v12708_v17 = vld [vmem:[#allocation105_spill] sm:$0xff] }
 0x6da   : > { %12703 = vst [vmem:[#allocation52_spill] sm:$0xff] %v11179_v43  ;;  %7505 = vrcp.f32 %v2750_v44  ;;  %3790 = vadd.xlane.f32.xlu1 %v11176_v23  ;;  %4269 = vadd.xlane.f32.xlu0 %v11179_v43  ;;  %v11186_v41 = vmul.f32 %v7494_v48, %v10698_v46 }
 0x6db   : > { %v4229_v39 = vmul.f32 1.442695, %v4208_v29  ;;  %6342 = vmatmul.mubr.f32.gmra.mrb[26].mxu1 %v2779_v5  ;;  %v2735_v55 = vpop.xlane.xlu0 %2734 }
 0x6dc   : > { %v7496_v57 = vpop.eup %7495  ;;  %v2751_v37 = vmax.f32 %v2735_v55, 1e-09  ;;  %v4184_v38 = vpop.xlane.xlu1 %4183  ;;  %12706 = vst [vmem:[#allocation160_spill] sm:$0xff] %v11186_v41 }
 0x6dd   : > { %v7498_v58 = vpop.eup %7497  ;;  %7507 = vpow2.f32 %v4229_v39  ;;  %v4209_v50 = vsub.f32 %v12707_v45, %v4184_v38  ;;  %v2780_v20 = vmul.f32 %v7496_v57, %v12708_v17  ;;  %v12712_v57 = vld [vmem:[#allocation198_spill] sm:$0xff]  ;;  %v12714_v45 = vld [vmem:[#allocation155_spill] sm:$0xff] }
 0x6de   : > { %7509 = vrcp.f32 %v2751_v37  ;;  %4267 = vadd.xlane.f32.xlu1 %v11186_v41  ;;  %v11194_v48 = vmul.f32 %v7498_v58, %v12665_v16 }
 0x6df   : > { %v7500_v44 = vpop.eup %7499  ;;  %v4231_v63 = vmul.f32 1.442695, %v4209_v50  ;;  %6344 = vmatprep.mubr.f32.mxu1 %v2780_v20  ;;  %v3258_v29 = vpop.xlane.xlu0 %3257 }
 0x6e0   : > { %v7502_v5 = vpop.eup %7501  ;;  %v3289_v43 = vmax.f32 %v3258_v29, 1e-09  ;;  %v4186_v55 = vpop.xlane.xlu1 %4185  ;;  %12710 = vst [vmem:[#allocation121_spill] sm:$0xff] %v11194_v48  ;;  %v11197_v39 = vmul.f32 %v7500_v44, %v10762_v51 }
 0x6e1   : > { %v11191_v23 = vpop.f32.mrb[32].mxu0  ;;  %7511 = vpow2.f32 %v4231_v63  ;;  %v4210_v37 = vsub.f32 %v12712_v57, %v4186_v55  ;;  %v2781_v50 = vmul.f32 %v7502_v5, %v12714_v45  ;;  %v12717_v55 = vld [vmem:[#allocation117_spill] sm:$0xff]  ;;  %v12719_v57 = vld [vmem:[#allocation88_spill] sm:$0xff] }
 0x6e2   : > { %12709 = vst [vmem:[#allocation123_spill] sm:$0xff] %v11191_v23  ;;  %12711 = vst [vmem:[#allocation82_spill] sm:$0xff] %v11197_v39  ;;  %v11200_v38 = vpop.f32.mrb[33].mxu0  ;;  %7513 = vrcp.f32 %v3289_v43  ;;  %4271 = vadd.xlane.f32.xlu1 %v11194_v48  ;;  %4273 = vadd.xlane.f32.xlu0 %v11197_v39 }
 0x6e3   : > { %12713 = vst [vmem:[#allocation125_spill] sm:$0xff] %v11200_v38  ;;  %v7504_v17 = vpop.eup %7503  ;;  %v4233_v20 = vmul.f32 1.442695, %v4210_v37  ;;  %6345 = vmatmul.mubr.f32.gmra.mrb[28].mxu1 %v2781_v50  ;;  %v3260_v58 = vpop.xlane.xlu0 %3259 }
 0x6e4   : > { %v7506_v29 = vpop.eup %7505  ;;  %v3290_v23 = vmax.f32 %v3260_v58, 1e-09  ;;  %v4188_v44 = vpop.xlane.xlu1 %4187  ;;  %v11208_v63 = vmul.f32 %v7504_v17, %v10872_v22 }
 0x6e5   : > { %v11205_v41 = vpop.f32.mrb[34].mxu0  ;;  %7515 = vpow2.f32 %v4233_v20  ;;  %v4211_v5 = vsub.f32 %v12717_v55, %v4188_v44  ;;  %v2782_v45 = vmul.f32 %v7506_v29, %v12719_v57  ;;  %v12721_v20 = vld [vmem:[#allocation79_spill] sm:$0xff] }
 0x6e6   : > { %12715 = vst [vmem:[#allocation126_spill] sm:$0xff] %v11205_v41  ;;  %12716 = vst [vmem:[#allocation141_spill] sm:$0xff] %v11208_v63  ;;  %v11211_v43 = vpop.f32.mrb[35].mxu0  ;;  %7517 = vrcp.f32 %v3290_v23  ;;  %4275 = vadd.xlane.f32.xlu1 %v11208_v63  ;;  %v12723_v23 = vld [vmem:[#allocation83_spill] sm:$0xff] }
 0x6e7   : > { %12718 = vst [vmem:[#allocation124_spill] sm:$0xff] %v11211_v43  ;;  %v7508_v37 = vpop.eup %7507  ;;  %v4235_v50 = vmul.f32 1.442695, %v4211_v5  ;;  %6347 = vmatprep.mubr.f32.mxu1 %v2782_v45  ;;  %v3262_v58 = vpop.xlane.xlu0 %3261 }
 0x6e8   : > { %v7510_v38 = vpop.eup %7509  ;;  %v3291_v48 = vmax.f32 %v3262_v58, 1e-09  ;;  %v4190_v41 = vpop.xlane.xlu1 %4189  ;;  %v11218_v17 = vmul.f32 %v7508_v37, %v10809_v14 }
 0x6e9   : > { %v11215_v39 = vpop.f32.mrb[36].mxu0  ;;  %7519 = vpow2.f32 %v4235_v50  ;;  %v4212_v44 = vsub.f32 %v12721_v20, %v4190_v41  ;;  %v2783_v29 = vmul.f32 %v7510_v38, %v12723_v23  ;;  %v12725_v41 = vld [vmem:[#allocation85_spill] sm:$0xff] }
 0x6ea   : > { %12720 = vst [vmem:[#allocation159_spill] sm:$0xff] %v11215_v39  ;;  %v11221_v55 = vpop.f32.mrb[37].mxu0  ;;  %7521 = vrcp.f32 %v3291_v48  ;;  %4277 = vadd.xlane.f32.xlu0 %v11218_v17  ;;  %v12727_v48 = vld [vmem:[#allocation127_spill] sm:$0xff] }
 0x6eb   : > { %12722 = vst [vmem:[#allocation129_spill] sm:$0xff] %v11221_v55  ;;  %v7512_v5 = vpop.eup %7511  ;;  %v4237_v57 = vmul.f32 1.442695, %v4212_v44  ;;  %6348 = vmatmul.mubr.f32.gmra.mrb[30].mxu1 %v2783_v29  ;;  %v3264_v45 = vpop.xlane.xlu0 %3263 }
 0x6ec   : > { %v7514_v58 = vpop.eup %7513  ;;  %v3292_v43 = vmax.f32 %v3264_v45, 1e-09  ;;  %v4192_v39 = vpop.xlane.xlu1 %4191  ;;  %v11228_v37 = vmul.f32 %v7512_v5, %v10922_v49 }
 0x6ed   : > { %v11225_v63 = vpop.f32.mrb[38].mxu0  ;;  %7523 = vpow2.f32 %v4237_v57  ;;  %v4213_v50 = vsub.f32 %v12725_v41, %v4192_v39  ;;  %v3321_v38 = vmul.f32 %v7514_v58, %v12727_v48 }
 0x6ee   : > { %12724 = vst [vmem:[#allocation164_spill] sm:$0xff] %v11225_v63  ;;  %v11231_v20 = vpop.f32.mrb[39].mxu0  ;;  %7525 = vrcp.f32 %v3292_v43  ;;  %4279 = vadd.xlane.f32.xlu1 %v11228_v37  ;;  %v12731_v43 = vld [vmem:[#allocation93_spill] sm:$0xff] }
 0x6ef   : > { %12726 = vst [vmem:[#allocation128_spill] sm:$0xff] %v11231_v20  ;;  %v7516_v44 = vpop.eup %7515  ;;  %v4239_v23 = vmul.f32 1.442695, %v4213_v50  ;;  %6382 = vmatprep.mubr.f32.mxu1 %v3321_v38  ;;  %v11235_v29 = vpop.xlane.xlu0 %4692 }
 0x6f0   : > { %v7518_v45 = vpop.eup %7517  ;;  %v4194_v63 = vpop.xlane.xlu1 %4193  ;;  %v11240_v5 = vmul.f32 %v7516_v44, %v10859_v18 }
 0x6f1   : > { %v11237_v55 = vpop.f32.mrb[40].mxu0  ;;  %7527 = vpow2.f32 %v4239_v23  ;;  %v4214_v39 = vsub.f32 %v10793_v12, %v4194_v63  ;;  %v3322_v58 = vmul.f32 %v7518_v45, %v12731_v43  ;;  %v12734_v63 = vld [vmem:[#allocation35_spill] sm:$0xff]  ;;  %v12736_v45 = vld [vmem:[#allocation134_spill] sm:$0xff] }
 0x6f2   : > { %12728 = vst [vmem:[#allocation131_spill] sm:$0xff] %v11237_v55  ;;  %12729 = vst [vmem:[#allocation162_spill] sm:$0xff] %v11240_v5  ;;  %v11243_v57 = vpop.f32.mrb[41].mxu0  ;;  %4281 = vadd.xlane.f32.xlu0 %v11240_v5 }
 0x6f3   : > { %12730 = vst [vmem:[#allocation136_spill] sm:$0xff] %v11243_v57  ;;  %v7520_v41 = vpop.eup %7519  ;;  %v4241_v50 = vmul.f32 1.442695, %v4214_v39  ;;  %6383 = vmatmul.mubr.f32.vlgmr.msra.gmra.mrb[16].mxu1 %v3322_v58  ;;  %v4679_v48 = vpop.xlane.xlu0 %4678 }
 0x6f4   : > { %v7522_v38 = vpop.eup %7521  ;;  %6765 = vmatpush3.bf16.msra.mxu1 %v12697_v40  ;;  %v4196_v55 = vpop.xlane.xlu1 %4195  ;;  %v11251_v44 = vmul.f32 %v7520_v41, %v10976_v7 }
 0x6f5   : > { %v11248_v20 = vpop.f32.mrb[42].mxu0  ;;  %7529 = vpow2.f32 %v4241_v50  ;;  %v4215_v12 = vsub.f32 %v10813_v11, %v4196_v55  ;;  %6767 = vmatprep.subr.bf16.mxu1 %v12734_v63  ;;  %v3323_v39 = vmul.f32 %v7522_v38, %v12736_v45  ;;  %v12739_v55 = vld [vmem:[#allocation44_spill] sm:$0xff]  ;;  %v12741_v45 = vld [vmem:[#allocation143_spill] sm:$0xff] }
 0x6f6   : > { %12732 = vst [vmem:[#allocation171_spill] sm:$0xff] %v11248_v20  ;;  %12733 = vst [vmem:[#allocation144_spill] sm:$0xff] %v11251_v44  ;;  %v11255_v23 = vpop.f32.mrb[43].mxu0  ;;  %4283 = vadd.xlane.f32.xlu1 %v11251_v44 }
 0x6f7   : > { %12735 = vst [vmem:[#allocation140_spill] sm:$0xff] %v11255_v23  ;;  %v7524_v43 = vpop.eup %7523  ;;  %v4243_v58 = vmul.f32 1.442695, %v4215_v12  ;;  %6385 = vmatprep.mubr.f32.mxu1 %v3323_v39  ;;  %v3268_v12 = vpop.xlane.xlu0 %3267 }
 0x6f8   : > { %v7526_v40 = vpop.eup %7525  ;;  %6769 = vmatpush3.bf16.msra.mxu1 %v12734_v63  ;;  %v4198_v20 = vpop.xlane.xlu1 %4197  ;;  %v11263_v50 = vmul.f32 %v7524_v43, %v10915_v15 }
 0x6f9   : > { %v11260_v41 = vpop.f32.mrb[44].mxu0  ;;  %7531 = vpow2.f32 %v4243_v58  ;;  %v4216_v11 = vsub.f32 %v10824_v56, %v4198_v20  ;;  %6771 = vmatprep.subr.bf16.mxu1 %v12739_v55  ;;  %v3324_v23 = vmul.f32 %v7526_v40, %v12741_v45  ;;  %v12744_v56 = vld [vmem:[#allocation25_spill] sm:$0xff] }
 0x6fa   : > { %12737 = vst [vmem:[#allocation166_spill] sm:$0xff] %v11260_v41  ;;  %12738 = vst [vmem:[#allocation176_spill] sm:$0xff] %v11263_v50  ;;  %v11267_v38 = vpop.f32.mrb[45].mxu0  ;;  %4285 = vadd.xlane.f32.xlu0 %v11263_v50  ;;  %v12748_v50 = vld [vmem:[#allocation103_spill] sm:$0xff] }
 0x6fb   : > { %12740 = vst [vmem:[#allocation95_spill] sm:$0xff] %v11267_v38  ;;  %v7528_v39 = vpop.eup %7527  ;;  %v4245_v63 = vmul.f32 1.442695, %v4216_v11  ;;  %6386 = vmatmul.mubr.f32.gmra.mrb[18].mxu1 %v3324_v23  ;;  %v12745_v38 = vld [vmem:[#allocation49_spill] sm:$0xff]  ;;  %v12747_v23 = vld [vmem:[#allocation56_spill] sm:$0xff] }
 0x6fc   : > { %6773 = vmatpush3.bf16.msra.mxu1 %v12739_v55  ;;  %v4200_v41 = vpop.xlane.xlu1 %4199  ;;  %v11272_v43 = vpop.f32.mrb[46].mxu0  ;;  %v11275_v58 = vmul.f32 %v7528_v39, %v11037_v31  ;;  %v4716_v55 = vsub.f32 %v12747_v23, %v11235_v29  ;;  %v3294_v23 = vmax.f32 %v3268_v12, 1e-09 }
 0x6fd   : > { %12742 = vst [vmem:[#allocation120_spill] sm:$0xff] %v11272_v43  ;;  %7533 = vpow2.f32 %v4245_v63  ;;  %v4217_v20 = vsub.f32 %v12744_v56, %v4200_v41  ;;  %6775 = vmatprep.subr.bf16.mxu1 %v12745_v38  ;;  %v11279_v40 = vpop.f32.mrb[47].mxu0  ;;  %v4709_v43 = vsub.f32 %v12748_v50, %v4679_v48  ;;  %v12750_v41 = vld [vmem:[#allocation157_spill] sm:$0xff] }
 0x6fe   : > { %12743 = vst [vmem:[#allocation132_spill] sm:$0xff] %v11275_v58  ;;  %12746 = vst [vmem:[#allocation150_spill] sm:$0xff] %v11279_v40  ;;  %4287 = vadd.xlane.f32.xlu1 %v11275_v58  ;;  %v4697_v45 = vpop.xlane.xlu0 %4696  ;;  %v12751_v40 = vld [vmem:[#allocation54_spill] sm:$0xff]  ;;  %v4740_v5 = vmul.f32 1.442695, %v4716_v55 }
 0x6ff   : > { %v7530_v11 = vpop.eup %7529  ;;  %v4247_v57 = vmul.f32 1.442695, %v4217_v20  ;;  %v4726_v20 = vmul.f32 1.442695, %v4709_v43 }
 0x700   : > { %6777 = vmatpush3.bf16.msra.mxu1 %v12745_v38  ;;  %v4202_v39 = vpop.xlane.xlu1 %4201  ;;  %v11287_v63 = vmul.f32 %v7530_v11, %v10970_v3  ;;  %v12753_v38 = vld [vmem:[#allocation87_spill] sm:$0xff]  ;;  %v12754_v11 = vld [vmem:[#allocation60_spill] sm:$0xff] }
 0x701   : > { %7535 = vpow2.f32 %v4247_v57  ;;  %v4218_v56 = vsub.f32 %v12750_v41, %v4202_v39  ;;  %6779 = vmatprep.subr.bf16.mxu1 %v12751_v40 }
 0x702   : > { %12749 = vst [vmem:[#allocation115_spill] sm:$0xff] %v11287_v63  ;;  %4289 = vadd.xlane.f32.xlu0 %v11287_v63  ;;  %v4683_v58 = vpop.xlane.xlu0 %4682 }
 0x703   : > { %v7532_v44 = vpop.eup %7531  ;;  %v4249_v29 = vmul.f32 1.442695, %v4218_v56  ;;  %v12756_v56 = vld [vmem:[#allocation66_spill] sm:$0xff] }
 0x704   : > { %6781 = vmatpush3.bf16.msra.mxu1 %v12751_v40  ;;  %v4677_v48 = vpop.xlane.xlu1 %4676  ;;  %v11294_v50 = vmul.f32 %v7532_v44, %v11063_v2 }
 0x705   : > { %7537 = vpow2.f32 %v4249_v29  ;;  %v4708_v57 = vsub.f32 %v12753_v38, %v4677_v48  ;;  %6783 = vmatprep.subr.bf16.mxu1 %v12754_v11  ;;  %v12757_v48 = vld [vmem:[#allocation108_spill] sm:$0xff] }
 0x706   : > { %12752 = vst [vmem:[#allocation138_spill] sm:$0xff] %v11294_v50  ;;  %4291 = vadd.xlane.f32.xlu1 %v11294_v50  ;;  %v3272_v39 = vpop.xlane.xlu0 %3271  ;;  %7539 = vpow2.f32 %v4740_v5  ;;  %v4718_v38 = vsub.f32 %v12757_v48, %v4697_v45  ;;  %v12758_v5 = vld [vmem:[#allocation118_spill] sm:$0xff] }
 0x707   : > { %v7534_v41 = vpop.eup %7533  ;;  %v4724_v55 = vmul.f32 1.442695, %v4708_v57  ;;  %7541 = vpow2.f32 %v4726_v20  ;;  %v4711_v20 = vsub.f32 %v12758_v5, %v4683_v58  ;;  %v3296_v5 = vmax.f32 %v3272_v39, 1e-09  ;;  %v12763_v39 = vld [vmem:[#allocation29_spill] sm:$0xff] }
 0x708   : > { %6785 = vmatpush3.bf16.msra.mxu1 %v12754_v11  ;;  %v3266_v43 = vpop.xlane.xlu1 %3265  ;;  %v11301_v40 = vmul.f32 %v7534_v41, %v10995_v19 }
 0x709   : > { %7543 = vpow2.f32 %v4724_v55  ;;  %v3293_v44 = vmax.f32 %v3266_v43, 1e-09  ;;  %6787 = vmatprep.subr.bf16.mxu1 %v12756_v56  ;;  %v12760_v55 = vld [vmem:[#allocation71_spill] sm:$0xff]  ;;  %v4730_v45 = vmul.f32 1.442695, %v4711_v20 }
 0x70a   : > { %12755 = vst [vmem:[#allocation146_spill] sm:$0xff] %v11301_v40  ;;  %7545 = vrcp.f32 %v3294_v23  ;;  %4293 = vadd.xlane.f32.xlu0 %v11301_v40  ;;  %v4701_v12 = vpop.xlane.xlu0 %4700  ;;  %v4744_v40 = vmul.f32 1.442695, %v4718_v38 }
 0x70b   : > { %v7536_v29 = vpop.eup %7535  ;;  %7547 = vrcp.f32 %v3293_v44 }
 0x70c   : > { %6789 = vmatpush3.bf16.msra.mxu1 %v12756_v56  ;;  %v4695_v57 = vpop.xlane.xlu1 %4694  ;;  %v11309_v11 = vmul.f32 %v7536_v29, %v11076_v9 }
 0x70d   : > { %v4717_v41 = vsub.f32 %v10902_v59, %v4695_v57  ;;  %6791 = vmatprep.subr.bf16.mxu1 %v12760_v55  ;;  %v12762_v59 = vld [vmem:[#allocation34_spill] sm:$0xff] }
 0x70e   : > { %12759 = vst [vmem:[#allocation175_spill] sm:$0xff] %v11309_v11  ;;  %4295 = vadd.xlane.f32.xlu1 %v11309_v11  ;;  %v4687_v23 = vpop.xlane.xlu0 %4686  ;;  %v12765_v11 = vld [vmem:[#allocation190_spill] sm:$0xff] }
 0x70f   : > { %v7538_v43 = vpop.eup %7537  ;;  %v4742_v50 = vmul.f32 1.442695, %v4717_v41 }
 0x710   : > { %6793 = vmatpush3.bf16.msra.mxu1 %v12760_v55  ;;  %v4681_v58 = vpop.xlane.xlu1 %4680  ;;  %v11316_v44 = vmul.f32 %v7538_v43, %v11013_v1  ;;  %v7540_v56 = vpop.eup %7539 }
 0x711   : > { %7549 = vpow2.f32 %v4742_v50  ;;  %v4710_v29 = vsub.f32 %v10928_v36, %v4681_v58  ;;  %6795 = vmatprep.subr.bf16.mxu1 %v12762_v59  ;;  %v7542_v48 = vpop.eup %7541  ;;  %v11322_v43 = vmul.f32 %v7540_v56, %v10976_v7  ;;  %v12766_v56 = vld [vmem:[#allocation199_spill] sm:$0xff] }
 0x712   : > { %12761 = vst [vmem:[#allocation148_spill] sm:$0xff] %v11316_v44  ;;  %4297 = vadd.xlane.f32.xlu0 %v11316_v44  ;;  %v3276_v57 = vpop.xlane.xlu0 %3275  ;;  %7551 = vpow2.f32 %v4744_v40  ;;  %v4713_v63 = vsub.f32 %v12766_v56, %v4687_v23 }
 0x713   : > { %v7544_v38 = vpop.eup %7543  ;;  %v4728_v20 = vmul.f32 1.442695, %v4710_v29  ;;  %7553 = vpow2.f32 %v4730_v45  ;;  %v12764_v29 = vld [vmem:[#allocation62_spill] sm:$0xff] }
 0x714   : > { %v7546_v41 = vpop.eup %7545  ;;  %v3270_v55 = vpop.xlane.xlu1 %3269  ;;  %v11325_v50 = vmul.f32 %v7544_v38, %v10698_v46  ;;  %v4720_v44 = vsub.f32 %v12764_v29, %v4701_v12  ;;  %v11334_v38 = vmul.f32 %v7542_v48, %v10718_v32  ;;  %v4734_v12 = vmul.f32 1.442695, %v4713_v63 }
 0x715   : > { %v7548_v36 = vpop.eup %7547  ;;  %7555 = vpow2.f32 %v4728_v20  ;;  %v3295_v58 = vmax.f32 %v3270_v55, 1e-09  ;;  %v3326_v7 = vmul.f32 %v7546_v41, %v12765_v11  ;;  %v3298_v48 = vmax.f32 %v3276_v57, 1e-09 }
 0x716   : > { %7557 = vrcp.f32 %v3296_v5  ;;  %4788 = vadd.xlane.f32.xlu0 %v11322_v43  ;;  %4772 = vadd.xlane.f32.xlu1 %v11325_v50  ;;  %v3325_v40 = vmul.f32 %v7548_v36, %v12763_v39  ;;  %v4705_v45 = vpop.xlane.xlu0 %4704  ;;  %v4748_v55 = vmul.f32 1.442695, %v4720_v44 }
 0x717   : > { %7559 = vrcp.f32 %v3295_v58  ;;  %v4722_v57 = vsub.f32 %v10949_v28, %v4705_v45 }
 0x718   : > { %6388 = vmatprep.mubr.f32.mxu1 %v3325_v40  ;;  %v4699_v46 = vpop.xlane.xlu1 %4698 }
 0x719   : > { %v4719_v5 = vsub.f32 %v10956_v62, %v4699_v46  ;;  %6389 = vmatmul.mubr.f32.gmra.mrb[20].mxu1 %v3326_v7 }
 0x71a   : > { %4774 = vadd.xlane.f32.xlu1 %v11334_v38  ;;  %v4691_v23 = vpop.xlane.xlu0 %4690 }
 0x71b   : > { %v7550_v20 = vpop.eup %7549  ;;  %v4746_v36 = vmul.f32 1.442695, %v4719_v5  ;;  %v12767_v5 = vld [vmem:[#allocation178_spill] sm:$0xff] }
 0x71c   : > { %v4685_v58 = vpop.xlane.xlu1 %4684  ;;  %v11339_v39 = vmul.f32 %v7550_v20, %v10915_v15  ;;  %v7552_v11 = vpop.eup %7551  ;;  %v4715_v20 = vsub.f32 %v10965_v33, %v4691_v23 }
 0x71d   : > { %7561 = vpow2.f32 %v4746_v36  ;;  %v4712_v41 = vsub.f32 %v10982_v53, %v4685_v58  ;;  %v7554_v32 = vpop.eup %7553  ;;  %v11344_v63 = vmul.f32 %v7552_v11, %v11037_v31 }
 0x71e   : > { %4790 = vadd.xlane.f32.xlu0 %v11339_v39  ;;  %7563 = vpow2.f32 %v4748_v55  ;;  %v3280_v46 = vpop.xlane.xlu0 %3279  ;;  %v11356_v55 = vmul.f32 %v7554_v32, %v10762_v51  ;;  %v4738_v28 = vmul.f32 1.442695, %v4715_v20 }
 0x71f   : > { %v7556_v62 = vpop.eup %7555  ;;  %v4732_v40 = vmul.f32 1.442695, %v4712_v41  ;;  %7565 = vpow2.f32 %v4734_v12  ;;  %v3300_v32 = vmax.f32 %v3280_v46, 1e-09 }
 0x720   : > { %v7558_v29 = vpop.eup %7557  ;;  %v3274_v44 = vpop.xlane.xlu1 %3273  ;;  %v11347_v15 = vmul.f32 %v7556_v62, %v12665_v16 }
 0x721   : > { %v7560_v7 = vpop.eup %7559  ;;  %7567 = vpow2.f32 %v4732_v40  ;;  %v3297_v56 = vmax.f32 %v3274_v44, 1e-09  ;;  %v3328_v31 = vmul.f32 %v7558_v29, %v12767_v5 }
 0x722   : > { %7569 = vrcp.f32 %v3298_v48  ;;  %4792 = vadd.xlane.f32.xlu0 %v11344_v63  ;;  %4776 = vadd.xlane.f32.xlu1 %v11347_v15  ;;  %v3327_v53 = vmul.f32 %v7560_v7, %v10940_v60  ;;  %v4752_v60 = vmul.f32 1.442695, %v4722_v57  ;;  %v3284_v33 = vpop.xlane.xlu0 %3283 }
 0x723   : > { %7571 = vrcp.f32 %v3297_v56  ;;  %v3302_v5 = vmax.f32 %v3284_v33, 1e-09 }
 0x724   : > { %6391 = vmatprep.mubr.f32.mxu1 %v3327_v53  ;;  %v4703_v16 = vpop.xlane.xlu1 %4702  ;;  %v12768_v53 = vld [vmem:[#allocation100_spill] sm:$0xff] }
 0x725   : > { %v4721_v36 = vsub.f32 %v11019_v30, %v4703_v16  ;;  %6392 = vmatmul.mubr.f32.gmra.mrb[22].mxu1 %v3328_v31 }
 0x726   : > { %4778 = vadd.xlane.f32.xlu1 %v11356_v55  ;;  %v3288_v56 = vpop.xlane.xlu0 %3287 }
 0x727   : > { %v7562_v12 = vpop.eup %7561  ;;  %v4750_v58 = vmul.f32 1.442695, %v4721_v36 }
 0x728   : > { %v4689_v45 = vpop.xlane.xlu1 %4688  ;;  %v11361_v11 = vmul.f32 %v7562_v12, %v10970_v3  ;;  %v7564_v41 = vpop.eup %7563 }
 0x729   : > { %7573 = vpow2.f32 %v4750_v58  ;;  %v4714_v23 = vsub.f32 %v11032_v4, %v4689_v45  ;;  %v7566_v51 = vpop.eup %7565  ;;  %v11366_v29 = vmul.f32 %v7564_v41, %v11063_v2 }
 0x72a   : > { %4794 = vadd.xlane.f32.xlu0 %v11361_v11  ;;  %7575 = vpow2.f32 %v4752_v60  ;;  %v11376_v46 = vmul.f32 %v7566_v51, %v10809_v14  ;;  %v3765_v12 = vpop.xlane.xlu0 %3764  ;;  %v3304_v14 = vmax.f32 %v3288_v56, 1e-09 }
 0x72b   : > { %v7568_v30 = vpop.eup %7567  ;;  %v4736_v48 = vmul.f32 1.442695, %v4714_v23  ;;  %7577 = vpow2.f32 %v4738_v28  ;;  %v3795_v51 = vmax.f32 %v3765_v12, 1e-09 }
 0x72c   : > { %v7570_v62 = vpop.eup %7569  ;;  %v3278_v40 = vpop.xlane.xlu1 %3277  ;;  %v11369_v3 = vmul.f32 %v7568_v30, %v10872_v22 }
 0x72d   : > { %v7572_v44 = vpop.eup %7571  ;;  %7579 = vpow2.f32 %v4736_v48  ;;  %v3299_v7 = vmax.f32 %v3278_v40, 1e-09  ;;  %v3330_v57 = vmul.f32 %v7570_v62, %v12768_v53 }
 0x72e   : > { %7581 = vrcp.f32 %v3300_v32  ;;  %4796 = vadd.xlane.f32.xlu0 %v11366_v29  ;;  %4780 = vadd.xlane.f32.xlu1 %v11369_v3  ;;  %v3329_v4 = vmul.f32 %v7572_v44, %v10999_v10  ;;  %v3769_v30 = vpop.xlane.xlu0 %3768 }
 0x72f   : > { %7583 = vrcp.f32 %v3299_v7  ;;  %v3797_v40 = vmax.f32 %v3769_v30, 1e-09 }
 0x730   : > { %6394 = vmatprep.mubr.f32.mxu1 %v3329_v4  ;;  %v4707_v2 = vpop.xlane.xlu1 %4706 }
 0x731   : > { %v4723_v22 = vsub.f32 %v11058_v8, %v4707_v2  ;;  %6395 = vmatmul.mubr.f32.gmra.mrb[24].mxu1 %v3330_v57 }
 0x732   : > { %4782 = vadd.xlane.f32.xlu1 %v11376_v46 }
 0x733   : > { %v7574_v31 = vpop.eup %7573  ;;  %v4754_v20 = vmul.f32 1.442695, %v4723_v22 }
 0x734   : > { %v3282_v16 = vpop.xlane.xlu1 %3281  ;;  %v11381_v10 = vmul.f32 %v7574_v31, %v10995_v19  ;;  %v7576_v36 = vpop.eup %7575 }
 0x735   : > { %7585 = vpow2.f32 %v4754_v20  ;;  %v3301_v60 = vmax.f32 %v3282_v16, 1e-09  ;;  %v7578_v58 = vpop.eup %7577  ;;  %v11385_v41 = vmul.f32 %v7576_v36, %v11076_v9  ;;  %v3773_v31 = vpop.xlane.xlu0 %3772 }
 0x736   : > { %7587 = vrcp.f32 %v3302_v5  ;;  %4798 = vadd.xlane.f32.xlu0 %v11381_v10  ;;  %v11395_v62 = vmul.f32 %v7578_v58, %v10859_v18  ;;  %v3799_v58 = vmax.f32 %v3773_v31, 1e-09 }
 0x737   : > { %v7580_v8 = vpop.eup %7579  ;;  %7589 = vrcp.f32 %v3301_v60  ;;  %v12769_v60 = vld [vmem:[#allocation36_spill] sm:$0xff] }
 0x738   : > { %v7582_v28 = vpop.eup %7581  ;;  %v3286_v45 = vpop.xlane.xlu1 %3285  ;;  %v11388_v33 = vmul.f32 %v7580_v8, %v10922_v49  ;;  %7591 = vrcp.f32 %v3304_v14 }
 0x739   : > { %v7584_v19 = vpop.eup %7583  ;;  %v3303_v23 = vmax.f32 %v3286_v45, 1e-09  ;;  %v3332_v48 = vmul.f32 %v7582_v28, %v10988_v61  ;;  %v3777_v12 = vpop.xlane.xlu0 %3776 }
 0x73a   : > { %4800 = vadd.xlane.f32.xlu0 %v11385_v41  ;;  %4784 = vadd.xlane.f32.xlu1 %v11388_v33  ;;  %v3331_v32 = vmul.f32 %v7584_v19, %v11049_v52  ;;  %v3801_v28 = vmax.f32 %v3777_v12, 1e-09 }
 0x73b   : > { %7593 = vrcp.f32 %v3303_v23  ;;  %v12772_v23 = vld [vmem:[#allocation55_spill] sm:$0xff] }
 0x73c   : > { %6397 = vmatprep.mubr.f32.mxu1 %v3331_v32  ;;  %v3763_v9 = vpop.xlane.xlu1 %3762  ;;  %7595 = vrcp.f32 %v3795_v51 }
 0x73d   : > { %v3794_v49 = vmax.f32 %v3763_v9, 1e-09  ;;  %6398 = vmatmul.mubr.f32.gmra.mrb[26].mxu1 %v3332_v48  ;;  %v3781_v14 = vpop.xlane.xlu0 %3780 }
 0x73e   : > { %4786 = vadd.xlane.f32.xlu1 %v11395_v62 }
 0x73f   : > { %v7586_v44 = vpop.eup %7585  ;;  %7597 = vrcp.f32 %v3794_v49  ;;  %v12773_v49 = vld [vmem:[#allocation61_spill] sm:$0xff] }
 0x740   : > { %v7588_v7 = vpop.eup %7587  ;;  %v3767_v4 = vpop.xlane.xlu1 %3766  ;;  %v11399_v52 = vmul.f32 %v7586_v44, %v11013_v1  ;;  %7599 = vrcp.f32 %v3797_v40 }
 0x741   : > { %v7590_v56 = vpop.eup %7589  ;;  %v3796_v61 = vmax.f32 %v3767_v4, 1e-09  ;;  %v3334_v53 = vmul.f32 %v7588_v7, %v11006_v34  ;;  %v3785_v19 = vpop.xlane.xlu0 %3784 }
 0x742   : > { %4802 = vadd.xlane.f32.xlu0 %v11399_v52  ;;  %v3333_v18 = vmul.f32 %v7590_v56, %v11071_v6  ;;  %v7592_v57 = vpop.eup %7591  ;;  %v3805_v30 = vmax.f32 %v3785_v19, 1e-09 }
 0x743   : > { %7601 = vrcp.f32 %v3796_v61  ;;  %v3336_v5 = vmul.f32 %v7592_v57, %v11024_v25 }
 0x744   : > { %6400 = vmatprep.mubr.f32.mxu1 %v3333_v18  ;;  %7603 = vrcp.f32 %v3799_v58 }
 0x745   : > { %v7594_v2 = vpop.eup %7593  ;;  %6401 = vmatmul.mubr.f32.gmra.mrb[28].mxu1 %v3334_v53  ;;  %v12774_v53 = vld [vmem:[#allocation67_spill] sm:$0xff] }
 0x746   : > { %v3335_v22 = vmul.f32 %v7594_v2, %v11084_v26  ;;  %v7596_v1 = vpop.eup %7595 }
 0x747   : > { %v3827_v6 = vmul.f32 %v7596_v1, %v11043_v27 }
 0x748   : > { %6403 = vmatprep.mubr.f32.mxu1 %v3335_v22 }
 0x749   : > { %v7598_v20 = vpop.eup %7597  ;;  %6404 = vmatmul.mubr.f32.gmra.mrb[30].mxu1 %v3336_v5 }
 0x74a   : > { %v3826_v16 = vmul.f32 %v7598_v20, %v11092_v54  ;;  %v7600_v36 = vpop.eup %7599  ;;  %v12770_v54 = vld [vmem:[#allocation45_spill] sm:$0xff]  ;;  %v12775_v20 = vld [vmem:[#allocation72_spill] sm:$0xff] }
 0x74b   : > { %v3829_v25 = vmul.f32 %v7600_v36, %v11053_v24  ;;  %v3803_v24 = vmax.f32 %v3781_v14, 1e-09  ;;  %v12778_v14 = vld [vmem:[#allocation183_spill] sm:$0xff] }
 0x74c   : > { %6438 = vmatprep.mubr.f32.mxu1 %v3826_v16 }
 0x74d   : > { %v7602_v34 = vpop.eup %7601  ;;  %6439 = vmatmul.mubr.f32.vlgmr.msra.gmra.mrb[16].mxu1 %v3827_v6 }
 0x74e   : > { %6797 = vmatpush3.bf16.msra.mxu1 %v12762_v59  ;;  %v3828_v26 = vmul.f32 %v7602_v34, %v11101_v0  ;;  %v12771_v0 = vld [vmem:[#allocation50_spill] sm:$0xff]  ;;  %v7604_v9 = vpop.eup %7603 }
 0x74f   : > { %6799 = vmatprep.subr.bf16.mxu1 %v12769_v60  ;;  %v3831_v61 = vmul.f32 %v7604_v9, %v11067_v13 }
 0x750   : > { %6441 = vmatprep.mubr.f32.mxu1 %v3828_v26 }
 0x751   : > { %6442 = vmatmul.mubr.f32.gmra.mrb[18].mxu1 %v3829_v25  ;;  %v12777_v25 = vld [vmem:[#allocation119_spill] sm:$0xff] }
 0x752   : > { %6801 = vmatpush3.bf16.msra.mxu1 %v12769_v60  ;;  %v12776_v60 = vld [vmem:[#allocation28_spill] sm:$0xff] }
 0x753   : > { %6803 = vmatprep.subr.bf16.mxu1 %v12770_v54  ;;  %v3771_v27 = vpop.xlane.xlu1 %3770 }
 0x754   : > { %v3798_v8 = vmax.f32 %v3771_v27, 1e-09 }
 0x756   : > { %7605 = vrcp.f32 %v3798_v8  ;;  %6805 = vmatpush3.bf16.msra.mxu1 %v12770_v54 }
 0x757   : > { %6807 = vmatprep.subr.bf16.mxu1 %v12771_v0  ;;  %v3775_v59 = vpop.xlane.xlu1 %3774  ;;  %7607 = vrcp.f32 %v3801_v28  ;;  %v3789_v48 = vpop.xlane.xlu0 %3788 }
 0x758   : > { %v3800_v45 = vmax.f32 %v3775_v59, 1e-09  ;;  %v3807_v4 = vmax.f32 %v3789_v48, 1e-09  ;;  %v12779_v59 = vld [vmem:[#allocation135_spill] sm:$0xff]  ;;  %v12781_v48 = vld [vmem:[#allocation68_spill] sm:$0xff] }
 0x75a   : > { %6809 = vmatpush3.bf16.msra.mxu1 %v12771_v0  ;;  %7609 = vrcp.f32 %v3800_v45 }
 0x75b   : > { %6811 = vmatprep.subr.bf16.mxu1 %v12772_v23  ;;  %v3779_v51 = vpop.xlane.xlu1 %3778  ;;  %7611 = vrcp.f32 %v3803_v24 }
 0x75c   : > { %v3802_v32 = vmax.f32 %v3779_v51, 1e-09  ;;  %v12780_v51 = vld [vmem:[#allocation192_spill] sm:$0xff] }
 0x75e   : > { %7613 = vrcp.f32 %v3802_v32  ;;  %6813 = vmatpush3.bf16.msra.mxu1 %v12772_v23 }
 0x75f   : > { %6815 = vmatprep.subr.bf16.mxu1 %v12773_v49  ;;  %v3783_v40 = vpop.xlane.xlu1 %3782  ;;  %7615 = vrcp.f32 %v3805_v30  ;;  %v3793_v18 = vpop.xlane.xlu0 %3792 }
 0x760   : > { %v7606_v44 = vpop.eup %7605  ;;  %v3804_v7 = vmax.f32 %v3783_v40, 1e-09  ;;  %v3809_v1 = vmax.f32 %v3793_v18, 1e-09  ;;  %v12783_v18 = vld [vmem:[#allocation38_spill] sm:$0xff] }
 0x761   : > { %v3830_v56 = vmul.f32 %v7606_v44, %v11131_v35  ;;  %v7608_v2 = vpop.eup %7607 }
 0x762   : > { %6817 = vmatpush3.bf16.msra.mxu1 %v12773_v49  ;;  %7617 = vrcp.f32 %v3804_v7  ;;  %v3833_v6 = vmul.f32 %v7608_v2, %v11080_v42  ;;  %v12782_v7 = vld [vmem:[#allocation165_spill] sm:$0xff] }
 0x763   : > { %6819 = vmatprep.subr.bf16.mxu1 %v12774_v53  ;;  %6444 = vmatprep.mubr.f32.mxu1 %v3830_v56  ;;  %v3787_v57 = vpop.xlane.xlu1 %3786  ;;  %7619 = vrcp.f32 %v3807_v4 }
 0x764   : > { %v3806_v22 = vmax.f32 %v3787_v57, 1e-09  ;;  %6445 = vmatmul.mubr.f32.gmra.mrb[20].mxu1 %v3831_v61  ;;  %v7610_v5 = vpop.eup %7609 }
 0x765   : > { %v3832_v35 = vmul.f32 %v7610_v5, %v11139_v47  ;;  %v7612_v31 = vpop.eup %7611 }
 0x766   : > { %7621 = vrcp.f32 %v3806_v22  ;;  %6821 = vmatpush3.bf16.msra.mxu1 %v12774_v53  ;;  %v3835_v58 = vmul.f32 %v7612_v31, %v12777_v25  ;;  %v12784_v22 = vld [vmem:[#allocation160_spill] sm:$0xff] }
 0x767   : > { %6823 = vmatprep.subr.bf16.mxu1 %v12775_v20  ;;  %v4270_v13 = vpop.xlane.xlu0 %4269  ;;  %v3791_v16 = vpop.xlane.xlu1 %3790  ;;  %6447 = vmatprep.mubr.f32.mxu1 %v3832_v35  ;;  %7623 = vrcp.f32 %v3809_v1  ;;  %v12785_v35 = vld [vmem:[#allocation52_spill] sm:$0xff] }
 0x768   : > { %v7614_v36 = vpop.eup %7613  ;;  %v3808_v34 = vmax.f32 %v3791_v16, 1e-09  ;;  %v4300_v12 = vmax.f32 %v4270_v13, 1e-09  ;;  %6448 = vmatmul.mubr.f32.gmra.mrb[22].mxu1 %v3833_v6  ;;  %v12786_v6 = vld [vmem:[#allocation82_spill] sm:$0xff] }
 0x769   : > { %v3834_v26 = vmul.f32 %v7614_v36, %v11151_v21  ;;  %v7616_v54 = vpop.eup %7615 }
 0x76a   : > { %6825 = vmatpush3.bf16.msra.mxu1 %v12775_v20  ;;  %7625 = vrcp.f32 %v3808_v34  ;;  %v3837_v45 = vmul.f32 %v7616_v54, %v12779_v59  ;;  %v12787_v34 = vld [vmem:[#allocation121_spill] sm:$0xff] }
 0x76b   : > { %6858 = vmatprep.subr.bf16.mxu1 %v12776_v60  ;;  %6450 = vmatprep.mubr.f32.mxu1 %v3834_v26  ;;  %v4268_v47 = vpop.xlane.xlu1 %4267  ;;  %7627 = vrcp.f32 %v4300_v12  ;;  %v12788_v26 = vld [vmem:[#allocation31_spill] sm:$0xff]  ;;  %v12789_v54 = vld [vmem:[#allocation141_spill] sm:$0xff] }
 0x76c   : > { %v4299_v27 = vmax.f32 %v4268_v47, 1e-09  ;;  %v7618_v42 = vpop.eup %7617  ;;  %6451 = vmatmul.mubr.f32.gmra.mrb[24].mxu1 %v3835_v58 }
 0x76d   : > { %v3836_v8 = vmul.f32 %v7618_v42, %v12778_v14  ;;  %v7620_v28 = vpop.eup %7619  ;;  %v12790_v42 = vld [vmem:[#allocation41_spill] sm:$0xff] }
 0x76e   : > { %7629 = vrcp.f32 %v4299_v27  ;;  %v3839_v9 = vmul.f32 %v7620_v28, %v12781_v48  ;;  %v12794_v48 = vld [vmem:[#allocation57_spill] sm:$0xff] }
 0x76f   : > { %v4274_v21 = vpop.xlane.xlu0 %4273  ;;  %v4272_v0 = vpop.xlane.xlu1 %4271  ;;  %6453 = vmatprep.mubr.f32.mxu1 %v3836_v8 }
 0x770   : > { %v7622_v24 = vpop.eup %7621  ;;  %v4302_v19 = vmax.f32 %v4274_v21, 1e-09  ;;  %v4301_v23 = vmax.f32 %v4272_v0, 1e-09  ;;  %6454 = vmatmul.mubr.f32.gmra.mrb[26].mxu1 %v3837_v45  ;;  %v12791_v21 = vld [vmem:[#allocation46_spill] sm:$0xff] }
 0x771   : > { %v3838_v32 = vmul.f32 %v7622_v24, %v12780_v51  ;;  %v7624_v49 = vpop.eup %7623 }
 0x772   : > { %7631 = vrcp.f32 %v4302_v19  ;;  %v3841_v53 = vmul.f32 %v7624_v49, %v12783_v18  ;;  %v12792_v19 = vld [vmem:[#allocation51_spill] sm:$0xff]  ;;  %v12797_v18 = vld [vmem:[#allocation176_spill] sm:$0xff] }
 0x773   : > { %7633 = vrcp.f32 %v4301_v23  ;;  %6456 = vmatprep.mubr.f32.mxu1 %v3838_v32  ;;  %v4276_v30 = vpop.xlane.xlu1 %4275  ;;  %v12793_v32 = vld [vmem:[#allocation162_spill] sm:$0xff] }
 0x774   : > { %v4303_v40 = vmax.f32 %v4276_v30, 1e-09  ;;  %v7626_v44 = vpop.eup %7625  ;;  %6457 = vmatmul.mubr.f32.gmra.mrb[28].mxu1 %v3839_v9 }
 0x775   : > { %v3840_v4 = vmul.f32 %v7626_v44, %v12782_v7  ;;  %v7628_v56 = vpop.eup %7627  ;;  %v12796_v7 = vld [vmem:[#allocation63_spill] sm:$0xff] }
 0x776   : > { %7635 = vrcp.f32 %v4303_v40  ;;  %v4332_v31 = vmul.f32 %v7628_v56, %v12785_v35  ;;  %v12795_v40 = vld [vmem:[#allocation144_spill] sm:$0xff] }
 0x777   : > { %v4278_v61 = vpop.xlane.xlu0 %4277  ;;  %6459 = vmatprep.mubr.f32.mxu1 %v3840_v4 }
 0x778   : > { %v7630_v57 = vpop.eup %7629  ;;  %v4304_v2 = vmax.f32 %v4278_v61, 1e-09  ;;  %6460 = vmatmul.mubr.f32.gmra.mrb[30].mxu1 %v3841_v53 }
 0x779   : > { %v4331_v5 = vmul.f32 %v7630_v57, %v12784_v22  ;;  %v12798_v57 = vld [vmem:[#allocation69_spill] sm:$0xff] }
 0x77a   : > { %7637 = vrcp.f32 %v4304_v2 }
 0x77b   : > { %6494 = vmatprep.mubr.f32.mxu1 %v4331_v5  ;;  %v4280_v1 = vpop.xlane.xlu1 %4279 }
 0x77c   : > { %v7632_v20 = vpop.eup %7631  ;;  %v4305_v13 = vmax.f32 %v4280_v1, 1e-09  ;;  %6495 = vmatmul.mubr.f32.vlgmr.msra.gmra.mrb[16].mxu1 %v4332_v31  ;;  %v12799_v1 = vld [vmem:[#allocation132_spill] sm:$0xff] }
 0x77d   : > { %v7634_v16 = vpop.eup %7633  ;;  %v4334_v36 = vmul.f32 %v7632_v20, %v12786_v6  ;;  %6866 = vmatpush3.bf16.msra.mxu1 %v12776_v60 }
 0x77e   : > { %7639 = vrcp.f32 %v4305_v13  ;;  %v4333_v12 = vmul.f32 %v7634_v16, %v12787_v34  ;;  %6859 = vmatprep.subr.bf16.mxu1 %v12788_v26  ;;  %v12800_v16 = vld [vmem:[#allocation115_spill] sm:$0xff] }
 0x77f   : > { %v4282_v47 = vpop.xlane.xlu0 %4281 }
 0x780   : > { %v7636_v25 = vpop.eup %7635  ;;  %v4306_v58 = vmax.f32 %v4282_v47, 1e-09  ;;  %6497 = vmatprep.mubr.f32.mxu1 %v4333_v12 }
 0x781   : > { %6498 = vmatmul.mubr.f32.gmra.mrb[18].mxu1 %v4334_v36  ;;  %v4335_v27 = vmul.f32 %v7636_v25, %v12789_v54 }
 0x782   : > { %7641 = vrcp.f32 %v4306_v58  ;;  %6867 = vmatpush3.bf16.msra.mxu1 %v12788_v26  ;;  %v12801_v26 = vld [vmem:[#allocation138_spill] sm:$0xff] }
 0x783   : > { %6860 = vmatprep.subr.bf16.mxu1 %v12790_v42  ;;  %6500 = vmatprep.mubr.f32.mxu1 %v4335_v27  ;;  %v4284_v14 = vpop.xlane.xlu1 %4283 }
 0x784   : > { %v7638_v8 = vpop.eup %7637  ;;  %v4307_v60 = vmax.f32 %v4284_v14, 1e-09  ;;  %v12802_v14 = vld [vmem:[#allocation146_spill] sm:$0xff] }
 0x785   : > { %v4336_v28 = vmul.f32 %v7638_v8, %v11218_v17 }
 0x786   : > { %7643 = vrcp.f32 %v4307_v60  ;;  %6868 = vmatpush3.bf16.msra.mxu1 %v12790_v42 }
 0x787   : > { %6861 = vmatprep.subr.bf16.mxu1 %v12791_v21  ;;  %v4286_v0 = vpop.xlane.xlu0 %4285  ;;  %6501 = vmatmul.mubr.f32.gmra.mrb[20].mxu1 %v4336_v28 }
 0x788   : > { %v7640_v59 = vpop.eup %7639  ;;  %v4308_v45 = vmax.f32 %v4286_v0, 1e-09  ;;  %v12803_v0 = vld [vmem:[#allocation175_spill] sm:$0xff] }
 0x789   : > { %v4337_v24 = vmul.f32 %v7640_v59, %v11228_v37 }
 0x78a   : > { %7645 = vrcp.f32 %v4308_v45  ;;  %6869 = vmatpush3.bf16.msra.mxu1 %v12791_v21 }
 0x78b   : > { %6862 = vmatprep.subr.bf16.mxu1 %v12792_v19  ;;  %6503 = vmatprep.mubr.f32.mxu1 %v4337_v24  ;;  %v4288_v23 = vpop.xlane.xlu1 %4287 }
 0x78c   : > { %v7642_v51 = vpop.eup %7641  ;;  %v4309_v17 = vmax.f32 %v4288_v23, 1e-09  ;;  %v12804_v23 = vld [vmem:[#allocation148_spill] sm:$0xff] }
 0x78d   : > { %v4338_v30 = vmul.f32 %v7642_v51, %v12793_v32 }
 0x78e   : > { %7647 = vrcp.f32 %v4309_v17  ;;  %6870 = vmatpush3.bf16.msra.mxu1 %v12792_v19 }
 0x78f   : > { %6863 = vmatprep.subr.bf16.mxu1 %v12794_v48  ;;  %v4290_v9 = vpop.xlane.xlu0 %4289  ;;  %6504 = vmatmul.mubr.f32.gmra.mrb[22].mxu1 %v4338_v30 }
 0x790   : > { %v7644_v49 = vpop.eup %7643  ;;  %v4310_v37 = vmax.f32 %v4290_v9, 1e-09 }
 0x791   : > { %v4339_v44 = vmul.f32 %v7644_v49, %v12795_v40 }
 0x792   : > { %7649 = vrcp.f32 %v4310_v37  ;;  %6871 = vmatpush3.bf16.msra.mxu1 %v12794_v48 }
 0x793   : > { %6864 = vmatprep.subr.bf16.mxu1 %v12796_v7  ;;  %6506 = vmatprep.mubr.f32.mxu1 %v4339_v44  ;;  %v4292_v4 = vpop.xlane.xlu1 %4291 }
 0x794   : > { %v7646_v56 = vpop.eup %7645  ;;  %v4311_v61 = vmax.f32 %v4292_v4, 1e-09 }
 0x795   : > { %v4340_v53 = vmul.f32 %v7646_v56, %v12797_v18 }
 0x796   : > { %7651 = vrcp.f32 %v4311_v61  ;;  %6872 = vmatpush3.bf16.msra.mxu1 %v12796_v7 }
 0x797   : > { %6865 = vmatprep.subr.bf16.mxu1 %v12798_v57  ;;  %v4294_v2 = vpop.xlane.xlu0 %4293  ;;  %6507 = vmatmul.mubr.f32.gmra.mrb[24].mxu1 %v4340_v53 }
 0x798   : > { %v7648_v22 = vpop.eup %7647  ;;  %v4312_v5 = vmax.f32 %v4294_v2, 1e-09 }
 0x799   : > { %v4341_v35 = vmul.f32 %v7648_v22, %v12799_v1 }
 0x79a   : > { %7653 = vrcp.f32 %v4312_v5  ;;  %6873 = vmatpush3.bf16.msra.mxu1 %v12798_v57 }
 0x79b   : > { %6509 = vmatprep.mubr.f32.mxu1 %v4341_v35  ;;  %v4296_v31 = vpop.xlane.xlu1 %4295 }
 0x79c   : > { %v7650_v20 = vpop.eup %7649  ;;  %v4313_v13 = vmax.f32 %v4296_v31, 1e-09 }
 0x79d   : > { %v4342_v6 = vmul.f32 %v7650_v20, %v12800_v16 }
 0x79e   : > { %7655 = vrcp.f32 %v4313_v13 }
 0x79f   : > { %v4298_v36 = vpop.xlane.xlu0 %4297  ;;  %6510 = vmatmul.mubr.f32.gmra.mrb[26].mxu1 %v4342_v6 }
 0x7a0   : > { %v7652_v34 = vpop.eup %7651  ;;  %v4314_v12 = vmax.f32 %v4298_v36, 1e-09 }
 0x7a1   : > { %v4343_v47 = vmul.f32 %v7652_v34, %v12801_v26 }
 0x7a2   : > { %7657 = vrcp.f32 %v4314_v12 }
 0x7a3   : > { %v4789_v25 = vpop.xlane.xlu0 %4788  ;;  %6512 = vmatprep.mubr.f32.mxu1 %v4343_v47  ;;  %v4773_v58 = vpop.xlane.xlu1 %4772 }
 0x7a4   : > { %v7654_v54 = vpop.eup %7653  ;;  %v4812_v27 = vmax.f32 %v4789_v25, 1e-09  ;;  %v4804_v42 = vmax.f32 %v4773_v58, 1e-09 }
 0x7a5   : > { %v4344_v8 = vmul.f32 %v7654_v54, %v12802_v14 }
 0x7a6   : > { %7659 = vrcp.f32 %v4812_v27 }
 0x7a7   : > { %7661 = vrcp.f32 %v4804_v42  ;;  %6513 = vmatmul.mubr.f32.gmra.mrb[28].mxu1 %v4344_v8  ;;  %v4775_v60 = vpop.xlane.xlu1 %4774 }
 0x7a8   : > { %v7656_v28 = vpop.eup %7655  ;;  %v4805_v21 = vmax.f32 %v4775_v60, 1e-09 }
 0x7a9   : > { %v4345_v59 = vmul.f32 %v7656_v28, %v12803_v0 }
 0x7aa   : > { %7663 = vrcp.f32 %v4805_v21 }
 0x7ab   : > { %v4791_v45 = vpop.xlane.xlu0 %4790  ;;  %6515 = vmatprep.mubr.f32.mxu1 %v4345_v59 }
 0x7ac   : > { %v7658_v24 = vpop.eup %7657  ;;  %v4813_v19 = vmax.f32 %v4791_v45, 1e-09 }
 0x7ad   : > { %v4346_v51 = vmul.f32 %v7658_v24, %v12804_v23 }
 0x7ae   : > { %7665 = vrcp.f32 %v4813_v19 }
 0x7af   : > { %v4793_v17 = vpop.xlane.xlu0 %4792  ;;  %6516 = vmatmul.mubr.f32.gmra.mrb[30].mxu1 %v4346_v51  ;;  %v4777_v32 = vpop.xlane.xlu1 %4776 }
 0x7b0   : > { %v7660_v30 = vpop.eup %7659  ;;  %v4814_v48 = vmax.f32 %v4793_v17, 1e-09  ;;  %v4806_v9 = vmax.f32 %v4777_v32, 1e-09  ;;  %v12806_v17 = vld [vmem:[#allocation125_spill] sm:$0xff] }
 0x7b1   : > { %v7662_v49 = vpop.eup %7661  ;;  %v4844_v37 = vmul.f32 %v7660_v30, %v11322_v43 }
 0x7b2   : > { %7667 = vrcp.f32 %v4814_v48  ;;  %v4836_v40 = vmul.f32 %v7662_v49, %v11325_v50 }
 0x7b3   : > { %7669 = vrcp.f32 %v4806_v9  ;;  %6562 = vmatprep.mubr.f32.mxu1 %v4844_v37  ;;  %v4779_v44 = vpop.xlane.xlu1 %4778  ;;  %v12808_v9 = vld [vmem:[#allocation124_spill] sm:$0xff] }
 0x7b4   : > { %v7664_v7 = vpop.eup %7663  ;;  %6550 = vmatprep.mubr.f32.mxu0 %v4836_v40  ;;  %v4807_v4 = vmax.f32 %v4779_v44, 1e-09  ;;  %v12809_v40 = vld [vmem:[#allocation159_spill] sm:$0xff] }
 0x7b5   : > { %v4837_v56 = vmul.f32 %v7664_v7, %v11334_v38  ;;  %v12810_v7 = vld [vmem:[#allocation129_spill] sm:$0xff] }
 0x7b6   : > { %7671 = vrcp.f32 %v4807_v4 }
 0x7b7   : > { %v4795_v61 = vpop.xlane.xlu0 %4794  ;;  %6551 = vmatmul.mubr.f32.vlgmr.msra.gmra.mrb[48].mxu0 %v4837_v56  ;;  %v12811_v56 = vld [vmem:[#allocation164_spill] sm:$0xff] }
 0x7b8   : > { %v7666_v18 = vpop.eup %7665  ;;  %v4815_v53 = vmax.f32 %v4795_v61, 1e-09 }
 0x7b9   : > { %v4845_v57 = vmul.f32 %v7666_v18, %v11339_v39 }
 0x7ba   : > { %7673 = vrcp.f32 %v4815_v53  ;;  %v12812_v53 = vld [vmem:[#allocation128_spill] sm:$0xff] }
 0x7bb   : > { %v4797_v43 = vpop.xlane.xlu0 %4796  ;;  %6563 = vmatmul.mubr.f32.vlgmr.msra.gmra.mrb[24].mxu1 %v4845_v57  ;;  %v4781_v2 = vpop.xlane.xlu1 %4780 }
 0x7bc   : > { %v7668_v50 = vpop.eup %7667  ;;  %v4816_v22 = vmax.f32 %v4797_v43, 1e-09  ;;  %v4808_v5 = vmax.f32 %v4781_v2, 1e-09 }
 0x7bd   : > { %v7670_v1 = vpop.eup %7669  ;;  %v4846_v35 = vmul.f32 %v7668_v50, %v11344_v63 }
 0x7be   : > { %7675 = vrcp.f32 %v4816_v22  ;;  %v4838_v38 = vmul.f32 %v7670_v1, %v11347_v15 }
 0x7bf   : > { %7677 = vrcp.f32 %v4808_v5  ;;  %6565 = vmatprep.mubr.f32.mxu1 %v4846_v35  ;;  %v4783_v31 = vpop.xlane.xlu1 %4782 }
 0x7c0   : > { %v7672_v20 = vpop.eup %7671  ;;  %6553 = vmatprep.mubr.f32.mxu0 %v4838_v38  ;;  %v4809_v13 = vmax.f32 %v4783_v31, 1e-09  ;;  %v12813_v38 = vld [vmem:[#allocation131_spill] sm:$0xff] }
 0x7c1   : > { %v4839_v39 = vmul.f32 %v7672_v20, %v11356_v55 }
 0x7c2   : > { %7679 = vrcp.f32 %v4809_v13  ;;  %v12814_v13 = vld [vmem:[#allocation136_spill] sm:$0xff] }
 0x7c3   : > { %v4799_v16 = vpop.xlane.xlu0 %4798  ;;  %6554 = vmatmul.mubr.f32.gmra.mrb[50].mxu0 %v4839_v39 }
 0x7c4   : > { %v7674_v6 = vpop.eup %7673  ;;  %v4817_v36 = vmax.f32 %v4799_v16, 1e-09 }
 0x7c5   : > { %v4847_v34 = vmul.f32 %v7674_v6, %v11361_v11 }
 0x7c6   : > { %7681 = vrcp.f32 %v4817_v36 }
 0x7c7   : > { %v4801_v63 = vpop.xlane.xlu0 %4800  ;;  %6566 = vmatmul.mubr.f32.gmra.mrb[26].mxu1 %v4847_v34  ;;  %v4785_v12 = vpop.xlane.xlu1 %4784 }
 0x7c8   : > { %v7676_v15 = vpop.eup %7675  ;;  %v4818_v26 = vmax.f32 %v4801_v63, 1e-09  ;;  %v4810_v47 = vmax.f32 %v4785_v12, 1e-09 }
 0x7c9   : > { %v7678_v25 = vpop.eup %7677  ;;  %v4848_v58 = vmul.f32 %v7676_v15, %v11366_v29 }
 0x7ca   : > { %7683 = vrcp.f32 %v4818_v26  ;;  %v4840_v55 = vmul.f32 %v7678_v25, %v11369_v3 }
 0x7cb   : > { %7685 = vrcp.f32 %v4810_v47  ;;  %6568 = vmatprep.mubr.f32.mxu1 %v4848_v58  ;;  %v4787_v54 = vpop.xlane.xlu1 %4786 }
 0x7cc   : > { %v7680_v27 = vpop.eup %7679  ;;  %6556 = vmatprep.mubr.f32.mxu0 %v4840_v55  ;;  %v4811_v42 = vmax.f32 %v4787_v54, 1e-09  ;;  %v12815_v54 = vld [vmem:[#allocation171_spill] sm:$0xff] }
 0x7cd   : > { %v4841_v11 = vmul.f32 %v7680_v27, %v11376_v46 }
 0x7ce   : > { %7687 = vrcp.f32 %v4811_v42 }
 0x7cf   : > { %v4803_v14 = vpop.xlane.xlu0 %4802  ;;  %6557 = vmatmul.mubr.f32.gmra.mrb[52].mxu0 %v4841_v11 }
 0x7d0   : > { %v7682_v8 = vpop.eup %7681  ;;  %v4819_v60 = vmax.f32 %v4803_v14, 1e-09  ;;  %v12816_v14 = vld [vmem:[#allocation140_spill] sm:$0xff] }
 0x7d1   : > { %v4849_v28 = vmul.f32 %v7682_v8, %v11381_v10  ;;  %v12805_v10 = vld [vmem:[#allocation123_spill] sm:$0xff] }
 0x7d2   : > { %7689 = vrcp.f32 %v4819_v60 }
 0x7d3   : > { %6569 = vmatmul.mubr.f32.gmra.mrb[28].mxu1 %v4849_v28 }
 0x7d4   : > { %v7684_v29 = vpop.eup %7683 }
 0x7d5   : > { %v7686_v21 = vpop.eup %7685  ;;  %v4850_v3 = vmul.f32 %v7684_v29, %v11385_v41  ;;  %v12807_v41 = vld [vmem:[#allocation126_spill] sm:$0xff] }
 0x7d6   : > { %v4842_v0 = vmul.f32 %v7686_v21, %v11388_v33 }
 0x7d7   : > { %6571 = vmatprep.mubr.f32.mxu1 %v4850_v3 }
 0x7d8   : > { %v7688_v59 = vpop.eup %7687  ;;  %6559 = vmatprep.mubr.f32.mxu0 %v4842_v0 }
 0x7d9   : > { %v4843_v46 = vmul.f32 %v7688_v59, %v11395_v62 }
 0x7db   : > { %6560 = vmatmul.mubr.f32.gmra.mrb[54].mxu0 %v4843_v46 }
 0x7dc   : > { %v7690_v45 = vpop.eup %7689 }
 0x7dd   : > { %v4851_v24 = vmul.f32 %v7690_v45, %v11399_v52 }
 0x7df   : > { %6572 = vmatmul.mubr.f32.gmra.mrb[30].mxu1 %v4851_v24 }
 0x84f   : > { %v6496_v19 = vpop.f32.mrb[16].mxu1 }
 0x850   : > { %v6874_v23 = vadd.f32 %v6496_v19, %v12805_v10  ;;  %v4433_v51 = vpop.f32.mrb[17].mxu1 }
 0x851   : > { %v6876_v32 = vadd.f32 %v4433_v51, %v12806_v17 }
 0x854   : > { %v6499_v30 = vpop.f32.mrb[18].mxu1 }
 0x855   : > { %v6878_v48 = vadd.f32 %v6499_v30, %v12807_v41  ;;  %v4443_v33 = vpop.f32.mrb[19].mxu1 }
 0x856   : > { %v6880_v49 = vadd.f32 %v4443_v33, %v12808_v9  ;;  %v12817_v33 = vld [vmem:[#allocation166_spill] sm:$0xff] }
 0x85a   : > { %v6502_v37 = vpop.f32.mrb[20].mxu1 }
 0x85b   : > { %v6882_v62 = vadd.f32 %v6502_v37, %v12809_v40  ;;  %v4453_v44 = vpop.f32.mrb[21].mxu1  ;;  %v12818_v40 = vld [vmem:[#allocation95_spill] sm:$0xff] }
 0x85c   : > { %v6884_v4 = vadd.f32 %v4453_v44, %v12810_v7 }
 0x862   : > { %v6505_v52 = vpop.f32.mrb[22].mxu1 }
 0x863   : > { %v11492_v61 = vadd.f32 %v6505_v52, %v12811_v56  ;;  %v4463_v18 = vpop.f32.mrb[23].mxu1 }
 0x864   : > { %v11495_v57 = vadd.f32 %v4463_v18, %v12812_v53 }
 0x88a   : > { %v6552_v43 = vpop.f32.mrb[48].mxu0 }
 0x88b   : > { %v6875_v2 = vadd.f32 %v6874_v23, %v6552_v43  ;;  %v4938_v50 = vpop.f32.mrb[49].mxu0 }
 0x88c   : > { %v6877_v22 = vadd.f32 %v6876_v32, %v4938_v50 }
 0x88d   : > { %v5051_v5 = vmul.f32 1.442695, %v6875_v2  ;;  %vm5034_vm8 = vcmp.gt.f32.partialorder %v6875_v2, 0.0 }
 0x88e   : > { %v5049_v1 = vmul.f32 1.442695, %v6877_v22  ;;  %v6564_v35 = vpop.f32.mrb[24].mxu1  ;;  %vm5033_vm0 = vcmp.gt.f32.partialorder %v6877_v22, 0.0 }
 0x88f   : > { %7691 = vpow2.f32 %v5051_v5  ;;  %v6890_v31 = vadd.f32 %v6564_v35, %v12813_v38  ;;  %v4978_v20 = vpop.f32.mrb[25].mxu1 }
 0x890   : > { %7693 = vpow2.f32 %v5049_v1  ;;  %v6891_v39 = vadd.f32 %v4978_v20, %v12814_v13 }
 0x891   : > { %v5067_v16 = vmul.f32 1.442695, %v6890_v31  ;;  %vm5042_vm12 = vcmp.gt.f32.partialorder %v6890_v31, 0.0 }
 0x892   : > { %v5065_v6 = vmul.f32 1.442695, %v6891_v39  ;;  %vm5041_vm15 = vcmp.gt.f32.partialorder %v6891_v39, 0.0 }
 0x893   : > { %7695 = vpow2.f32 %v5067_v16  ;;  %v12819_v16 = vld [vmem:[#allocation120_spill] sm:$0xff] }
 0x894   : > { %7697 = vpow2.f32 %v5065_v6 }
 0x896   : > { %v6555_v36 = vpop.f32.mrb[50].mxu0 }
 0x897   : > { %v11499_v34 = vadd.f32 %v6878_v48, %v6555_v36  ;;  %v4948_v63 = vpop.f32.mrb[51].mxu0 }
 0x898   : > { %v6881_v12 = vadd.f32 %v6880_v49, %v4948_v63 }
 0x899   : > { %v7692_v15 = vpop.eup %7691  ;;  %v5055_v26 = vmul.f32 1.442695, %v11499_v34  ;;  %vm5036_vm7 = vcmp.gt.f32.partialorder %v11499_v34, 0.0 }
 0x89a   : > { %v7694_v47 = vpop.eup %7693  ;;  %v5053_v25 = vmul.f32 1.442695, %v6881_v12  ;;  %v6567_v58 = vpop.f32.mrb[26].mxu1  ;;  %v5684_v55 = vadd.f32 -1.0, %v7692_v15  ;;  %vm5035_vm5 = vcmp.gt.f32.partialorder %v6881_v12, 0.0 }
 0x89b   : > { %7699 = vpow2.f32 %v5055_v26  ;;  %v11503_v27 = vadd.f32 %v6567_v58, %v12815_v54  ;;  %v4988_v42 = vpop.f32.mrb[27].mxu1  ;;  %v5683_v11 = vadd.f32 -1.0, %v7694_v47 }
 0x89c   : > { %7701 = vpow2.f32 %v5053_v25  ;;  %v6893_v8 = vadd.f32 %v4988_v42, %v12816_v14  ;;  %v11506_v60 = vsel %vm5034_vm8, %v6875_v2, %v5684_v55  ;;  %vm5273_vm8 = vcmask 269312  }
 0x89d   : > { %v7696_v28 = vpop.eup %7695  ;;  %v5071_v29 = vmul.f32 1.442695, %v11503_v27  ;;  %5131 = vrot.lane.b32.xlu0 %v11506_v60, %s7865_s11  ;;  %v11511_v21 = vsel %vm5033_vm0, %v6877_v22, %v5683_v11  ;;  %vm5044_vm4 = vcmp.gt.f32.partialorder %v11503_v27, 0.0  ;;  %vm12823_vm0 = vcmask 261120  }
 0x89e   : > { %v7698_v3 = vpop.eup %7697  ;;  %v5069_v0 = vmul.f32 1.442695, %v6893_v8  ;;  %5129 = vrot.lane.b32.xlu1 %v11511_v21, %s7865_s11  ;;  %v5692_v45 = vadd.f32 -1.0, %v7696_v28  ;;  %vm5043_vm14 = vcmp.gt.f32.partialorder %v6893_v8, 0.0 }
 0x89f   : > { %7703 = vpow2.f32 %v5071_v29  ;;  %v5691_v59 = vadd.f32 -1.0, %v7698_v3  ;;  %v7740_v3 = vld [vmem:[%s8009_s17 + $0x8] sm:$0xff] }
 0x8a0   : > { %7705 = vpow2.f32 %v5069_v0  ;;  %v11522_v32 = vsel %vm5042_vm12, %v6890_v31, %v5692_v45  ;;  %v7741_v0 = vld [vmem:[%s8009_s17 + $0x40] sm:$0xff]  ;;  %vm12826_vm12 = vmmov %vm12823_vm0 }
 0x8a1   : > { %v11515_v46 = vsel %vm5041_vm15, %v6891_v39, %v5691_v59  ;;  %vm12825_vm15 = vmmov %vm12823_vm0 }
 0x8a2   : > { %5145 = vrot.lane.b32.xlu1 %v11515_v46, %s7865_s11  ;;  %v6558_v24 = vpop.f32.mrb[52].mxu0 }
 0x8a3   : > { %v11519_v19 = vadd.f32 %v6882_v62, %v6558_v24  ;;  %v4958_v10 = vpop.f32.mrb[53].mxu0 }
 0x8a4   : > { %v6885_v23 = vadd.f32 %v6884_v4, %v4958_v10 }
 0x8a5   : > { %v7700_v51 = vpop.eup %7699  ;;  %v5059_v17 = vmul.f32 1.442695, %v11519_v19  ;;  %vm5038_vm13 = vcmp.gt.f32.partialorder %v11519_v19, 0.0 }
 0x8a6   : > { %v7702_v30 = vpop.eup %7701  ;;  %v5057_v41 = vmul.f32 1.442695, %v6885_v23  ;;  %v6570_v48 = vpop.f32.mrb[28].mxu1  ;;  %5147 = vrot.lane.b32.xlu1 %v11522_v32, %s7865_s11  ;;  %v5686_v52 = vadd.f32 -1.0, %v7700_v51  ;;  %vm5037_vm11 = vcmp.gt.f32.partialorder %v6885_v23, 0.0 }
 0x8a7   : > { %7707 = vpow2.f32 %v5059_v17  ;;  %v6894_v9 = vadd.f32 %v6570_v48, %v12817_v33  ;;  %v4998_v49 = vpop.f32.mrb[29].mxu1  ;;  %v5685_v37 = vadd.f32 -1.0, %v7702_v30  ;;  %v7743_v17 = vld [vmem:[%s8009_s17 + $0x10] sm:$0xff] }
 0x8a8   : > { %7709 = vpow2.f32 %v5057_v41  ;;  %v6895_v62 = vadd.f32 %v4998_v49, %v12818_v40  ;;  %v11536_v2 = vsel %vm5036_vm7, %v11499_v34, %v5686_v52  ;;  %v12820_v34 = vld [vmem:[#allocation150_spill] sm:$0xff]  ;;  %v7746_v49 = vld [vmem:[%s8009_s17 + $0x58] sm:$0xff]  ;;  %v7748_v40 = vld [vmem:[%s8009_s17 + $0x60] sm:$0xff] }
 0x8a9   : > { %v7704_v44 = vpop.eup %7703  ;;  %v5075_v7 = vmul.f32 1.442695, %v6894_v9  ;;  %v11528_v4 = vsel %vm5035_vm5, %v6881_v12, %v5685_v37  ;;  %vm5046_vm3 = vcmp.gt.f32.partialorder %v6894_v9, 0.0  ;;  %v7744_v48 = vld [vmem:[%s8009_s17 + $0x50] sm:$0xff]  ;;  %v7747_v37 = vld [vmem:[%s8009_s17 + $0x20] sm:$0xff]  ;;  %vm12829_vm5 = vmmov %vm12823_vm0 }
 0x8aa   : > { %v7706_v56 = vpop.eup %7705  ;;  %v5073_v18 = vmul.f32 1.442695, %v6895_v62  ;;  %5133 = vrot.lane.b32.xlu0 %v11528_v4, %s7865_s11  ;;  %v5694_v50 = vadd.f32 -1.0, %v7704_v44  ;;  %vm5045_vm2 = vcmp.gt.f32.partialorder %v6895_v62, 0.0  ;;  %v7750_v44 = vld [vmem:[%s8009_s17 + $0x68] sm:$0xff]  ;;  %v7752_v52 = vld [vmem:[%s8009_s17 + $0x70] sm:$0xff]  ;;  %vm12830_vm7 = vmmov %vm12823_vm0 }
 0x8ab   : > { %7711 = vpow2.f32 %v5075_v7  ;;  %v5693_v53 = vadd.f32 -1.0, %v7706_v56  ;;  %v7751_v7 = vld [vmem:[%s8009_s17 + $0x30] sm:$0xff]  ;;  %v7753_v56 = vld [vmem:[%s8009_s17 + $0x38] sm:$0xff] }
 0x8ac   : > { %7713 = vpow2.f32 %v5073_v18  ;;  %v11548_v31 = vsel %vm5044_vm4, %v11503_v27, %v5694_v50  ;;  %v7754_v18 = vld [vmem:[%s8009_s17 + $0x78] sm:$0xff]  ;;  %vm5386_vm4 = vcmask 1040384  }
 0x8ad   : > { %v11533_v43 = vsel %vm5043_vm14, %v6893_v8, %v5693_v53  ;;  %v7739_v8 = vld [vmem:[%s8009_s17] sm:$0xff]  ;;  %vm12832_vm14 = vmmov %vm12823_vm0 }
 0x8ae   : > { %5149 = vrot.lane.b32.xlu1 %v11533_v43, %s7865_s11  ;;  %5135 = vrot.lane.b32.xlu0 %v11536_v2, %s7865_s11  ;;  %v6561_v22 = vpop.f32.mrb[54].mxu0 }
 0x8af   : > { %v11543_v5 = vadd.f32 %v11492_v61, %v6561_v22  ;;  %v4968_v1 = vpop.f32.mrb[55].mxu0 }
 0x8b0   : > { %v6889_v35 = vadd.f32 %v11495_v57, %v4968_v1 }
 0x8b1   : > { %v7708_v38 = vpop.eup %7707  ;;  %v5063_v58 = vmul.f32 1.442695, %v11543_v5  ;;  %vm5040_vm10 = vcmp.gt.f32.partialorder %v11543_v5, 0.0 }
 0x8b2   : > { %v7710_v20 = vpop.eup %7709  ;;  %v5061_v13 = vmul.f32 1.442695, %v6889_v35  ;;  %v6573_v39 = vpop.f32.mrb[30].mxu1  ;;  %5151 = vrot.lane.b32.xlu1 %v11548_v31, %s7865_s11  ;;  %v5688_v15 = vadd.f32 -1.0, %v7708_v38  ;;  %vm5039_vm6 = vcmp.gt.f32.partialorder %v6889_v35, 0.0 }
 0x8b3   : > { %v6896_v6 = vadd.f32 %v6573_v39, %v12819_v16  ;;  %v5008_v36 = vpop.f32.mrb[31].mxu1  ;;  %v5687_v61 = vadd.f32 -1.0, %v7710_v20 }
 0x8b4   : > { %7715 = vpow2.f32 %v5061_v13  ;;  %v6897_v63 = vadd.f32 %v5008_v36, %v12820_v34  ;;  %v11563_v54 = vsel %vm5038_vm13, %v11519_v19, %v5688_v15  ;;  %v7742_v19 = vld [vmem:[%s8009_s17 + $0x48] sm:$0xff]  ;;  %vm12840_vm13 = vmmov %vm12823_vm0 }
 0x8b5   : > { %v7712_v12 = vpop.eup %7711  ;;  %v11554_v57 = vsel %vm5037_vm11, %v6885_v23, %v5687_v61  ;;  %v5079_v42 = vmul.f32 1.442695, %v6896_v6  ;;  %vm5048_vm9 = vcmp.gt.f32.partialorder %v6896_v6, 0.0  ;;  %vm12834_vm11 = vmmov %vm12823_vm0 }
 0x8b6   : > { %v7714_v26 = vpop.eup %7713  ;;  %v5077_v47 = vmul.f32 1.442695, %v6897_v63  ;;  %5137 = vrot.lane.b32.xlu0 %v11554_v57, %s7865_s11  ;;  %v5696_v27 = vadd.f32 -1.0, %v7712_v12  ;;  %vm5047_vm1 = vcmp.gt.f32.partialorder %v6897_v63, 0.0  ;;  %v12821_v12 = vld [vmem:[#allocation8_spill] sm:$0xff] }
 0x8b7   : > { %v5695_v25 = vadd.f32 -1.0, %v7714_v26  ;;  %v12822_v26 = vld [vmem:[#allocation9_spill] sm:$0xff] }
 0x8b8   : > { %7717 = vpow2.f32 %v5077_v47  ;;  %v11569_v11 = vsel %vm5046_vm3, %v6894_v9, %v5696_v27  ;;  %v7745_v9 = vld [vmem:[%s8009_s17 + $0x18] sm:$0xff]  ;;  %vm12843_vm3 = vmmov %vm12823_vm0 }
 0x8b9   : > { %v11560_v55 = vsel %vm5045_vm2, %v6895_v62, %v5695_v25  ;;  %7719 = vpow2.f32 %v5063_v58  ;;  %v7749_v62 = vld [vmem:[%s8009_s17 + $0x28] sm:$0xff]  ;;  %vm12841_vm2 = vmmov %vm12823_vm0 }
 0x8ba   : > { %5153 = vrot.lane.b32.xlu1 %v11560_v55, %s7865_s11  ;;  %5139 = vrot.lane.b32.xlu0 %v11563_v54, %s7865_s11  ;;  %7721 = vpow2.f32 %v5079_v42  ;;  %v12824_v58 = vld [vmem:[#allocation17_spill] sm:$0xff] }
 0x8be   : > { %v7716_v14 = vpop.eup %7715  ;;  %5155 = vrot.lane.b32.xlu1 %v11569_v11, %s7865_s11  ;;  %5209 = vrot.lane.b32.xlu0 %v7739_v8, %s7866_s23 }
 0x8bf   : > { %v5689_v28 = vadd.f32 -1.0, %v7716_v14 }
 0x8c1   : > { %v11579_v59 = vsel %vm5039_vm6, %v6889_v35, %v5689_v28  ;;  %vm12845_vm6 = vmmov %vm12823_vm0 }
 0x8c2   : > { %v7718_v29 = vpop.eup %7717  ;;  %5211 = vrot.lane.b32.xlu1 %v7740_v3, %s7866_s23  ;;  %5225 = vrot.lane.b32.xlu0 %v7741_v0, %s7866_s23 }
 0x8c3   : > { %v5697_v45 = vadd.f32 -1.0, %v7718_v29  ;;  %v7720_v24 = vpop.eup %7719 }
 0x8c4   : > { %v5690_v23 = vadd.f32 -1.0, %v7720_v24  ;;  %v7722_v51 = vpop.eup %7721 }
 0x8c5   : > { %v11585_v10 = vsel %vm5047_vm1, %v6897_v63, %v5697_v45  ;;  %v5698_v41 = vadd.f32 -1.0, %v7722_v51  ;;  %vm12847_vm1 = vmmov %vm12823_vm0 }
 0x8c6   : > { %5227 = vrot.lane.b32.xlu1 %v7742_v19, %s7866_s23  ;;  %5141 = vrot.lane.b32.xlu0 %v11579_v59, %s7865_s11  ;;  %v11593_v30 = vsel %vm5040_vm10, %v11543_v5, %v5690_v23  ;;  %v12827_v23 = vld [vmem:[#allocation16_spill] sm:$0xff]  ;;  %vm12848_vm10 = vmmov %vm12823_vm0 }
 0x8c7   : > { %v11599_v33 = vsel %vm5048_vm9, %v6896_v6, %v5698_v41  ;;  %vm5388_vm9 = vcmask 1041408  }
 0x8ca   : > { %5157 = vrot.lane.b32.xlu1 %v11585_v10, %s7865_s11  ;;  %5213 = vrot.lane.b32.xlu0 %v7743_v17, %s7866_s23  ;;  %v12828_v17 = vld [vmem:[#allocation11_spill] sm:$0xff] }
 0x8ce   : > { %5229 = vrot.lane.b32.xlu1 %v7744_v48, %s7866_s23  ;;  %5143 = vrot.lane.b32.xlu0 %v11593_v30, %s7865_s11 }
 0x8d2   : > { %5159 = vrot.lane.b32.xlu1 %v11599_v33, %s7865_s11  ;;  %5215 = vrot.lane.b32.xlu0 %v7745_v9, %s7866_s23 }
 0x8d6   : > { %5231 = vrot.lane.b32.xlu1 %v7746_v49, %s7866_s23  ;;  %5217 = vrot.lane.b32.xlu0 %v7747_v37, %s7866_s23 }
 0x8da   : > { %5233 = vrot.lane.b32.xlu1 %v7748_v40, %s7866_s23  ;;  %5219 = vrot.lane.b32.xlu0 %v7749_v62, %s7866_s23 }
 0x8de   : > { %5235 = vrot.lane.b32.xlu1 %v7750_v44, %s7866_s23  ;;  %5221 = vrot.lane.b32.xlu0 %v7751_v7, %s7866_s23 }
 0x8e2   : > { %5237 = vrot.lane.b32.xlu1 %v7752_v52, %s7866_s23  ;;  %5223 = vrot.lane.b32.xlu0 %v7753_v56, %s7866_s23  ;;  %v12831_v52 = vld [vmem:[#allocation19_spill] sm:$0xff] }
 0x8e6   : > { %5239 = vrot.lane.b32.xlu1 %v7754_v18, %s7866_s23 }
 0x90f   : > { %v5132_v22 = vpop.permute.xlu0 %5131 }
 0x910   : > { %v5130_v53 = vpop.permute.xlu1 %5129  ;;  %v5178_v36 = vadd.f32 %v5132_v22, %v11506_v60 }
 0x911   : > { %v5177_v6 = vadd.f32 %v5130_v53, %v11511_v21 }
 0x912   : > { %v5194_v47 = vadd.f32 %v12822_v26, %v5178_v36 }
 0x913   : > { %v5193_v15 = vadd.f32 %v12821_v12, %v5177_v6 }
 0x914   : > { %v5146_v50 = vpop.permute.xlu1 %5145 }
 0x915   : > { %v5185_v61 = vadd.f32 %v5146_v50, %v11515_v46 }
 0x917   : > { %v5201_v27 = vadd.f32 %v12824_v58, %v5185_v61  ;;  %v12833_v61 = vld [vmem:[#allocation10_spill] sm:$0xff] }
 0x918   : > { %v5148_v5 = vpop.permute.xlu1 %5147 }
 0x919   : > { %v5186_v21 = vadd.f32 %v5148_v5, %v11522_v32 }
 0x91b   : > { %v5202_v51 = vadd.f32 %v12827_v23, %v5186_v21 }
 0x91c   : > { %v5134_v1 = vpop.permute.xlu0 %5133 }
 0x91d   : > { %v5179_v29 = vadd.f32 %v5134_v1, %v11528_v4 }
 0x91f   : > { %v5195_v41 = vadd.f32 %v12828_v17, %v5179_v29 }
 0x920   : > { %v5150_v35 = vpop.permute.xlu1 %5149  ;;  %v5136_v38 = vpop.permute.xlu0 %5135 }
 0x921   : > { %v5187_v32 = vadd.f32 %v5150_v35, %v11533_v43  ;;  %v5180_v44 = vadd.f32 %v5136_v38, %v11536_v2 }
 0x923   : > { %v5203_v56 = vadd.f32 %v12831_v52, %v5187_v32  ;;  %v5196_v2 = vadd.f32 %v12833_v61, %v5180_v44  ;;  %v12842_v44 = vld [vmem:[#allocation15_spill] sm:$0xff] }
 0x924   : > { %v5152_v20 = vpop.permute.xlu1 %5151 }
 0x925   : > { %v5188_v1 = vadd.f32 %v5152_v20, %v11548_v31  ;;  %v12835_v20 = vld [vmem:[#allocation18_spill] sm:$0xff] }
 0x928   : > { %v5138_v13 = vpop.permute.xlu0 %5137 }
 0x929   : > { %v5181_v35 = vadd.f32 %v5138_v13, %v11554_v57  ;;  %v5204_v13 = vadd.f32 %v12835_v20, %v5188_v1 }
 0x92c   : > { %v5140_v39 = vpop.permute.xlu0 %5139  ;;  %v5154_v16 = vpop.permute.xlu1 %5153 }
 0x92d   : > { %v5182_v38 = vadd.f32 %v5140_v39, %v11563_v54  ;;  %v5189_v12 = vadd.f32 %v5154_v16, %v11560_v55  ;;  %v12837_v55 = vld [vmem:[#allocation12_spill] sm:$0xff] }
 0x92f   : > { %v5198_v16 = vadd.f32 %v12837_v55, %v5182_v38 }
 0x930   : > { %v5210_v34 = vpop.permute.xlu0 %5209  ;;  %v5156_v63 = vpop.permute.xlu1 %5155 }
 0x931   : > { %v5257_v25 = vsel %vm12823_vm0, %v5193_v15, %v5210_v34  ;;  %v5190_v31 = vadd.f32 %v5156_v63, %v11569_v11  ;;  %vm5390_vm0 = vcmask 1042432  }
 0x932   : > { %v5274_v60 = vsel %vm5273_vm8, %v5257_v25, -inf }
 0x933   : > { %v5275_v24 = vrot.slane %v5274_v60, 4 }
 0x934   : > { %v5226_v42 = vpop.permute.xlu0 %5225  ;;  %v5212_v14 = vpop.permute.xlu1 %5211 }
 0x935   : > { %v5258_v8 = vsel %vm12825_vm15, %v5194_v47, %v5212_v14  ;;  %v5265_v46 = vsel %vm12826_vm12, %v5201_v27, %v5226_v42  ;;  %v5276_v62 = vmax.f32 %v5274_v60, %v5275_v24  ;;  %v12836_v42 = vld [vmem:[#allocation13_spill] sm:$0xff]  ;;  %vm12850_vm15 = vmmov %vm12847_vm1 }
 0x936   : > { %v5281_v28 = vsel %vm5273_vm8, %v5258_v8, -inf  ;;  %v5330_v19 = vsel %vm5273_vm8, %v5265_v46, -inf  ;;  %v5197_v14 = vadd.f32 %v12836_v42, %v5181_v35  ;;  %v12838_v46 = vld [vmem:[#allocation21_spill] sm:$0xff]  ;;  %vm12851_vm12 = vmmov %vm12847_vm1 }
 0x937   : > { %v5282_v3 = vrot.slane %v5281_v28, 4  ;;  %v5331_v48 = vrot.slane %v5330_v19, 4  ;;  %v5277_v5 = vrot.slane %v5276_v62, 2 }
 0x938   : > { %v5142_v0 = vpop.permute.xlu0 %5141  ;;  %v5228_v45 = vpop.permute.xlu1 %5227 }
 0x939   : > { %v5283_v9 = vmax.f32 %v5281_v28, %v5282_v3  ;;  %v5266_v49 = vsel %vm12829_vm5, %v5202_v51, %v5228_v45  ;;  %v5332_v18 = vmax.f32 %v5330_v19, %v5331_v48  ;;  %v5278_v27 = vmax.f32 %v5276_v62, %v5277_v5  ;;  %v12839_v19 = vld [vmem:[#allocation20_spill] sm:$0xff]  ;;  %v12844_v5 = vld [vmem:[#allocation23_spill] sm:$0xff] }
 0x93a   : > { %v5337_v7 = vsel %vm5273_vm8, %v5266_v49, -inf  ;;  %v5205_v28 = vadd.f32 %v12838_v46, %v5189_v12  ;;  %v5183_v11 = vadd.f32 %v5142_v0, %v11579_v59  ;;  %v5206_v23 = vadd.f32 %v12839_v19, %v5190_v31 }
 0x93b   : > { %v5284_v53 = vrot.slane %v5283_v9, 2  ;;  %v5338_v6 = vrot.slane %v5337_v7, 4  ;;  %v5333_v15 = vrot.slane %v5332_v18, 2  ;;  %v5279_v24 = vrot.slane %v5278_v27, 1 }
 0x93c   : > { %v5214_v37 = vpop.permute.xlu0 %5213  ;;  %v5158_v40 = vpop.permute.xlu1 %5157  ;;  %vm5392_vm5 = vcmask 1043456  }
 0x93d   : > { %v5259_v4 = vsel %vm12830_vm7, %v5195_v41, %v5214_v37  ;;  %v5285_v26 = vmax.f32 %v5283_v9, %v5284_v53  ;;  %v5339_v54 = vmax.f32 %v5337_v7, %v5338_v6  ;;  %v5334_v29 = vmax.f32 %v5332_v18, %v5333_v15 }
 0x93e   : > { %v5288_v50 = vsel %vm5273_vm8, %v5259_v4, -inf  ;;  %v5191_v32 = vadd.f32 %v5158_v40, %v11585_v10  ;;  %v5199_v7 = vadd.f32 %v12842_v44, %v5183_v11  ;;  %v5280_v53 = vmax.f32 %v5278_v27, %v5279_v24 }
 0x93f   : > { %v5289_v34 = vrot.slane %v5288_v50, 4  ;;  %v5286_v3 = vrot.slane %v5285_v26, 1  ;;  %v5340_v41 = vrot.slane %v5339_v54, 2  ;;  %v5335_v0 = vrot.slane %v5334_v29, 1 }
 0x940   : > { %v5144_v43 = vpop.permute.xlu0 %5143  ;;  %v5230_v22 = vpop.permute.xlu1 %5229  ;;  %v5207_v1 = vadd.f32 %v12844_v5, %v5191_v32  ;;  %vm5394_vm7 = vcmask 1044480  }
 0x941   : > { %v5267_v36 = vsel %vm12832_vm14, %v5203_v56, %v5230_v22  ;;  %v5290_v8 = vmax.f32 %v5288_v50, %v5289_v34  ;;  %v5287_v4 = vmax.f32 %v5285_v26, %v5286_v3  ;;  %v5184_v50 = vadd.f32 %v5144_v43, %v11593_v30 }
 0x942   : > { %v5344_v47 = vsel %vm5273_vm8, %v5267_v36, -inf  ;;  %v11670_v40 = vmax.f32 %v5339_v54, %v5340_v41  ;;  %v11675_v34 = vmax.f32 %v5334_v29, %v5335_v0  ;;  %vm5396_vm14 = vcmask 1045504  }
 0x943   : > { %v5345_v21 = vrot.slane %v5344_v47, 4  ;;  %v5291_v49 = vrot.slane %v5290_v8, 2  ;;  %v11678_v12 = vsel %vm5386_vm4, %v5280_v53, %v5287_v4 }
 0x944   : > { %v5216_v25 = vpop.permute.xlu0 %5215  ;;  %v5160_v58 = vpop.permute.xlu1 %5159  ;;  %v5342_v20 = vrot.slane %v11670_v40, 1 }
 0x945   : > { %v5260_v57 = vsel %vm12834_vm11, %v5196_v2, %v5216_v25  ;;  %v5346_v37 = vmax.f32 %v5344_v47, %v5345_v21  ;;  %v5292_v36 = vmax.f32 %v5290_v8, %v5291_v49  ;;  %v12846_v47 = vld [vmem:[#allocation14_spill] sm:$0xff]  ;;  %v5192_v27 = vadd.f32 %v5160_v58, %v11599_v33  ;;  %vm12852_vm11 = vmmov %vm12847_vm1 }
 0x946   : > { %v5295_v39 = vsel %vm5273_vm8, %v5260_v57, -inf  ;;  %v5200_v25 = vadd.f32 %v12846_v47, %v5184_v50 }
 0x947   : > { %v5296_v60 = vrot.slane %v5295_v39, 4  ;;  %v5347_v61 = vrot.slane %v5346_v37, 2  ;;  %v5293_v54 = vrot.slane %v5292_v36, 1 }
 0x948   : > { %v5218_v63 = vpop.permute.xlu0 %5217  ;;  %v5232_v45 = vpop.permute.xlu1 %5231 }
 0x949   : > { %v5261_v51 = vsel %vm12840_vm13, %v5197_v14, %v5218_v63  ;;  %v5268_v17 = vsel %vm12841_vm2, %v5204_v13, %v5232_v45  ;;  %v5297_v62 = vmax.f32 %v5295_v39, %v5296_v60  ;;  %v5348_v39 = vmax.f32 %v5346_v37, %v5347_v61  ;;  %vm12854_vm2 = vmmov %vm12847_vm1 }
 0x94a   : > { %v5302_v48 = vsel %vm5273_vm8, %v5261_v51, -inf  ;;  %v5351_v9 = vsel %vm5273_vm8, %v5268_v17, -inf  ;;  %v5294_v51 = vmax.f32 %v5292_v36, %v5293_v54  ;;  %vm5398_vm13 = vcmask 1046528  }
 0x94b   : > { %v5303_v59 = vrot.slane %v5302_v48, 4  ;;  %v5352_v52 = vrot.slane %v5351_v9, 4  ;;  %v5298_v2 = vrot.slane %v5297_v62, 2  ;;  %v5349_v17 = vrot.slane %v5348_v39, 1 }
 0x94c   : > { %v5220_v56 = vpop.permute.xlu0 %5219  ;;  %v5234_v18 = vpop.permute.xlu1 %5233 }
 0x94d   : > { %v5304_v22 = vmax.f32 %v5302_v48, %v5303_v59  ;;  %v5262_v10 = vsel %vm12843_vm3, %v5198_v16, %v5220_v56  ;;  %v5269_v6 = vsel %vm12845_vm6, %v5205_v28, %v5234_v18  ;;  %v5353_v30 = vmax.f32 %v5351_v9, %v5352_v52  ;;  %v12849_v28 = vld [vmem:[#allocation22_spill] sm:$0xff]  ;;  %vm12855_vm6 = vmmov %vm12847_vm1 }
 0x94e   : > { %v5309_v35 = vsel %vm5273_vm8, %v5262_v10, -inf  ;;  %v5358_v43 = vsel %vm5273_vm8, %v5269_v6, -inf  ;;  %v5299_v55 = vmax.f32 %v5297_v62, %v5298_v2  ;;  %v5208_v29 = vadd.f32 %v12849_v28, %v5192_v27 }
 0x94f   : > { %v5310_v38 = vrot.slane %v5309_v35, 4  ;;  %v5305_v31 = vrot.slane %v5304_v22, 2  ;;  %v5359_v13 = vrot.slane %v5358_v43, 4  ;;  %v5354_v8 = vrot.slane %v5353_v30, 2 }
 0x950   : > { %v5222_v15 = vpop.permute.xlu0 %5221  ;;  %v5236_v26 = vpop.permute.xlu1 %5235  ;;  %v5300_v41 = vrot.slane %v5299_v55, 1  ;;  %v5350_v47 = vmax.f32 %v5348_v39, %v5349_v17  ;;  %vm5487_vm3 = vcmask 277504  }
 0x951   : > { %v5311_v57 = vmax.f32 %v5309_v35, %v5310_v38  ;;  %v5263_v42 = vsel %vm12847_vm1, %v5199_v7, %v5222_v15  ;;  %v5270_v14 = vsel %vm12848_vm10, %v5206_v23, %v5236_v26  ;;  %v5360_v21 = vmax.f32 %v5358_v43, %v5359_v13 }
 0x952   : > { %v5316_v60 = vsel %vm5273_vm8, %v5263_v42, -inf  ;;  %v5365_v46 = vsel %vm5273_vm8, %v5270_v14, -inf  ;;  %v5306_v3 = vmax.f32 %v5304_v22, %v5305_v31  ;;  %v5355_v48 = vmax.f32 %v5353_v30, %v5354_v8 }
 0x953   : > { %v5312_v16 = vrot.slane %v5311_v57, 2  ;;  %v5317_v63 = vrot.slane %v5316_v60, 4  ;;  %v5361_v45 = vrot.slane %v5360_v21, 2  ;;  %v5366_v24 = vrot.slane %v5365_v46, 4 }
 0x954   : > { %v5224_v33 = vpop.permute.xlu0 %5223  ;;  %v5238_v58 = vpop.permute.xlu1 %5237  ;;  %v5307_v7 = vrot.slane %v5306_v3, 1  ;;  %v5301_v5 = vmax.f32 %v5299_v55, %v5300_v41  ;;  %v5343_v30 = vmax.f32 %v11670_v40, %v5342_v20 }
 0x955   : > { %v5313_v11 = vmax.f32 %v5311_v57, %v5312_v16  ;;  %v5264_v19 = vsel %vm12850_vm15, %v5200_v25, %v5224_v33  ;;  %v5271_v23 = vsel %vm12851_vm12, %v5207_v1, %v5238_v58  ;;  %v5318_v32 = vmax.f32 %v5316_v60, %v5317_v63 }
 0x956   : > { %v5367_v9 = vmax.f32 %v5365_v46, %v5366_v24  ;;  %v5323_v49 = vsel %vm5273_vm8, %v5264_v19, -inf  ;;  %v5372_v37 = vsel %vm5273_vm8, %v5271_v23, -inf  ;;  %v5362_v59 = vmax.f32 %v5360_v21, %v5361_v45 }
 0x957   : > { %v5319_v0 = vrot.slane %v5318_v32, 2  ;;  %v5324_v4 = vrot.slane %v5323_v49, 4  ;;  %v5373_v44 = vrot.slane %v5372_v37, 4  ;;  %v5314_v52 = vrot.slane %v5313_v11, 1 }
 0x958   : > { %v5240_v62 = vpop.permute.xlu1 %5239  ;;  %v5368_v56 = vrot.slane %v5367_v9, 2  ;;  %v5356_v1 = vrot.slane %v5355_v48, 1  ;;  %v5363_v36 = vrot.slane %v5362_v59, 1  ;;  %v5308_v43 = vmax.f32 %v5306_v3, %v5307_v7 }
 0x959   : > { %v5272_v18 = vsel %vm12852_vm11, %v5208_v29, %v5240_v62  ;;  %v5320_v53 = vmax.f32 %v5318_v32, %v5319_v0  ;;  %v5325_v50 = vmax.f32 %v5323_v49, %v5324_v4  ;;  %v5374_v22 = vmax.f32 %v5372_v37, %v5373_v44  ;;  %v5700_v32 = vld [vmem:[%s11785_s0 + $0x12] ss:$0 sm:$0xff] }
 0x95a   : > { %v5379_v10 = vsel %vm5273_vm8, %v5272_v18, -inf  ;;  %v5369_v35 = vmax.f32 %v5367_v9, %v5368_v56  ;;  %v5315_v25 = vmax.f32 %v5313_v11, %v5314_v52  ;;  %v5389_v57 = vsel %vm5388_vm9, %v11678_v12, %v5294_v51  ;;  %v5699_v12 = vld [vmem:[%s11785_s0 + $0x11] ss:$0 sm:$0xff] }
 0x95b   : > { %v5380_v6 = vrot.slane %v5379_v10, 4  ;;  %v5321_v61 = vrot.slane %v5320_v53, 1  ;;  %v5326_v2 = vrot.slane %v5325_v50, 2  ;;  %v5375_v38 = vrot.slane %v5374_v22, 2 }
 0x95c   : > { %v5370_v15 = vrot.slane %v5369_v35, 1  ;;  %v5357_v13 = vmax.f32 %v5355_v48, %v5356_v1  ;;  %v5391_v54 = vsel %vm5390_vm0, %v5389_v57, %v5301_v5  ;;  %v5364_v55 = vmax.f32 %v5362_v59, %v5363_v36 }
 0x95d   : > { %v5381_v26 = vmax.f32 %v5379_v10, %v5380_v6  ;;  %v5327_v27 = vmax.f32 %v5325_v50, %v5326_v2  ;;  %v5376_v31 = vmax.f32 %v5374_v22, %v5375_v38  ;;  %v5322_v42 = vmax.f32 %v5320_v53, %v5321_v61 }
 0x95e   : > { %v5400_v40 = vsel %vm5386_vm4, %v11675_v34, %v5343_v30  ;;  %v5393_v20 = vsel %vm5392_vm5, %v5391_v54, %v5308_v43  ;;  %v5371_v39 = vmax.f32 %v5369_v35, %v5370_v15  ;;  %vm12853_vm4 = vmmov %vm12847_vm1 }
 0x95f   : > { %v5382_v14 = vrot.slane %v5381_v26, 2  ;;  %v5328_v16 = vrot.slane %v5327_v27, 1  ;;  %v5377_v8 = vrot.slane %v5376_v31, 1  ;;  %v5401_v60 = vsel %vm5388_vm9, %v5400_v40, %v5350_v47 }
 0x960   : > { %v5395_v58 = vsel %vm5394_vm7, %v5393_v20, %v5315_v25  ;;  %v5402_v28 = vsel %vm5390_vm0, %v5401_v60, %v5357_v13 }
 0x961   : > { %v5383_v21 = vmax.f32 %v5381_v26, %v5382_v14  ;;  %v5329_v46 = vmax.f32 %v5327_v27, %v5328_v16  ;;  %v5378_v33 = vmax.f32 %v5376_v31, %v5377_v8  ;;  %v5397_v3 = vsel %vm5396_vm14, %v5395_v58, %v5322_v42 }
 0x962   : > { %v5403_v34 = vsel %vm5392_vm5, %v5402_v28, %v5364_v55 }
 0x963   : > { %v5384_v29 = vrot.slane %v5383_v21, 1  ;;  %v11711_v11 = vsel %vm5398_vm13, %v5397_v3, %v5329_v46  ;;  %v5404_v24 = vsel %vm5394_vm7, %v5403_v34, %v5371_v39 }
 0x964   : > { %v5411_v45 = vmul.f32 %v5699_v12, %v11711_v11  ;;  %v5405_v19 = vsel %vm5396_vm14, %v5404_v24, %v5378_v33 }
 0x965   : > { %v5385_v63 = vmax.f32 %v5383_v21, %v5384_v29 }
 0x966   : > { %v5413_v23 = vsel %vm12853_vm4, %v5411_v45, 0.0 }
 0x967   : > { %v11718_v51 = vsel %vm5398_vm13, %v5405_v19, %v5385_v63  ;;  %5414 = vadd.xlane.f32.xlu0 %v5413_v23 }
 0x968   : > { %v5412_v17 = vmul.f32 %v5699_v12, %v11718_v51 }
 0x96a   : > { %v5416_v41 = vsel %vm12854_vm2, %v5412_v17, 0.0 }
 0x96b   : > { %5417 = vadd.xlane.f32.xlu1 %v5416_v41 }
 0x97c   : > { %5443 = vrot.lane.b32.xlu1 %v11718_v51, %s7865_s11 }
 0x97d   : > { %5441 = vrot.lane.b32.xlu0 %v11711_v11, %s7865_s11  ;;  %s7789_s11 = sshll.u32 %s7869_s20, 4  ;;  %s7790_s11 = int_to_ptr.vmem [resolvable:$false] %s7789_s11 }
 0x97e   : > { %s7791_s23 = scalar_lea.vmem %s7790_s11, 512  ;;  %p7792_p9 = scmp.lt.s32.totalorder %s11734_s10, %s7790_s11 }
 0x97f   : > { %p7793_p13 = scmp.lt.s32.totalorder %s7791_s23, %s7785_s19 }
 0x981   : > { %p7794_p1 = por %p7793_p13, %p7792_p9 }
 0x983   : > { %p7795_p3 = pnand %p7794_p1, %p7788_p8 }
 0x9f4   : > { %v5415_v48 = vpop.xlane.xlu0 %5414 }
 0x9f5   : > { %v5423_v9 = vadd.f32 %v5700_v32, %v5415_v48 }
 0x9f7   : > { %v5425_v49 = vsub.f32 0.0, %v5423_v9  ;;  %v5451_v37 = vand.u32 2147483647, %v5423_v9  ;;  %v5437_v43 = vmax.f32 %v5423_v9, 0.0 }
 0x9f8   : > { %v5418_v62 = vpop.xlane.xlu1 %5417  ;;  %v5442_v61 = vpop.permute.xlu0 %5441 }
 0x9f9   : > { %v5424_v59 = vadd.f32 %v5700_v32, %v5418_v62  ;;  %v5427_v0 = vmul.f32 1.442695, %v5425_v49  ;;  %v5453_v4 = vsub.f32 0.0, %v5451_v37  ;;  %v5447_v2 = vmul.f32 %v5442_v61, %v5423_v9 }
 0x9fb   : > { %v5426_v44 = vsub.f32 0.0, %v5424_v59  ;;  %v5452_v7 = vand.u32 2147483647, %v5424_v59  ;;  %7723 = vpow2.f32 %v5427_v0  ;;  %v5455_v52 = vmul.f32 1.442695, %v5453_v4 }
 0x9fc   : > { %v5444_v38 = vpop.permute.xlu1 %5443  ;;  %v5449_v27 = vsub.f32 %v5437_v43, %v5447_v2  ;;  %v5438_v31 = vmax.f32 %v5424_v59, 0.0 }
 0x9fd   : > { %v5429_v56 = vmul.f32 1.442695, %v5426_v44  ;;  %v5454_v18 = vsub.f32 0.0, %v5452_v7  ;;  %7725 = vpow2.f32 %v5455_v52  ;;  %v5448_v26 = vmul.f32 %v5444_v38, %v5424_v59 }
 0x9ff   : > { %7727 = vpow2.f32 %v5429_v56  ;;  %v5457_v53 = vmul.f32 1.442695, %v5454_v18  ;;  %v5450_v14 = vsub.f32 %v5438_v31, %v5448_v26 }
 0xa01   : > { %7729 = vpow2.f32 %v5457_v53 }
 0xa05   : > { %v7724_v50 = vpop.eup %7723 }
 0xa06   : > { %v5431_v22 = vadd.f32 1.0, %v7724_v50 }
 0xa07   : > { %v7726_v10 = vpop.eup %7725 }
 0xa08   : > { %7731 = vrcp.f32 %v5431_v22  ;;  %v5459_v1 = vadd.f32 1.0, %v7726_v10 }
 0xa09   : > { %v7728_v5 = vpop.eup %7727 }
 0xa0a   : > { %v5432_v35 = vadd.f32 1.0, %v7728_v5  ;;  %7733 = vlog2.f32 %v5459_v1 }
 0xa0b   : > { %v7730_v6 = vpop.eup %7729 }
 0xa0c   : > { %7735 = vrcp.f32 %v5432_v35  ;;  %v5460_v36 = vadd.f32 1.0, %v7730_v6 }
 0xa0e   : > { %7737 = vlog2.f32 %v5460_v36 }
 0xa12   : > { %v7732_v30 = vpop.eup %7731 }
 0xa13   : > { %5469 = vrot.lane.b32.xlu0 %v7732_v30, %s7867_s28 }
 0xa14   : > { %v7734_v15 = vpop.eup %7733 }
 0xa15   : > { %v5462_v25 = vmul.f32 0.6931472, %v7734_v15 }
 0xa16   : > { %v7736_v47 = vpop.eup %7735 }
 0xa17   : > { %5471 = vrot.lane.b32.xlu1 %v7736_v47, %s7867_s28  ;;  %v5465_v13 = vadd.f32 %v5462_v25, %v5449_v27 }
 0xa18   : > { %v7738_v57 = vpop.eup %7737 }
 0xa19   : > { %v5464_v42 = vmul.f32 0.6931472, %v7738_v57  ;;  %5477 = vrot.lane.b32.xlu0 %v5465_v13, %s7868_s29 }
 0xa1b   : > { %v5466_v54 = vadd.f32 %v5464_v42, %v5450_v14 }
 0xa1d   : > { %5479 = vrot.lane.b32.xlu1 %v5466_v54, %s7868_s29 }
 0xa85   : > { %v5470_v55 = vpop.permute.xlu0 %5469 }
 0xa86   : > { %v5483_v8 = vsel %vm12855_vm6, %v11711_v11, %v5470_v55 }
 0xa89   : > { %v5472_v16 = vpop.permute.xlu1 %5471 }
 0xa8a   : > { %v5484_v21 = vsel %vm12847_vm1, %v11718_v51, %v5472_v16 }
 0xa8b   : > { %v5478_v40 = vpop.permute.xlu0 %5477 }
 0xa8c   : > { %v5485_v20 = vsel %vm5273_vm8, %v5483_v8, %v5478_v40 }
 0xa8d   : > { %v5488_v39 = vsel %vm5487_vm3, %v5485_v20, 0.0 }
 0xa8e   : > { %5490 = vst [vmem:[%s204_s9] sm:$0xff] %v5488_v39 }
 0xa8f   : > { %v5480_v60 = vpop.permute.xlu1 %5479 }
 0xa90   : > { %v5486_v46 = vsel %vm5273_vm8, %v5484_v21, %v5480_v60 }
 0xa91   : > { %v5489_v33 = vsel %vm5487_vm3, %v5486_v46, 0.0 }
 0xa92   : > { %5491 = vst [vmem:[%s204_s9 + $0x8] sm:$0xff] %v5489_v33 }
 0xa93   : > { %7798 = shalt.err (!%p7795_p3)
}
 0xa94   : > { %s7799_s17 = scalar_lea.hbm %s11741_s8, 256  ;;  %s7803_s27 = scalar_lea.hbm %s11788_s3, 1024 }
 0xa95   : > { %p7800_p4 = scmp.ne.s32.totalorder %s11741_s8, %s7799_s17  ;;  %p7804_p2 = scmp.lt.u32.totalorder %s11741_s8, %s11788_s3 }
 0xa96   : > { %p7805_p7 = scmp.lt.u32.totalorder %s7803_s27, %s7799_s17  ;;  %p7807_p6 = scmp.lt.u32.totalorder %s7799_s17, %s11741_s8 }
 0xa97   : > { %p7801_p5 = pnand %p7800_p4, %p12856_p11 }
 0xa98   : > { %p7806_p10 = por %p7805_p7, %p7804_p2 }
 0xa99   : > { %p7802_p0 = pneg %p7801_p5 }
 0xa9a   : > { %p7808_p12 = por %p7807_p6, %p7806_p10 }
 0xa9c   : > { %p7809_p8 = pnand %p7808_p12, %p7802_p0 }
 0xa9e   : > { %7812 = shalt.err (!%p7809_p8)
}
 0xa9f   : > { %s7870_s30 = smov 128   ;;  %s7871_s9 = smov 8  }
 0xaa0   : > { %6988 = dma.vmem_to_hbm [thread:$0]  (%p12856_p11), %s11734_s10, 256, %s11741_s8, %s5493_s16, %s7870_s30, %s7870_s30, %s7871_s9  }
 0xaa1 PF: > { %p6999_p9 = scmp.ge.s32.totalorder %s7851_s15, 2  ;;  %s5521_s4 = sand.u32 1, %s7839_s12  }
 0xaa2   : > { %p12857_p13 = scmp.ne.s32.totalorder %s12123_s25, 0  ;;  %s5522_s6 = scalar_lea.sflag [#allocation4], %s5521_s4 }
 0xaa4   : > { %p6995_p1 = pnand %p6999_p9, %p12857_p13 }
 0xaa6   : > { %7834 = dma.done.wait (!%p6995_p1), %s5522_s6, 256  }
 0xaa7   : > { %7836 = vsyncadd (!%p6995_p1), %s5522_s6, 4294967040  ;;  %p16_p3 = scmp.ge.s32.totalorder %s7917_s18, 6   ;;  %s12858_s12 = smov %s7843_s13 }
 0xaa8   : > { %s12859_s13 = smov %s7847_s14  ;;  %s12860_s14 = smov %s7929_s21 }
 0xaa9   : > { %s12861_s15 = smov %s7917_s18  ;;  %18 = sbr.rel (!%p16_p3) target bundleno = 5 (0x5), region = 80 }
 0xab0   :  { %5527 = vsyncpa [#allocation3], 1 }
 0xab1   :  { %5529 = vsyncpa [#allocation3 + $0x1], 1 }
 0xab2   :  { %5530 = vsyncpa [#allocation4], 1 }
 0xab3   :  { %5532 = vsyncpa [#allocation4 + $0x1], 1 }

</bundles_post_ra>
